<compile_context>
chip_gen: v7x
topology: tpu7x:2x2x1
jax: 0.10.0
libtpu: 0.0.40
codegen_flags: <defaults>
</compile_context>

<pallas_src>
import functools

import jax
import jax.numpy as jnp
import numpy as np
from jax.experimental import pallas as pl
from jax.experimental.pallas import tpu as pltpu

DILATIONS = (1, 2, 4, 8, 16)
MAX_PAD = max(DILATIONS)          # 16: fixed (sublane-aligned) center offset
LANE = 128                        # lane width: channels padded to a multiple


def _dblock_kernel(x_ref, w_ref, out_ref, pad_ref, *, H, W, C):
    """Grid = (batch, dilation); one dilated 3x3 conv + ReLU + residual-sum
    per grid step.  The padded bf16 scratch carries the cascade activation."""
    i = pl.program_id(1)          # dilation index (innermost, "arbitrary")
    Hp = H + 2 * MAX_PAD
    Wp = W + 2 * MAX_PAD

    @pl.when(i == 0)
    def _init():
        # Zero ONLY the pad border (the center is overwritten right below and
        # at the end of every dilation step), once per batch element — safe
        # under TensorCore-sharded batch parallelism (scratch is per-core).
        zrow = jnp.zeros((MAX_PAD, Wp, C), pad_ref.dtype)
        pad_ref[0:MAX_PAD, :, :] = zrow
        pad_ref[MAX_PAD + H:Hp, :, :] = zrow
        zcol = jnp.zeros((H, MAX_PAD, C), pad_ref.dtype)
        pad_ref[MAX_PAD:MAX_PAD + H, 0:MAX_PAD, :] = zcol
        pad_ref[MAX_PAD:MAX_PAD + H, MAX_PAD + W:Wp, :] = zcol

        x = x_ref[...]                                  # (H, W, C) f32
        out_ref[...] = x                                # running sum starts at x
        pad_ref[MAX_PAD:MAX_PAD + H, MAX_PAD:MAX_PAD + W, :] = (
            x.astype(pad_ref.dtype))

    # One pl.when branch per dilation: static tap offsets, bounded live ranges,
    # and w_ref already holds exactly this dilation's streamed (9C, C) weights.
    for di, d in enumerate(DILATIONS):

        @pl.when(i == di)
        def _conv(d=d, di=di):
            acc = None
            for dy in range(3):
                y0 = MAX_PAD + (dy - 1) * d
                for dx in range(3):
                    x0 = MAX_PAD + (dx - 1) * d
                    k = dy * 3 + dx
                    # 9 accumulating dots — no (H*W, 9C) im2col concat buffer.
                    tap = pad_ref[y0:y0 + H, x0:x0 + W, :].reshape(H * W, C)
                    wk = w_ref[k * C:(k + 1) * C, :]
                    part = jnp.dot(tap, wk, preferred_element_type=jnp.float32)
                    acc = part if acc is None else acc + part
            cur = jnp.maximum(acc, 0.0).reshape(H, W, C)   # ReLU (bias == 0)
            out_ref[...] += cur                            # f32 resident accumulator
            if di + 1 < len(DILATIONS):
                # Feed the next dilation; center write is sublane-aligned (16).
                pad_ref[MAX_PAD:MAX_PAD + H, MAX_PAD:MAX_PAD + W, :] = (
                    cur.astype(pad_ref.dtype))


def _vmem_limit_bytes(H, W, Cp):
    """Derive the scoped-VMEM limit from shapes; clamp to physical capacity."""
    Hp, Wp = H + 2 * MAX_PAD, W + 2 * MAX_PAD
    scratch = Hp * Wp * Cp * 2                      # bf16 padded activation
    w_blk = 9 * Cp * Cp * 2                         # one streamed weight block
    x_blk = H * W * Cp * 4                          # f32 input block
    o_blk = H * W * Cp * 4                          # f32 output block (resident)
    temps = 3 * H * W * Cp * 4 + H * W * Cp * 2     # acc / cur / relayout headroom
    need = scratch + 2 * (w_blk + x_blk + o_blk) + temps   # x2: double buffering
    limit = max(2 * need, 32 * 1024 * 1024)
    limit = min(limit, 96 * 1024 * 1024)            # v5e/v6e: 128 MiB physical
    phys = 128 * 1024 * 1024
    try:                                            # v7x reports 64 MiB per TC
        phys = getattr(pltpu.get_tpu_info(), "vmem_capacity_bytes", phys)
    except Exception:
        pass
    return int(min(limit, phys * 3 // 4))


def dblock_more_dilate(x_nchw, weights):
    """x_nchw: (N, C, H, W) float32; weights: list of 5 arrays (3,3,C,C) HWIO."""
    N, C, H, W = x_nchw.shape
    Cp = ((C + LANE - 1) // LANE) * LANE            # lane-dense channel padding

    x = jnp.transpose(x_nchw, (0, 2, 3, 1)).astype(jnp.float32)   # -> NHWC
    if Cp != C:
        x = jnp.pad(x, ((0, 0), (0, 0), (0, 0), (0, Cp - C)))

    # Stack + flatten weights to (5, 9*Cp, Cp) bf16; row index = (dy*3+dx)*Cp+ci,
    # matching the tap order in the kernel.  Zero-padded in/out channels keep the
    # extra lanes exactly zero through the cascade.
    w_list = []
    for w in weights:
        if Cp != C:
            w = jnp.pad(w, ((0, 0), (0, 0), (0, Cp - C), (0, Cp - C)))
        w_list.append(w.reshape(9 * Cp, Cp))
    w_all = jnp.stack(w_list, axis=0).astype(jnp.bfloat16)

    kernel = functools.partial(_dblock_kernel, H=H, W=W, C=Cp)

    # TODO(synk): for very large H*W*C on v7x (64 MiB VMEM), add an H-tile grid
    # axis with a 2*MAX_PAD-row halo; not needed at these shapes.
    out_nhwc = pl.pallas_call(
        kernel,
        out_shape=jax.ShapeDtypeStruct((N, H, W, Cp), jnp.float32),
        grid=(N, len(DILATIONS)),
        in_specs=[
            pl.BlockSpec((None, H, W, Cp), lambda n, i: (n, 0, 0, 0)),
            pl.BlockSpec((None, 9 * Cp, Cp), lambda n, i: (i, 0, 0)),
        ],
        out_specs=pl.BlockSpec((None, H, W, Cp), lambda n, i: (n, 0, 0, 0)),
        scratch_shapes=[
            pltpu.VMEM((H + 2 * MAX_PAD, W + 2 * MAX_PAD, Cp), jnp.bfloat16),
        ],
        compiler_params=pltpu.CompilerParams(
            dimension_semantics=("parallel", "arbitrary"),
            vmem_limit_bytes=_vmem_limit_bytes(H, W, Cp),
        ),
    )(x, w_all)

    if Cp != C:
        out_nhwc = out_nhwc[..., :C]
    return jnp.transpose(out_nhwc, (0, 3, 1, 2))                   # -> NCHW


def _reference(x_nchw, weights, *, mxu_bf16):
    """Pure-JAX reference via lax.conv_general_dilated.

    mxu_bf16=True mirrors the kernel's numerics (bf16 MXU inputs, f32
    accumulation); mxu_bf16=False is the exact f32 module math.
    """
    cur = jnp.transpose(x_nchw, (0, 2, 3, 1)).astype(jnp.float32)
    acc = cur
    for w, d in zip(weights, DILATIONS):
        lhs = cur.astype(jnp.bfloat16) if mxu_bf16 else cur
        rhs = w.astype(jnp.bfloat16) if mxu_bf16 else w
        conv = jax.lax.conv_general_dilated(
            lhs, rhs, window_strides=(1, 1),
            padding=((d, d), (d, d)), rhs_dilation=(d, d),
            dimension_numbers=("NHWC", "HWIO", "NHWC"),
            preferred_element_type=jnp.float32,
            precision=None if mxu_bf16 else jax.lax.Precision.HIGHEST,
        )
        cur = jnp.maximum(conv, 0.0)
        acc = acc + cur
    return jnp.transpose(acc, (0, 3, 1, 2))


if __name__ == "__main__":
    key = jax.random.PRNGKey(0)
    N, C, H, W = 2, 4, 16, 16

    kx, *kws = jax.random.split(key, 6)
    x = jax.random.normal(kx, (N, C, H, W), jnp.float32)
    # Deterministic synthetic weights (HWIO); biases are zero per the module.
    weights = [0.1 * jax.random.normal(k, (3, 3, C, C), jnp.float32) for k in kws]

    out = jax.block_until_ready(dblock_more_dilate(x, weights))

    # Tight check against a reference with identical MXU numerics
    # (bf16 inputs, f32 accumulation).
    ref_bf16 = jax.block_until_ready(_reference(x, weights, mxu_bf16=True))
    np.testing.assert_allclose(np.asarray(out), np.asarray(ref_bf16),
                               rtol=1e-3, atol=1e-3)

    # Loose sanity check against the exact f32 module math (bf16 MXU rounding
    # accumulates over the 5 cascaded convs).
    ref_f32 = jax.block_until_ready(_reference(x, weights, mxu_bf16=False))
    np.testing.assert_allclose(np.asarray(out), np.asarray(ref_f32),
                               rtol=5e-2, atol=5e-2)

    print("KERNEL_OK")
</pallas_src>

<mosaic_0001>
module attributes {stable_mosaic.version = 11 : i64} {
  func.func @_dblock_kernel(%arg0: i32, %arg1: i32, %arg2: memref<1x16x16x128xf32, #tpu.memory_space<vmem>>, %arg3: memref<1x1152x128xbf16, #tpu.memory_space<vmem>>, %arg4: memref<1x16x16x128xf32, #tpu.memory_space<vmem>>, %arg5: memref<48x48x128xbf16, #tpu.memory_space<vmem>>) attributes {dimension_semantics = [#tpu.dimension_semantics<parallel>, #tpu.dimension_semantics<arbitrary>], iteration_bounds = array<i64: 2, 5>, scalar_prefetch = 0 : i64, scratch_operands = 1 : i64, tpu.core_type = #tpu.core_type<tc>, window_params = [{transform_indices = @transform_0, window_bounds = array<i64: 1, 16, 16, 128>}, {transform_indices = @transform_1, window_bounds = array<i64: 1, 1152, 128>}, {transform_indices = @transform_2, window_bounds = array<i64: 1, 16, 16, 128>}]} {
    %c0_i32 = arith.constant 0 : i32
    %0 = arith.cmpi eq, %arg1, %c0_i32 : i32
    %1 = arith.extui %0 : i1 to i32
    %c0_i32_0 = arith.constant 0 : i32
    %2 = arith.cmpi ne, %1, %c0_i32_0 : i32
    scf.if %2 {
      %cst = arith.constant 0.000000e+00 : bf16
      %18 = vector.broadcast %cst : bf16 to vector<16x48x128xbf16>
      %c0 = arith.constant 0 : index
      %c0_7 = arith.constant 0 : index
      %c0_8 = arith.constant 0 : index
      %19 = vector.load %arg5[%c0, %c0_7, %c0_8] : memref<48x48x128xbf16, #tpu.memory_space<vmem>>, vector<16x48x128xbf16>
      tpu.vector_store %arg5[%c0, %c0_7, %c0_8], %18 {strides = array<i32>} : memref<48x48x128xbf16, #tpu.memory_space<vmem>>, vector<16x48x128xbf16>,
      %c32 = arith.constant 32 : index
      %c0_9 = arith.constant 0 : index
      %c0_10 = arith.constant 0 : index
      %20 = vector.load %arg5[%c32, %c0_9, %c0_10] : memref<48x48x128xbf16, #tpu.memory_space<vmem>>, vector<16x48x128xbf16>
      tpu.vector_store %arg5[%c32, %c0_9, %c0_10], %18 {strides = array<i32>} : memref<48x48x128xbf16, #tpu.memory_space<vmem>>, vector<16x48x128xbf16>,
      %cst_11 = arith.constant 0.000000e+00 : bf16
      %21 = vector.broadcast %cst_11 : bf16 to vector<16x16x128xbf16>
      %c16 = arith.constant 16 : index
      %c0_12 = arith.constant 0 : index
      %c0_13 = arith.constant 0 : index
      %22 = vector.load %arg5[%c16, %c0_12, %c0_13] : memref<48x48x128xbf16, #tpu.memory_space<vmem>>, vector<16x16x128xbf16>
      tpu.vector_store %arg5[%c16, %c0_12, %c0_13], %21 {strides = array<i32>} : memref<48x48x128xbf16, #tpu.memory_space<vmem>>, vector<16x16x128xbf16>,
      %c16_14 = arith.constant 16 : index
      %c32_15 = arith.constant 32 : index
      %c0_16 = arith.constant 0 : index
      %23 = vector.load %arg5[%c16_14, %c32_15, %c0_16] : memref<48x48x128xbf16, #tpu.memory_space<vmem>>, vector<16x16x128xbf16>
      tpu.vector_store %arg5[%c16_14, %c32_15, %c0_16], %21 {strides = array<i32>} : memref<48x48x128xbf16, #tpu.memory_space<vmem>>, vector<16x16x128xbf16>,
      %c0_17 = arith.constant 0 : index
      %c0_18 = arith.constant 0 : index
      %c0_19 = arith.constant 0 : index
      %c0_20 = arith.constant 0 : index
      %24 = vector.load %arg2[%c0_17, %c0_18, %c0_19, %c0_20] : memref<1x16x16x128xf32, #tpu.memory_space<vmem>>, vector<1x16x16x128xf32>
      %25 = vector.shape_cast %24 : vector<1x16x16x128xf32> to vector<16x16x128xf32>
      %c0_21 = arith.constant 0 : index
      %c0_22 = arith.constant 0 : index
      %c0_23 = arith.constant 0 : index
      %c0_24 = arith.constant 0 : index
      %26 = vector.load %arg4[%c0_21, %c0_22, %c0_23, %c0_24] : memref<1x16x16x128xf32, #tpu.memory_space<vmem>>, vector<1x16x16x128xf32>
      %27 = vector.shape_cast %26 : vector<1x16x16x128xf32> to vector<16x16x128xf32>
      %28 = vector.shape_cast %25 : vector<16x16x128xf32> to vector<1x16x16x128xf32>
      tpu.vector_store %arg4[%c0_21, %c0_22, %c0_23, %c0_24], %28 {strides = array<i32>} : memref<1x16x16x128xf32, #tpu.memory_space<vmem>>, vector<1x16x16x128xf32>,
      %29 = arith.truncf %25 : vector<16x16x128xf32> to vector<16x16x128xbf16>
      %c16_25 = arith.constant 16 : index
      %c16_26 = arith.constant 16 : index
      %c0_27 = arith.constant 0 : index
      %30 = vector.load %arg5[%c16_25, %c16_26, %c0_27] : memref<48x48x128xbf16, #tpu.memory_space<vmem>>, vector<16x16x128xbf16>
      tpu.vector_store %arg5[%c16_25, %c16_26, %c0_27], %29 {strides = array<i32>} : memref<48x48x128xbf16, #tpu.memory_space<vmem>>, vector<16x16x128xbf16>,
    } else {
    }
    %c0_i32_1 = arith.constant 0 : i32
    %3 = arith.cmpi eq, %arg1, %c0_i32_1 : i32
    %4 = arith.extui %3 : i1 to i32
    %c0_i32_2 = arith.constant 0 : i32
    %5 = arith.cmpi ne, %4, %c0_i32_2 : i32
    scf.if %5 {
      %c15 = arith.constant 15 : index
      %c15_7 = arith.constant 15 : index
      %c0 = arith.constant 0 : index
      %18 = vector.load %arg5[%c15, %c15_7, %c0] : memref<48x48x128xbf16, #tpu.memory_space<vmem>>, vector<16x16x128xbf16>
      %19 = vector.shape_cast %18 : vector<16x16x128xbf16> to vector<256x128xbf16>
      %c0_8 = arith.constant 0 : index
      %c0_9 = arith.constant 0 : index
      %c0_10 = arith.constant 0 : index
      %20 = vector.load %arg3[%c0_8, %c0_9, %c0_10] : memref<1x1152x128xbf16, #tpu.memory_space<vmem>>, vector<1x128x128xbf16>
      %21 = vector.shape_cast %20 : vector<1x128x128xbf16> to vector<128x128xbf16>
      %cst = arith.constant dense<0.000000e+00> : vector<256x128xf32>
      %22 = tpu.matmul %19, %21, %cst {dimension_numbers = #tpu.dot_dimension_numbers<[1], [0], [0], [1], [0, 0, 1, 1], [], []>} : vector<256x128xbf16>, vector<128x128xbf16>, vector<256x128xf32> -> vector<256x128xf32>
      %c15_11 = arith.constant 15 : index
      %c16 = arith.constant 16 : index
      %c0_12 = arith.constant 0 : index
      %23 = vector.load %arg5[%c15_11, %c16, %c0_12] : memref<48x48x128xbf16, #tpu.memory_space<vmem>>, vector<16x16x128xbf16>
      %24 = vector.shape_cast %23 : vector<16x16x128xbf16> to vector<256x128xbf16>
      %c0_13 = arith.constant 0 : index
      %c128 = arith.constant 128 : index
      %c0_14 = arith.constant 0 : index
      %25 = vector.load %arg3[%c0_13, %c128, %c0_14] : memref<1x1152x128xbf16, #tpu.memory_space<vmem>>, vector<1x128x128xbf16>
      %26 = vector.shape_cast %25 : vector<1x128x128xbf16> to vector<128x128xbf16>
      %cst_15 = arith.constant dense<0.000000e+00> : vector<256x128xf32>
      %27 = tpu.matmul %24, %26, %cst_15 {dimension_numbers = #tpu.dot_dimension_numbers<[1], [0], [0], [1], [0, 0, 1, 1], [], []>} : vector<256x128xbf16>, vector<128x128xbf16>, vector<256x128xf32> -> vector<256x128xf32>
      %28 = arith.addf %22, %27 : vector<256x128xf32>
      %c15_16 = arith.constant 15 : index
      %c17 = arith.constant 17 : index
      %c0_17 = arith.constant 0 : index
      %29 = vector.load %arg5[%c15_16, %c17, %c0_17] : memref<48x48x128xbf16, #tpu.memory_space<vmem>>, vector<16x16x128xbf16>
      %30 = vector.shape_cast %29 : vector<16x16x128xbf16> to vector<256x128xbf16>
      %c0_18 = arith.constant 0 : index
      %c256 = arith.constant 256 : index
      %c0_19 = arith.constant 0 : index
      %31 = vector.load %arg3[%c0_18, %c256, %c0_19] : memref<1x1152x128xbf16, #tpu.memory_space<vmem>>, vector<1x128x128xbf16>
      %32 = vector.shape_cast %31 : vector<1x128x128xbf16> to vector<128x128xbf16>
      %cst_20 = arith.constant dense<0.000000e+00> : vector<256x128xf32>
      %33 = tpu.matmul %30, %32, %cst_20 {dimension_numbers = #tpu.dot_dimension_numbers<[1], [0], [0], [1], [0, 0, 1, 1], [], []>} : vector<256x128xbf16>, vector<128x128xbf16>, vector<256x128xf32> -> vector<256x128xf32>
      %34 = arith.addf %28, %33 : vector<256x128xf32>
      %c16_21 = arith.constant 16 : index
      %c15_22 = arith.constant 15 : index
      %c0_23 = arith.constant 0 : index
      %35 = vector.load %arg5[%c16_21, %c15_22, %c0_23] : memref<48x48x128xbf16, #tpu.memory_space<vmem>>, vector<16x16x128xbf16>
      %36 = vector.shape_cast %35 : vector<16x16x128xbf16> to vector<256x128xbf16>
      %c0_24 = arith.constant 0 : index
      %c384 = arith.constant 384 : index
      %c0_25 = arith.constant 0 : index
      %37 = vector.load %arg3[%c0_24, %c384, %c0_25] : memref<1x1152x128xbf16, #tpu.memory_space<vmem>>, vector<1x128x128xbf16>
      %38 = vector.shape_cast %37 : vector<1x128x128xbf16> to vector<128x128xbf16>
      %cst_26 = arith.constant dense<0.000000e+00> : vector<256x128xf32>
      %39 = tpu.matmul %36, %38, %cst_26 {dimension_numbers = #tpu.dot_dimension_numbers<[1], [0], [0], [1], [0, 0, 1, 1], [], []>} : vector<256x128xbf16>, vector<128x128xbf16>, vector<256x128xf32> -> vector<256x128xf32>
      %40 = arith.addf %34, %39 : vector<256x128xf32>
      %c16_27 = arith.constant 16 : index
      %c16_28 = arith.constant 16 : index
      %c0_29 = arith.constant 0 : index
      %41 = vector.load %arg5[%c16_27, %c16_28, %c0_29] : memref<48x48x128xbf16, #tpu.memory_space<vmem>>, vector<16x16x128xbf16>
      %42 = vector.shape_cast %41 : vector<16x16x128xbf16> to vector<256x128xbf16>
      %c0_30 = arith.constant 0 : index
      %c512 = arith.constant 512 : index
      %c0_31 = arith.constant 0 : index
      %43 = vector.load %arg3[%c0_30, %c512, %c0_31] : memref<1x1152x128xbf16, #tpu.memory_space<vmem>>, vector<1x128x128xbf16>
      %44 = vector.shape_cast %43 : vector<1x128x128xbf16> to vector<128x128xbf16>
      %cst_32 = arith.constant dense<0.000000e+00> : vector<256x128xf32>
      %45 = tpu.matmul %42, %44, %cst_32 {dimension_numbers = #tpu.dot_dimension_numbers<[1], [0], [0], [1], [0, 0, 1, 1], [], []>} : vector<256x128xbf16>, vector<128x128xbf16>, vector<256x128xf32> -> vector<256x128xf32>
      %46 = arith.addf %40, %45 : vector<256x128xf32>
      %c16_33 = arith.constant 16 : index
      %c17_34 = arith.constant 17 : index
      %c0_35 = arith.constant 0 : index
      %47 = vector.load %arg5[%c16_33, %c17_34, %c0_35] : memref<48x48x128xbf16, #tpu.memory_space<vmem>>, vector<16x16x128xbf16>
      %48 = vector.shape_cast %47 : vector<16x16x128xbf16> to vector<256x128xbf16>
      %c0_36 = arith.constant 0 : index
      %c640 = arith.constant 640 : index
      %c0_37 = arith.constant 0 : index
      %49 = vector.load %arg3[%c0_36, %c640, %c0_37] : memref<1x1152x128xbf16, #tpu.memory_space<vmem>>, vector<1x128x128xbf16>
      %50 = vector.shape_cast %49 : vector<1x128x128xbf16> to vector<128x128xbf16>
      %cst_38 = arith.constant dense<0.000000e+00> : vector<256x128xf32>
      %51 = tpu.matmul %48, %50, %cst_38 {dimension_numbers = #tpu.dot_dimension_numbers<[1], [0], [0], [1], [0, 0, 1, 1], [], []>} : vector<256x128xbf16>, vector<128x128xbf16>, vector<256x128xf32> -> vector<256x128xf32>
      %52 = arith.addf %46, %51 : vector<256x128xf32>
      %c17_39 = arith.constant 17 : index
      %c15_40 = arith.constant 15 : index
      %c0_41 = arith.constant 0 : index
      %53 = vector.load %arg5[%c17_39, %c15_40, %c0_41] : memref<48x48x128xbf16, #tpu.memory_space<vmem>>, vector<16x16x128xbf16>
      %54 = vector.shape_cast %53 : vector<16x16x128xbf16> to vector<256x128xbf16>
      %c0_42 = arith.constant 0 : index
      %c768 = arith.constant 768 : index
      %c0_43 = arith.constant 0 : index
      %55 = vector.load %arg3[%c0_42, %c768, %c0_43] : memref<1x1152x128xbf16, #tpu.memory_space<vmem>>, vector<1x128x128xbf16>
      %56 = vector.shape_cast %55 : vector<1x128x128xbf16> to vector<128x128xbf16>
      %cst_44 = arith.constant dense<0.000000e+00> : vector<256x128xf32>
      %57 = tpu.matmul %54, %56, %cst_44 {dimension_numbers = #tpu.dot_dimension_numbers<[1], [0], [0], [1], [0, 0, 1, 1], [], []>} : vector<256x128xbf16>, vector<128x128xbf16>, vector<256x128xf32> -> vector<256x128xf32>
      %58 = arith.addf %52, %57 : vector<256x128xf32>
      %c17_45 = arith.constant 17 : index
      %c16_46 = arith.constant 16 : index
      %c0_47 = arith.constant 0 : index
      %59 = vector.load %arg5[%c17_45, %c16_46, %c0_47] : memref<48x48x128xbf16, #tpu.memory_space<vmem>>, vector<16x16x128xbf16>
      %60 = vector.shape_cast %59 : vector<16x16x128xbf16> to vector<256x128xbf16>
      %c0_48 = arith.constant 0 : index
      %c896 = arith.constant 896 : index
      %c0_49 = arith.constant 0 : index
      %61 = vector.load %arg3[%c0_48, %c896, %c0_49] : memref<1x1152x128xbf16, #tpu.memory_space<vmem>>, vector<1x128x128xbf16>
      %62 = vector.shape_cast %61 : vector<1x128x128xbf16> to vector<128x128xbf16>
      %cst_50 = arith.constant dense<0.000000e+00> : vector<256x128xf32>
      %63 = tpu.matmul %60, %62, %cst_50 {dimension_numbers = #tpu.dot_dimension_numbers<[1], [0], [0], [1], [0, 0, 1, 1], [], []>} : vector<256x128xbf16>, vector<128x128xbf16>, vector<256x128xf32> -> vector<256x128xf32>
      %64 = arith.addf %58, %63 : vector<256x128xf32>
      %c17_51 = arith.constant 17 : index
      %c17_52 = arith.constant 17 : index
      %c0_53 = arith.constant 0 : index
      %65 = vector.load %arg5[%c17_51, %c17_52, %c0_53] : memref<48x48x128xbf16, #tpu.memory_space<vmem>>, vector<16x16x128xbf16>
      %66 = vector.shape_cast %65 : vector<16x16x128xbf16> to vector<256x128xbf16>
      %c0_54 = arith.constant 0 : index
      %c1024 = arith.constant 1024 : index
      %c0_55 = arith.constant 0 : index
      %67 = vector.load %arg3[%c0_54, %c1024, %c0_55] : memref<1x1152x128xbf16, #tpu.memory_space<vmem>>, vector<1x128x128xbf16>
      %68 = vector.shape_cast %67 : vector<1x128x128xbf16> to vector<128x128xbf16>
      %cst_56 = arith.constant dense<0.000000e+00> : vector<256x128xf32>
      %69 = tpu.matmul %66, %68, %cst_56 {dimension_numbers = #tpu.dot_dimension_numbers<[1], [0], [0], [1], [0, 0, 1, 1], [], []>} : vector<256x128xbf16>, vector<128x128xbf16>, vector<256x128xf32> -> vector<256x128xf32>
      %70 = arith.addf %64, %69 : vector<256x128xf32>
      %cst_57 = arith.constant 0.000000e+00 : f32
      %71 = vector.broadcast %cst_57 : f32 to vector<256x128xf32>
      %72 = arith.maximumf %70, %71 : vector<256x128xf32>
      %73 = vector.shape_cast %72 : vector<256x128xf32> to vector<16x16x128xf32>
      %c0_58 = arith.constant 0 : index
      %c0_59 = arith.constant 0 : index
      %c0_60 = arith.constant 0 : index
      %c0_61 = arith.constant 0 : index
      %74 = vector.load %arg4[%c0_58, %c0_59, %c0_60, %c0_61] : memref<1x16x16x128xf32, #tpu.memory_space<vmem>>, vector<1x16x16x128xf32>
      %75 = vector.shape_cast %74 : vector<1x16x16x128xf32> to vector<16x16x128xf32>
      %76 = arith.addf %75, %73 : vector<16x16x128xf32>
      %c0_62 = arith.constant 0 : index
      %c0_63 = arith.constant 0 : index
      %c0_64 = arith.constant 0 : index
      %c0_65 = arith.constant 0 : index
      %77 = vector.load %arg4[%c0_62, %c0_63, %c0_64, %c0_65] : memref<1x16x16x128xf32, #tpu.memory_space<vmem>>, vector<1x16x16x128xf32>
      %78 = vector.shape_cast %77 : vector<1x16x16x128xf32> to vector<16x16x128xf32>
      %79 = vector.shape_cast %76 : vector<16x16x128xf32> to vector<1x16x16x128xf32>
      tpu.vector_store %arg4[%c0_62, %c0_63, %c0_64, %c0_65], %79 {strides = array<i32>} : memref<1x16x16x128xf32, #tpu.memory_space<vmem>>, vector<1x16x16x128xf32>,
      %80 = arith.truncf %73 : vector<16x16x128xf32> to vector<16x16x128xbf16>
      %c16_66 = arith.constant 16 : index
      %c16_67 = arith.constant 16 : index
      %c0_68 = arith.constant 0 : index
      %81 = vector.load %arg5[%c16_66, %c16_67, %c0_68] : memref<48x48x128xbf16, #tpu.memory_space<vmem>>, vector<16x16x128xbf16>
      tpu.vector_store %arg5[%c16_66, %c16_67, %c0_68], %80 {strides = array<i32>} : memref<48x48x128xbf16, #tpu.memory_space<vmem>>, vector<16x16x128xbf16>,
    } else {
    }
    %c1_i32 = arith.constant 1 : i32
    %6 = arith.cmpi eq, %arg1, %c1_i32 : i32
    %7 = arith.extui %6 : i1 to i32
    %c0_i32_3 = arith.constant 0 : i32
    %8 = arith.cmpi ne, %7, %c0_i32_3 : i32
    scf.if %8 {
      %c14 = arith.constant 14 : index
      %c14_7 = arith.constant 14 : index
      %c0 = arith.constant 0 : index
      %18 = vector.load %arg5[%c14, %c14_7, %c0] : memref<48x48x128xbf16, #tpu.memory_space<vmem>>, vector<16x16x128xbf16>
      %19 = vector.shape_cast %18 : vector<16x16x128xbf16> to vector<256x128xbf16>
      %c0_8 = arith.constant 0 : index
      %c0_9 = arith.constant 0 : index
      %c0_10 = arith.constant 0 : index
      %20 = vector.load %arg3[%c0_8, %c0_9, %c0_10] : memref<1x1152x128xbf16, #tpu.memory_space<vmem>>, vector<1x128x128xbf16>
      %21 = vector.shape_cast %20 : vector<1x128x128xbf16> to vector<128x128xbf16>
      %cst = arith.constant dense<0.000000e+00> : vector<256x128xf32>
      %22 = tpu.matmul %19, %21, %cst {dimension_numbers = #tpu.dot_dimension_numbers<[1], [0], [0], [1], [0, 0, 1, 1], [], []>} : vector<256x128xbf16>, vector<128x128xbf16>, vector<256x128xf32> -> vector<256x128xf32>
      %c14_11 = arith.constant 14 : index
      %c16 = arith.constant 16 : index
      %c0_12 = arith.constant 0 : index
      %23 = vector.load %arg5[%c14_11, %c16, %c0_12] : memref<48x48x128xbf16, #tpu.memory_space<vmem>>, vector<16x16x128xbf16>
      %24 = vector.shape_cast %23 : vector<16x16x128xbf16> to vector<256x128xbf16>
      %c0_13 = arith.constant 0 : index
      %c128 = arith.constant 128 : index
      %c0_14 = arith.constant 0 : index
      %25 = vector.load %arg3[%c0_13, %c128, %c0_14] : memref<1x1152x128xbf16, #tpu.memory_space<vmem>>, vector<1x128x128xbf16>
      %26 = vector.shape_cast %25 : vector<1x128x128xbf16> to vector<128x128xbf16>
      %cst_15 = arith.constant dense<0.000000e+00> : vector<256x128xf32>
      %27 = tpu.matmul %24, %26, %cst_15 {dimension_numbers = #tpu.dot_dimension_numbers<[1], [0], [0], [1], [0, 0, 1, 1], [], []>} : vector<256x128xbf16>, vector<128x128xbf16>, vector<256x128xf32> -> vector<256x128xf32>
      %28 = arith.addf %22, %27 : vector<256x128xf32>
      %c14_16 = arith.constant 14 : index
      %c18 = arith.constant 18 : index
      %c0_17 = arith.constant 0 : index
      %29 = vector.load %arg5[%c14_16, %c18, %c0_17] : memref<48x48x128xbf16, #tpu.memory_space<vmem>>, vector<16x16x128xbf16>
      %30 = vector.shape_cast %29 : vector<16x16x128xbf16> to vector<256x128xbf16>
      %c0_18 = arith.constant 0 : index
      %c256 = arith.constant 256 : index
      %c0_19 = arith.constant 0 : index
      %31 = vector.load %arg3[%c0_18, %c256, %c0_19] : memref<1x1152x128xbf16, #tpu.memory_space<vmem>>, vector<1x128x128xbf16>
      %32 = vector.shape_cast %31 : vector<1x128x128xbf16> to vector<128x128xbf16>
      %cst_20 = arith.constant dense<0.000000e+00> : vector<256x128xf32>
      %33 = tpu.matmul %30, %32, %cst_20 {dimension_numbers = #tpu.dot_dimension_numbers<[1], [0], [0], [1], [0, 0, 1, 1], [], []>} : vector<256x128xbf16>, vector<128x128xbf16>, vector<256x128xf32> -> vector<256x128xf32>
      %34 = arith.addf %28, %33 : vector<256x128xf32>
      %c16_21 = arith.constant 16 : index
      %c14_22 = arith.constant 14 : index
      %c0_23 = arith.constant 0 : index
      %35 = vector.load %arg5[%c16_21, %c14_22, %c0_23] : memref<48x48x128xbf16, #tpu.memory_space<vmem>>, vector<16x16x128xbf16>
      %36 = vector.shape_cast %35 : vector<16x16x128xbf16> to vector<256x128xbf16>
      %c0_24 = arith.constant 0 : index
      %c384 = arith.constant 384 : index
      %c0_25 = arith.constant 0 : index
      %37 = vector.load %arg3[%c0_24, %c384, %c0_25] : memref<1x1152x128xbf16, #tpu.memory_space<vmem>>, vector<1x128x128xbf16>
      %38 = vector.shape_cast %37 : vector<1x128x128xbf16> to vector<128x128xbf16>
      %cst_26 = arith.constant dense<0.000000e+00> : vector<256x128xf32>
      %39 = tpu.matmul %36, %38, %cst_26 {dimension_numbers = #tpu.dot_dimension_numbers<[1], [0], [0], [1], [0, 0, 1, 1], [], []>} : vector<256x128xbf16>, vector<128x128xbf16>, vector<256x128xf32> -> vector<256x128xf32>
      %40 = arith.addf %34, %39 : vector<256x128xf32>
      %c16_27 = arith.constant 16 : index
      %c16_28 = arith.constant 16 : index
      %c0_29 = arith.constant 0 : index
      %41 = vector.load %arg5[%c16_27, %c16_28, %c0_29] : memref<48x48x128xbf16, #tpu.memory_space<vmem>>, vector<16x16x128xbf16>
      %42 = vector.shape_cast %41 : vector<16x16x128xbf16> to vector<256x128xbf16>
      %c0_30 = arith.constant 0 : index
      %c512 = arith.constant 512 : index
      %c0_31 = arith.constant 0 : index
      %43 = vector.load %arg3[%c0_30, %c512, %c0_31] : memref<1x1152x128xbf16, #tpu.memory_space<vmem>>, vector<1x128x128xbf16>
      %44 = vector.shape_cast %43 : vector<1x128x128xbf16> to vector<128x128xbf16>
      %cst_32 = arith.constant dense<0.000000e+00> : vector<256x128xf32>
      %45 = tpu.matmul %42, %44, %cst_32 {dimension_numbers = #tpu.dot_dimension_numbers<[1], [0], [0], [1], [0, 0, 1, 1], [], []>} : vector<256x128xbf16>, vector<128x128xbf16>, vector<256x128xf32> -> vector<256x128xf32>
      %46 = arith.addf %40, %45 : vector<256x128xf32>
      %c16_33 = arith.constant 16 : index
      %c18_34 = arith.constant 18 : index
      %c0_35 = arith.constant 0 : index
      %47 = vector.load %arg5[%c16_33, %c18_34, %c0_35] : memref<48x48x128xbf16, #tpu.memory_space<vmem>>, vector<16x16x128xbf16>
      %48 = vector.shape_cast %47 : vector<16x16x128xbf16> to vector<256x128xbf16>
      %c0_36 = arith.constant 0 : index
      %c640 = arith.constant 640 : index
      %c0_37 = arith.constant 0 : index
      %49 = vector.load %arg3[%c0_36, %c640, %c0_37] : memref<1x1152x128xbf16, #tpu.memory_space<vmem>>, vector<1x128x128xbf16>
      %50 = vector.shape_cast %49 : vector<1x128x128xbf16> to vector<128x128xbf16>
      %cst_38 = arith.constant dense<0.000000e+00> : vector<256x128xf32>
      %51 = tpu.matmul %48, %50, %cst_38 {dimension_numbers = #tpu.dot_dimension_numbers<[1], [0], [0], [1], [0, 0, 1, 1], [], []>} : vector<256x128xbf16>, vector<128x128xbf16>, vector<256x128xf32> -> vector<256x128xf32>
      %52 = arith.addf %46, %51 : vector<256x128xf32>
      %c18_39 = arith.constant 18 : index
      %c14_40 = arith.constant 14 : index
      %c0_41 = arith.constant 0 : index
      %53 = vector.load %arg5[%c18_39, %c14_40, %c0_41] : memref<48x48x128xbf16, #tpu.memory_space<vmem>>, vector<16x16x128xbf16>
      %54 = vector.shape_cast %53 : vector<16x16x128xbf16> to vector<256x128xbf16>
      %c0_42 = arith.constant 0 : index
      %c768 = arith.constant 768 : index
      %c0_43 = arith.constant 0 : index
      %55 = vector.load %arg3[%c0_42, %c768, %c0_43] : memref<1x1152x128xbf16, #tpu.memory_space<vmem>>, vector<1x128x128xbf16>
      %56 = vector.shape_cast %55 : vector<1x128x128xbf16> to vector<128x128xbf16>
      %cst_44 = arith.constant dense<0.000000e+00> : vector<256x128xf32>
      %57 = tpu.matmul %54, %56, %cst_44 {dimension_numbers = #tpu.dot_dimension_numbers<[1], [0], [0], [1], [0, 0, 1, 1], [], []>} : vector<256x128xbf16>, vector<128x128xbf16>, vector<256x128xf32> -> vector<256x128xf32>
      %58 = arith.addf %52, %57 : vector<256x128xf32>
      %c18_45 = arith.constant 18 : index
      %c16_46 = arith.constant 16 : index
      %c0_47 = arith.constant 0 : index
      %59 = vector.load %arg5[%c18_45, %c16_46, %c0_47] : memref<48x48x128xbf16, #tpu.memory_space<vmem>>, vector<16x16x128xbf16>
      %60 = vector.shape_cast %59 : vector<16x16x128xbf16> to vector<256x128xbf16>
      %c0_48 = arith.constant 0 : index
      %c896 = arith.constant 896 : index
      %c0_49 = arith.constant 0 : index
      %61 = vector.load %arg3[%c0_48, %c896, %c0_49] : memref<1x1152x128xbf16, #tpu.memory_space<vmem>>, vector<1x128x128xbf16>
      %62 = vector.shape_cast %61 : vector<1x128x128xbf16> to vector<128x128xbf16>
      %cst_50 = arith.constant dense<0.000000e+00> : vector<256x128xf32>
      %63 = tpu.matmul %60, %62, %cst_50 {dimension_numbers = #tpu.dot_dimension_numbers<[1], [0], [0], [1], [0, 0, 1, 1], [], []>} : vector<256x128xbf16>, vector<128x128xbf16>, vector<256x128xf32> -> vector<256x128xf32>
      %64 = arith.addf %58, %63 : vector<256x128xf32>
      %c18_51 = arith.constant 18 : index
      %c18_52 = arith.constant 18 : index
      %c0_53 = arith.constant 0 : index
      %65 = vector.load %arg5[%c18_51, %c18_52, %c0_53] : memref<48x48x128xbf16, #tpu.memory_space<vmem>>, vector<16x16x128xbf16>
      %66 = vector.shape_cast %65 : vector<16x16x128xbf16> to vector<256x128xbf16>
      %c0_54 = arith.constant 0 : index
      %c1024 = arith.constant 1024 : index
      %c0_55 = arith.constant 0 : index
      %67 = vector.load %arg3[%c0_54, %c1024, %c0_55] : memref<1x1152x128xbf16, #tpu.memory_space<vmem>>, vector<1x128x128xbf16>
      %68 = vector.shape_cast %67 : vector<1x128x128xbf16> to vector<128x128xbf16>
      %cst_56 = arith.constant dense<0.000000e+00> : vector<256x128xf32>
      %69 = tpu.matmul %66, %68, %cst_56 {dimension_numbers = #tpu.dot_dimension_numbers<[1], [0], [0], [1], [0, 0, 1, 1], [], []>} : vector<256x128xbf16>, vector<128x128xbf16>, vector<256x128xf32> -> vector<256x128xf32>
      %70 = arith.addf %64, %69 : vector<256x128xf32>
      %cst_57 = arith.constant 0.000000e+00 : f32
      %71 = vector.broadcast %cst_57 : f32 to vector<256x128xf32>
      %72 = arith.maximumf %70, %71 : vector<256x128xf32>
      %73 = vector.shape_cast %72 : vector<256x128xf32> to vector<16x16x128xf32>
      %c0_58 = arith.constant 0 : index
      %c0_59 = arith.constant 0 : index
      %c0_60 = arith.constant 0 : index
      %c0_61 = arith.constant 0 : index
      %74 = vector.load %arg4[%c0_58, %c0_59, %c0_60, %c0_61] : memref<1x16x16x128xf32, #tpu.memory_space<vmem>>, vector<1x16x16x128xf32>
      %75 = vector.shape_cast %74 : vector<1x16x16x128xf32> to vector<16x16x128xf32>
      %76 = arith.addf %75, %73 : vector<16x16x128xf32>
      %c0_62 = arith.constant 0 : index
      %c0_63 = arith.constant 0 : index
      %c0_64 = arith.constant 0 : index
      %c0_65 = arith.constant 0 : index
      %77 = vector.load %arg4[%c0_62, %c0_63, %c0_64, %c0_65] : memref<1x16x16x128xf32, #tpu.memory_space<vmem>>, vector<1x16x16x128xf32>
      %78 = vector.shape_cast %77 : vector<1x16x16x128xf32> to vector<16x16x128xf32>
      %79 = vector.shape_cast %76 : vector<16x16x128xf32> to vector<1x16x16x128xf32>
      tpu.vector_store %arg4[%c0_62, %c0_63, %c0_64, %c0_65], %79 {strides = array<i32>} : memref<1x16x16x128xf32, #tpu.memory_space<vmem>>, vector<1x16x16x128xf32>,
      %80 = arith.truncf %73 : vector<16x16x128xf32> to vector<16x16x128xbf16>
      %c16_66 = arith.constant 16 : index
      %c16_67 = arith.constant 16 : index
      %c0_68 = arith.constant 0 : index
      %81 = vector.load %arg5[%c16_66, %c16_67, %c0_68] : memref<48x48x128xbf16, #tpu.memory_space<vmem>>, vector<16x16x128xbf16>
      tpu.vector_store %arg5[%c16_66, %c16_67, %c0_68], %80 {strides = array<i32>} : memref<48x48x128xbf16, #tpu.memory_space<vmem>>, vector<16x16x128xbf16>,
    } else {
    }
    %c2_i32 = arith.constant 2 : i32
    %9 = arith.cmpi eq, %arg1, %c2_i32 : i32
    %10 = arith.extui %9 : i1 to i32
    %c0_i32_4 = arith.constant 0 : i32
    %11 = arith.cmpi ne, %10, %c0_i32_4 : i32
    scf.if %11 {
      %c12 = arith.constant 12 : index
      %c12_7 = arith.constant 12 : index
      %c0 = arith.constant 0 : index
      %18 = vector.load %arg5[%c12, %c12_7, %c0] : memref<48x48x128xbf16, #tpu.memory_space<vmem>>, vector<16x16x128xbf16>
      %19 = vector.shape_cast %18 : vector<16x16x128xbf16> to vector<256x128xbf16>
      %c0_8 = arith.constant 0 : index
      %c0_9 = arith.constant 0 : index
      %c0_10 = arith.constant 0 : index
      %20 = vector.load %arg3[%c0_8, %c0_9, %c0_10] : memref<1x1152x128xbf16, #tpu.memory_space<vmem>>, vector<1x128x128xbf16>
      %21 = vector.shape_cast %20 : vector<1x128x128xbf16> to vector<128x128xbf16>
      %cst = arith.constant dense<0.000000e+00> : vector<256x128xf32>
      %22 = tpu.matmul %19, %21, %cst {dimension_numbers = #tpu.dot_dimension_numbers<[1], [0], [0], [1], [0, 0, 1, 1], [], []>} : vector<256x128xbf16>, vector<128x128xbf16>, vector<256x128xf32> -> vector<256x128xf32>
      %c12_11 = arith.constant 12 : index
      %c16 = arith.constant 16 : index
      %c0_12 = arith.constant 0 : index
      %23 = vector.load %arg5[%c12_11, %c16, %c0_12] : memref<48x48x128xbf16, #tpu.memory_space<vmem>>, vector<16x16x128xbf16>
      %24 = vector.shape_cast %23 : vector<16x16x128xbf16> to vector<256x128xbf16>
      %c0_13 = arith.constant 0 : index
      %c128 = arith.constant 128 : index
      %c0_14 = arith.constant 0 : index
      %25 = vector.load %arg3[%c0_13, %c128, %c0_14] : memref<1x1152x128xbf16, #tpu.memory_space<vmem>>, vector<1x128x128xbf16>
      %26 = vector.shape_cast %25 : vector<1x128x128xbf16> to vector<128x128xbf16>
      %cst_15 = arith.constant dense<0.000000e+00> : vector<256x128xf32>
      %27 = tpu.matmul %24, %26, %cst_15 {dimension_numbers = #tpu.dot_dimension_numbers<[1], [0], [0], [1], [0, 0, 1, 1], [], []>} : vector<256x128xbf16>, vector<128x128xbf16>, vector<256x128xf32> -> vector<256x128xf32>
      %28 = arith.addf %22, %27 : vector<256x128xf32>
      %c12_16 = arith.constant 12 : index
      %c20 = arith.constant 20 : index
      %c0_17 = arith.constant 0 : index
      %29 = vector.load %arg5[%c12_16, %c20, %c0_17] : memref<48x48x128xbf16, #tpu.memory_space<vmem>>, vector<16x16x128xbf16>
      %30 = vector.shape_cast %29 : vector<16x16x128xbf16> to vector<256x128xbf16>
      %c0_18 = arith.constant 0 : index
      %c256 = arith.constant 256 : index
      %c0_19 = arith.constant 0 : index
      %31 = vector.load %arg3[%c0_18, %c256, %c0_19] : memref<1x1152x128xbf16, #tpu.memory_space<vmem>>, vector<1x128x128xbf16>
      %32 = vector.shape_cast %31 : vector<1x128x128xbf16> to vector<128x128xbf16>
      %cst_20 = arith.constant dense<0.000000e+00> : vector<256x128xf32>
      %33 = tpu.matmul %30, %32, %cst_20 {dimension_numbers = #tpu.dot_dimension_numbers<[1], [0], [0], [1], [0, 0, 1, 1], [], []>} : vector<256x128xbf16>, vector<128x128xbf16>, vector<256x128xf32> -> vector<256x128xf32>
      %34 = arith.addf %28, %33 : vector<256x128xf32>
      %c16_21 = arith.constant 16 : index
      %c12_22 = arith.constant 12 : index
      %c0_23 = arith.constant 0 : index
      %35 = vector.load %arg5[%c16_21, %c12_22, %c0_23] : memref<48x48x128xbf16, #tpu.memory_space<vmem>>, vector<16x16x128xbf16>
      %36 = vector.shape_cast %35 : vector<16x16x128xbf16> to vector<256x128xbf16>
      %c0_24 = arith.constant 0 : index
      %c384 = arith.constant 384 : index
      %c0_25 = arith.constant 0 : index
      %37 = vector.load %arg3[%c0_24, %c384, %c0_25] : memref<1x1152x128xbf16, #tpu.memory_space<vmem>>, vector<1x128x128xbf16>
      %38 = vector.shape_cast %37 : vector<1x128x128xbf16> to vector<128x128xbf16>
      %cst_26 = arith.constant dense<0.000000e+00> : vector<256x128xf32>
      %39 = tpu.matmul %36, %38, %cst_26 {dimension_numbers = #tpu.dot_dimension_numbers<[1], [0], [0], [1], [0, 0, 1, 1], [], []>} : vector<256x128xbf16>, vector<128x128xbf16>, vector<256x128xf32> -> vector<256x128xf32>
      %40 = arith.addf %34, %39 : vector<256x128xf32>
      %c16_27 = arith.constant 16 : index
      %c16_28 = arith.constant 16 : index
      %c0_29 = arith.constant 0 : index
      %41 = vector.load %arg5[%c16_27, %c16_28, %c0_29] : memref<48x48x128xbf16, #tpu.memory_space<vmem>>, vector<16x16x128xbf16>
      %42 = vector.shape_cast %41 : vector<16x16x128xbf16> to vector<256x128xbf16>
      %c0_30 = arith.constant 0 : index
      %c512 = arith.constant 512 : index
      %c0_31 = arith.constant 0 : index
      %43 = vector.load %arg3[%c0_30, %c512, %c0_31] : memref<1x1152x128xbf16, #tpu.memory_space<vmem>>, vector<1x128x128xbf16>
      %44 = vector.shape_cast %43 : vector<1x128x128xbf16> to vector<128x128xbf16>
      %cst_32 = arith.constant dense<0.000000e+00> : vector<256x128xf32>
      %45 = tpu.matmul %42, %44, %cst_32 {dimension_numbers = #tpu.dot_dimension_numbers<[1], [0], [0], [1], [0, 0, 1, 1], [], []>} : vector<256x128xbf16>, vector<128x128xbf16>, vector<256x128xf32> -> vector<256x128xf32>
      %46 = arith.addf %40, %45 : vector<256x128xf32>
      %c16_33 = arith.constant 16 : index
      %c20_34 = arith.constant 20 : index
      %c0_35 = arith.constant 0 : index
      %47 = vector.load %arg5[%c16_33, %c20_34, %c0_35] : memref<48x48x128xbf16, #tpu.memory_space<vmem>>, vector<16x16x128xbf16>
      %48 = vector.shape_cast %47 : vector<16x16x128xbf16> to vector<256x128xbf16>
      %c0_36 = arith.constant 0 : index
      %c640 = arith.constant 640 : index
      %c0_37 = arith.constant 0 : index
      %49 = vector.load %arg3[%c0_36, %c640, %c0_37] : memref<1x1152x128xbf16, #tpu.memory_space<vmem>>, vector<1x128x128xbf16>
      %50 = vector.shape_cast %49 : vector<1x128x128xbf16> to vector<128x128xbf16>
      %cst_38 = arith.constant dense<0.000000e+00> : vector<256x128xf32>
      %51 = tpu.matmul %48, %50, %cst_38 {dimension_numbers = #tpu.dot_dimension_numbers<[1], [0], [0], [1], [0, 0, 1, 1], [], []>} : vector<256x128xbf16>, vector<128x128xbf16>, vector<256x128xf32> -> vector<256x128xf32>
      %52 = arith.addf %46, %51 : vector<256x128xf32>
      %c20_39 = arith.constant 20 : index
      %c12_40 = arith.constant 12 : index
      %c0_41 = arith.constant 0 : index
      %53 = vector.load %arg5[%c20_39, %c12_40, %c0_41] : memref<48x48x128xbf16, #tpu.memory_space<vmem>>, vector<16x16x128xbf16>
      %54 = vector.shape_cast %53 : vector<16x16x128xbf16> to vector<256x128xbf16>
      %c0_42 = arith.constant 0 : index
      %c768 = arith.constant 768 : index
      %c0_43 = arith.constant 0 : index
      %55 = vector.load %arg3[%c0_42, %c768, %c0_43] : memref<1x1152x128xbf16, #tpu.memory_space<vmem>>, vector<1x128x128xbf16>
      %56 = vector.shape_cast %55 : vector<1x128x128xbf16> to vector<128x128xbf16>
      %cst_44 = arith.constant dense<0.000000e+00> : vector<256x128xf32>
      %57 = tpu.matmul %54, %56, %cst_44 {dimension_numbers = #tpu.dot_dimension_numbers<[1], [0], [0], [1], [0, 0, 1, 1], [], []>} : vector<256x128xbf16>, vector<128x128xbf16>, vector<256x128xf32> -> vector<256x128xf32>
      %58 = arith.addf %52, %57 : vector<256x128xf32>
      %c20_45 = arith.constant 20 : index
      %c16_46 = arith.constant 16 : index
      %c0_47 = arith.constant 0 : index
      %59 = vector.load %arg5[%c20_45, %c16_46, %c0_47] : memref<48x48x128xbf16, #tpu.memory_space<vmem>>, vector<16x16x128xbf16>
      %60 = vector.shape_cast %59 : vector<16x16x128xbf16> to vector<256x128xbf16>
      %c0_48 = arith.constant 0 : index
      %c896 = arith.constant 896 : index
      %c0_49 = arith.constant 0 : index
      %61 = vector.load %arg3[%c0_48, %c896, %c0_49] : memref<1x1152x128xbf16, #tpu.memory_space<vmem>>, vector<1x128x128xbf16>
      %62 = vector.shape_cast %61 : vector<1x128x128xbf16> to vector<128x128xbf16>
      %cst_50 = arith.constant dense<0.000000e+00> : vector<256x128xf32>
      %63 = tpu.matmul %60, %62, %cst_50 {dimension_numbers = #tpu.dot_dimension_numbers<[1], [0], [0], [1], [0, 0, 1, 1], [], []>} : vector<256x128xbf16>, vector<128x128xbf16>, vector<256x128xf32> -> vector<256x128xf32>
      %64 = arith.addf %58, %63 : vector<256x128xf32>
      %c20_51 = arith.constant 20 : index
      %c20_52 = arith.constant 20 : index
      %c0_53 = arith.constant 0 : index
      %65 = vector.load %arg5[%c20_51, %c20_52, %c0_53] : memref<48x48x128xbf16, #tpu.memory_space<vmem>>, vector<16x16x128xbf16>
      %66 = vector.shape_cast %65 : vector<16x16x128xbf16> to vector<256x128xbf16>
      %c0_54 = arith.constant 0 : index
      %c1024 = arith.constant 1024 : index
      %c0_55 = arith.constant 0 : index
      %67 = vector.load %arg3[%c0_54, %c1024, %c0_55] : memref<1x1152x128xbf16, #tpu.memory_space<vmem>>, vector<1x128x128xbf16>
      %68 = vector.shape_cast %67 : vector<1x128x128xbf16> to vector<128x128xbf16>
      %cst_56 = arith.constant dense<0.000000e+00> : vector<256x128xf32>
      %69 = tpu.matmul %66, %68, %cst_56 {dimension_numbers = #tpu.dot_dimension_numbers<[1], [0], [0], [1], [0, 0, 1, 1], [], []>} : vector<256x128xbf16>, vector<128x128xbf16>, vector<256x128xf32> -> vector<256x128xf32>
      %70 = arith.addf %64, %69 : vector<256x128xf32>
      %cst_57 = arith.constant 0.000000e+00 : f32
      %71 = vector.broadcast %cst_57 : f32 to vector<256x128xf32>
      %72 = arith.maximumf %70, %71 : vector<256x128xf32>
      %73 = vector.shape_cast %72 : vector<256x128xf32> to vector<16x16x128xf32>
      %c0_58 = arith.constant 0 : index
      %c0_59 = arith.constant 0 : index
      %c0_60 = arith.constant 0 : index
      %c0_61 = arith.constant 0 : index
      %74 = vector.load %arg4[%c0_58, %c0_59, %c0_60, %c0_61] : memref<1x16x16x128xf32, #tpu.memory_space<vmem>>, vector<1x16x16x128xf32>
      %75 = vector.shape_cast %74 : vector<1x16x16x128xf32> to vector<16x16x128xf32>
      %76 = arith.addf %75, %73 : vector<16x16x128xf32>
      %c0_62 = arith.constant 0 : index
      %c0_63 = arith.constant 0 : index
      %c0_64 = arith.constant 0 : index
      %c0_65 = arith.constant 0 : index
      %77 = vector.load %arg4[%c0_62, %c0_63, %c0_64, %c0_65] : memref<1x16x16x128xf32, #tpu.memory_space<vmem>>, vector<1x16x16x128xf32>
      %78 = vector.shape_cast %77 : vector<1x16x16x128xf32> to vector<16x16x128xf32>
      %79 = vector.shape_cast %76 : vector<16x16x128xf32> to vector<1x16x16x128xf32>
      tpu.vector_store %arg4[%c0_62, %c0_63, %c0_64, %c0_65], %79 {strides = array<i32>} : memref<1x16x16x128xf32, #tpu.memory_space<vmem>>, vector<1x16x16x128xf32>,
      %80 = arith.truncf %73 : vector<16x16x128xf32> to vector<16x16x128xbf16>
      %c16_66 = arith.constant 16 : index
      %c16_67 = arith.constant 16 : index
      %c0_68 = arith.constant 0 : index
      %81 = vector.load %arg5[%c16_66, %c16_67, %c0_68] : memref<48x48x128xbf16, #tpu.memory_space<vmem>>, vector<16x16x128xbf16>
      tpu.vector_store %arg5[%c16_66, %c16_67, %c0_68], %80 {strides = array<i32>} : memref<48x48x128xbf16, #tpu.memory_space<vmem>>, vector<16x16x128xbf16>,
    } else {
    }
    %c3_i32 = arith.constant 3 : i32
    %12 = arith.cmpi eq, %arg1, %c3_i32 : i32
    %13 = arith.extui %12 : i1 to i32
    %c0_i32_5 = arith.constant 0 : i32
    %14 = arith.cmpi ne, %13, %c0_i32_5 : i32
    scf.if %14 {
      %c8 = arith.constant 8 : index
      %c8_7 = arith.constant 8 : index
      %c0 = arith.constant 0 : index
      %18 = vector.load %arg5[%c8, %c8_7, %c0] : memref<48x48x128xbf16, #tpu.memory_space<vmem>>, vector<16x16x128xbf16>
      %19 = vector.shape_cast %18 : vector<16x16x128xbf16> to vector<256x128xbf16>
      %c0_8 = arith.constant 0 : index
      %c0_9 = arith.constant 0 : index
      %c0_10 = arith.constant 0 : index
      %20 = vector.load %arg3[%c0_8, %c0_9, %c0_10] : memref<1x1152x128xbf16, #tpu.memory_space<vmem>>, vector<1x128x128xbf16>
      %21 = vector.shape_cast %20 : vector<1x128x128xbf16> to vector<128x128xbf16>
      %cst = arith.constant dense<0.000000e+00> : vector<256x128xf32>
      %22 = tpu.matmul %19, %21, %cst {dimension_numbers = #tpu.dot_dimension_numbers<[1], [0], [0], [1], [0, 0, 1, 1], [], []>} : vector<256x128xbf16>, vector<128x128xbf16>, vector<256x128xf32> -> vector<256x128xf32>
      %c8_11 = arith.constant 8 : index
      %c16 = arith.constant 16 : index
      %c0_12 = arith.constant 0 : index
      %23 = vector.load %arg5[%c8_11, %c16, %c0_12] : memref<48x48x128xbf16, #tpu.memory_space<vmem>>, vector<16x16x128xbf16>
      %24 = vector.shape_cast %23 : vector<16x16x128xbf16> to vector<256x128xbf16>
      %c0_13 = arith.constant 0 : index
      %c128 = arith.constant 128 : index
      %c0_14 = arith.constant 0 : index
      %25 = vector.load %arg3[%c0_13, %c128, %c0_14] : memref<1x1152x128xbf16, #tpu.memory_space<vmem>>, vector<1x128x128xbf16>
      %26 = vector.shape_cast %25 : vector<1x128x128xbf16> to vector<128x128xbf16>
      %cst_15 = arith.constant dense<0.000000e+00> : vector<256x128xf32>
      %27 = tpu.matmul %24, %26, %cst_15 {dimension_numbers = #tpu.dot_dimension_numbers<[1], [0], [0], [1], [0, 0, 1, 1], [], []>} : vector<256x128xbf16>, vector<128x128xbf16>, vector<256x128xf32> -> vector<256x128xf32>
      %28 = arith.addf %22, %27 : vector<256x128xf32>
      %c8_16 = arith.constant 8 : index
      %c24 = arith.constant 24 : index
      %c0_17 = arith.constant 0 : index
      %29 = vector.load %arg5[%c8_16, %c24, %c0_17] : memref<48x48x128xbf16, #tpu.memory_space<vmem>>, vector<16x16x128xbf16>
      %30 = vector.shape_cast %29 : vector<16x16x128xbf16> to vector<256x128xbf16>
      %c0_18 = arith.constant 0 : index
      %c256 = arith.constant 256 : index
      %c0_19 = arith.constant 0 : index
      %31 = vector.load %arg3[%c0_18, %c256, %c0_19] : memref<1x1152x128xbf16, #tpu.memory_space<vmem>>, vector<1x128x128xbf16>
      %32 = vector.shape_cast %31 : vector<1x128x128xbf16> to vector<128x128xbf16>
      %cst_20 = arith.constant dense<0.000000e+00> : vector<256x128xf32>
      %33 = tpu.matmul %30, %32, %cst_20 {dimension_numbers = #tpu.dot_dimension_numbers<[1], [0], [0], [1], [0, 0, 1, 1], [], []>} : vector<256x128xbf16>, vector<128x128xbf16>, vector<256x128xf32> -> vector<256x128xf32>
      %34 = arith.addf %28, %33 : vector<256x128xf32>
      %c16_21 = arith.constant 16 : index
      %c8_22 = arith.constant 8 : index
      %c0_23 = arith.constant 0 : index
      %35 = vector.load %arg5[%c16_21, %c8_22, %c0_23] : memref<48x48x128xbf16, #tpu.memory_space<vmem>>, vector<16x16x128xbf16>
      %36 = vector.shape_cast %35 : vector<16x16x128xbf16> to vector<256x128xbf16>
      %c0_24 = arith.constant 0 : index
      %c384 = arith.constant 384 : index
      %c0_25 = arith.constant 0 : index
      %37 = vector.load %arg3[%c0_24, %c384, %c0_25] : memref<1x1152x128xbf16, #tpu.memory_space<vmem>>, vector<1x128x128xbf16>
      %38 = vector.shape_cast %37 : vector<1x128x128xbf16> to vector<128x128xbf16>
      %cst_26 = arith.constant dense<0.000000e+00> : vector<256x128xf32>
      %39 = tpu.matmul %36, %38, %cst_26 {dimension_numbers = #tpu.dot_dimension_numbers<[1], [0], [0], [1], [0, 0, 1, 1], [], []>} : vector<256x128xbf16>, vector<128x128xbf16>, vector<256x128xf32> -> vector<256x128xf32>
      %40 = arith.addf %34, %39 : vector<256x128xf32>
      %c16_27 = arith.constant 16 : index
      %c16_28 = arith.constant 16 : index
      %c0_29 = arith.constant 0 : index
      %41 = vector.load %arg5[%c16_27, %c16_28, %c0_29] : memref<48x48x128xbf16, #tpu.memory_space<vmem>>, vector<16x16x128xbf16>
      %42 = vector.shape_cast %41 : vector<16x16x128xbf16> to vector<256x128xbf16>
      %c0_30 = arith.constant 0 : index
      %c512 = arith.constant 512 : index
      %c0_31 = arith.constant 0 : index
      %43 = vector.load %arg3[%c0_30, %c512, %c0_31] : memref<1x1152x128xbf16, #tpu.memory_space<vmem>>, vector<1x128x128xbf16>
      %44 = vector.shape_cast %43 : vector<1x128x128xbf16> to vector<128x128xbf16>
      %cst_32 = arith.constant dense<0.000000e+00> : vector<256x128xf32>
      %45 = tpu.matmul %42, %44, %cst_32 {dimension_numbers = #tpu.dot_dimension_numbers<[1], [0], [0], [1], [0, 0, 1, 1], [], []>} : vector<256x128xbf16>, vector<128x128xbf16>, vector<256x128xf32> -> vector<256x128xf32>
      %46 = arith.addf %40, %45 : vector<256x128xf32>
      %c16_33 = arith.constant 16 : index
      %c24_34 = arith.constant 24 : index
      %c0_35 = arith.constant 0 : index
      %47 = vector.load %arg5[%c16_33, %c24_34, %c0_35] : memref<48x48x128xbf16, #tpu.memory_space<vmem>>, vector<16x16x128xbf16>
      %48 = vector.shape_cast %47 : vector<16x16x128xbf16> to vector<256x128xbf16>
      %c0_36 = arith.constant 0 : index
      %c640 = arith.constant 640 : index
      %c0_37 = arith.constant 0 : index
      %49 = vector.load %arg3[%c0_36, %c640, %c0_37] : memref<1x1152x128xbf16, #tpu.memory_space<vmem>>, vector<1x128x128xbf16>
      %50 = vector.shape_cast %49 : vector<1x128x128xbf16> to vector<128x128xbf16>
      %cst_38 = arith.constant dense<0.000000e+00> : vector<256x128xf32>
      %51 = tpu.matmul %48, %50, %cst_38 {dimension_numbers = #tpu.dot_dimension_numbers<[1], [0], [0], [1], [0, 0, 1, 1], [], []>} : vector<256x128xbf16>, vector<128x128xbf16>, vector<256x128xf32> -> vector<256x128xf32>
      %52 = arith.addf %46, %51 : vector<256x128xf32>
      %c24_39 = arith.constant 24 : index
      %c8_40 = arith.constant 8 : index
      %c0_41 = arith.constant 0 : index
      %53 = vector.load %arg5[%c24_39, %c8_40, %c0_41] : memref<48x48x128xbf16, #tpu.memory_space<vmem>>, vector<16x16x128xbf16>
      %54 = vector.shape_cast %53 : vector<16x16x128xbf16> to vector<256x128xbf16>
      %c0_42 = arith.constant 0 : index
      %c768 = arith.constant 768 : index
      %c0_43 = arith.constant 0 : index
      %55 = vector.load %arg3[%c0_42, %c768, %c0_43] : memref<1x1152x128xbf16, #tpu.memory_space<vmem>>, vector<1x128x128xbf16>
      %56 = vector.shape_cast %55 : vector<1x128x128xbf16> to vector<128x128xbf16>
      %cst_44 = arith.constant dense<0.000000e+00> : vector<256x128xf32>
      %57 = tpu.matmul %54, %56, %cst_44 {dimension_numbers = #tpu.dot_dimension_numbers<[1], [0], [0], [1], [0, 0, 1, 1], [], []>} : vector<256x128xbf16>, vector<128x128xbf16>, vector<256x128xf32> -> vector<256x128xf32>
      %58 = arith.addf %52, %57 : vector<256x128xf32>
      %c24_45 = arith.constant 24 : index
      %c16_46 = arith.constant 16 : index
      %c0_47 = arith.constant 0 : index
      %59 = vector.load %arg5[%c24_45, %c16_46, %c0_47] : memref<48x48x128xbf16, #tpu.memory_space<vmem>>, vector<16x16x128xbf16>
      %60 = vector.shape_cast %59 : vector<16x16x128xbf16> to vector<256x128xbf16>
      %c0_48 = arith.constant 0 : index
      %c896 = arith.constant 896 : index
      %c0_49 = arith.constant 0 : index
      %61 = vector.load %arg3[%c0_48, %c896, %c0_49] : memref<1x1152x128xbf16, #tpu.memory_space<vmem>>, vector<1x128x128xbf16>
      %62 = vector.shape_cast %61 : vector<1x128x128xbf16> to vector<128x128xbf16>
      %cst_50 = arith.constant dense<0.000000e+00> : vector<256x128xf32>
      %63 = tpu.matmul %60, %62, %cst_50 {dimension_numbers = #tpu.dot_dimension_numbers<[1], [0], [0], [1], [0, 0, 1, 1], [], []>} : vector<256x128xbf16>, vector<128x128xbf16>, vector<256x128xf32> -> vector<256x128xf32>
      %64 = arith.addf %58, %63 : vector<256x128xf32>
      %c24_51 = arith.constant 24 : index
      %c24_52 = arith.constant 24 : index
      %c0_53 = arith.constant 0 : index
      %65 = vector.load %arg5[%c24_51, %c24_52, %c0_53] : memref<48x48x128xbf16, #tpu.memory_space<vmem>>, vector<16x16x128xbf16>
      %66 = vector.shape_cast %65 : vector<16x16x128xbf16> to vector<256x128xbf16>
      %c0_54 = arith.constant 0 : index
      %c1024 = arith.constant 1024 : index
      %c0_55 = arith.constant 0 : index
      %67 = vector.load %arg3[%c0_54, %c1024, %c0_55] : memref<1x1152x128xbf16, #tpu.memory_space<vmem>>, vector<1x128x128xbf16>
      %68 = vector.shape_cast %67 : vector<1x128x128xbf16> to vector<128x128xbf16>
      %cst_56 = arith.constant dense<0.000000e+00> : vector<256x128xf32>
      %69 = tpu.matmul %66, %68, %cst_56 {dimension_numbers = #tpu.dot_dimension_numbers<[1], [0], [0], [1], [0, 0, 1, 1], [], []>} : vector<256x128xbf16>, vector<128x128xbf16>, vector<256x128xf32> -> vector<256x128xf32>
      %70 = arith.addf %64, %69 : vector<256x128xf32>
      %cst_57 = arith.constant 0.000000e+00 : f32
      %71 = vector.broadcast %cst_57 : f32 to vector<256x128xf32>
      %72 = arith.maximumf %70, %71 : vector<256x128xf32>
      %73 = vector.shape_cast %72 : vector<256x128xf32> to vector<16x16x128xf32>
      %c0_58 = arith.constant 0 : index
      %c0_59 = arith.constant 0 : index
      %c0_60 = arith.constant 0 : index
      %c0_61 = arith.constant 0 : index
      %74 = vector.load %arg4[%c0_58, %c0_59, %c0_60, %c0_61] : memref<1x16x16x128xf32, #tpu.memory_space<vmem>>, vector<1x16x16x128xf32>
      %75 = vector.shape_cast %74 : vector<1x16x16x128xf32> to vector<16x16x128xf32>
      %76 = arith.addf %75, %73 : vector<16x16x128xf32>
      %c0_62 = arith.constant 0 : index
      %c0_63 = arith.constant 0 : index
      %c0_64 = arith.constant 0 : index
      %c0_65 = arith.constant 0 : index
      %77 = vector.load %arg4[%c0_62, %c0_63, %c0_64, %c0_65] : memref<1x16x16x128xf32, #tpu.memory_space<vmem>>, vector<1x16x16x128xf32>
      %78 = vector.shape_cast %77 : vector<1x16x16x128xf32> to vector<16x16x128xf32>
      %79 = vector.shape_cast %76 : vector<16x16x128xf32> to vector<1x16x16x128xf32>
      tpu.vector_store %arg4[%c0_62, %c0_63, %c0_64, %c0_65], %79 {strides = array<i32>} : memref<1x16x16x128xf32, #tpu.memory_space<vmem>>, vector<1x16x16x128xf32>,
      %80 = arith.truncf %73 : vector<16x16x128xf32> to vector<16x16x128xbf16>
      %c16_66 = arith.constant 16 : index
      %c16_67 = arith.constant 16 : index
      %c0_68 = arith.constant 0 : index
      %81 = vector.load %arg5[%c16_66, %c16_67, %c0_68] : memref<48x48x128xbf16, #tpu.memory_space<vmem>>, vector<16x16x128xbf16>
      tpu.vector_store %arg5[%c16_66, %c16_67, %c0_68], %80 {strides = array<i32>} : memref<48x48x128xbf16, #tpu.memory_space<vmem>>, vector<16x16x128xbf16>,
    } else {
    }
    %c4_i32 = arith.constant 4 : i32
    %15 = arith.cmpi eq, %arg1, %c4_i32 : i32
    %16 = arith.extui %15 : i1 to i32
    %c0_i32_6 = arith.constant 0 : i32
    %17 = arith.cmpi ne, %16, %c0_i32_6 : i32
    scf.if %17 {
      %c0 = arith.constant 0 : index
      %c0_7 = arith.constant 0 : index
      %c0_8 = arith.constant 0 : index
      %18 = vector.load %arg5[%c0, %c0_7, %c0_8] : memref<48x48x128xbf16, #tpu.memory_space<vmem>>, vector<16x16x128xbf16>
      %19 = vector.shape_cast %18 : vector<16x16x128xbf16> to vector<256x128xbf16>
      %c0_9 = arith.constant 0 : index
      %c0_10 = arith.constant 0 : index
      %c0_11 = arith.constant 0 : index
      %20 = vector.load %arg3[%c0_9, %c0_10, %c0_11] : memref<1x1152x128xbf16, #tpu.memory_space<vmem>>, vector<1x128x128xbf16>
      %21 = vector.shape_cast %20 : vector<1x128x128xbf16> to vector<128x128xbf16>
      %cst = arith.constant dense<0.000000e+00> : vector<256x128xf32>
      %22 = tpu.matmul %19, %21, %cst {dimension_numbers = #tpu.dot_dimension_numbers<[1], [0], [0], [1], [0, 0, 1, 1], [], []>} : vector<256x128xbf16>, vector<128x128xbf16>, vector<256x128xf32> -> vector<256x128xf32>
      %c0_12 = arith.constant 0 : index
      %c16 = arith.constant 16 : index
      %c0_13 = arith.constant 0 : index
      %23 = vector.load %arg5[%c0_12, %c16, %c0_13] : memref<48x48x128xbf16, #tpu.memory_space<vmem>>, vector<16x16x128xbf16>
      %24 = vector.shape_cast %23 : vector<16x16x128xbf16> to vector<256x128xbf16>
      %c0_14 = arith.constant 0 : index
      %c128 = arith.constant 128 : index
      %c0_15 = arith.constant 0 : index
      %25 = vector.load %arg3[%c0_14, %c128, %c0_15] : memref<1x1152x128xbf16, #tpu.memory_space<vmem>>, vector<1x128x128xbf16>
      %26 = vector.shape_cast %25 : vector<1x128x128xbf16> to vector<128x128xbf16>
      %cst_16 = arith.constant dense<0.000000e+00> : vector<256x128xf32>
      %27 = tpu.matmul %24, %26, %cst_16 {dimension_numbers = #tpu.dot_dimension_numbers<[1], [0], [0], [1], [0, 0, 1, 1], [], []>} : vector<256x128xbf16>, vector<128x128xbf16>, vector<256x128xf32> -> vector<256x128xf32>
      %28 = arith.addf %22, %27 : vector<256x128xf32>
      %c0_17 = arith.constant 0 : index
      %c32 = arith.constant 32 : index
      %c0_18 = arith.constant 0 : index
      %29 = vector.load %arg5[%c0_17, %c32, %c0_18] : memref<48x48x128xbf16, #tpu.memory_space<vmem>>, vector<16x16x128xbf16>
      %30 = vector.shape_cast %29 : vector<16x16x128xbf16> to vector<256x128xbf16>
      %c0_19 = arith.constant 0 : index
      %c256 = arith.constant 256 : index
      %c0_20 = arith.constant 0 : index
      %31 = vector.load %arg3[%c0_19, %c256, %c0_20] : memref<1x1152x128xbf16, #tpu.memory_space<vmem>>, vector<1x128x128xbf16>
      %32 = vector.shape_cast %31 : vector<1x128x128xbf16> to vector<128x128xbf16>
      %cst_21 = arith.constant dense<0.000000e+00> : vector<256x128xf32>
      %33 = tpu.matmul %30, %32, %cst_21 {dimension_numbers = #tpu.dot_dimension_numbers<[1], [0], [0], [1], [0, 0, 1, 1], [], []>} : vector<256x128xbf16>, vector<128x128xbf16>, vector<256x128xf32> -> vector<256x128xf32>
      %34 = arith.addf %28, %33 : vector<256x128xf32>
      %c16_22 = arith.constant 16 : index
      %c0_23 = arith.constant 0 : index
      %c0_24 = arith.constant 0 : index
      %35 = vector.load %arg5[%c16_22, %c0_23, %c0_24] : memref<48x48x128xbf16, #tpu.memory_space<vmem>>, vector<16x16x128xbf16>
      %36 = vector.shape_cast %35 : vector<16x16x128xbf16> to vector<256x128xbf16>
      %c0_25 = arith.constant 0 : index
      %c384 = arith.constant 384 : index
      %c0_26 = arith.constant 0 : index
      %37 = vector.load %arg3[%c0_25, %c384, %c0_26] : memref<1x1152x128xbf16, #tpu.memory_space<vmem>>, vector<1x128x128xbf16>
      %38 = vector.shape_cast %37 : vector<1x128x128xbf16> to vector<128x128xbf16>
      %cst_27 = arith.constant dense<0.000000e+00> : vector<256x128xf32>
      %39 = tpu.matmul %36, %38, %cst_27 {dimension_numbers = #tpu.dot_dimension_numbers<[1], [0], [0], [1], [0, 0, 1, 1], [], []>} : vector<256x128xbf16>, vector<128x128xbf16>, vector<256x128xf32> -> vector<256x128xf32>
      %40 = arith.addf %34, %39 : vector<256x128xf32>
      %c16_28 = arith.constant 16 : index
      %c16_29 = arith.constant 16 : index
      %c0_30 = arith.constant 0 : index
      %41 = vector.load %arg5[%c16_28, %c16_29, %c0_30] : memref<48x48x128xbf16, #tpu.memory_space<vmem>>, vector<16x16x128xbf16>
      %42 = vector.shape_cast %41 : vector<16x16x128xbf16> to vector<256x128xbf16>
      %c0_31 = arith.constant 0 : index
      %c512 = arith.constant 512 : index
      %c0_32 = arith.constant 0 : index
      %43 = vector.load %arg3[%c0_31, %c512, %c0_32] : memref<1x1152x128xbf16, #tpu.memory_space<vmem>>, vector<1x128x128xbf16>
      %44 = vector.shape_cast %43 : vector<1x128x128xbf16> to vector<128x128xbf16>
      %cst_33 = arith.constant dense<0.000000e+00> : vector<256x128xf32>
      %45 = tpu.matmul %42, %44, %cst_33 {dimension_numbers = #tpu.dot_dimension_numbers<[1], [0], [0], [1], [0, 0, 1, 1], [], []>} : vector<256x128xbf16>, vector<128x128xbf16>, vector<256x128xf32> -> vector<256x128xf32>
      %46 = arith.addf %40, %45 : vector<256x128xf32>
      %c16_34 = arith.constant 16 : index
      %c32_35 = arith.constant 32 : index
      %c0_36 = arith.constant 0 : index
      %47 = vector.load %arg5[%c16_34, %c32_35, %c0_36] : memref<48x48x128xbf16, #tpu.memory_space<vmem>>, vector<16x16x128xbf16>
      %48 = vector.shape_cast %47 : vector<16x16x128xbf16> to vector<256x128xbf16>
      %c0_37 = arith.constant 0 : index
      %c640 = arith.constant 640 : index
      %c0_38 = arith.constant 0 : index
      %49 = vector.load %arg3[%c0_37, %c640, %c0_38] : memref<1x1152x128xbf16, #tpu.memory_space<vmem>>, vector<1x128x128xbf16>
      %50 = vector.shape_cast %49 : vector<1x128x128xbf16> to vector<128x128xbf16>
      %cst_39 = arith.constant dense<0.000000e+00> : vector<256x128xf32>
      %51 = tpu.matmul %48, %50, %cst_39 {dimension_numbers = #tpu.dot_dimension_numbers<[1], [0], [0], [1], [0, 0, 1, 1], [], []>} : vector<256x128xbf16>, vector<128x128xbf16>, vector<256x128xf32> -> vector<256x128xf32>
      %52 = arith.addf %46, %51 : vector<256x128xf32>
      %c32_40 = arith.constant 32 : index
      %c0_41 = arith.constant 0 : index
      %c0_42 = arith.constant 0 : index
      %53 = vector.load %arg5[%c32_40, %c0_41, %c0_42] : memref<48x48x128xbf16, #tpu.memory_space<vmem>>, vector<16x16x128xbf16>
      %54 = vector.shape_cast %53 : vector<16x16x128xbf16> to vector<256x128xbf16>
      %c0_43 = arith.constant 0 : index
      %c768 = arith.constant 768 : index
      %c0_44 = arith.constant 0 : index
      %55 = vector.load %arg3[%c0_43, %c768, %c0_44] : memref<1x1152x128xbf16, #tpu.memory_space<vmem>>, vector<1x128x128xbf16>
      %56 = vector.shape_cast %55 : vector<1x128x128xbf16> to vector<128x128xbf16>
      %cst_45 = arith.constant dense<0.000000e+00> : vector<256x128xf32>
      %57 = tpu.matmul %54, %56, %cst_45 {dimension_numbers = #tpu.dot_dimension_numbers<[1], [0], [0], [1], [0, 0, 1, 1], [], []>} : vector<256x128xbf16>, vector<128x128xbf16>, vector<256x128xf32> -> vector<256x128xf32>
      %58 = arith.addf %52, %57 : vector<256x128xf32>
      %c32_46 = arith.constant 32 : index
      %c16_47 = arith.constant 16 : index
      %c0_48 = arith.constant 0 : index
      %59 = vector.load %arg5[%c32_46, %c16_47, %c0_48] : memref<48x48x128xbf16, #tpu.memory_space<vmem>>, vector<16x16x128xbf16>
      %60 = vector.shape_cast %59 : vector<16x16x128xbf16> to vector<256x128xbf16>
      %c0_49 = arith.constant 0 : index
      %c896 = arith.constant 896 : index
      %c0_50 = arith.constant 0 : index
      %61 = vector.load %arg3[%c0_49, %c896, %c0_50] : memref<1x1152x128xbf16, #tpu.memory_space<vmem>>, vector<1x128x128xbf16>
      %62 = vector.shape_cast %61 : vector<1x128x128xbf16> to vector<128x128xbf16>
      %cst_51 = arith.constant dense<0.000000e+00> : vector<256x128xf32>
      %63 = tpu.matmul %60, %62, %cst_51 {dimension_numbers = #tpu.dot_dimension_numbers<[1], [0], [0], [1], [0, 0, 1, 1], [], []>} : vector<256x128xbf16>, vector<128x128xbf16>, vector<256x128xf32> -> vector<256x128xf32>
      %64 = arith.addf %58, %63 : vector<256x128xf32>
      %c32_52 = arith.constant 32 : index
      %c32_53 = arith.constant 32 : index
      %c0_54 = arith.constant 0 : index
      %65 = vector.load %arg5[%c32_52, %c32_53, %c0_54] : memref<48x48x128xbf16, #tpu.memory_space<vmem>>, vector<16x16x128xbf16>
      %66 = vector.shape_cast %65 : vector<16x16x128xbf16> to vector<256x128xbf16>
      %c0_55 = arith.constant 0 : index
      %c1024 = arith.constant 1024 : index
      %c0_56 = arith.constant 0 : index
      %67 = vector.load %arg3[%c0_55, %c1024, %c0_56] : memref<1x1152x128xbf16, #tpu.memory_space<vmem>>, vector<1x128x128xbf16>
      %68 = vector.shape_cast %67 : vector<1x128x128xbf16> to vector<128x128xbf16>
      %cst_57 = arith.constant dense<0.000000e+00> : vector<256x128xf32>
      %69 = tpu.matmul %66, %68, %cst_57 {dimension_numbers = #tpu.dot_dimension_numbers<[1], [0], [0], [1], [0, 0, 1, 1], [], []>} : vector<256x128xbf16>, vector<128x128xbf16>, vector<256x128xf32> -> vector<256x128xf32>
      %70 = arith.addf %64, %69 : vector<256x128xf32>
      %cst_58 = arith.constant 0.000000e+00 : f32
      %71 = vector.broadcast %cst_58 : f32 to vector<256x128xf32>
      %72 = arith.maximumf %70, %71 : vector<256x128xf32>
      %73 = vector.shape_cast %72 : vector<256x128xf32> to vector<16x16x128xf32>
      %c0_59 = arith.constant 0 : index
      %c0_60 = arith.constant 0 : index
      %c0_61 = arith.constant 0 : index
      %c0_62 = arith.constant 0 : index
      %74 = vector.load %arg4[%c0_59, %c0_60, %c0_61, %c0_62] : memref<1x16x16x128xf32, #tpu.memory_space<vmem>>, vector<1x16x16x128xf32>
      %75 = vector.shape_cast %74 : vector<1x16x16x128xf32> to vector<16x16x128xf32>
      %76 = arith.addf %75, %73 : vector<16x16x128xf32>
      %c0_63 = arith.constant 0 : index
      %c0_64 = arith.constant 0 : index
      %c0_65 = arith.constant 0 : index
      %c0_66 = arith.constant 0 : index
      %77 = vector.load %arg4[%c0_63, %c0_64, %c0_65, %c0_66] : memref<1x16x16x128xf32, #tpu.memory_space<vmem>>, vector<1x16x16x128xf32>
      %78 = vector.shape_cast %77 : vector<1x16x16x128xf32> to vector<16x16x128xf32>
      %79 = vector.shape_cast %76 : vector<16x16x128xf32> to vector<1x16x16x128xf32>
      tpu.vector_store %arg4[%c0_63, %c0_64, %c0_65, %c0_66], %79 {strides = array<i32>} : memref<1x16x16x128xf32, #tpu.memory_space<vmem>>, vector<1x16x16x128xf32>,
    } else {
    }
    return
  }
  func.func @transform_0(%arg0: i32, %arg1: i32) -> (i32, i32, i32, i32) {
    %c0_i32 = arith.constant 0 : i32
    %c0_i32_0 = arith.constant 0 : i32
    %c0_i32_1 = arith.constant 0 : i32
    %c0_i32_2 = arith.constant 0 : i32
    return %arg0, %c0_i32, %c0_i32_0, %c0_i32_1 : i32, i32, i32, i32
  }
  func.func @transform_1(%arg0: i32, %arg1: i32) -> (i32, i32, i32) {
    %c0_i32 = arith.constant 0 : i32
    %c0_i32_0 = arith.constant 0 : i32
    %c0_i32_1 = arith.constant 0 : i32
    return %arg1, %c0_i32, %c0_i32_0 : i32, i32, i32
  }
  func.func @transform_2(%arg0: i32, %arg1: i32) -> (i32, i32, i32, i32) {
    %c0_i32 = arith.constant 0 : i32
    %c0_i32_0 = arith.constant 0 : i32
    %c0_i32_1 = arith.constant 0 : i32
    %c0_i32_2 = arith.constant 0 : i32
    return %arg0, %c0_i32, %c0_i32_0, %c0_i32_1 : i32, i32, i32, i32
  }
}

</mosaic_0001>

<bundles_post_ra>
// kernel: tpu_custom_call.1
= control target key start
LH: loop header
LB: loop body
LE: loop exit
PB: predicated region body
PF: predicated region fallthrough
CT: control target
= control target key end

     0   :  { %s24852_s0 = inlined_call_operand.hbm [shape: f32[2,16,16,128], index: 0, kind: input, shape index: {}]   ;;  %s24853_s1 = inlined_call_operand.hbm [shape: bf16[5,1152,128], index: 1, kind: input, shape index: {}]   ;;  %s24854_s2 = inlined_call_operand.hbm [shape: f32[2,16,16,128], index: 2, kind: output, shape index: {}]  }
   0x1   :  { %24867 = sst [smem:[#allocation15_spill]] %s24852_s0 }
   0x2   :  { %7 = vsyncpa [#allocation4], 0 }
   0x3   :  { %9 = vsyncpa [#allocation4 + $0x1], 0 }
   0x4   :  { %10 = vsyncpa [#allocation7], 0 }
   0x5   :  { %12 = vsyncpa [#allocation7 + $0x1], 0 }
   0x6   :  { %13 = vsyncpa [#allocation5], 0 }
   0x7   :  { %15 = vsyncpa [#allocation5 + $0x1], 0  ;;  %s22370_s9 = smov 0   ;;  %s22372_s10 = smov 0  }
   0x8   :  { %s22374_s11 = smov 0   ;;  %s22376_s12 = smov 0  }
   0x9   :  { %s22378_s13 = smov 0   ;;  %s22380_s14 = smov 0  }
   0xa   :  { %s22382_s15 = smov 0   ;;  %s22384_s16 = smov 0  }
   0xb   :  { %s22386_s17 = smov 0   ;;  %s22388_s18 = smov 0  }
   0xc   :  { %s22390_s19 = smov 0  }
   0xd LB: > { %24868 = sst [smem:[#allocation12_spill]] %s22339_s18  ;;  %s16647_s20 = sadd.s32 4294967295, %s22343_s19   ;;  %s22343_s19 = sphi %s22390_s19, %s21_s19   ;;  %s22339_s18 = sphi %s22388_s18, %s24894_s18   ;;  %s22335_s17 = sphi %s22386_s17, %s24902_s17   ;;  %s22331_s16 = sphi %s22384_s16, %s24892_s16   ;;  %s22327_s15 = sphi %s22382_s15, %s24901_s15   ;;  %s22323_s14 = sphi %s22380_s14, %s24900_s14   ;;  %s22319_s13 = sphi %s22378_s13, %s24899_s13   ;;  %s22315_s12 = sphi %s22376_s12, %s24898_s12   ;;  %s22311_s11 = sphi %s22374_s11, %s24897_s11   ;;  %s22307_s10 = sphi %s22372_s10, %s24896_s10   ;;  %s22303_s9 = sphi %s22370_s9, %s24895_s9  }
   0xe   : > { %s16648_s21 = sadd.s32 4294967294, %s22343_s19   ;;  %s33_s22 = sadd.s32 1, %s22339_s18 }
   0xf   : > { %s40_s23 = sadd.s32 1, %s22323_s14  ;;  %p47_p0 = scmp.ne.s32.totalorder %s22323_s14, %s22319_s13 }
  0x10   : > { %p24856_p1 = scmp.eq.s32.totalorder %s22343_s19, 0  ;;  %p53_p2 = scmp.ne.s32.totalorder %s22319_s13, %s22315_s12 }
  0x11   : > { %p22434_p3 = scmp.eq.s32.totalorder %s16647_s20, 0  ;;  %p103_p5 = scmp.eq.s32.totalorder %s16647_s20, 9 }
  0x12   : > { %p22440_p4 = por %p24856_p1, %p47_p0  ;;  %p109_p7 = scmp.eq.s32.totalorder %s16648_s21, 9 }
  0x13   : > { %p22446_p6 = por %p22434_p3, %p53_p2  ;;  %p22450_p8 = por %p103_p5, %p47_p0 }
  0x14   : > { %p22454_p9 = por %p109_p7, %p53_p2  ;;  %p24855_p10 = scmp.lt.s32.totalorder %s22343_s19, 10 }
  0x15   : > { %s24871_s26 = scalar_select %p22446_p6, 1, 0 }
  0x16   : > { %s24872_s27 = scalar_select %p22450_p8, 1, 0 }
  0x17   : > { %s24873_s28 = scalar_select %p22454_p9, 1, 0 }
  0x18   : > { %s129_s29 = sand.u32 1, %s22323_s14   ;;  %s17028_s30 = sshll.u32 %s22339_s18, 12 }
  0x19   : > { %s16651_s3 = sshll.u32 %s129_s29, 8  ;;  %s24874_s0 = sld [smem:[#allocation15_spill]] }
  0x1a   : > { %s133_s7 = scalar_lea.vmem [#allocation3], %s16651_s3  ;;  %p22470_p11 = pnand %p24855_p10, %p22440_p4 }
  0x1b   : > { %s140_s8 = sshll.u32 %s133_s7, 4  ;;  %s22476_s21 = scalar_lea.sflag [#allocation4], %s129_s29  ;;  %s22474_s8 = int_to_ptr.vmem [resolvable:$true] %s140_s8 }
  0x1c   : > { %p22159_p13 = pneg %p22470_p11 }
  0x1f   : > { %s22464_s6 = scalar_lea.hbm %s24874_s0, %s17028_s30  ;;  %s22162_s4 = scalar_lea.hbm %s24874_s0, 8192 }
  0x20   : > { %s22157_s30 = scalar_lea.hbm %s22464_s6, 4096  ;;  %p22163_p4 = scmp.lt.u32.totalorder %s22464_s6, %s24874_s0 }
  0x21   : > { %p22158_p12 = scmp.ne.s32.totalorder %s22464_s6, %s22157_s30  ;;  %p22164_p5 = scmp.lt.u32.totalorder %s22162_s4, %s22157_s30 }
  0x22   : > { %p22166_p10 = scmp.lt.u32.totalorder %s22157_s30, %s22464_s6 }
  0x23   : > { %p22160_p0 = pnand %p22159_p13, %p22158_p12  ;;  %p22165_p7 = por %p22164_p5, %p22163_p4 }
  0x25   : > { %p22161_p2 = pneg %p22160_p0  ;;  %p22167_p1 = por %p22166_p10, %p22165_p7 }
  0x27   : > { %p22168_p9 = pnand %p22167_p1, %p22161_p2 }
  0x29   : > { %22171 = shalt.err (!%p22168_p9)
}
  0x2a   : > { %s22172_s29 = scalar_lea.vmem %s22474_s8, 4096  ;;  %s22345_s25 = smov [#allocation3]  }
  0x2b   : > { %p22173_p12 = scmp.ne.s32.totalorder %s22474_s8, %s22172_s29  ;;  %s22177_s3 = sshll.u32 %s22345_s25, 4  ;;  %s22178_s3 = int_to_ptr.vmem [resolvable:$false] %s22177_s3 }
  0x2c   : > { %s22179_s5 = scalar_lea.vmem %s22178_s3, 8192  ;;  %p22180_p6 = scmp.lt.s32.totalorder %s22474_s8, %s22178_s3 }
  0x2d   : > { %p22175_p0 = pnand %p22173_p12, %p22159_p13  ;;  %p22181_p4 = scmp.lt.s32.totalorder %s22179_s5, %s22172_s29 }
  0x2f   : > { %p22176_p8 = pneg %p22175_p0  ;;  %p22182_p5 = por %p22181_p4, %p22180_p6 }
  0x31   : > { %p22183_p10 = pnand %p22182_p5, %p22176_p8 }
  0x33   : > { %22186 = shalt.err (!%p22183_p10)
}
  0x34   : > { %s22346_s30 = smov 128   ;;  %s22347_s4 = smov 8  }
  0x35   : > { %21642 = dma.hbm_to_vmem [thread:$0]  (!%p22470_p11), %s22464_s6, 4096, %s22474_s8, %s22476_s21, %s22346_s30, %s22346_s30, %s22347_s4  }
  0x36   : > { %p16655_p1 = scmp.ge.s32.totalorder %s22343_s19, 1  ;;  %p169_p6 = scmp.lt.s32.totalorder %s22343_s19, 11 }
  0x37   : > { %s30_s29 = sadd.s32 1, %s22335_s17  ;;  %s66_s25 = sadd.s32 1, %s22311_s11 }
  0x38   : > { %p22506_p8 = pnand %p16655_p1, %p169_p6  ;;  %p31_p9 = scmp.ge.s32.totalorder %s30_s29, 5 }
  0x39   : > { %p73_p13 = scmp.ne.s32.totalorder %s22311_s11, %s22307_s10  ;;  %p79_p2 = scmp.ne.s32.totalorder %s22307_s10, %s22303_s9 }
  0x3a   : > { %s24904_s29 = smov (%p31_p9, %s30_s29), 0  ;;  %s24906_s22 = smov (!%p31_p9, %s33_s22), %s22339_s18 }
  0x3b   : > { %24877 = sst [smem:[#allocation13_spill]] %s24904_s29  ;;  %s63_s6 = ssub.s32 %s22335_s17, %s24904_s29 }
  0x3c   : > { %p24878_p11 = scmp.eq.s32.totalorder %s22343_s19, 0  ;;  %p35_p12 = scmp.ge.s32.totalorder %s24906_s22, 2 }
  0x3d   : > { %p64_p0 = scmp.eq.s32.totalorder %s63_s6, 0  ;;  %p22527_p4 = por %p79_p2, %p22434_p3 }
  0x3e   : > { %p75_p7 = por %p73_p13, %p24878_p11  ;;  %s150_s20 = sand.u32 1, %s22311_s11  }
  0x3f   : > { %s24879_s8 = scalar_select %p22527_p4, 1, 0 }
  0x40   : > { %s24908_s22 = smov (%p35_p12, %s24906_s22), 0  ;;  %s21630_s3 = smul.u32 576, %s150_s20 }
  0x41   : > { %24880 = sst [smem:[#allocation14_spill]] %s24908_s22  ;;  %s37_s21 = ssub.s32 %s22339_s18, %s24908_s22 }
  0x42   : > { %s22535_s9 = scalar_select %p64_p0, %s22311_s11, %s66_s25  }
  0x43   : > { %p38_p5 = scmp.eq.s32.totalorder %s37_s21, 0  ;;  %s21631_s5 = smul.u32 9216, %s22335_s17 }
  0x44   : > { %p24881_p10 = scmp.lt.s32.totalorder %s22343_s19, 10  ;;  %s154_s25 = scalar_lea.vmem [#allocation6], %s21630_s3 }
  0x45   : > { %s22549_s24 = scalar_select %p38_p5, %s22323_s14, %s40_s23  }
  0x46   : > { %p22542_p1 = pnand %p24881_p10, %p75_p7  ;;  %s22554_s0 = scalar_lea.hbm %s24853_s1, %s21631_s5 }
  0x47   : > { %s161_s21 = sshll.u32 %s154_s25, 4  ;;  %s22558_s22 = scalar_lea.sflag [#allocation7], %s150_s20  ;;  %s22556_s21 = int_to_ptr.vmem [resolvable:$true] %s161_s21 }
  0x48   : > { %s22187_s29 = scalar_lea.hbm %s22554_s0, 9216  ;;  %p22189_p6 = pneg %p22542_p1 }
  0x49   : > { %p22188_p3 = scmp.ne.s32.totalorder %s22554_s0, %s22187_s29  ;;  %s22192_s4 = scalar_lea.hbm %s24853_s1, 46080 }
  0x4a   : > { %p22193_p2 = scmp.lt.u32.totalorder %s22554_s0, %s24853_s1  ;;  %p22194_p11 = scmp.lt.u32.totalorder %s22192_s4, %s22187_s29 }
  0x4b   : > { %p22190_p9 = pnand %p22189_p6, %p22188_p3  ;;  %p22196_p12 = scmp.lt.u32.totalorder %s22187_s29, %s22554_s0 }
  0x4c   : > { %p22195_p7 = por %p22194_p11, %p22193_p2 }
  0x4d   : > { %p22191_p13 = pneg %p22190_p9 }
  0x4e   : > { %p22197_p0 = por %p22196_p12, %p22195_p7 }
  0x50   : > { %p22198_p5 = pnand %p22197_p0, %p22191_p13 }
  0x52   : > { %22201 = shalt.err (!%p22198_p5)
}
  0x53   : > { %s22202_s20 = scalar_lea.vmem %s22556_s21, 9216  ;;  %s22348_s3 = smov [#allocation6]  }
  0x54   : > { %p22203_p10 = scmp.ne.s32.totalorder %s22556_s21, %s22202_s20  ;;  %s22207_s25 = sshll.u32 %s22348_s3, 4  ;;  %s22208_s25 = int_to_ptr.vmem [resolvable:$false] %s22207_s25 }
  0x55   : > { %s22209_s18 = scalar_lea.vmem %s22208_s25, 18432  ;;  %p22210_p4 = scmp.lt.s32.totalorder %s22556_s21, %s22208_s25 }
  0x56   : > { %p22205_p3 = pnand %p22203_p10, %p22189_p6  ;;  %p22211_p2 = scmp.lt.s32.totalorder %s22209_s18, %s22202_s20 }
  0x58   : > { %p22206_p9 = pneg %p22205_p3  ;;  %p22212_p11 = por %p22211_p2, %p22210_p4 }
  0x5a   : > { %p22213_p7 = pnand %p22212_p11, %p22206_p9 }
  0x5c   : > { %22216 = shalt.err (!%p22213_p7)
}
  0x5d   : > { %s22349_s29 = smov 64   ;;  %s22350_s23 = smov 4  }
  0x5e   : > { %21645 = dma.hbm_to_vmem [thread:$0]  (!%p22542_p1), %s22554_s0, 9216, %s22556_s21, %s22558_s22, %s22349_s29, %s22349_s29, %s22350_s23  }
  0x5f   : > { %173 = sbr.rel (%p22506_p8) target bundleno = 2834 (0xb12), region = 28  ;;  %s22589_s5 = sand.u32 (!%p22506_p8), 1, %s22319_s13  }
  0x60   : > { %s16656_s4 = sshll.u32 (!%p22506_p8), %s22589_s5, 8  ;;  %s176_s6 = scalar_lea.sflag (!%p22506_p8), [#allocation4], %s22589_s5 }
  0x61   : > { %s22593_s20 = scalar_lea.vmem (!%p22506_p8), [#allocation3], %s16656_s4  ;;  %p24883_p4 = scmp.ne.s32.totalorder (!%p22506_p8), %s24871_s26, 0 }
  0x66   : > { %22290 = dma.done.wait (%p24883_p4), %s176_s6, 4096  }
  0x67   : > { %22292 = vsyncadd (%p24883_p4), %s176_s6, 4294963200  ;;  %s184_s0 = sand.u32 1, %s22307_s10   ;;  %p24884_p8 = scmp.ne.s32.totalorder %s24879_s8, 0 }
  0x68   : > { %s21632_s22 = smul.u32 576, %s184_s0  ;;  %s185_s7 = scalar_lea.sflag [#allocation7], %s184_s0 }
  0x6a   : > { %s22600_s30 = scalar_lea.vmem [#allocation6], %s21632_s22 }
  0x6b   : > { %22294 = dma.done.wait (%p24884_p8), %s185_s7, 9216  }
  0x6c   : > { %22296 = vsyncadd (%p24884_p8), %s185_s7, 4294958080  ;;  %s22606_s21 = scalar_lea.vmem [#allocation8], %s16656_s4  ;;  %p16658_p1 = scmp.ne.s32.totalorder %s22327_s15, 0 }
  0x6d   : > { %v22610_v0 = vld [vmem:[%s22600_s30 + $0x40] sm:$0xff] (!%p16658_p1)   ;;  %v22351_v2 = vmov (!%p16658_p1), 0   ;;  %v21749_v3 = vld [vmem:[%s22600_s30 + $0x48] sm:$0xff] (!%p16658_p1)   ;;  %v21751_v5 = vld [vmem:[%s22600_s30 + $0x50] sm:$0xff] (!%p16658_p1)   ;;  %vm1169_vm0 = vsmask.f32 (!%p16658_p1), 7424 }
  0x6e   : > { %218 = sbr.rel (%p16658_p1) target bundleno = 660 (0x294), region = 40  ;;  %v22613_v1 = vld [vmem:[%s22600_s30 + $0x100] sm:$0xff] (!%p16658_p1)   ;;  %219 = vst [vmem:[#allocation2] sm:$0xff] (!%p16658_p1), %v22351_v2  ;;  %220 = vst [vmem:[#allocation2 + $0x8] sm:$0xff] (!%p16658_p1), %v22351_v2  ;;  %18126 = vmatprep.mubr.bf16.mxu1 (!%p16658_p1), %v22351_v2  ;;  %18110 = vmatprep.subr.bf16.mxu1 (!%p16658_p1), %v22610_v0  ;;  %v21750_v4 = vld [vmem:[%s22600_s30 + $0x108] sm:$0xff] (!%p16658_p1)  }
  0x6f   : > { %221 = vst [vmem:[#allocation2 + $0x10] sm:$0xff] (!%p16658_p1), %v22351_v2  ;;  %222 = vst [vmem:[#allocation2 + $0x18] sm:$0xff] (!%p16658_p1), %v22351_v2  ;;  %18302 = vmatprep.subr.bf16.mxu0 (!%p16658_p1), %v22613_v1  ;;  %18111 = vmatpush3.bf16.msra.mxu1 (!%p16658_p1), %v22610_v0  ;;  %v21752_v6 = vld [vmem:[%s22600_s30 + $0x110] sm:$0xff] (!%p16658_p1)   ;;  %v21753_v7 = vld [vmem:[%s22600_s30 + $0x58] sm:$0xff] (!%p16658_p1)   ;;  %vm478_vm1 = vsmask.f32 (!%p16658_p1), 256 }
  0x70   : > { %223 = vst [vmem:[#allocation2 + $0x20] sm:$0xff] (!%p16658_p1), %v22351_v2  ;;  %224 = vst [vmem:[#allocation2 + $0x28] sm:$0xff] (!%p16658_p1), %v22351_v2  ;;  %18303 = vmatpush3.bf16.msra.mxu0 (!%p16658_p1), %v22613_v1  ;;  %18112 = vmatprep.subr.bf16.mxu1 (!%p16658_p1), %v21749_v3  ;;  %v21754_v8 = vld [vmem:[%s22600_s30 + $0x118] sm:$0xff] (!%p16658_p1)   ;;  %v21755_v9 = vld [vmem:[%s22600_s30 + $0x60] sm:$0xff] (!%p16658_p1)  }
  0x71   : > { %225 = vst [vmem:[#allocation2 + $0x30] sm:$0xff] (!%p16658_p1), %v22351_v2  ;;  %226 = vst [vmem:[#allocation2 + $0x38] sm:$0xff] (!%p16658_p1), %v22351_v2  ;;  %18304 = vmatprep.subr.bf16.mxu0 (!%p16658_p1), %v21750_v4  ;;  %v21756_v10 = vld [vmem:[%s22600_s30 + $0x120] sm:$0xff] (!%p16658_p1)   ;;  %v21757_v11 = vld [vmem:[%s22600_s30 + $0x68] sm:$0xff] (!%p16658_p1)  }
  0x72   : > { %227 = vst [vmem:[#allocation2 + $0x40] sm:$0xff] (!%p16658_p1), %v22351_v2  ;;  %228 = vst [vmem:[#allocation2 + $0x48] sm:$0xff] (!%p16658_p1), %v22351_v2  ;;  %v349_v12 = vld [vmem:[%s22593_s20] sm:$0xff] (!%p16658_p1)  ;;  %v350_v13 = vld [vmem:[%s22593_s20 + $0x8] sm:$0xff] (!%p16658_p1) }
  0x73   : > { %229 = vst [vmem:[#allocation2 + $0x50] sm:$0xff] (!%p16658_p1), %v22351_v2  ;;  %230 = vst [vmem:[#allocation2 + $0x58] sm:$0xff] (!%p16658_p1), %v22351_v2  ;;  %18113 = vmatpush3.bf16.msra.mxu1 (!%p16658_p1), %v21749_v3  ;;  %v21758_v14 = vld [vmem:[%s22600_s30 + $0x128] sm:$0xff] (!%p16658_p1)   ;;  %v22760_v15 = vpack.c.bf16 (!%p16658_p1), %v350_v13, %v349_v12  ;;  %v351_v16 = vld [vmem:[%s22593_s20 + $0x10] sm:$0xff] (!%p16658_p1) }
  0x74   : > { %231 = vst [vmem:[#allocation2 + $0x60] sm:$0xff] (!%p16658_p1), %v22351_v2  ;;  %232 = vst [vmem:[#allocation2 + $0x68] sm:$0xff] (!%p16658_p1), %v22351_v2  ;;  %18305 = vmatpush3.bf16.msra.mxu0 (!%p16658_p1), %v21750_v4  ;;  %18114 = vmatprep.subr.bf16.mxu1 (!%p16658_p1), %v21751_v5  ;;  %v352_v17 = vld [vmem:[%s22593_s20 + $0x18] sm:$0xff] (!%p16658_p1)  ;;  %v21759_v18 = vld [vmem:[%s22600_s30 + $0x70] sm:$0xff] (!%p16658_p1)  }
  0x75   : > { %233 = vst [vmem:[#allocation2 + $0x70] sm:$0xff] %v22351_v2  ;;  %234 = vst [vmem:[#allocation2 + $0x78] sm:$0xff] %v22351_v2  ;;  %18306 = vmatprep.subr.bf16.mxu0 %v21752_v6  ;;  %18318 = vmatprep.mubr.bf16.mxu0 %v22760_v15  ;;  %v22770_v19 = vpack.c.bf16 %v352_v17, %v351_v16  ;;  %v353_v20 = vld [vmem:[%s22593_s20 + $0x20] sm:$0xff]  ;;  %v354_v21 = vld [vmem:[%s22593_s20 + $0x28] sm:$0xff]  ;;  %v1675_v61 = vshll.u32 %v22760_v15, 16 }
  0x76   : > { %235 = vst [vmem:[#allocation2 + $0x80] sm:$0xff] %v22351_v2  ;;  %236 = vst [vmem:[#allocation2 + $0x88] sm:$0xff] %v22351_v2  ;;  %v21760_v22 = vld [vmem:[%s22600_s30 + $0x130] sm:$0xff]   ;;  %v22777_v23 = vpack.c.bf16 %v354_v21, %v353_v20  ;;  %v356_v25 = vld [vmem:[%s22593_s20 + $0x38] sm:$0xff] }
  0x77   : > { %237 = vst [vmem:[#allocation2 + $0x90] sm:$0xff] %v22351_v2  ;;  %238 = vst [vmem:[#allocation2 + $0x98] sm:$0xff] %v22351_v2  ;;  %18115 = vmatpush3.bf16.msra.mxu1 %v21751_v5  ;;  %v355_v24 = vld [vmem:[%s22593_s20 + $0x30] sm:$0xff]  ;;  %v21761_v26 = vld [vmem:[%s22600_s30 + $0x78] sm:$0xff]  }
  0x78   : > { %239 = vst [vmem:[#allocation2 + $0xa0] sm:$0xff] %v22351_v2  ;;  %240 = vst [vmem:[#allocation2 + $0xa8] sm:$0xff] %v22351_v2  ;;  %18307 = vmatpush3.bf16.msra.mxu0 %v21752_v6  ;;  %18116 = vmatprep.subr.bf16.mxu1 %v21753_v7  ;;  %v22787_v27 = vpack.c.bf16 %v356_v25, %v355_v24  ;;  %v21762_v28 = vld [vmem:[%s22600_s30 + $0x138] sm:$0xff]   ;;  %v357_v29 = vld [vmem:[%s22593_s20 + $0x40] sm:$0xff]  ;;  %v1672_v6 = vshrl.u32 %v22760_v15, 16 }
  0x79   : > { %241 = vst [vmem:[#allocation2 + $0xb0] sm:$0xff] %v22351_v2  ;;  %242 = vst [vmem:[#allocation2 + $0xb8] sm:$0xff] %v22351_v2  ;;  %18308 = vmatprep.subr.bf16.mxu0 %v21754_v8  ;;  %v358_v30 = vld [vmem:[%s22593_s20 + $0x48] sm:$0xff]  ;;  %v359_v32 = vld [vmem:[%s22593_s20 + $0x50] sm:$0xff] }
  0x7a   : > { %243 = vst [vmem:[#allocation2 + $0xc0] sm:$0xff] %v22351_v2  ;;  %244 = vst [vmem:[#allocation2 + $0xc8] sm:$0xff] %v22351_v2  ;;  %v22793_v31 = vpack.c.bf16 %v358_v30, %v357_v29  ;;  %v360_v33 = vld [vmem:[%s22593_s20 + $0x58] sm:$0xff]  ;;  %v21763_v34 = vld [vmem:[%s22600_s30] sm:$0xff]  }
  0x7b   : > { %245 = vst [vmem:[#allocation2 + $0xd0] sm:$0xff] %v22351_v2  ;;  %246 = vst [vmem:[#allocation2 + $0xd8] sm:$0xff] %v22351_v2  ;;  %18117 = vmatpush3.bf16.msra.mxu1 %v21753_v7  ;;  %v21764_v35 = vld [vmem:[%s22600_s30 + $0x140] sm:$0xff]   ;;  %v22802_v36 = vpack.c.bf16 %v360_v33, %v359_v32  ;;  %v362_v38 = vld [vmem:[%s22593_s20 + $0x68] sm:$0xff] }
  0x7c   : > { %247 = vst [vmem:[#allocation2 + $0xe0] sm:$0xff] %v22351_v2  ;;  %248 = vst [vmem:[#allocation2 + $0xe8] sm:$0xff] %v22351_v2  ;;  %18309 = vmatpush3.bf16.msra.mxu0 %v21754_v8  ;;  %18118 = vmatprep.subr.bf16.mxu1 %v21755_v9  ;;  %v361_v37 = vld [vmem:[%s22593_s20 + $0x60] sm:$0xff]  ;;  %v363_v40 = vld [vmem:[%s22593_s20 + $0x70] sm:$0xff]  ;;  %v2426_v8 = vrot.slane %v1675_v61, 1 }
  0x7d   : > { %249 = vst [vmem:[#allocation2 + $0xf0] sm:$0xff] %v22351_v2  ;;  %250 = vst [vmem:[#allocation2 + $0xf8] sm:$0xff] %v22351_v2  ;;  %18310 = vmatprep.subr.bf16.mxu0 %v21756_v10  ;;  %v22809_v39 = vpack.c.bf16 %v362_v38, %v361_v37  ;;  %v364_v41 = vld [vmem:[%s22593_s20 + $0x78] sm:$0xff]  ;;  %v21765_v42 = vld [vmem:[%s22600_s30 + $0x148] sm:$0xff]  }
  0x7e   : > { %251 = vst [vmem:[#allocation2 + $0x100] sm:$0xff] %v22351_v2  ;;  %252 = vst [vmem:[#allocation2 + $0x108] sm:$0xff] %v22351_v2  ;;  %v22817_v43 = vpack.c.bf16 %v364_v41, %v363_v40  ;;  %v21766_v44 = vld [vmem:[%s22600_s30 + $0x8] sm:$0xff]   ;;  %v365_v45 = vld [vmem:[%s22593_s20 + $0x80] sm:$0xff] }
  0x7f   : > { %253 = vst [vmem:[#allocation2 + $0x110] sm:$0xff] %v22351_v2  ;;  %254 = vst [vmem:[#allocation2 + $0x118] sm:$0xff] %v22351_v2  ;;  %18119 = vmatpush3.bf16.msra.mxu1 %v21755_v9  ;;  %v366_v46 = vld [vmem:[%s22593_s20 + $0x88] sm:$0xff]  ;;  %v21769_v47 = vld [vmem:[%s22600_s30 + $0x10] sm:$0xff]  }
  0x80   : > { %255 = vst [vmem:[#allocation2 + $0x120] sm:$0xff] %v22351_v2  ;;  %256 = vst [vmem:[#allocation2 + $0x128] sm:$0xff] %v22351_v2  ;;  %18311 = vmatpush3.bf16.msra.mxu0 %v21756_v10  ;;  %18120 = vmatprep.subr.bf16.mxu1 %v21757_v11  ;;  %v22829_v48 = vpack.c.bf16 %v366_v46, %v365_v45  ;;  %v21767_v49 = vld [vmem:[%s22600_s30 + $0x150] sm:$0xff]   ;;  %v368_v51 = vld [vmem:[%s22593_s20 + $0x98] sm:$0xff] }
  0x81   : > { %257 = vst [vmem:[#allocation2 + $0x130] sm:$0xff] %v22351_v2  ;;  %258 = vst [vmem:[#allocation2 + $0x138] sm:$0xff] %v22351_v2  ;;  %18312 = vmatprep.subr.bf16.mxu0 %v21758_v14  ;;  %v367_v50 = vld [vmem:[%s22593_s20 + $0x90] sm:$0xff]  ;;  %v369_v53 = vld [vmem:[%s22593_s20 + $0xa0] sm:$0xff] }
  0x82   : > { %259 = vst [vmem:[#allocation2 + $0x140] sm:$0xff] %v22351_v2  ;;  %260 = vst [vmem:[#allocation2 + $0x148] sm:$0xff] %v22351_v2  ;;  %v22838_v52 = vpack.c.bf16 %v368_v51, %v367_v50  ;;  %v370_v54 = vld [vmem:[%s22593_s20 + $0xa8] sm:$0xff]  ;;  %v21768_v55 = vld [vmem:[%s22600_s30 + $0x158] sm:$0xff]  }
  0x83   : > { %261 = vst [vmem:[#allocation2 + $0x150] sm:$0xff] %v22351_v2  ;;  %262 = vst [vmem:[#allocation2 + $0x158] sm:$0xff] %v22351_v2  ;;  %18121 = vmatpush3.bf16.msra.mxu1 %v21757_v11  ;;  %v22845_v56 = vpack.c.bf16 %v370_v54, %v369_v53  ;;  %v21772_v57 = vld [vmem:[%s22600_s30 + $0x18] sm:$0xff]   ;;  %v371_v58 = vld [vmem:[%s22593_s20 + $0xb0] sm:$0xff] }
  0x84   : > { %263 = vst [vmem:[#allocation2 + $0x160] sm:$0xff] %v22351_v2  ;;  %265 = vst [vmem:[#allocation2 + $0x170] sm:$0xff] %v22351_v2  ;;  %18313 = vmatpush3.bf16.msra.mxu0 %v21758_v14  ;;  %18122 = vmatprep.subr.bf16.mxu1 %v21759_v18  ;;  %v372_v59 = vld [vmem:[%s22593_s20 + $0xb8] sm:$0xff]  ;;  %v373_v60 = vld [vmem:[%s22593_s20 + $0xc0] sm:$0xff] }
  0x85   : > { %271 = vst [vmem:[#allocation2 + $0x318] sm:$0xff] %v22351_v2  ;;  %272 = vst [vmem:[#allocation2 + $0x320] sm:$0xff] %v22351_v2  ;;  %18314 = vmatprep.subr.bf16.mxu0 %v21760_v22  ;;  %v21770_v62 = vld [vmem:[%s22600_s30 + $0x160] sm:$0xff]   ;;  %v22862_v63 = vpack.c.bf16 %v372_v59, %v371_v58  ;;  %v374_v0 = vld [vmem:[%s22593_s20 + $0xc8] sm:$0xff] }
  0x86   : > { %273 = vst [vmem:[#allocation2 + $0x328] sm:$0xff] %v22351_v2  ;;  %274 = vst [vmem:[#allocation2 + $0x330] sm:$0xff] %v22351_v2  ;;  %v21775_v3 = vld [vmem:[%s22600_s30 + $0x20] sm:$0xff]   ;;  %v22868_v4 = vpack.c.bf16 %v374_v0, %v373_v60  ;;  %v375_v5 = vld [vmem:[%s22593_s20 + $0xd0] sm:$0xff] }
  0x87   : > { %275 = vst [vmem:[#allocation2 + $0x338] sm:$0xff] %v22351_v2  ;;  %276 = vst [vmem:[#allocation2 + $0x340] sm:$0xff] %v22351_v2  ;;  %18123 = vmatpush3.bf16.msra.mxu1 %v21759_v18  ;;  %v21771_v7 = vld [vmem:[%s22600_s30 + $0x168] sm:$0xff]   ;;  %v376_v10 = vld [vmem:[%s22593_s20 + $0xd8] sm:$0xff]  ;;  %v1699_v18 = vshll.u32 %v22777_v23, 16 }
  0x88   : > { %277 = vst [vmem:[#allocation2 + $0x348] sm:$0xff] %v22351_v2  ;;  %278 = vst [vmem:[#allocation2 + $0x350] sm:$0xff] %v22351_v2  ;;  %18315 = vmatpush3.bf16.msra.mxu0 %v21760_v22  ;;  %18124 = vmatprep.subr.bf16.mxu1 %v21761_v26  ;;  %v377_v11 = vld [vmem:[%s22593_s20 + $0xe0] sm:$0xff]  ;;  %v378_v14 = vld [vmem:[%s22593_s20 + $0xe8] sm:$0xff] }
  0x89   : > { %279 = vst [vmem:[#allocation2 + $0x358] sm:$0xff] %v22351_v2  ;;  %280 = vst [vmem:[#allocation2 + $0x360] sm:$0xff] %v22351_v2  ;;  %18316 = vmatprep.subr.bf16.mxu0 %v21762_v28 }
  0x8a   : > { %281 = vst [vmem:[#allocation2 + $0x368] sm:$0xff] %v22351_v2  ;;  %282 = vst [vmem:[#allocation2 + $0x370] sm:$0xff] %v22351_v2 }
  0x8b   : > { %283 = vst [vmem:[#allocation2 + $0x378] sm:$0xff] %v22351_v2  ;;  %284 = vst [vmem:[#allocation2 + $0x380] sm:$0xff] %v22351_v2  ;;  %18125 = vmatpush3.bf16.msra.mxu1 %v21761_v26  ;;  %v21779_v26 = vld [vmem:[%s22600_s30 + $0x30] sm:$0xff]  }
  0x8c   : > { %285 = vst [vmem:[#allocation2 + $0x388] sm:$0xff] %v22351_v2  ;;  %286 = vst [vmem:[#allocation2 + $0x390] sm:$0xff] %v22351_v2  ;;  %18317 = vmatpush3.bf16.msra.mxu0 %v21762_v28  ;;  %18158 = vmatprep.subr.bf16.mxu1 %v21763_v34  ;;  %v1684_v28 = vshrl.u32 %v22770_v19, 16 }
  0x8d   : > { %287 = vst [vmem:[#allocation2 + $0x398] sm:$0xff] %v22351_v2  ;;  %288 = vst [vmem:[#allocation2 + $0x3a0] sm:$0xff] %v22351_v2  ;;  %18350 = vmatprep.subr.bf16.mxu0 %v21764_v35 }
  0x8e   : > { %289 = vst [vmem:[#allocation2 + $0x3a8] sm:$0xff] %v22351_v2  ;;  %290 = vst [vmem:[#allocation2 + $0x3b0] sm:$0xff] %v22351_v2  ;;  %18127 = vmatmul.mubr.bf16.vlgmr.msra.gmra.mrb[0].mxu1 %v22760_v15 }
  0x8f   : > { %291 = vst [vmem:[#allocation2 + $0x3b8] sm:$0xff] %v22351_v2  ;;  %292 = vst [vmem:[#allocation2 + $0x3c0] sm:$0xff] %v22351_v2  ;;  %18319 = vmatmul.mubr.bf16.vlgmr.msra.gmra.mrb[0].mxu0 %v22770_v19  ;;  %18159 = vmatpush3.bf16.msra.mxu1 %v21763_v34 }
  0x90   : > { %293 = vst [vmem:[#allocation2 + $0x3c8] sm:$0xff] %v22351_v2  ;;  %294 = vst [vmem:[#allocation2 + $0x3d0] sm:$0xff] %v22351_v2  ;;  %18351 = vmatpush3.bf16.msra.mxu0 %v21764_v35  ;;  %18130 = vmatprep.mubr.bf16.mxu1 %v22770_v19  ;;  %v2450_v35 = vrot.slane %v1699_v18, 1 }
  0x91   : > { %295 = vst [vmem:[#allocation2 + $0x3d8] sm:$0xff] %v22351_v2  ;;  %296 = vst [vmem:[#allocation2 + $0x3e0] sm:$0xff] %v22351_v2  ;;  %18352 = vmatprep.subr.bf16.mxu0 %v21765_v42  ;;  %18322 = vmatprep.mubr.bf16.mxu0 %v22777_v23 }
  0x92   : > { %297 = vst [vmem:[#allocation2 + $0x3e8] sm:$0xff] %v22351_v2  ;;  %298 = vst [vmem:[#allocation2 + $0x3f0] sm:$0xff] %v22351_v2  ;;  %18160 = vmatprep.subr.bf16.mxu1 %v21766_v44 }
  0x93   : > { %299 = vst [vmem:[#allocation2 + $0x3f8] sm:$0xff] %v22351_v2  ;;  %300 = vst [vmem:[#allocation2 + $0x400] sm:$0xff] %v22351_v2  ;;  %18161 = vmatpush3.bf16.msra.mxu1 %v21766_v44 }
  0x94   : > { %301 = vst [vmem:[#allocation2 + $0x408] sm:$0xff] %v22351_v2  ;;  %302 = vst [vmem:[#allocation2 + $0x410] sm:$0xff] %v22351_v2  ;;  %18353 = vmatpush3.bf16.msra.mxu0 %v21765_v42  ;;  %18162 = vmatprep.subr.bf16.mxu1 %v21769_v47 }
  0x95   : > { %303 = vst [vmem:[#allocation2 + $0x418] sm:$0xff] %v22351_v2  ;;  %304 = vst [vmem:[#allocation2 + $0x420] sm:$0xff] %v22351_v2  ;;  %18354 = vmatprep.subr.bf16.mxu0 %v21767_v49 }
  0x96   : > { %305 = vst [vmem:[#allocation2 + $0x428] sm:$0xff] %v22351_v2  ;;  %306 = vst [vmem:[#allocation2 + $0x430] sm:$0xff] %v22351_v2  ;;  %18131 = vmatmul.mubr.bf16.gmra.mrb[4].mxu1 %v22777_v23 }
  0x97   : > { %307 = vst [vmem:[#allocation2 + $0x438] sm:$0xff] %v22351_v2  ;;  %308 = vst [vmem:[#allocation2 + $0x440] sm:$0xff] %v22351_v2  ;;  %18323 = vmatmul.mubr.bf16.gmra.mrb[4].mxu0 %v22787_v27  ;;  %18134 = vmatprep.mubr.bf16.mxu1 %v22787_v27 }
  0x98   : > { %309 = vst [vmem:[#allocation2 + $0x448] sm:$0xff] %v22351_v2  ;;  %310 = vst [vmem:[#allocation2 + $0x450] sm:$0xff] %v22351_v2  ;;  %18355 = vmatpush3.bf16.msra.mxu0 %v21767_v49  ;;  %18326 = vmatprep.mubr.bf16.mxu0 %v22793_v31 }
  0x99   : > { %311 = vst [vmem:[#allocation2 + $0x458] sm:$0xff] %v22351_v2  ;;  %312 = vst [vmem:[#allocation2 + $0x460] sm:$0xff] %v22351_v2  ;;  %18356 = vmatprep.subr.bf16.mxu0 %v21768_v55  ;;  %18163 = vmatpush3.bf16.msra.mxu1 %v21769_v47 }
  0x9a   : > { %313 = vst [vmem:[#allocation2 + $0x468] sm:$0xff] %v22351_v2  ;;  %314 = vst [vmem:[#allocation2 + $0x470] sm:$0xff] %v22351_v2  ;;  %18164 = vmatprep.subr.bf16.mxu1 %v21772_v57 }
  0x9b   : > { %315 = vst [vmem:[#allocation2 + $0x478] sm:$0xff] %v22351_v2  ;;  %264 = vst [vmem:[#allocation2 + $0x168] sm:$0xff] %v22351_v2 }
  0x9c   : > { %266 = vst [vmem:[#allocation2 + $0x178] sm:$0xff] %v22351_v2  ;;  %268 = vst [vmem:[#allocation2 + $0x300] sm:$0xff] %v22351_v2  ;;  %18357 = vmatpush3.bf16.msra.mxu0 %v21768_v55 }
  0x9d   : > { %269 = vst [vmem:[#allocation2 + $0x308] sm:$0xff] %v22351_v2  ;;  %270 = vst [vmem:[#allocation2 + $0x310] sm:$0xff] %v22351_v2  ;;  %18358 = vmatprep.subr.bf16.mxu0 %v21770_v62  ;;  %18165 = vmatpush3.bf16.msra.mxu1 %v21772_v57 }
  0x9e   : > { %317 = vst [vmem:[#allocation2 + $0x180] sm:$0xff] %v22351_v2  ;;  %318 = vst [vmem:[#allocation2 + $0x198] sm:$0xff] %v22351_v2  ;;  %18135 = vmatmul.mubr.bf16.gmra.mrb[8].mxu1 %v22793_v31  ;;  %18166 = vmatprep.subr.bf16.mxu1 %v21775_v3 }
  0x9f   : > { %319 = vst [vmem:[#allocation2 + $0x1b0] sm:$0xff] %v22351_v2  ;;  %320 = vst [vmem:[#allocation2 + $0x1c8] sm:$0xff] %v22351_v2  ;;  %18327 = vmatmul.mubr.bf16.gmra.mrb[8].mxu0 %v22802_v36  ;;  %18138 = vmatprep.mubr.bf16.mxu1 %v22802_v36 }
  0xa0   : > { %321 = vst [vmem:[#allocation2 + $0x1e0] sm:$0xff] %v22351_v2  ;;  %322 = vst [vmem:[#allocation2 + $0x1f8] sm:$0xff] %v22351_v2  ;;  %18359 = vmatpush3.bf16.msra.mxu0 %v21770_v62  ;;  %18330 = vmatprep.mubr.bf16.mxu0 %v22809_v39 }
  0xa1   : > { %323 = vst [vmem:[#allocation2 + $0x210] sm:$0xff] %v22351_v2  ;;  %324 = vst [vmem:[#allocation2 + $0x228] sm:$0xff] %v22351_v2  ;;  %18360 = vmatprep.subr.bf16.mxu0 %v21771_v7  ;;  %18167 = vmatpush3.bf16.msra.mxu1 %v21775_v3  ;;  %v1747_v3 = vshll.u32 %v22809_v39, 16 }
  0xa2   : > { %325 = vst [vmem:[#allocation2 + $0x240] sm:$0xff] %v22351_v2  ;;  %326 = vst [vmem:[#allocation2 + $0x258] sm:$0xff] %v22351_v2 }
  0xa3   : > { %327 = vst [vmem:[#allocation2 + $0x270] sm:$0xff] %v22351_v2  ;;  %328 = vst [vmem:[#allocation2 + $0x288] sm:$0xff] %v22351_v2 }
  0xa4   : > { %329 = vst [vmem:[#allocation2 + $0x2a0] sm:$0xff] %v22351_v2  ;;  %330 = vst [vmem:[#allocation2 + $0x2b8] sm:$0xff] %v22351_v2  ;;  %18361 = vmatpush3.bf16.msra.mxu0 %v21771_v7 }
  0xa5   : > { %331 = vst [vmem:[#allocation2 + $0x2d0] sm:$0xff] %v22351_v2  ;;  %332 = vst [vmem:[#allocation2 + $0x2e8] sm:$0xff] %v22351_v2 }
  0xa6   : > { %333 = vst [vmem:[#allocation2 + $0x190] sm:$0xff] %v22351_v2  ;;  %334 = vst [vmem:[#allocation2 + $0x1a8] sm:$0xff] %v22351_v2  ;;  %18139 = vmatmul.mubr.bf16.gmra.mrb[12].mxu1 %v22809_v39 }
  0xa7   : > { %335 = vst [vmem:[#allocation2 + $0x1c0] sm:$0xff] %v22351_v2  ;;  %336 = vst [vmem:[#allocation2 + $0x1d8] sm:$0xff] %v22351_v2  ;;  %18331 = vmatmul.mubr.bf16.gmra.mrb[12].mxu0 %v22817_v43  ;;  %18142 = vmatprep.mubr.bf16.mxu1 %v22817_v43 }
  0xa8   : > { %337 = vst [vmem:[#allocation2 + $0x1f0] sm:$0xff] %v22351_v2  ;;  %338 = vst [vmem:[#allocation2 + $0x208] sm:$0xff] %v22351_v2 }
  0xa9   : > { %339 = vst [vmem:[#allocation2 + $0x220] sm:$0xff] %v22351_v2  ;;  %340 = vst [vmem:[#allocation2 + $0x238] sm:$0xff] %v22351_v2 }
  0xaa   : > { %341 = vst [vmem:[#allocation2 + $0x250] sm:$0xff] %v22351_v2  ;;  %342 = vst [vmem:[#allocation2 + $0x268] sm:$0xff] %v22351_v2 }
  0xab   : > { %343 = vst [vmem:[#allocation2 + $0x280] sm:$0xff] %v22351_v2  ;;  %344 = vst [vmem:[#allocation2 + $0x298] sm:$0xff] %v22351_v2 }
  0xac   : > { %345 = vst [vmem:[#allocation2 + $0x2b0] sm:$0xff] %v22351_v2  ;;  %346 = vst [vmem:[#allocation2 + $0x2c8] sm:$0xff] %v22351_v2 }
  0xad   : > { %347 = vst [vmem:[#allocation2 + $0x2e0] sm:$0xff] %v22351_v2  ;;  %348 = vst [vmem:[#allocation2 + $0x2f8] sm:$0xff] %v22351_v2  ;;  %v2390_v1 = vld [vmem:[#allocation2 + $0x190] sm:$0x1] }
  0xae   : > { %381 = vst [vmem:[%s22606_s21] sm:$0xff] %v349_v12  ;;  %382 = vst [vmem:[%s22606_s21 + $0x8] sm:$0xff] %v350_v13  ;;  %v2429_v9 = vshll.u32 %v2390_v1, 16  ;;  %v21777_v12 = vld [vmem:[%s22600_s30 + $0x28] sm:$0xff]   ;;  %v22883_v13 = vpack.c.bf16 %v376_v10, %v375_v5  ;;  %v2396_v49 = vld [vmem:[#allocation2 + $0x1d8] sm:$0x1]  ;;  %18143 = vmatmul.mubr.bf16.gmra.mrb[16].mxu1 %v22829_v48  ;;  %v1735_v1 = vshll.u32 %v22802_v36, 16 }
  0xaf   : > { %383 = vst [vmem:[%s22606_s21 + $0x10] sm:$0xff] %v351_v16  ;;  %429 = vst [vmem:[#allocation2 + $0x188] sm:$0xff] %v22760_v15  ;;  %v22890_v16 = vpack.c.bf16 %v378_v14, %v377_v11  ;;  %18168 = vmatprep.subr.bf16.mxu1 %v21777_v12  ;;  %v2465_v57 = vshll.u32 %v2396_v49, 16  ;;  %18146 = vmatprep.mubr.bf16.mxu1 %v22838_v52  ;;  %v446_v49 = vld [vmem:[#allocation2 + $0x168] sm:$0x80] }
  0xb0   : > { %384 = vst [vmem:[%s22606_s21 + $0x18] sm:$0xff] %v352_v17  ;;  %430 = vst [vmem:[#allocation2 + $0x1a0] sm:$0xff] %v22770_v19  ;;  %v1687_v17 = vshll.u32 %v22770_v19, 16  ;;  %v2431_v22 = vrot.slane %v2429_v9, 1  ;;  %18169 = vmatpush3.bf16.msra.mxu1 %v21777_v12  ;;  %v2402_v12 = vld [vmem:[#allocation2 + $0x220] sm:$0x1] }
  0xb1   : > { %385 = vst [vmem:[%s22606_s21 + $0x20] sm:$0xff] %v353_v20  ;;  %386 = vst [vmem:[%s22606_s21 + $0x28] sm:$0xff] %v354_v21  ;;  %v21773_v20 = vld [vmem:[%s22600_s30 + $0x170] sm:$0xff]   ;;  %v2427_v21 = vor.u32 %v2426_v8, %v1672_v6  ;;  %18170 = vmatprep.subr.bf16.mxu1 %v21779_v26  ;;  %v2467_v7 = vrot.slane %v2465_v57, 1  ;;  %v2400_v8 = vld [vmem:[#allocation2 + $0x208] sm:$0x1] }
  0xb2   : > { %431 = vst [vmem:[#allocation2 + $0x1b8] sm:$0xff] %v22777_v23  ;;  %387 = vst [vmem:[%s22606_s21 + $0x30] sm:$0xff] %v355_v24  ;;  %v2392_v24 = vld [vmem:[#allocation2 + $0x1a8] sm:$0x1]  ;;  %18362 = vmatprep.subr.bf16.mxu0 %v21773_v20  ;;  %v1756_v57 = vshrl.u32 %v22817_v43, 16 }
  0xb3   : > { %388 = vst [vmem:[%s22606_s21 + $0x38] sm:$0xff] %v356_v25  ;;  %432 = vst [vmem:[#allocation2 + $0x1d0] sm:$0xff] %v22787_v27  ;;  %v2394_v25 = vld [vmem:[#allocation2 + $0x1c0] sm:$0x1]  ;;  %v2432_v34 = vsel %vm1169_vm0, %v2427_v21, %v2431_v22  ;;  %18363 = vmatpush3.bf16.msra.mxu0 %v21773_v20  ;;  %v380_v20 = vld [vmem:[%s22593_s20 + $0xf8] sm:$0xff]  ;;  %v1732_v22 = vshrl.u32 %v22802_v36, 16 }
  0xb4   : > { %389 = vst [vmem:[%s22606_s21 + $0x40] sm:$0xff] %v357_v29  ;;  %390 = vst [vmem:[%s22606_s21 + $0x48] sm:$0xff] %v358_v30  ;;  %v2438_v29 = vrot.slane %v1687_v17, 1  ;;  %v2441_v30 = vshll.u32 %v2392_v24, 16  ;;  %18366 = vmatprep.mubr.bf16.mxu0 %v2432_v34  ;;  %18171 = vmatpush3.bf16.msra.mxu1 %v21779_v26  ;;  %v2489_v26 = vshll.u32 %v2400_v8, 16  ;;  %v2501_v34 = vshll.u32 %v2402_v12, 16 }
  0xb5   : > { %433 = vst [vmem:[#allocation2 + $0x1e8] sm:$0xff] %v22793_v31  ;;  %391 = vst [vmem:[%s22606_s21 + $0x50] sm:$0xff] %v359_v32  ;;  %v1696_v32 = vshrl.u32 %v22777_v23, 16 }
  0xb6   : > { %392 = vst [vmem:[%s22606_s21 + $0x58] sm:$0xff] %v360_v33  ;;  %434 = vst [vmem:[#allocation2 + $0x200] sm:$0xff] %v22802_v36  ;;  %v21774_v33 = vld [vmem:[%s22600_s30 + $0x178] sm:$0xff]   ;;  %v2439_v42 = vor.u32 %v2438_v29, %v1684_v28  ;;  %v2443_v44 = vrot.slane %v2441_v30, 1  ;;  %v1744_v29 = vshrl.u32 %v22809_v39, 16  ;;  %18147 = vmatmul.mubr.bf16.gmra.mrb[20].mxu1 %v22845_v56  ;;  %v1758_v36 = vrot.slane %v1756_v57, 7 }
  0xb7   : > { %393 = vst [vmem:[%s22606_s21 + $0x60] sm:$0xff] %v361_v37  ;;  %394 = vst [vmem:[%s22606_s21 + $0x68] sm:$0xff] %v362_v38  ;;  %v2453_v37 = vshll.u32 %v2394_v25, 16  ;;  %v21781_v38 = vld [vmem:[%s22600_s30 + $0x38] sm:$0xff]   ;;  %18364 = vmatprep.subr.bf16.mxu0 %v21774_v33  ;;  %v2486_v25 = vrot.slane %v1735_v1, 1  ;;  %18150 = vmatprep.mubr.bf16.mxu1 %v22862_v63 }
  0xb8   : > { %435 = vst [vmem:[#allocation2 + $0x218] sm:$0xff] %v22809_v39  ;;  %395 = vst [vmem:[%s22606_s21 + $0x70] sm:$0xff] %v363_v40  ;;  %v1711_v40 = vshll.u32 %v22787_v27, 16  ;;  %18172 = vmatprep.subr.bf16.mxu1 %v21781_v38  ;;  %18365 = vmatpush3.bf16.msra.mxu0 %v21774_v33  ;;  %v2498_v33 = vrot.slane %v1747_v3, 1 }
  0xb9   : > { %396 = vst [vmem:[%s22606_s21 + $0x78] sm:$0xff] %v364_v41  ;;  %436 = vst [vmem:[#allocation2 + $0x230] sm:$0xff] %v22817_v43  ;;  %v1723_v41 = vshll.u32 %v22793_v31, 16  ;;  %v2455_v47 = vrot.slane %v2453_v37, 1  ;;  %18173 = vmatpush3.bf16.msra.mxu1 %v21781_v38  ;;  %v1759_v37 = vshll.u32 %v22817_v43, 16  ;;  %v595_v38 = vshll.u32 %v22829_v48, 16 }
  0xba   : > { %397 = vst [vmem:[%s22606_s21 + $0x80] sm:$0xff] %v365_v45  ;;  %398 = vst [vmem:[%s22606_s21 + $0x88] sm:$0xff] %v366_v46  ;;  %v21776_v45 = vld [vmem:[%s22600_s30 + $0x180] sm:$0xff]   ;;  %v2451_v46 = vor.u32 %v2450_v35, %v1696_v32  ;;  %v2462_v55 = vrot.slane %v1711_v40, 1  ;;  %v21782_v35 = vld [vmem:[%s22600_s30 + $0x198] sm:$0xff]  }
  0xbb   : > { %437 = vst [vmem:[#allocation2 + $0x248] sm:$0xff] %v22829_v48  ;;  %399 = vst [vmem:[%s22606_s21 + $0x90] sm:$0xff] %v367_v50  ;;  %v2398_v50 = vld [vmem:[#allocation2 + $0x1f0] sm:$0x1]  ;;  %18398 = vmatprep.subr.bf16.mxu0 %v21776_v45  ;;  %v2474_v62 = vrot.slane %v1723_v41, 1  ;;  %v2522_v8 = vrot.slane %v595_v38, 1  ;;  %v23117_v39 = vor.u32 %v1759_v37, %v1758_v36 }
  0xbc   : > { %400 = vst [vmem:[%s22606_s21 + $0x98] sm:$0xff] %v368_v51  ;;  %401 = vst [vmem:[%s22606_s21 + $0xa0] sm:$0xff] %v369_v53  ;;  %v22922_v51 = vld [vmem:[%s22600_s30 + $0x80] sm:$0xff]   ;;  %v1708_v53 = vshrl.u32 %v22787_v27, 16 }
  0xbd   : > { %402 = vst [vmem:[%s22606_s21 + $0xa8] sm:$0xff] %v370_v54  ;;  %438 = vst [vmem:[#allocation2 + $0x260] sm:$0xff] %v22838_v52  ;;  %v2444_v54 = vsel %vm1169_vm0, %v2439_v42, %v2443_v44  ;;  %18206 = vmatprep.subr.bf16.mxu1 %v22922_v51  ;;  %v2487_v42 = vor.u32 %v2486_v25, %v1732_v22  ;;  %v2491_v44 = vrot.slane %v2489_v26, 1 }
  0xbe   : > { %439 = vst [vmem:[#allocation2 + $0x278] sm:$0xff] %v22845_v56  ;;  %403 = vst [vmem:[%s22606_s21 + $0xb0] sm:$0xff] %v371_v58  ;;  %v1720_v58 = vshrl.u32 %v22793_v31, 16  ;;  %18367 = vmatmul.mubr.bf16.vlgmr.msra.gmra.mrb[0].mxu0 %v2444_v54  ;;  %v2406_v54 = vld [vmem:[#allocation2 + $0x250] sm:$0x1]  ;;  %18151 = vmatmul.mubr.bf16.gmra.mrb[24].mxu1 %v22868_v4 }
  0xbf   : > { %404 = vst [vmem:[%s22606_s21 + $0xb8] sm:$0xff] %v372_v59  ;;  %405 = vst [vmem:[%s22606_s21 + $0xc0] sm:$0xff] %v373_v60  ;;  %v2456_v59 = vsel %vm1169_vm0, %v2451_v46, %v2455_v47  ;;  %v21778_v60 = vld [vmem:[%s22600_s30 + $0x188] sm:$0xff]   ;;  %18399 = vmatpush3.bf16.msra.mxu0 %v21776_v45  ;;  %v2404_v45 = vld [vmem:[#allocation2 + $0x238] sm:$0x1]  ;;  %v2499_v46 = vor.u32 %v2498_v33, %v1744_v29  ;;  %v2503_v47 = vrot.slane %v2501_v34, 1  ;;  %18154 = vmatprep.mubr.bf16.mxu1 %v22883_v13 }
  0xc0   : > { %406 = vst [vmem:[%s22606_s21 + $0xc8] sm:$0xff] %v374_v0  ;;  %440 = vst [vmem:[#allocation2 + $0x290] sm:$0xff] %v22862_v63  ;;  %v2477_v0 = vshll.u32 %v2398_v50, 16  ;;  %18370 = vmatprep.mubr.bf16.mxu0 %v2456_v59  ;;  %18400 = vmatprep.subr.bf16.mxu0 %v21778_v60  ;;  %v2475_v9 = vor.u32 %v2474_v62, %v1720_v58  ;;  %v21784_v50 = vld [vmem:[%s22600_s30 + $0x1a0] sm:$0xff]   ;;  %v2510_v59 = vrot.slane %v1759_v37, 1  ;;  %v2513_v62 = vshll.u32 %v2404_v45, 16 }
  0xc1   : > { %441 = vst [vmem:[#allocation2 + $0x2a8] sm:$0xff] %v22868_v4  ;;  %407 = vst [vmem:[%s22606_s21 + $0xd0] sm:$0xff] %v375_v5  ;;  %v2463_v5 = vor.u32 %v2462_v55, %v1708_v53  ;;  %v486_v55 = vrot.slane %v22351_v2, 7  ;;  %v21786_v2 = vld [vmem:[%s22600_s30 + $0x1a8] sm:$0xff]   ;;  %v450_v33 = vld [vmem:[#allocation2 + $0x198] sm:$0x80] }
  0xc2   : > { %408 = vst [vmem:[%s22606_s21 + $0xd8] sm:$0xff] %v376_v10  ;;  %409 = vst [vmem:[%s22606_s21 + $0xe0] sm:$0xff] %v377_v11  ;;  %v2479_v10 = vrot.slane %v2477_v0, 1  ;;  %v21780_v11 = vld [vmem:[%s22600_s30 + $0x190] sm:$0xff]   ;;  %v480_v0 = vshrl.u32 %v446_v49, 16  ;;  %v2511_v12 = vor.u32 %v2510_v59, %v1756_v57  ;;  %v604_v45 = vshrl.u32 %v22838_v52, 16 }
  0xc3   : > { %410 = vst [vmem:[%s22606_s21 + $0xe8] sm:$0xff] %v378_v14  ;;  %442 = vst [vmem:[#allocation2 + $0x2c0] sm:$0xff] %v22883_v13  ;;  %v379_v14 = vld [vmem:[%s22593_s20 + $0xf0] sm:$0xff]  ;;  %v2468_v24 = vsel %vm1169_vm0, %v2463_v5, %v2467_v7  ;;  %18401 = vmatpush3.bf16.msra.mxu0 %v21778_v60  ;;  %v2492_v60 = vsel %vm1169_vm0, %v2487_v42, %v2491_v44  ;;  %v592_v5 = vshrl.u32 %v22829_v48, 16  ;;  %v2410_v42 = vld [vmem:[#allocation2 + $0x280] sm:$0x1] }
  0xc4   : > { %443 = vst [vmem:[#allocation2 + $0x2d8] sm:$0xff] %v22890_v16  ;;  %v22945_v21 = vpack.c.bf16 %v380_v20, %v379_v14  ;;  %411 = vst [vmem:[%s22606_s21 + $0xf0] sm:$0xff] %v379_v14  ;;  %v2480_v30 = vsel %vm1169_vm0, %v2475_v9, %v2479_v10  ;;  %18402 = vmatprep.subr.bf16.mxu0 %v21780_v11  ;;  %v2504_v7 = vsel %vm1169_vm0, %v2499_v46, %v2503_v47  ;;  %v21788_v34 = vld [vmem:[%s22600_s30 + $0x1b0] sm:$0xff]  }
  0xc5   : > { %412 = vst [vmem:[%s22606_s21 + $0xf8] sm:$0xff] %v380_v20  ;;  %v2525_v9 = vshll.u32 %v2406_v54, 16  ;;  %v607_v10 = vshll.u32 %v22838_v52, 16  ;;  %v2515_v14 = vrot.slane %v2513_v62, 1  ;;  %v482_v20 = vrot.slane %v480_v0, 7  ;;  %v21790_v0 = vld [vmem:[%s22600_s30 + $0x1b8] sm:$0xff]  }
  0xc6   : > { %444 = vst [vmem:[#allocation2 + $0x2f0] sm:$0xff] %v22945_v21  ;;  %18371 = vmatmul.mubr.bf16.gmra.mrb[4].mxu0 %v2468_v24  ;;  %v448_v24 = vld [vmem:[#allocation2 + $0x180] sm:$0x80]  ;;  %v2523_v25 = vor.u32 %v2522_v8, %v592_v5  ;;  %v1686_v44 = vrot.slane %v1684_v28, 7  ;;  %v504_v59 = vshrl.u32 %v450_v33, 16  ;;  %v2549_v62 = vshll.u32 %v2410_v42, 16  ;;  %18155 = vmatmul.mubr.bf16.gmra.mrb[28].mxu1 %v22890_v16 }
  0xc7   : > { %18374 = vmatprep.mubr.bf16.mxu0 %v2480_v30  ;;  %18403 = vmatpush3.bf16.msra.mxu0 %v21780_v11  ;;  %v619_v11 = vshll.u32 %v22845_v56, 16  ;;  %v2527_v26 = vrot.slane %v2525_v9, 1  ;;  %v2408_v30 = vld [vmem:[#allocation2 + $0x268] sm:$0x1]  ;;  %v492_v46 = vshrl.u32 %v448_v24, 16  ;;  %v2534_v47 = vrot.slane %v607_v10, 1 }
  0xc8   : > { %18404 = vmatprep.subr.bf16.mxu0 %v21782_v35  ;;  %v2516_v49 = vsel %vm1169_vm0, %v2511_v12, %v2515_v14  ;;  %v2537_v54 = vshll.u32 %v2408_v30, 16  ;;  %v1710_v8 = vrot.slane %v1708_v53, 7  ;;  %v631_v9 = vshll.u32 %v22862_v63, 16  ;;  %v452_v14 = vld [vmem:[#allocation2 + $0x1b0] sm:$0x80]  ;;  %v23021_v30 = vld [vmem:[%s22600_s30 + $0x1c0] sm:$0xff]  }
  0xc9   : > { %v2546_v28 = vrot.slane %v619_v11, 1  ;;  %v494_v12 = vrot.slane %v492_v46, 7  ;;  %v2535_v15 = vor.u32 %v2534_v47, %v604_v45  ;;  %v23016_v53 = vor.u32 %v1687_v17, %v1686_v44  ;;  %v2414_v33 = vld [vmem:[#allocation2 + $0x2b0] sm:$0x1]  ;;  %v21785_v44 = vld [vmem:[%s22600_s30 + $0x88] sm:$0xff]  }
  0xca   : > { %v2551_v24 = vrot.slane %v2549_v62, 1  ;;  %v640_v42 = vshrl.u32 %v22868_v4, 16  ;;  %v516_v19 = vshrl.u32 %v452_v14, 16  ;;  %v2558_v46 = vrot.slane %v631_v9, 1 }
  0xcb   : > { %18405 = vmatpush3.bf16.msra.mxu0 %v21782_v35  ;;  %v1674_v35 = vrot.slane %v1672_v6, 7  ;;  %v616_v6 = vshrl.u32 %v22845_v56, 16  ;;  %v652_v62 = vshrl.u32 %v22883_v13, 16 }
  0xcc   : > { %18406 = vmatprep.subr.bf16.mxu0 %v21784_v50  ;;  %v518_v14 = vrot.slane %v516_v19, 7  ;;  %v1734_v19 = vrot.slane %v1732_v22, 7  ;;  %v23070_v22 = vld [vmem:[#allocation2 + $0x1a0] sm:$0xff] }
  0xce   : > { %18375 = vmatmul.mubr.bf16.gmra.mrb[8].mxu0 %v2492_v60  ;;  %v2528_v60 = vsel %vm1169_vm0, %v2523_v25, %v2527_v26  ;;  %v2412_v25 = vld [vmem:[#allocation2 + $0x298] sm:$0x1]  ;;  %v454_v26 = vld [vmem:[#allocation2 + $0x1c8] sm:$0x80] }
  0xcf   : > { %18378 = vmatprep.mubr.bf16.mxu0 %v2504_v7  ;;  %18407 = vmatpush3.bf16.msra.mxu0 %v21784_v50  ;;  %v490_v50 = vsel %vm478_vm1, %v482_v20, %v486_v55  ;;  %v23003_v7 = vor.u32 %v1675_v61, %v1674_v35  ;;  %v1698_v55 = vrot.slane %v1696_v32, 7  ;;  %v2539_v61 = vrot.slane %v2537_v54, 1 }
  0xd0   : > { %18408 = vmatprep.subr.bf16.mxu0 %v21786_v2  ;;  %18174 = vmatprep.mubr.bf16.mxu1 %v490_v50  ;;  %v506_v32 = vrot.slane %v504_v59, 7  ;;  %v2547_v20 = vor.u32 %v2546_v28, %v616_v6  ;;  %v628_v35 = vshrl.u32 %v22862_v63, 16  ;;  %v2561_v47 = vshll.u32 %v2412_v25, 16  ;;  %v2416_v25 = vld [vmem:[#allocation2 + $0x2c8] sm:$0x1] }
  0xd1   : > { %v2540_v17 = vsel %vm1169_vm0, %v2535_v15, %v2539_v61  ;;  %v1722_v28 = vrot.slane %v1720_v58, 7  ;;  %v23044_v15 = vor.u32 %v1699_v18, %v1698_v55  ;;  %v21787_v61 = vld [vmem:[%s22600_s30 + $0x90] sm:$0xff]  }
  0xd2   : > { %v514_v50 = vsel %vm478_vm1, %v506_v32, %v23016_v53  ;;  %v2552_v54 = vsel %vm1169_vm0, %v2547_v20, %v2551_v24  ;;  %v2559_v58 = vor.u32 %v2558_v46, %v628_v35  ;;  %v2563_v32 = vrot.slane %v2561_v47, 1 }
  0xd3   : > { %18409 = vmatpush3.bf16.msra.mxu0 %v21786_v2  ;;  %v643_v2 = vshll.u32 %v22868_v4, 16  ;;  %v23051_v24 = vor.u32 %v1711_v40, %v1710_v8  ;;  %v2585_v40 = vshll.u32 %v2416_v25, 16  ;;  %v462_v25 = vld [vmem:[#allocation2 + $0x228] sm:$0x80] }
  0xd4   : > { %18410 = vmatprep.subr.bf16.mxu0 %v21788_v34  ;;  %v2564_v46 = vsel %vm1169_vm0, %v2559_v58, %v2563_v32 }
  0xd5   : > { %v2570_v59 = vrot.slane %v643_v2, 1  ;;  %v2587_v32 = vrot.slane %v2585_v40, 1 }
  0xd6   : > { %18379 = vmatmul.mubr.bf16.gmra.mrb[12].mxu0 %v2516_v49  ;;  %v528_v49 = vshrl.u32 %v454_v26, 16  ;;  %v458_v26 = vld [vmem:[#allocation2 + $0x1f8] sm:$0x80] }
  0xd7   : > { %18382 = vmatprep.mubr.bf16.mxu0 %v2528_v60  ;;  %18411 = vmatpush3.bf16.msra.mxu0 %v21788_v34  ;;  %v502_v34 = vsel %vm478_vm1, %v494_v12, %v23003_v7  ;;  %v2573_v60 = vshll.u32 %v2414_v33, 16  ;;  %v655_v12 = vshll.u32 %v22883_v13, 16  ;;  %v2571_v23 = vor.u32 %v2570_v59, %v640_v42  ;;  %v2418_v33 = vld [vmem:[#allocation2 + $0x2e0] sm:$0x1]  ;;  %v460_v59 = vld [vmem:[#allocation2 + $0x210] sm:$0x80] }
  0xd8   : > { %18412 = vmatprep.subr.bf16.mxu0 %v21790_v0  ;;  %18175 = vmatmul.mubr.bf16.vlgmr.msra.gmra.mrb[0].mxu1 %v502_v34  ;;  %v530_v20 = vrot.slane %v528_v49, 7  ;;  %v526_v34 = vsel %vm478_vm1, %v518_v14, %v23044_v15  ;;  %v552_v8 = vshrl.u32 %v458_v26, 16  ;;  %v21789_v49 = vld [vmem:[%s22600_s30 + $0x98] sm:$0xff]   ;;  %v23074_v14 = vor.u32 %v1723_v41, %v1722_v28 }
  0xd9   : > { %18207 = vmatpush3.bf16.msra.mxu1 %v22922_v51  ;;  %18178 = vmatprep.mubr.bf16.mxu1 %v514_v50  ;;  %v667_v51 = vshll.u32 %v22890_v16, 16  ;;  %v2575_v18 = vrot.slane %v2573_v60, 1  ;;  %v2582_v27 = vrot.slane %v655_v12, 1  ;;  %v2420_v60 = vld [vmem:[#allocation2 + $0x2f8] sm:$0x1] }
  0xda   : > { %18208 = vmatprep.subr.bf16.mxu1 %v21785_v44  ;;  %v538_v47 = vsel %vm478_vm1, %v530_v20, %v23051_v24  ;;  %v554_v20 = vrot.slane %v552_v8, 7  ;;  %v2887_v26 = vld [vmem:[#allocation2 + $0x198] sm:$0x80]  ;;  %v2609_v28 = vshll.u32 %v2420_v60, 16  ;;  %v21793_v60 = vld [vmem:[%s22600_s30 + $0xa8] sm:$0xff]  }
  0xdb   : > { %18413 = vmatpush3.bf16.msra.mxu0 %v21790_v0  ;;  %v456_v0 = vld [vmem:[#allocation2 + $0x1e0] sm:$0x80]  ;;  %v2576_v50 = vsel %vm1169_vm0, %v2571_v23, %v2575_v18  ;;  %v2583_v58 = vor.u32 %v2582_v27, %v652_v62  ;;  %v23080_v23 = vor.u32 %v1735_v1, %v1734_v19  ;;  %v564_v18 = vshrl.u32 %v460_v59, 16 }
  0xdc   : > { %18446 = vmatprep.subr.bf16.mxu0 %v23021_v30  ;;  %v540_v55 = vshrl.u32 %v456_v0, 16  ;;  %v1746_v27 = vrot.slane %v1744_v29, 7  ;;  %v2920_v8 = vshrl.u32 %v2887_v26, 16  ;;  %v2927_v59 = vshll.u32 %v23070_v22, 16 }
  0xdd   : > { %18209 = vmatpush3.bf16.msra.mxu1 %v21785_v44  ;;  %v2594_v44 = vrot.slane %v667_v51, 1  ;;  %v2588_v40 = vsel %vm1169_vm0, %v2583_v58, %v2587_v32  ;;  %v562_v19 = vsel %vm478_vm1, %v554_v20, %v23080_v23  ;;  %v464_v32 = vld [vmem:[#allocation2 + $0x240] sm:$0x80] }
  0xde   : > { %18383 = vmatmul.mubr.bf16.gmra.mrb[16].mxu0 %v2540_v17  ;;  %v664_v17 = vshrl.u32 %v22890_v16, 16  ;;  %18210 = vmatprep.subr.bf16.mxu1 %v21787_v61  ;;  %v542_v0 = vrot.slane %v540_v55, 7  ;;  %v24863_v55 = vshll.u32 %v22945_v21, 16  ;;  %v2922_v20 = vrot.slane %v2920_v8, 7 }
  0xdf   : > { %18386 = vmatprep.mubr.bf16.mxu0 %v2552_v54  ;;  %v2597_v54 = vshll.u32 %v2418_v33, 16  ;;  %v2924_v33 = vshrl.u32 %v23070_v22, 16  ;;  %v588_v37 = vshrl.u32 %v464_v32, 16 }
  0xe0   : > { %18179 = vmatmul.mubr.bf16.gmra.mrb[4].mxu1 %v526_v34  ;;  %v2595_v31 = vor.u32 %v2594_v44, %v664_v17  ;;  %v21791_v34 = vld [vmem:[%s22600_s30 + $0xa0] sm:$0xff]   ;;  %v550_v1 = vsel %vm478_vm1, %v542_v0, %v23074_v14  ;;  %v2606_v29 = vrot.slane %v24863_v55, 1  ;;  %v2611_v44 = vrot.slane %v2609_v28, 1  ;;  %v21794_v55 = vld [vmem:[%s22600_s30 + $0x1c8] sm:$0xff]  }
  0xe1   : > { %18182 = vmatprep.mubr.bf16.mxu1 %v538_v47  ;;  %18211 = vmatpush3.bf16.msra.mxu1 %v21787_v61  ;;  %v2599_v41 = vrot.slane %v2597_v54, 1  ;;  %v576_v61 = vshrl.u32 %v462_v25, 16  ;;  %v24864_v47 = vshrl.u32 %v22945_v21, 16  ;;  %v2926_v54 = vrot.slane %v2924_v33, 7  ;;  %v2889_v25 = vld [vmem:[#allocation2 + $0x1b0] sm:$0x80] }
  0xe2   : > { %18212 = vmatprep.subr.bf16.mxu1 %v21789_v49  ;;  %v23108_v0 = vor.u32 %v1747_v3, %v1746_v27  ;;  %v466_v3 = vld [vmem:[#allocation2 + $0x258] sm:$0x80]  ;;  %v21795_v27 = vld [vmem:[%s22600_s30 + $0xb0] sm:$0xff]   ;;  %v666_v13 = vrot.slane %v664_v17, 7  ;;  %v21802_v17 = vld [vmem:[%s22600_s30 + $0x1e8] sm:$0xff]  }
  0xe3   : > { %v2600_v57 = vsel %vm1169_vm0, %v2595_v31, %v2599_v41  ;;  %v578_v58 = vrot.slane %v576_v61, 7  ;;  %v2891_v31 = vld [vmem:[#allocation2 + $0x1c8] sm:$0x80]  ;;  %v2929_v41 = vor.u32 %v2927_v59, %v2926_v54  ;;  %v594_v61 = vrot.slane %v592_v5, 7 }
  0xe4   : > { %v600_v8 = vshrl.u32 %v466_v3, 16  ;;  %v590_v3 = vrot.slane %v588_v37, 7  ;;  %v2895_v37 = vld [vmem:[#allocation2 + $0x1f8] sm:$0x80] }
  0xe5   : > { %18213 = vmatpush3.bf16.msra.mxu1 %v21789_v49  ;;  %v23110_v49 = vld [vmem:[#allocation2 + $0x1d0] sm:$0xff]  ;;  %v586_v5 = vsel %vm478_vm1, %v578_v58, %v23117_v39  ;;  %v23146_v58 = vld [vmem:[#allocation2 + $0x200] sm:$0xff] }
  0xe6   : > { %18387 = vmatmul.mubr.bf16.gmra.mrb[20].mxu0 %v2564_v46  ;;  %v566_v46 = vrot.slane %v564_v18, 7  ;;  %18214 = vmatprep.subr.bf16.mxu1 %v21791_v34  ;;  %v2607_v18 = vor.u32 %v2606_v29, %v24864_v47  ;;  %v2948_v28 = vshrl.u32 %v23110_v49, 16  ;;  %v2951_v32 = vshll.u32 %v23110_v49, 16  ;;  %v23174_v47 = vld [vmem:[#allocation2 + $0x218] sm:$0xff] }
  0xe7   : > { %18390 = vmatprep.mubr.bf16.mxu0 %v2576_v50  ;;  %v23099_v50 = vld [vmem:[#allocation2 + $0x1b8] sm:$0xff] }
  0xe8   : > { %18183 = vmatmul.mubr.bf16.gmra.mrb[8].mxu1 %v550_v1  ;;  %v2936_v26 = vshrl.u32 %v23099_v50, 16  ;;  %v606_v1 = vrot.slane %v604_v45, 7  ;;  %v574_v43 = vsel %vm478_vm1, %v566_v46, %v23108_v0  ;;  %v2612_v29 = vsel %vm1169_vm0, %v2607_v18, %v2611_v44  ;;  %v23135_v45 = vld [vmem:[#allocation2 + $0x1e8] sm:$0xff]  ;;  %v2893_v18 = vld [vmem:[#allocation2 + $0x1e0] sm:$0x80] }
  0xe9   : > { %18186 = vmatprep.mubr.bf16.mxu1 %v562_v19  ;;  %18215 = vmatpush3.bf16.msra.mxu1 %v21791_v34  ;;  %v2932_v34 = vshrl.u32 %v2889_v25, 16  ;;  %v468_v19 = vld [vmem:[#allocation2 + $0x270] sm:$0x80]  ;;  %v2930_v46 = vsel %vm478_vm1, %v2922_v20, %v2929_v41  ;;  %v2950_v54 = vrot.slane %v2948_v28, 7  ;;  %v21797_v25 = vld [vmem:[%s22600_s30 + $0xb8] sm:$0xff]   ;;  %v23144_v44 = vor.u32 %v595_v38, %v594_v61 }
  0xea   : > { %18216 = vmatprep.subr.bf16.mxu1 %v21793_v60  ;;  %v2938_v36 = vrot.slane %v2936_v26, 7  ;;  %v602_v20 = vrot.slane %v600_v8, 7  ;;  %v612_v38 = vshrl.u32 %v468_v19, 16  ;;  %v470_v61 = vld [vmem:[#allocation2 + $0x288] sm:$0x80]  ;;  %v24865_v8 = vshrl.u32 %v23146_v58, 16 }
  0xeb   : > { %v598_v52 = vsel %vm478_vm1, %v590_v3, %v23144_v44  ;;  %v624_v19 = vshrl.u32 %v470_v61, 16  ;;  %v2975_v61 = vshll.u32 %v23146_v58, 16 }
  0xed   : > { %18217 = vmatpush3.bf16.msra.mxu1 %v21793_v60  ;;  %v2934_v60 = vrot.slane %v2932_v34, 7  ;;  %v2953_v34 = vor.u32 %v2951_v32, %v2950_v54 }
  0xee   : > { %18391 = vmatmul.mubr.bf16.gmra.mrb[24].mxu0 %v2588_v40  ;;  %v2939_v40 = vshll.u32 %v23099_v50, 16  ;;  %18218 = vmatprep.subr.bf16.mxu1 %v21795_v27 }
  0xef   : > { %18394 = vmatprep.mubr.bf16.mxu0 %v2600_v57  ;;  %v2944_v57 = vshrl.u32 %v2891_v31, 16  ;;  %v2960_v31 = vshrl.u32 %v23135_v45, 16 }
  0xf0   : > { %18187 = vmatmul.mubr.bf16.gmra.mrb[12].mxu1 %v574_v43  ;;  %v2941_v41 = vor.u32 %v2939_v40, %v2938_v36  ;;  %v23153_v43 = vor.u32 %v607_v10, %v606_v1  ;;  %v618_v36 = vrot.slane %v616_v6, 7  ;;  %v2956_v10 = vshrl.u32 %v2893_v18, 16 }
  0xf1   : > { %18190 = vmatprep.mubr.bf16.mxu1 %v586_v5  ;;  %v2946_v48 = vrot.slane %v2944_v57, 7  ;;  %18219 = vmatpush3.bf16.msra.mxu1 %v21795_v27  ;;  %v2962_v1 = vrot.slane %v2960_v31, 7  ;;  %v2963_v27 = vshll.u32 %v23135_v45, 16  ;;  %v2968_v5 = vshrl.u32 %v2895_v37, 16  ;;  %v472_v37 = vld [vmem:[#allocation2 + $0x2a0] sm:$0x80] }
  0xf2   : > { %18220 = vmatprep.subr.bf16.mxu1 %v21797_v25  ;;  %v630_v57 = vrot.slane %v628_v35, 7  ;;  %v610_v54 = vsel %vm478_vm1, %v602_v20, %v23153_v43  ;;  %v614_v6 = vrot.slane %v612_v38, 7  ;;  %v2974_v18 = vrot.slane %v24865_v8, 7  ;;  %v23185_v20 = vld [vmem:[#allocation2 + $0x230] sm:$0xff] }
  0xf3   : > { %v2954_v3 = vsel %vm478_vm1, %v2946_v48, %v2953_v34  ;;  %v23183_v35 = vor.u32 %v619_v11, %v618_v36  ;;  %v2970_v48 = vrot.slane %v2968_v5, 7  ;;  %v2984_v38 = vshrl.u32 %v23174_v47, 16  ;;  %v2897_v11 = vld [vmem:[#allocation2 + $0x210] sm:$0x80]  ;;  %v474_v34 = vld [vmem:[#allocation2 + $0x2b8] sm:$0x80] }
  0xf4   : > { %v23193_v56 = vor.u32 %v631_v9, %v630_v57  ;;  %v2977_v36 = vor.u32 %v2975_v61, %v2974_v18  ;;  %v636_v9 = vshrl.u32 %v472_v37, 16  ;;  %v2980_v57 = vshrl.u32 %v2897_v11, 16  ;;  %v21798_v37 = vld [vmem:[%s22600_s30 + $0x1d8] sm:$0xff]  }
  0xf5   : > { %18221 = vmatpush3.bf16.msra.mxu1 %v21797_v25  ;;  %v2965_v25 = vor.u32 %v2963_v27, %v2962_v1  ;;  %v24866_v1 = vshrl.u32 %v23185_v20, 16  ;;  %v622_v63 = vsel %vm478_vm1, %v614_v6, %v23183_v35 }
  0xf6   : > { %18395 = vmatmul.mubr.bf16.gmra.mrb[28].mxu0 %v2612_v29  ;;  %v23159_v29 = vld [vmem:[%s22600_s30 + $0xc0] sm:$0xff]   ;;  %v2978_v8 = vsel %vm478_vm1, %v2970_v48, %v2977_v36 }
  0xf7   : > { %18414 = vmatprep.mubr.bf16.mxu0 %v2930_v46  ;;  %v2942_v46 = vsel %vm478_vm1, %v2934_v60, %v2941_v41  ;;  %18254 = vmatprep.subr.bf16.mxu1 %v23159_v29  ;;  %v2958_v60 = vrot.slane %v2956_v10, 7  ;;  %v626_v41 = vrot.slane %v624_v19, 7  ;;  %v2899_v10 = vld [vmem:[#allocation2 + $0x228] sm:$0x80]  ;;  %v642_v19 = vrot.slane %v640_v42, 7  ;;  %v23226_v36 = vld [vmem:[#allocation2] sm:$0xff] }
  0xf8   : > { %18191 = vmatmul.mubr.bf16.gmra.mrb[16].mxu1 %v598_v52  ;;  %v21796_v52 = vld [vmem:[%s22600_s30 + $0x1d0] sm:$0xff]   ;;  %v2992_v18 = vshrl.u32 %v2899_v10, 16  ;;  %v2998_v6 = vrot.slane %v24866_v1, 7  ;;  %v1173_v10 = vshll.u32 %v23226_v36, 16 }
  0xf9   : > { %18194 = vmatprep.mubr.bf16.mxu1 %v610_v54  ;;  %v2966_v5 = vsel %vm478_vm1, %v2958_v60, %v2965_v25  ;;  %v2987_v54 = vshll.u32 %v23174_v47, 16  ;;  %v634_v42 = vsel %vm478_vm1, %v626_v41, %v23193_v56  ;;  %v638_v60 = vrot.slane %v636_v9, 7  ;;  %v21800_v9 = vld [vmem:[%s22600_s30 + $0x1e0] sm:$0xff]  }
  0xfa   : > { %v2982_v25 = vrot.slane %v2980_v57, 7  ;;  %v2994_v4 = vrot.slane %v2992_v18, 7  ;;  %v1139_v18 = vld [vmem:[#allocation2 + $0x188] sm:$0xff] }
  0xfe   : > { %18415 = vmatmul.mubr.bf16.vlgmr.msra.gmra.mrb[0].mxu0 %v2942_v46  ;;  %v2986_v46 = vrot.slane %v2984_v38, 7 }
  0xff   : > { %18447 = vmatpush3.bf16.msra.mxu0 %v23021_v30  ;;  %18418 = vmatprep.mubr.bf16.mxu0 %v2954_v3  ;;  %v654_v30 = vrot.slane %v652_v62, 7  ;;  %v648_v3 = vshrl.u32 %v474_v34, 16  ;;  %v2999_v62 = vshll.u32 %v23185_v20, 16  ;;  %v476_v34 = vld [vmem:[#allocation2 + $0x2d0] sm:$0x80] }
 0x100   : > { %18448 = vmatprep.subr.bf16.mxu0 %v21794_v55  ;;  %18195 = vmatmul.mubr.bf16.gmra.mrb[20].mxu1 %v622_v63  ;;  %v2989_v41 = vor.u32 %v2987_v54, %v2986_v46  ;;  %v1138_v63 = vld [vmem:[#allocation2 + $0x178] sm:$0x1] }
 0x101   : > { %18198 = vmatprep.mubr.bf16.mxu1 %v634_v42  ;;  %v650_v48 = vrot.slane %v648_v3, 7  ;;  %v23224_v11 = vor.u32 %v655_v12, %v654_v30  ;;  %v1175_v42 = vrot.slane %v1173_v10, 1  ;;  %v1178_v3 = vshll.u32 %v1138_v63, 16  ;;  %v21804_v63 = vld [vmem:[%s22600_s30 + $0x1f0] sm:$0xff]  }
 0x102   : > { %v2990_v30 = vsel %vm478_vm1, %v2982_v25, %v2989_v41  ;;  %v23246_v25 = vor.u32 %v667_v51, %v666_v13  ;;  %v1183_v51 = vshrl.u32 %v1139_v18, 16 }
 0x103   : > { %18449 = vmatpush3.bf16.msra.mxu0 %v21794_v55  ;;  %v23218_v55 = vor.u32 %v643_v2, %v642_v19  ;;  %v3001_v2 = vor.u32 %v2999_v62, %v2998_v6  ;;  %v2901_v19 = vld [vmem:[#allocation2 + $0x240] sm:$0x80]  ;;  %v658_v57 = vsel %vm478_vm1, %v650_v48, %v23224_v11 }
 0x104   : > { %18450 = vmatprep.subr.bf16.mxu0 %v21796_v52  ;;  %v3004_v46 = vshrl.u32 %v2901_v19, 16  ;;  %v2905_v19 = vld [vmem:[#allocation2 + $0x270] sm:$0x80] }
 0x105   : > { %v646_v12 = vsel %vm478_vm1, %v638_v60, %v23218_v55  ;;  %v3002_v6 = vsel %vm478_vm1, %v2994_v4, %v3001_v2  ;;  %v1140_v4 = vld [vmem:[#allocation2 + $0x190] sm:$0x1] }
 0x106   : > { %18419 = vmatmul.mubr.bf16.gmra.mrb[4].mxu0 %v2966_v5  ;;  %v660_v5 = vshrl.u32 %v476_v34, 16  ;;  %v3006_v41 = vrot.slane %v3004_v46, 7  ;;  %v1180_v34 = vrot.slane %v1178_v3, 1  ;;  %v3028_v46 = vshrl.u32 %v2905_v19, 16 }
 0x107   : > { %18422 = vmatprep.mubr.bf16.mxu0 %v2978_v8  ;;  %18451 = vmatpush3.bf16.msra.mxu0 %v21796_v52  ;;  %v1171_v8 = vshrl.u32 %v23226_v36, 16  ;;  %v2903_v52 = vld [vmem:[#allocation2 + $0x258] sm:$0x80]  ;;  %v1211_v19 = vrot.slane %v2939_v40, 1 }
 0x108   : > { %18452 = vmatprep.subr.bf16.mxu0 %v21798_v37  ;;  %v3016_v1 = vshrl.u32 %v2903_v52, 16  ;;  %18199 = vmatmul.mubr.bf16.gmra.mrb[24].mxu1 %v646_v12  ;;  %v662_v60 = vrot.slane %v660_v5, 7  ;;  %v1142_v52 = vld [vmem:[#allocation2 + $0x1a8] sm:$0x1]  ;;  %v2907_v12 = vld [vmem:[#allocation2 + $0x288] sm:$0x80]  ;;  %v3014_v5 = vsel %vm478_vm1, %v3006_v41, %v23144_v44 }
 0x109   : > { %18202 = vmatprep.mubr.bf16.mxu1 %v658_v57  ;;  %v1176_v48 = vor.u32 %v1175_v42, %v1171_v8  ;;  %v1202_v42 = vshll.u32 %v1142_v52, 16  ;;  %v3040_v3 = vshrl.u32 %v2907_v12, 16  ;;  %v1212_v40 = vor.u32 %v2936_v26, %v1211_v19 }
 0x10a   : > { %v3018_v2 = vrot.slane %v3016_v1, 7  ;;  %v670_v16 = vsel %vm478_vm1, %v662_v60, %v23246_v25  ;;  %v3030_v60 = vrot.slane %v3028_v46, 7 }
 0x10b   : > { %18453 = vmatpush3.bf16.msra.mxu0 %v21798_v37  ;;  %v1185_v37 = vshll.u32 %v1139_v18, 16  ;;  %v1181_v57 = vsel %vm1169_vm0, %v1176_v48, %v1180_v34  ;;  %v1204_v41 = vrot.slane %v1202_v42, 1  ;;  %v1146_v48 = vld [vmem:[#allocation2 + $0x1d8] sm:$0x1]  ;;  %v23264_v34 = vld [vmem:[%s22600_s30 + $0x200] sm:$0xff]  }
 0x10c   : > { %18454 = vmatprep.subr.bf16.mxu0 %v21800_v9  ;;  %v3026_v1 = vsel %vm478_vm1, %v3018_v2, %v23153_v43  ;;  %v2913_v42 = vld [vmem:[#allocation2 + $0x2d0] sm:$0x80] }
 0x10d   : > { %v1187_v13 = vrot.slane %v1185_v37, 1  ;;  %v1144_v37 = vld [vmem:[#allocation2 + $0x1c0] sm:$0x1] }
 0x10e   : > { %18423 = vmatmul.mubr.bf16.gmra.mrb[8].mxu0 %v2990_v30  ;;  %v1190_v30 = vshll.u32 %v1140_v4, 16  ;;  %v2911_v4 = vld [vmem:[#allocation2 + $0x2b8] sm:$0x80]  ;;  %v1214_v52 = vshll.u32 %v1144_v37, 16  ;;  %v1247_v37 = vrot.slane %v2975_v61, 1  ;;  %v24886_v61 = vshrl.u32 %v23146_v58, 16 }
 0x10f   : > { %18426 = vmatprep.mubr.bf16.mxu0 %v3002_v6  ;;  %18455 = vmatpush3.bf16.msra.mxu0 %v21800_v9  ;;  %v1199_v9 = vrot.slane %v2927_v59, 1  ;;  %v21806_v6 = vld [vmem:[%s22600_s30 + $0x1f8] sm:$0xff]   ;;  %v1188_v18 = vor.u32 %v1187_v13, %v1183_v51  ;;  %v3042_v59 = vrot.slane %v3040_v3, 7  ;;  %v1150_v3 = vld [vmem:[#allocation2 + $0x208] sm:$0x1] }
 0x110   : > { %18456 = vmatprep.subr.bf16.mxu0 %v21802_v17  ;;  %18203 = vmatmul.mubr.bf16.gmra.mrb[28].mxu1 %v670_v16  ;;  %v1192_v44 = vrot.slane %v1190_v30, 1  ;;  %v1226_v16 = vshll.u32 %v1146_v48, 16  ;;  %v21801_v30 = vld [vmem:[%s22600_s30 + $0xc8] sm:$0xff]   ;;  %v21805_v48 = vld [vmem:[%s22600_s30 + $0xd8] sm:$0xff]   ;;  %v1248_v19 = vor.u32 %v24886_v61, %v1247_v37 }
 0x111   : > { %18222 = vmatprep.mubr.bf16.mxu1 %v1181_v57  ;;  %v1200_v43 = vor.u32 %v2924_v33, %v1199_v9  ;;  %v1223_v33 = vrot.slane %v2951_v32, 1  ;;  %v3050_v13 = vsel %vm478_vm1, %v3042_v59, %v23193_v56  ;;  %v1216_v32 = vrot.slane %v1214_v52, 1  ;;  %v1148_v56 = vld [vmem:[#allocation2 + $0x1f0] sm:$0x1]  ;;  %v1152_v52 = vld [vmem:[#allocation2 + $0x220] sm:$0x1] }
 0x112   : > { %v1193_v2 = vsel %vm1169_vm0, %v1188_v18, %v1192_v44  ;;  %v1228_v46 = vrot.slane %v1226_v16, 1  ;;  %v1235_v18 = vrot.slane %v2963_v27, 1  ;;  %v1238_v44 = vshll.u32 %v1148_v56, 16  ;;  %v23314_v56 = vld [vmem:[#allocation2 + $0x248] sm:$0xff] }
 0x113   : > { %18457 = vmatpush3.bf16.msra.mxu0 %v21802_v17  ;;  %v2909_v17 = vld [vmem:[#allocation2 + $0x2a0] sm:$0x80]  ;;  %v1205_v51 = vsel %vm1169_vm0, %v1200_v43, %v1204_v41  ;;  %v1224_v57 = vor.u32 %v2948_v28, %v1223_v33  ;;  %v24885_v59 = vshrl.u32 %v22945_v21, 16  ;;  %v24887_v33 = vshll.u32 %v22945_v21, 16 }
 0x114   : > { %18458 = vmatprep.subr.bf16.mxu0 %v21804_v63  ;;  %v3052_v12 = vshrl.u32 %v2909_v17, 16  ;;  %v1250_v17 = vshll.u32 %v1150_v3, 16  ;;  %v1236_v27 = vor.u32 %v2960_v31, %v1235_v18  ;;  %v1259_v31 = vrot.slane %v2987_v54, 1  ;;  %v1156_v18 = vld [vmem:[#allocation2 + $0x250] sm:$0x1] }
 0x115   : > { %v1229_v28 = vsel %vm1169_vm0, %v1224_v57, %v1228_v46  ;;  %v1271_v57 = vrot.slane %v2999_v62, 1  ;;  %v1281_v3 = vshll.u32 %v23314_v56, 16 }
 0x116   : > { %18427 = vmatmul.mubr.bf16.gmra.mrb[12].mxu0 %v3014_v5  ;;  %v3064_v5 = vshrl.u32 %v2911_v4, 16  ;;  %v1240_v4 = vrot.slane %v1238_v44, 1 }
 0x117   : > { %18430 = vmatprep.mubr.bf16.mxu0 %v3026_v1  ;;  %18459 = vmatpush3.bf16.msra.mxu0 %v21804_v63  ;;  %v3038_v63 = vsel %vm478_vm1, %v3030_v60, %v23183_v35  ;;  %v3054_v35 = vrot.slane %v3052_v12, 7  ;;  %v21803_v1 = vld [vmem:[%s22600_s30 + $0xd0] sm:$0xff]   ;;  %v3076_v60 = vshrl.u32 %v2913_v42, 16  ;;  %v2917_v12 = vld [vmem:[#allocation2 + $0x300] sm:$0x80] }
 0x118   : > { %18460 = vmatprep.subr.bf16.mxu0 %v21806_v6  ;;  %18223 = vmatmul.mubr.bf16.vlgmr.msra.gmra.mrb[0].mxu1 %v1193_v2  ;;  %v3066_v9 = vrot.slane %v3064_v5, 7  ;;  %v1262_v5 = vshll.u32 %v1152_v52, 16 }
 0x119   : > { %18255 = vmatpush3.bf16.msra.mxu1 %v23159_v29  ;;  %18226 = vmatprep.mubr.bf16.mxu1 %v1205_v51  ;;  %v1217_v29 = vsel %vm1169_vm0, %v1212_v40, %v1216_v32  ;;  %v3062_v26 = vsel %vm478_vm1, %v3054_v35, %v23218_v55  ;;  %v3094_v55 = vrot.slane %v24885_v59, 7  ;;  %v3078_v2 = vrot.slane %v3076_v60, 7  ;;  %v1154_v51 = vld [vmem:[#allocation2 + $0x238] sm:$0x1] }
 0x11a   : > { %18256 = vmatprep.subr.bf16.mxu1 %v21801_v30  ;;  %v3074_v43 = vsel %vm478_vm1, %v3066_v9, %v23224_v11  ;;  %v1252_v11 = vrot.slane %v1250_v17, 1  ;;  %v3100_v40 = vshrl.u32 %v2917_v12, 16  ;;  %v3106_v32 = vrot.slane %v1171_v8, 7  ;;  %v21809_v9 = vld [vmem:[%s22600_s30 + $0xe8] sm:$0xff]  }
 0x11b   : > { %18461 = vmatpush3.bf16.msra.mxu0 %v21806_v6  ;;  %v2915_v6 = vld [vmem:[#allocation2 + $0x2e8] sm:$0x80]  ;;  %v3097_v16 = vor.u32 %v3094_v55, %v24887_v33  ;;  %v3086_v35 = vsel %vm478_vm1, %v3078_v2, %v23246_v25  ;;  %v1274_v46 = vshll.u32 %v1154_v51, 16  ;;  %v1260_v8 = vor.u32 %v2984_v38, %v1259_v31  ;;  %v21811_v38 = vld [vmem:[%s22600_s30 + $0xf0] sm:$0xff]   ;;  %v21813_v2 = vld [vmem:[%s22600_s30 + $0xf8] sm:$0xff]  }
 0x11c   : > { %18494 = vmatprep.subr.bf16.mxu0 %v23264_v34  ;;  %v3088_v41 = vshrl.u32 %v2915_v6, 16  ;;  %v1253_v21 = vsel %vm1169_vm0, %v1248_v19, %v1252_v11  ;;  %v1264_v25 = vrot.slane %v1262_v5, 1  ;;  %v3102_v42 = vrot.slane %v3100_v40, 7 }
 0x11d   : > { %18257 = vmatpush3.bf16.msra.mxu1 %v21801_v30  ;;  %v1241_v30 = vsel %vm1169_vm0, %v1236_v27, %v1240_v4  ;;  %v3109_v62 = vor.u32 %v3106_v32, %v1173_v10  ;;  %v24888_v6 = vshrl.u32 %v23185_v20, 16  ;;  %v1279_v60 = vshrl.u32 %v23314_v56, 16  ;;  %v23338_v27 = vld [vmem:[#allocation2 + $0x278] sm:$0xff]  ;;  %v23340_v4 = vld [vmem:[#allocation2 + $0x290] sm:$0xff] }
 0x11e   : > { %18431 = vmatmul.mubr.bf16.gmra.mrb[16].mxu0 %v3038_v63  ;;  %18258 = vmatprep.subr.bf16.mxu1 %v21803_v1  ;;  %v3090_v63 = vrot.slane %v3088_v41, 7  ;;  %v1265_v37 = vsel %vm1169_vm0, %v1260_v8, %v1264_v25  ;;  %v1283_v17 = vrot.slane %v1281_v3, 1  ;;  %v1305_v11 = vshll.u32 %v23338_v27, 16 }
 0x11f   : > { %18434 = vmatprep.mubr.bf16.mxu0 %v3050_v13  ;;  %v21807_v13 = vld [vmem:[%s22600_s30 + $0xe0] sm:$0xff]   ;;  %v3110_v10 = vsel %vm478_vm1, %v3102_v42, %v3109_v62  ;;  %v1317_v33 = vshll.u32 %v23340_v4, 16  ;;  %v1315_v5 = vshrl.u32 %v23340_v4, 16  ;;  %v1164_v62 = vld [vmem:[#allocation2 + $0x2b0] sm:$0x1] }
 0x120   : > { %18227 = vmatmul.mubr.bf16.gmra.mrb[4].mxu1 %v1217_v29  ;;  %v3098_v54 = vsel %vm478_vm1, %v3090_v63, %v3097_v16  ;;  %v1272_v29 = vor.u32 %v24888_v6, %v1271_v57  ;;  %v23345_v61 = vor.u32 %v1283_v17, %v1279_v60  ;;  %v1160_v63 = vld [vmem:[#allocation2 + $0x280] sm:$0x1]  ;;  %v1162_v16 = vld [vmem:[#allocation2 + $0x298] sm:$0x1]  ;;  %v21812_v6 = vld [vmem:[%s22600_s30 + $0x210] sm:$0xff]  }
 0x121   : > { %18230 = vmatprep.mubr.bf16.mxu1 %v1229_v28  ;;  %18259 = vmatpush3.bf16.msra.mxu1 %v21803_v1  ;;  %v23317_v1 = vld [vmem:[#allocation2 + $0x260] sm:$0xff]  ;;  %v1158_v28 = vld [vmem:[#allocation2 + $0x268] sm:$0x1]  ;;  %v1310_v31 = vshll.u32 %v1160_v63, 16  ;;  %v1319_v40 = vrot.slane %v1317_v33, 1  ;;  %v1322_v32 = vshll.u32 %v1162_v16, 16 }
 0x122   : > { %18260 = vmatprep.subr.bf16.mxu1 %v21805_v48  ;;  %v1293_v44 = vshll.u32 %v23317_v1, 16  ;;  %v1291_v59 = vshrl.u32 %v23317_v1, 16  ;;  %v23367_v57 = vld [vmem:[#allocation2 + $0x2c0] sm:$0xff]  ;;  %v23397_v17 = vld [vmem:[#allocation2 + $0x2d8] sm:$0xff] }
 0x123   : > { %v23383_v25 = vor.u32 %v1319_v40, %v1315_v5  ;;  %v1324_v42 = vrot.slane %v1322_v32, 1  ;;  %v21815_v63 = vld [vmem:[%s22600_s30 + $0x220] sm:$0xff]   ;;  %v21816_v40 = vld [vmem:[%s22600_s30 + $0x228] sm:$0xff]  }
 0x124   : > { %v1295_v55 = vrot.slane %v1293_v44, 1 }
 0x125   : > { %18261 = vmatpush3.bf16.msra.mxu1 %v21805_v48  ;;  %v1298_v48 = vshll.u32 %v1158_v28, 16  ;;  %v1325_v28 = vsel %vm1169_vm0, %v23383_v25, %v1324_v42  ;;  %v1637_v42 = vld [vmem:[#allocation2 + $0x198] sm:$0x80] }
 0x126   : > { %18435 = vmatmul.mubr.bf16.gmra.mrb[20].mxu0 %v3062_v26  ;;  %18262 = vmatprep.subr.bf16.mxu1 %v21807_v13  ;;  %v1276_v26 = vrot.slane %v1274_v46, 1  ;;  %v23351_v52 = vor.u32 %v1295_v55, %v1291_v59  ;;  %v23370_v46 = vld [vmem:[%s22600_s30 + $0x100] sm:$0xff]  }
 0x127   : > { %18438 = vmatprep.mubr.bf16.mxu0 %v3074_v43  ;;  %v1286_v43 = vshll.u32 %v1156_v18, 16  ;;  %v1300_v12 = vrot.slane %v1298_v48, 1  ;;  %v1353_v48 = vshll.u32 %v23397_v17, 16 }
 0x128   : > { %18231 = vmatmul.mubr.bf16.gmra.mrb[8].mxu1 %v1241_v30  ;;  %v1277_v41 = vsel %vm1169_vm0, %v1272_v29, %v1276_v26  ;;  %v1166_v29 = vld [vmem:[#allocation2 + $0x2c8] sm:$0x1] }
 0x129   : > { %18234 = vmatprep.mubr.bf16.mxu1 %v1253_v21  ;;  %18263 = vmatpush3.bf16.msra.mxu1 %v21807_v13  ;;  %v1288_v19 = vrot.slane %v1286_v43, 1  ;;  %v1303_v13 = vshrl.u32 %v23338_v27, 16  ;;  %v1301_v30 = vsel %vm1169_vm0, %v23351_v52, %v1300_v12  ;;  %v21810_v21 = vld [vmem:[%s22600_s30 + $0x208] sm:$0xff]   ;;  %v21814_v43 = vld [vmem:[%s22600_s30 + $0x218] sm:$0xff]   ;;  %v1168_v12 = vld [vmem:[#allocation2 + $0x2e0] sm:$0x1] }
 0x12a   : > { %18264 = vmatprep.subr.bf16.mxu1 %v21809_v9 }
 0x12b   : > { %v1289_v51 = vsel %vm1169_vm0, %v23345_v61, %v1288_v19 }
 0x12d   : > { %18265 = vmatpush3.bf16.msra.mxu1 %v21809_v9  ;;  %v1312_v9 = vrot.slane %v1310_v31, 1 }
 0x12e   : > { %18439 = vmatmul.mubr.bf16.gmra.mrb[24].mxu0 %v3086_v35  ;;  %18266 = vmatprep.subr.bf16.mxu1 %v21811_v38  ;;  %v23364_v35 = vld [vmem:[#allocation2 + $0x2a8] sm:$0xff] }
 0x12f   : > { %18442 = vmatprep.mubr.bf16.mxu0 %v3098_v54  ;;  %v1329_v8 = vshll.u32 %v23364_v35, 16  ;;  %v1327_v18 = vshrl.u32 %v23364_v35, 16 }
 0x130   : > { %18235 = vmatmul.mubr.bf16.gmra.mrb[12].mxu1 %v1265_v37 }
 0x131   : > { %18238 = vmatprep.mubr.bf16.mxu1 %v1277_v41  ;;  %18267 = vmatpush3.bf16.msra.mxu1 %v21811_v38  ;;  %v1339_v38 = vshrl.u32 %v23367_v57, 16 }
 0x132   : > { %18268 = vmatprep.subr.bf16.mxu1 %v21813_v2 }
 0x135   : > { %18269 = vmatpush3.bf16.msra.mxu1 %v21813_v2 }
 0x136   : > { %18443 = vmatmul.mubr.bf16.gmra.mrb[28].mxu0 %v3110_v10  ;;  %20270 = vmatprep.subr.bf16.mxu1 %v23370_v46  ;;  %v1346_v10 = vshll.u32 %v1166_v29, 16 }
 0x137   : > { %18462 = vmatprep.mubr.bf16.mxu0 %v23070_v22  ;;  %v1307_v22 = vrot.slane %v1305_v11, 1 }
 0x138   : > { %18239 = vmatmul.mubr.bf16.gmra.mrb[16].mxu1 %v1289_v51  ;;  %v1348_v19 = vrot.slane %v1346_v10, 1  ;;  %v1351_v51 = vshrl.u32 %v23397_v17, 16  ;;  %v1641_v10 = vld [vmem:[#allocation2 + $0x1c8] sm:$0x80] }
 0x139   : > { %18242 = vmatprep.mubr.bf16.mxu1 %v1301_v30  ;;  %v23376_v54 = vor.u32 %v1307_v22, %v1303_v13  ;;  %v1355_v22 = vrot.slane %v1353_v48, 1 }
 0x13b   : > { %v1313_v26 = vsel %vm1169_vm0, %v23376_v54, %v1312_v9  ;;  %v23423_v32 = vor.u32 %v1355_v22, %v1351_v51  ;;  %v21824_v22 = vld [vmem:[#allocation2 + $0x290] sm:$0xff] }
 0x13e   : > { %18463 = vmatmul.mubr.bf16.vlgmr.msra.gmra.mrb[0].mxu0 %v23099_v50  ;;  %v1341_v50 = vshll.u32 %v23367_v57, 16 }
 0x13f   : > { %18495 = vmatpush3.bf16.msra.mxu0 %v23264_v34  ;;  %18466 = vmatprep.mubr.bf16.mxu0 %v23110_v49  ;;  %v1331_v49 = vrot.slane %v1329_v8, 1  ;;  %v1334_v34 = vshll.u32 %v1164_v62, 16  ;;  %v21817_v62 = vld [vmem:[%s22600_s30 + $0x230] sm:$0xff]  }
 0x140   : > { %18496 = vmatprep.subr.bf16.mxu0 %v21810_v21  ;;  %v1343_v37 = vrot.slane %v1341_v50, 1  ;;  %18243 = vmatmul.mubr.bf16.gmra.mrb[20].mxu1 %v1313_v26  ;;  %v1680_v26 = vshrl.u32 %v1637_v42, 16  ;;  %v3641_v42 = vld [vmem:[#allocation2 + $0x1a0] sm:$0xff] }
 0x141   : > { %18246 = vmatprep.mubr.bf16.mxu1 %v1325_v28  ;;  %v23403_v41 = vor.u32 %v1331_v49, %v1327_v18  ;;  %v1336_v55 = vrot.slane %v1334_v34, 1  ;;  %v21818_v34 = vld [vmem:[%s22600_s30 + $0x238] sm:$0xff]   ;;  %v21821_v28 = vld [vmem:[#allocation2 + $0x248] sm:$0xff] }
 0x142   : > { %v23409_v2 = vor.u32 %v1343_v37, %v1339_v38  ;;  %v21822_v37 = vld [vmem:[#allocation2 + $0x260] sm:$0xff] }
 0x143   : > { %18497 = vmatpush3.bf16.msra.mxu0 %v21810_v21  ;;  %v1337_v16 = vsel %vm1169_vm0, %v23403_v41, %v1336_v55  ;;  %v1643_v55 = vld [vmem:[#allocation2 + $0x1e0] sm:$0x80] }
 0x144   : > { %18498 = vmatprep.subr.bf16.mxu0 %v21812_v6  ;;  %v1349_v31 = vsel %vm1169_vm0, %v23409_v2, %v1348_v19  ;;  %v1704_v19 = vshrl.u32 %v1641_v10, 16  ;;  %v1770_v10 = vrot.slane %v1279_v60, 7 }
 0x146   : > { %18467 = vmatmul.mubr.bf16.gmra.mrb[4].mxu0 %v23135_v45  ;;  %v1635_v45 = vld [vmem:[#allocation2 + $0x180] sm:$0x80]  ;;  %v1773_v60 = vor.u32 %v1770_v10, %v1281_v3 }
 0x147   : > { %18470 = vmatprep.mubr.bf16.mxu0 %v23146_v58  ;;  %18499 = vmatpush3.bf16.msra.mxu0 %v21812_v6  ;;  %v1358_v58 = vshll.u32 %v1168_v12, 16  ;;  %v1668_v30 = vshrl.u32 %v1635_v45, 16  ;;  %v1639_v6 = vld [vmem:[#allocation2 + $0x1b0] sm:$0x80]  ;;  %v1716_v12 = vshrl.u32 %v1643_v55, 16  ;;  %v3674_v55 = vshrl.u32 %v3641_v42, 16 }
 0x148   : > { %18500 = vmatprep.subr.bf16.mxu0 %v21814_v43  ;;  %18247 = vmatmul.mubr.bf16.gmra.mrb[24].mxu1 %v1337_v16  ;;  %v1692_v49 = vshrl.u32 %v1639_v6, 16  ;;  %v1706_v16 = vrot.slane %v1704_v19, 7 }
 0x149   : > { %18250 = vmatprep.mubr.bf16.mxu1 %v1349_v31  ;;  %v1360_v21 = vrot.slane %v1358_v58, 1  ;;  %v1670_v9 = vrot.slane %v1668_v30, 7  ;;  %v1718_v58 = vrot.slane %v1716_v12, 7  ;;  %v1645_v31 = vld [vmem:[#allocation2 + $0x1f8] sm:$0x80]  ;;  %v21825_v30 = vld [vmem:[%s22600_s30 + $0x108] sm:$0xff]  }
 0x14a   : > { %v21830_v12 = vld [vmem:[%s22600_s30 + $0x120] sm:$0xff]  }
 0x14b   : > { %18501 = vmatpush3.bf16.msra.mxu0 %v21814_v43  ;;  %v1361_v29 = vsel %vm1169_vm0, %v23423_v32, %v1360_v21  ;;  %v1694_v43 = vrot.slane %v1692_v49, 7  ;;  %v1726_v21 = vsel %vm478_vm1, %v1718_v58, %v23074_v14  ;;  %v21829_v49 = vld [vmem:[%s22600_s30 + $0x118] sm:$0xff]   ;;  %v3676_v14 = vshll.u32 %v3641_v42, 16 }
 0x14c   : > { %18502 = vmatprep.subr.bf16.mxu0 %v21815_v63  ;;  %v1653_v58 = vld [vmem:[#allocation2 + $0x258] sm:$0x80]  ;;  %v1782_v42 = vrot.slane %v1291_v59, 7 }
 0x14d   : > { %v1702_v45 = vsel %vm478_vm1, %v1694_v43, %v23044_v15  ;;  %v1728_v15 = vshrl.u32 %v1645_v31, 16 }
 0x14e   : > { %18471 = vmatmul.mubr.bf16.gmra.mrb[8].mxu0 %v23174_v47  ;;  %v1678_v47 = vsel %vm478_vm1, %v1670_v9, %v23003_v7  ;;  %v21826_v9 = vld [vmem:[%s22600_s30 + $0x110] sm:$0xff]   ;;  %v1785_v10 = vor.u32 %v1782_v42, %v1293_v44 }
 0x14f   : > { %18474 = vmatprep.mubr.bf16.mxu0 %v23185_v20  ;;  %18503 = vmatpush3.bf16.msra.mxu0 %v21815_v63  ;;  %v1682_v20 = vrot.slane %v1680_v26, 7  ;;  %v21823_v63 = vld [vmem:[#allocation2 + $0x278] sm:$0xff]  ;;  %v1730_v6 = vrot.slane %v1728_v15, 7  ;;  %v1655_v15 = vld [vmem:[#allocation2 + $0x270] sm:$0x80] }
 0x150   : > { %18504 = vmatprep.subr.bf16.mxu0 %v21816_v40  ;;  %18251 = vmatmul.mubr.bf16.gmra.mrb[28].mxu1 %v1361_v29  ;;  %v21828_v29 = vld [vmem:[#allocation2 + $0x2c0] sm:$0xff] }
 0x151   : > { %18270 = vmatprep.mubr.bf16.mxu1 %v1678_v47  ;;  %v1690_v7 = vsel %vm478_vm1, %v1682_v20, %v23016_v53  ;;  %v1647_v53 = vld [vmem:[#allocation2 + $0x210] sm:$0x80]  ;;  %v1651_v47 = vld [vmem:[#allocation2 + $0x240] sm:$0x80] }
 0x153   : > { %18505 = vmatpush3.bf16.msra.mxu0 %v21816_v40  ;;  %v1714_v40 = vsel %vm478_vm1, %v1706_v16, %v23051_v24  ;;  %v1649_v24 = vld [vmem:[#allocation2 + $0x228] sm:$0x80]  ;;  %v21831_v16 = vld [vmem:[#allocation2 + $0x2d8] sm:$0xff] }
 0x154   : > { %18506 = vmatprep.subr.bf16.mxu0 %v21817_v62  ;;  %v1752_v20 = vshrl.u32 %v1649_v24, 16 }
 0x156   : > { %18475 = vmatmul.mubr.bf16.gmra.mrb[12].mxu0 %v21821_v28  ;;  %v1738_v28 = vsel %vm478_vm1, %v1730_v6, %v23080_v23  ;;  %v1754_v23 = vrot.slane %v1752_v20, 7 }
 0x157   : > { %18478 = vmatprep.mubr.bf16.mxu0 %v21822_v37  ;;  %18507 = vmatpush3.bf16.msra.mxu0 %v21817_v62  ;;  %v21827_v62 = vld [vmem:[#allocation2 + $0x2a8] sm:$0xff]  ;;  %v1764_v37 = vshrl.u32 %v1651_v47, 16  ;;  %v1788_v47 = vshrl.u32 %v1655_v15, 16 }
 0x158   : > { %18508 = vmatprep.subr.bf16.mxu0 %v21818_v34  ;;  %18271 = vmatmul.mubr.bf16.vlgmr.msra.gmra.mrb[0].mxu1 %v1690_v7  ;;  %v3678_v7 = vrot.slane %v3676_v14, 1  ;;  %v1762_v3 = vsel %vm478_vm1, %v1754_v23, %v23117_v39  ;;  %v3647_v14 = vld [vmem:[#allocation2 + $0x1e8] sm:$0xff] }
 0x159   : > { %20278 = vmatpush3.bf16.msra.mxu1 %v23370_v46  ;;  %18274 = vmatprep.mubr.bf16.mxu1 %v1702_v45  ;;  %v1740_v46 = vshrl.u32 %v1647_v53, 16  ;;  %v3643_v45 = vld [vmem:[#allocation2 + $0x1b8] sm:$0xff] }
 0x15a   : > { %20271 = vmatprep.subr.bf16.mxu1 %v21825_v30  ;;  %v3688_v31 = vshll.u32 %v3643_v45, 16 }
 0x15b   : > { %18509 = vmatpush3.bf16.msra.mxu0 %v21818_v34  ;;  %v1742_v26 = vrot.slane %v1740_v46, 7  ;;  %v3642_v34 = vld [vmem:[#allocation2 + $0x1a8] sm:$0x1]  ;;  %v1776_v46 = vshrl.u32 %v1653_v58, 16 }
 0x15c   : > { %v3681_v19 = vshll.u32 %v3642_v34, 16 }
 0x15d   : > { %20279 = vmatpush3.bf16.msra.mxu1 %v21825_v30  ;;  %v1750_v43 = vsel %vm478_vm1, %v1742_v26, %v23108_v0  ;;  %v21832_v0 = vld [vmem:[#allocation2 + $0x2f0] sm:$0xff]  ;;  %v3679_v30 = vor.u32 %v3678_v7, %v3674_v55  ;;  %v3690_v26 = vrot.slane %v3688_v31, 1  ;;  %v1778_v39 = vrot.slane %v1776_v46, 7 }
 0x15e   : > { %18479 = vmatmul.mubr.bf16.gmra.mrb[16].mxu0 %v21823_v63  ;;  %20272 = vmatprep.subr.bf16.mxu1 %v21826_v9  ;;  %v3645_v63 = vld [vmem:[#allocation2 + $0x1d0] sm:$0xff]  ;;  %v3683_v53 = vrot.slane %v3681_v19, 1  ;;  %v3712_v55 = vshll.u32 %v3647_v14, 16  ;;  %v3710_v31 = vshrl.u32 %v3647_v14, 16  ;;  %v1661_v14 = vld [vmem:[#allocation2 + $0x2b8] sm:$0x80] }
 0x15f   : > { %18482 = vmatprep.mubr.bf16.mxu0 %v21824_v22  ;;  %v1766_v22 = vrot.slane %v1764_v37, 7  ;;  %v21834_v37 = vld [vmem:[%s22600_s30 + $0x130] sm:$0xff]  }
 0x160   : > { %18275 = vmatmul.mubr.bf16.gmra.mrb[4].mxu1 %v1714_v40  ;;  %v3644_v40 = vld [vmem:[#allocation2 + $0x1c0] sm:$0x1]  ;;  %v3684_v34 = vsel %vm1169_vm0, %v3679_v30, %v3683_v53  ;;  %v3650_v30 = vld [vmem:[#allocation2 + $0x208] sm:$0x1]  ;;  %v3714_v53 = vrot.slane %v3712_v55, 1 }
 0x161   : > { %18278 = vmatprep.mubr.bf16.mxu1 %v1726_v21  ;;  %20280 = vmatpush3.bf16.msra.mxu1 %v21826_v9  ;;  %v3700_v21 = vshll.u32 %v3645_v63, 16  ;;  %v21833_v9 = vld [vmem:[%s22600_s30 + $0x128] sm:$0xff]   ;;  %v1774_v6 = vsel %vm478_vm1, %v1766_v22, %v1773_v60  ;;  %v3693_v24 = vshll.u32 %v3644_v40, 16  ;;  %v21835_v60 = vld [vmem:[%s22600_s30 + $0x138] sm:$0xff]  }
 0x162   : > { %20273 = vmatprep.subr.bf16.mxu1 %v21829_v49 }
 0x163   : > { %v3702_v20 = vrot.slane %v3700_v21, 1  ;;  %v3695_v19 = vrot.slane %v3693_v24, 1 }
 0x165   : > { %20281 = vmatpush3.bf16.msra.mxu1 %v21829_v49  ;;  %v1794_v49 = vrot.slane %v1303_v13, 7  ;;  %v1657_v13 = vld [vmem:[#allocation2 + $0x288] sm:$0x80] }
 0x166   : > { %18483 = vmatmul.mubr.bf16.gmra.mrb[20].mxu0 %v21827_v62  ;;  %20274 = vmatprep.subr.bf16.mxu1 %v21830_v12  ;;  %v3646_v62 = vld [vmem:[#allocation2 + $0x1d8] sm:$0x1]  ;;  %v1800_v58 = vshrl.u32 %v1657_v13, 16 }
 0x167   : > { %18486 = vmatprep.mubr.bf16.mxu0 %v21828_v29  ;;  %v3686_v29 = vshrl.u32 %v3643_v45, 16  ;;  %v3705_v59 = vshll.u32 %v3646_v62, 16  ;;  %v1797_v45 = vor.u32 %v1794_v49, %v1305_v11  ;;  %v1818_v11 = vrot.slane %v1327_v18, 7 }
 0x168   : > { %18279 = vmatmul.mubr.bf16.gmra.mrb[8].mxu1 %v1738_v28  ;;  %v3698_v28 = vshrl.u32 %v3645_v63, 16  ;;  %v3648_v63 = vld [vmem:[#allocation2 + $0x1f0] sm:$0x1]  ;;  %v3715_v18 = vor.u32 %v3714_v53, %v3710_v31  ;;  %v1665_v53 = vld [vmem:[#allocation2 + $0x2e8] sm:$0x80] }
 0x169   : > { %18282 = vmatprep.mubr.bf16.mxu1 %v1750_v43  ;;  %20282 = vmatpush3.bf16.msra.mxu1 %v21830_v12  ;;  %v3649_v43 = vld [vmem:[#allocation2 + $0x200] sm:$0xff]  ;;  %v3691_v7 = vor.u32 %v3690_v26, %v3686_v29  ;;  %v1790_v12 = vrot.slane %v1788_v47, 7  ;;  %v3707_v22 = vrot.slane %v3705_v59, 1  ;;  %v3717_v40 = vshll.u32 %v3648_v63, 16  ;;  %v3653_v26 = vld [vmem:[#allocation2 + $0x230] sm:$0xff] }
 0x16a   : > { %20275 = vmatprep.subr.bf16.mxu1 %v21833_v9  ;;  %v3703_v23 = vor.u32 %v3702_v20, %v3698_v28  ;;  %v3724_v44 = vshll.u32 %v3649_v43, 16  ;;  %v3722_v42 = vshrl.u32 %v3649_v43, 16  ;;  %v1821_v49 = vor.u32 %v1818_v11, %v1329_v8  ;;  %v3652_v59 = vld [vmem:[#allocation2 + $0x220] sm:$0x1]  ;;  %v3654_v43 = vld [vmem:[#allocation2 + $0x238] sm:$0x1] }
 0x16b   : > { %v3696_v21 = vsel %vm1169_vm0, %v3691_v7, %v3695_v19  ;;  %v3719_v24 = vrot.slane %v3717_v40, 1  ;;  %v1830_v7 = vrot.slane %v1339_v38, 7  ;;  %v1842_v63 = vrot.slane %v1351_v51, 7  ;;  %v3656_v11 = vld [vmem:[#allocation2 + $0x250] sm:$0x1] }
 0x16c   : > { %v3708_v46 = vsel %vm1169_vm0, %v3703_v23, %v3707_v22  ;;  %v3726_v62 = vrot.slane %v3724_v44, 1  ;;  %v3746_v22 = vshrl.u32 %v3653_v26, 16 }
 0x16d   : > { %20283 = vmatpush3.bf16.msra.mxu1 %v21833_v9  ;;  %v1798_v9 = vsel %vm478_vm1, %v1790_v12, %v1797_v45  ;;  %v3720_v13 = vsel %vm1169_vm0, %v3715_v18, %v3719_v24  ;;  %v3741_v12 = vshll.u32 %v3652_v59, 16  ;;  %v1833_v38 = vor.u32 %v1830_v7, %v1341_v50  ;;  %v3668_v7 = vld [vmem:[#allocation2 + $0x2e0] sm:$0x1] }
 0x16e   : > { %18487 = vmatmul.mubr.bf16.gmra.mrb[24].mxu0 %v21831_v16  ;;  %20276 = vmatprep.subr.bf16.mxu1 %v21834_v37  ;;  %v1659_v16 = vld [vmem:[#allocation2 + $0x2a0] sm:$0x80]  ;;  %v3727_v28 = vor.u32 %v3726_v62, %v3722_v42 }
 0x16f   : > { %18490 = vmatprep.mubr.bf16.mxu0 %v21832_v0  ;;  %v1806_v0 = vrot.slane %v1315_v5, 7  ;;  %v1812_v15 = vshrl.u32 %v1659_v16, 16  ;;  %v1802_v5 = vrot.slane %v1800_v58, 7  ;;  %v23488_v16 = vld [vmem:[#allocation2 + $0x2f0] sm:$0xff]  ;;  %v3743_v31 = vrot.slane %v3741_v12, 1 }
 0x170   : > { %18283 = vmatmul.mubr.bf16.gmra.mrb[12].mxu1 %v1762_v3  ;;  %v3729_v3 = vshll.u32 %v3650_v30, 16  ;;  %v1852_v58 = vshrl.u32 %v23488_v16, 16  ;;  %v1845_v30 = vor.u32 %v1842_v63, %v1353_v48  ;;  %v1855_v42 = vshll.u32 %v23488_v16, 16 }
 0x171   : > { %18286 = vmatprep.mubr.bf16.mxu1 %v1774_v6  ;;  %20284 = vmatpush3.bf16.msra.mxu1 %v21834_v37  ;;  %v3651_v6 = vld [vmem:[#allocation2 + $0x218] sm:$0xff]  ;;  %v1809_v29 = vor.u32 %v1806_v0, %v1317_v33  ;;  %v1814_v47 = vrot.slane %v1812_v15, 7  ;;  %v1663_v37 = vld [vmem:[#allocation2 + $0x2d0] sm:$0x80]  ;;  %v1824_v33 = vshrl.u32 %v1661_v14, 16  ;;  %v3837_v12 = vshll.u32 %v3668_v7, 16 }
 0x172   : > { %20277 = vmatprep.subr.bf16.mxu1 %v21835_v60  ;;  %v3731_v20 = vrot.slane %v3729_v3, 1  ;;  %v3734_v8 = vshrl.u32 %v3651_v6, 16  ;;  %v1836_v45 = vshrl.u32 %v1663_v37, 16  ;;  %v1854_v50 = vrot.slane %v1852_v58, 7 }
 0x173   : > { %v1822_v55 = vsel %vm478_vm1, %v1814_v47, %v1821_v49  ;;  %v3660_v47 = vld [vmem:[#allocation2 + $0x280] sm:$0x1]  ;;  %v3662_v49 = vld [vmem:[#allocation2 + $0x298] sm:$0x1] }
 0x174   : > { %v3732_v23 = vsel %vm1169_vm0, %v3727_v28, %v3731_v20  ;;  %v1838_v51 = vrot.slane %v1836_v45, 7  ;;  %v3789_v28 = vshll.u32 %v3660_v47, 16  ;;  %v3801_v59 = vshll.u32 %v3662_v49, 16  ;;  %v4173_v49 = vld [vmem:[%s22606_s21 + $0x18] sm:$0xff] }
 0x175   : > { %20285 = vmatpush3.bf16.msra.mxu1 %v21835_v60  ;;  %v3753_v60 = vshll.u32 %v3654_v43, 16  ;;  %v3846_v45 = vrot.slane %v1855_v42, 1 }
 0x176   : > { %18491 = vmatmul.mubr.bf16.gmra.mrb[28].mxu0 %v23226_v36  ;;  %v1786_v36 = vsel %vm478_vm1, %v1778_v39, %v1785_v10  ;;  %v3748_v39 = vshll.u32 %v3653_v26, 16  ;;  %v1810_v10 = vsel %vm478_vm1, %v1802_v5, %v1809_v29  ;;  %v1846_v3 = vsel %vm478_vm1, %v1838_v51, %v1845_v30 }
 0x177   : > { %18510 = vmatprep.mubr.bf16.mxu0 %v3684_v34  ;;  %v3736_v34 = vshll.u32 %v3651_v6, 16  ;;  %v3755_v15 = vrot.slane %v3753_v60, 1  ;;  %v3765_v6 = vshll.u32 %v3656_v11, 16  ;;  %v1857_v26 = vor.u32 %v1855_v42, %v1854_v50 }
 0x178   : > { %18287 = vmatmul.mubr.bf16.gmra.mrb[16].mxu1 %v1786_v36  ;;  %v3750_v44 = vrot.slane %v3748_v39, 1  ;;  %v1826_v36 = vrot.slane %v1824_v33, 7  ;;  %v3791_v37 = vrot.slane %v3789_v28, 1  ;;  %v3803_v39 = vrot.slane %v3801_v59, 1  ;;  %v3666_v33 = vld [vmem:[#allocation2 + $0x2c8] sm:$0x1] }
 0x179   : > { %18290 = vmatprep.mubr.bf16.mxu1 %v1798_v9  ;;  %v3738_v19 = vrot.slane %v3736_v34, 1  ;;  %v3767_v18 = vrot.slane %v3765_v6, 1  ;;  %v4172_v6 = vld [vmem:[%s22606_s21 + $0x10] sm:$0xff] }
 0x17a   : > { %v3751_v40 = vor.u32 %v3750_v44, %v3746_v22  ;;  %v1834_v9 = vsel %vm478_vm1, %v1826_v36, %v1833_v38  ;;  %v3792_v43 = vsel %vm1169_vm0, %v23376_v54, %v3791_v37 }
 0x17b   : > { %v3739_v0 = vor.u32 %v3738_v19, %v3734_v8  ;;  %v3768_v34 = vsel %vm1169_vm0, %v23345_v61, %v3767_v18  ;;  %v3804_v61 = vsel %vm1169_vm0, %v23383_v25, %v3803_v39  ;;  %v3670_v8 = vld [vmem:[#allocation2 + $0x2f8] sm:$0x1] }
 0x17c   : > { %v3756_v48 = vsel %vm1169_vm0, %v3751_v40, %v3755_v15  ;;  %v3849_v25 = vshll.u32 %v3670_v8, 16 }
 0x17d   : > { %v3744_v62 = vsel %vm1169_vm0, %v3739_v0, %v3743_v31 }
 0x17e   : > { %18511 = vmatmul.mubr.bf16.vlgmr.msra.gmra.mrb[0].mxu0 %v3696_v21  ;;  %v3658_v21 = vld [vmem:[#allocation2 + $0x268] sm:$0x1]  ;;  %v3851_v22 = vrot.slane %v3849_v25, 1  ;;  %v4177_v25 = vld [vmem:[%s22606_s21 + $0x38] sm:$0xff] }
 0x17f   : > { %18514 = vmatprep.mubr.bf16.mxu0 %v3708_v46  ;;  %v1848_v46 = vshrl.u32 %v1665_v53, 16  ;;  %v3777_v5 = vshll.u32 %v3658_v21, 16 }
 0x180   : > { %18291 = vmatmul.mubr.bf16.gmra.mrb[20].mxu1 %v1810_v10  ;;  %v3664_v10 = vld [vmem:[#allocation2 + $0x2b0] sm:$0x1] }
 0x181   : > { %18294 = vmatprep.mubr.bf16.mxu1 %v1822_v55  ;;  %v1850_v29 = vrot.slane %v1848_v46, 7  ;;  %v3779_v24 = vrot.slane %v3777_v5, 1  ;;  %v3825_v55 = vshll.u32 %v3666_v33, 16 }
 0x183   : > { %v1858_v14 = vsel %vm478_vm1, %v1850_v29, %v1857_v26  ;;  %v3780_v20 = vsel %vm1169_vm0, %v23351_v52, %v3779_v24  ;;  %v3827_v52 = vrot.slane %v3825_v55, 1  ;;  %v4170_v26 = vld [vmem:[%s22606_s21] sm:$0xff] }
 0x185   : > { %v3828_v54 = vsel %vm1169_vm0, %v23409_v2, %v3827_v52 }
 0x186   : > { %18515 = vmatmul.mubr.bf16.gmra.mrb[4].mxu0 %v3720_v13  ;;  %v3813_v13 = vshll.u32 %v3664_v10, 16 }
 0x187   : > { %18518 = vmatprep.mubr.bf16.mxu0 %v3732_v23  ;;  %v3847_v23 = vor.u32 %v3846_v45, %v1852_v58 }
 0x188   : > { %18295 = vmatmul.mubr.bf16.gmra.mrb[24].mxu1 %v1834_v9 }
 0x189   : > { %18298 = vmatprep.mubr.bf16.mxu1 %v1846_v3 }
 0x18e   : > { %18519 = vmatmul.mubr.bf16.gmra.mrb[8].mxu0 %v3744_v62 }
 0x18f   : > { %18522 = vmatprep.mubr.bf16.mxu0 %v3756_v48 }
 0x190   : > { %18299 = vmatmul.mubr.bf16.gmra.mrb[28].mxu1 %v1858_v14 }
 0x191   : > { %18334 = vmatprep.mubr.bf16.mxu1 %v23314_v56  ;;  %v3815_v56 = vrot.slane %v3813_v13, 1 }
 0x193   : > { %v3816_v19 = vsel %vm1169_vm0, %v23403_v41, %v3815_v56  ;;  %v3672_v41 = vld [vmem:[#allocation2 + $0x310] sm:$0x1] }
 0x194   : > { %v3861_v36 = vshll.u32 %v3672_v41, 16  ;;  %v4176_v56 = vld [vmem:[%s22606_s21 + $0x30] sm:$0xff] }
 0x196   : > { %18523 = vmatmul.mubr.bf16.gmra.mrb[12].mxu0 %v3768_v34  ;;  %v3863_v38 = vrot.slane %v3861_v36, 1 }
 0x197   : > { %18526 = vmatprep.mubr.bf16.mxu0 %v3780_v20  ;;  %v4171_v20 = vld [vmem:[%s22606_s21 + $0x8] sm:$0xff] }
 0x198   : > { %18335 = vmatmul.mubr.bf16.vlgmr.msra.gmra.mrb[16].mxu1 %v23317_v1  ;;  %v3839_v1 = vrot.slane %v3837_v12, 1 }
 0x199   : > { %18338 = vmatprep.mubr.bf16.mxu1 %v23338_v27  ;;  %v21836_v27 = vld [vmem:[#allocation2] sm:$0xff] }
 0x19a   : > { %v3856_v63 = vshll.u32 %v21836_v27, 16  ;;  %v3840_v44 = vsel %vm1169_vm0, %v23423_v32, %v3839_v1  ;;  %v3854_v2 = vshrl.u32 %v21836_v27, 16 }
 0x19c   : > { %v3858_v60 = vrot.slane %v3856_v63, 1 }
 0x19e   : > { %18527 = vmatmul.mubr.bf16.gmra.mrb[16].mxu0 %v3792_v43 }
 0x19f   : > { %18530 = vmatprep.mubr.bf16.mxu0 %v3804_v61 }
 0x1a0   : > { %18339 = vmatmul.mubr.bf16.gmra.mrb[20].mxu1 %v23340_v4  ;;  %v3852_v4 = vsel %vm1169_vm0, %v3847_v23, %v3851_v22  ;;  %v4175_v23 = vld [vmem:[%s22606_s21 + $0x28] sm:$0xff] }
 0x1a1   : > { %18342 = vmatprep.mubr.bf16.mxu1 %v23364_v35  ;;  %v3859_v35 = vor.u32 %v3858_v60, %v3854_v2 }
 0x1a3   : > { %v3864_v58 = vsel %vm1169_vm0, %v3859_v35, %v3863_v38 }
 0x1a6   : > { %18531 = vmatmul.mubr.bf16.gmra.mrb[20].mxu0 %v3816_v19  ;;  %v4174_v19 = vld [vmem:[%s22606_s21 + $0x20] sm:$0xff] }
 0x1a7   : > { %18534 = vmatprep.mubr.bf16.mxu0 %v3828_v54 }
 0x1a8   : > { %18343 = vmatmul.mubr.bf16.gmra.mrb[24].mxu1 %v23367_v57 }
 0x1a9   : > { %18346 = vmatprep.mubr.bf16.mxu1 %v23397_v17 }
 0x1ae   : > { %18535 = vmatmul.mubr.bf16.gmra.mrb[24].mxu0 %v3840_v44 }
 0x1af   : > { %18538 = vmatprep.mubr.bf16.mxu0 %v3852_v4 }
 0x1b0   : > { %18347 = vmatmul.mubr.bf16.gmra.mrb[28].mxu1 %v23488_v16 }
 0x1b6   : > { %18539 = vmatmul.mubr.bf16.gmra.mrb[28].mxu0 %v3864_v58  ;;  %v4180_v58 = vld [vmem:[%s22606_s21 + $0x50] sm:$0xff] }
 0x22b   : > { %v18272_v0 = vpop.f32.mrb[0].mxu1 }
 0x22c   : > { %v1973_v32 = vpop.f32.mrb[1].mxu1 }
 0x22d   : > { %v18273_v31 = vpop.f32.mrb[2].mxu1 }
 0x22e   : > { %v1976_v51 = vpop.f32.mrb[3].mxu1 }
 0x233   : > { %v18276_v30 = vpop.f32.mrb[4].mxu1 }
 0x234   : > { %v1989_v53 = vpop.f32.mrb[5].mxu1 }
 0x235   : > { %v18277_v40 = vpop.f32.mrb[6].mxu1 }
 0x236   : > { %v1992_v57 = vpop.f32.mrb[7].mxu1 }
 0x23b   : > { %v23530_v15 = vpop.f32.mrb[8].mxu1 }
 0x23c   : > { %v23532_v17 = vpop.f32.mrb[9].mxu1 }
 0x23d   : > { %v23534_v11 = vpop.f32.mrb[10].mxu1 }
 0x23e   : > { %v23536_v21 = vpop.f32.mrb[11].mxu1 }
 0x243   : > { %v23538_v16 = vpop.f32.mrb[12].mxu1 }
 0x244   : > { %v23540_v9 = vpop.f32.mrb[13].mxu1 }
 0x245   : > { %v23542_v46 = vpop.f32.mrb[14].mxu1 }
 0x246   : > { %v23544_v50 = vpop.f32.mrb[15].mxu1 }
 0x251   : > { %v18512_v42 = vpop.f32.mrb[0].mxu0 }
 0x252   : > { %v20286_v62 = vadd.f32 %v18512_v42, %v18272_v0  ;;  %v3979_v3 = vpop.f32.mrb[1].mxu0 }
 0x253   : > { %v20287_v48 = vadd.f32 %v3979_v3, %v1973_v32  ;;  %v18513_v5 = vpop.f32.mrb[2].mxu0  ;;  %v4179_v3 = vld [vmem:[%s22606_s21 + $0x48] sm:$0xff] }
 0x254   : > { %v4140_v29 = vmax.f32 %v20286_v62, 0.0  ;;  %v20288_v18 = vadd.f32 %v18513_v5, %v18273_v31  ;;  %v3982_v24 = vpop.f32.mrb[3].mxu0 }
 0x255   : > { %v4138_v47 = vmax.f32 %v20287_v48, 0.0  ;;  %v20289_v14 = vadd.f32 %v3982_v24, %v1976_v51  ;;  %v4178_v51 = vld [vmem:[%s22606_s21 + $0x40] sm:$0xff]  ;;  %v4184_v24 = vld [vmem:[%s22606_s21 + $0x70] sm:$0xff] }
 0x256   : > { %v4204_v34 = vadd.f32 %v4172_v6, %v4140_v29  ;;  %v4141_v28 = vmax.f32 %v20288_v18, 0.0 }
 0x257   : > { %v4202_v59 = vadd.f32 %v4170_v26, %v4138_v47  ;;  %v4139_v37 = vmax.f32 %v20289_v14, 0.0 }
 0x258   : > { %4236 = vst [vmem:[%s22606_s21 + $0x10] sm:$0xff] %v4204_v34  ;;  %v4205_v39 = vadd.f32 %v4173_v49, %v4141_v28  ;;  %v4267_v10 = vpack.c.bf16 %v4141_v28, %v4140_v29  ;;  %v4182_v34 = vld [vmem:[%s22606_s21 + $0x60] sm:$0xff] }
 0x259   : > { %4234 = vst [vmem:[%s22606_s21] sm:$0xff] %v4202_v59  ;;  %v4203_v33 = vadd.f32 %v4171_v20, %v4139_v37  ;;  %v4266_v43 = vpack.c.bf16 %v4139_v37, %v4138_v47  ;;  %v18516_v13 = vpop.f32.mrb[4].mxu0  ;;  %v4185_v37 = vld [vmem:[%s22606_s21 + $0x78] sm:$0xff] }
 0x25a   : > { %4237 = vst [vmem:[%s22606_s21 + $0x18] sm:$0xff] %v4205_v39  ;;  %4283 = vst [vmem:[#allocation2 + $0x1a0] sm:$0xff] %v4267_v10  ;;  %v20290_v61 = vadd.f32 %v18516_v13, %v18276_v30  ;;  %v3995_v55 = vpop.f32.mrb[5].mxu0 }
 0x25b   : > { %4235 = vst [vmem:[%s22606_s21 + $0x8] sm:$0xff] %v4203_v33  ;;  %4282 = vst [vmem:[#allocation2 + $0x188] sm:$0xff] %v4266_v43  ;;  %v20291_v52 = vadd.f32 %v3995_v55, %v1989_v53  ;;  %v18517_v7 = vpop.f32.mrb[6].mxu0  ;;  %v4183_v33 = vld [vmem:[%s22606_s21 + $0x68] sm:$0xff] }
 0x25c   : > { %v4144_v8 = vmax.f32 %v20290_v61, 0.0  ;;  %v20292_v12 = vadd.f32 %v18517_v7, %v18277_v40  ;;  %v3998_v54 = vpop.f32.mrb[7].mxu0 }
 0x25d   : > { %v4142_v45 = vmax.f32 %v20291_v52, 0.0  ;;  %v20293_v1 = vadd.f32 %v3998_v54, %v1992_v57  ;;  %v4181_v57 = vld [vmem:[%s22606_s21 + $0x58] sm:$0xff] }
 0x25e   : > { %v4208_v27 = vadd.f32 %v4176_v56, %v4144_v8  ;;  %v4145_v63 = vmax.f32 %v20292_v12, 0.0  ;;  %v4188_v12 = vld [vmem:[%s22606_s21 + $0x90] sm:$0xff] }
 0x25f   : > { %v4206_v22 = vadd.f32 %v4174_v19, %v4142_v45  ;;  %v4143_v41 = vmax.f32 %v20293_v1, 0.0 }
 0x260   : > { %4240 = vst [vmem:[%s22606_s21 + $0x30] sm:$0xff] %v4208_v27  ;;  %v4209_v44 = vadd.f32 %v4177_v25, %v4145_v63  ;;  %v4269_v2 = vpack.c.bf16 %v4145_v63, %v4144_v8  ;;  %v4186_v27 = vld [vmem:[%s22606_s21 + $0x80] sm:$0xff] }
 0x261   : > { %4238 = vst [vmem:[%s22606_s21 + $0x20] sm:$0xff] %v4206_v22  ;;  %v4207_v60 = vadd.f32 %v4175_v23, %v4143_v41  ;;  %v4268_v36 = vpack.c.bf16 %v4143_v41, %v4142_v45  ;;  %v18520_v4 = vpop.f32.mrb[8].mxu0  ;;  %v4189_v41 = vld [vmem:[%s22606_s21 + $0x98] sm:$0xff] }
 0x262   : > { %4241 = vst [vmem:[%s22606_s21 + $0x38] sm:$0xff] %v4209_v44  ;;  %4285 = vst [vmem:[#allocation2 + $0x1d0] sm:$0xff] %v4269_v2  ;;  %v20294_v35 = vadd.f32 %v18520_v4, %v23530_v15  ;;  %v4011_v38 = vpop.f32.mrb[9].mxu0 }
 0x263   : > { %4239 = vst [vmem:[%s22606_s21 + $0x28] sm:$0xff] %v4207_v60  ;;  %4284 = vst [vmem:[#allocation2 + $0x1b8] sm:$0xff] %v4268_v36  ;;  %v20295_v0 = vadd.f32 %v4011_v38, %v23532_v17  ;;  %v18521_v32 = vpop.f32.mrb[10].mxu0  ;;  %v4187_v36 = vld [vmem:[%s22606_s21 + $0x88] sm:$0xff] }
 0x264   : > { %v4148_v31 = vmax.f32 %v20294_v35, 0.0  ;;  %v20296_v30 = vadd.f32 %v18521_v32, %v23534_v11  ;;  %v4014_v53 = vpop.f32.mrb[11].mxu0 }
 0x265   : > { %v4146_v40 = vmax.f32 %v20295_v0, 0.0  ;;  %v20297_v15 = vadd.f32 %v4014_v53, %v23536_v21 }
 0x266   : > { %v4212_v42 = vadd.f32 %v4180_v58, %v4148_v31  ;;  %v4149_v62 = vmax.f32 %v20296_v30, 0.0 }
 0x267   : > { %v4210_v6 = vadd.f32 %v4178_v51, %v4146_v40  ;;  %v4147_v48 = vmax.f32 %v20297_v15, 0.0  ;;  %v4192_v15 = vld [vmem:[%s22606_s21 + $0xb0] sm:$0xff] }
 0x268   : > { %4244 = vst [vmem:[%s22606_s21 + $0x50] sm:$0xff] %v4212_v42  ;;  %v4213_v17 = vadd.f32 %v4181_v57, %v4149_v62  ;;  %v4271_v5 = vpack.c.bf16 %v4149_v62, %v4148_v31 }
 0x269   : > { %4242 = vst [vmem:[%s22606_s21 + $0x40] sm:$0xff] %v4210_v6  ;;  %v4211_v29 = vadd.f32 %v4179_v3, %v4147_v48  ;;  %v4270_v11 = vpack.c.bf16 %v4147_v48, %v4146_v40  ;;  %v18524_v26 = vpop.f32.mrb[12].mxu0  ;;  %v4190_v48 = vld [vmem:[%s22606_s21 + $0xa0] sm:$0xff] }
 0x26a   : > { %4245 = vst [vmem:[%s22606_s21 + $0x58] sm:$0xff] %v4213_v17  ;;  %4287 = vst [vmem:[#allocation2 + $0x200] sm:$0xff] %v4271_v5  ;;  %v20298_v21 = vadd.f32 %v18524_v26, %v23538_v16  ;;  %v4027_v18 = vpop.f32.mrb[13].mxu0 }
 0x26b   : > { %4243 = vst [vmem:[%s22606_s21 + $0x48] sm:$0xff] %v4211_v29  ;;  %4286 = vst [vmem:[#allocation2 + $0x1e8] sm:$0xff] %v4270_v11  ;;  %v20299_v47 = vadd.f32 %v4027_v18, %v23540_v9  ;;  %v18525_v49 = vpop.f32.mrb[14].mxu0  ;;  %v18336_v55 = vpop.f32.mrb[16].mxu1  ;;  %v4193_v11 = vld [vmem:[%s22606_s21 + $0xb8] sm:$0xff] }
 0x26c   : > { %v4152_v14 = vmax.f32 %v20298_v21, 0.0  ;;  %v20300_v28 = vadd.f32 %v18525_v49, %v23542_v46  ;;  %v4030_v20 = vpop.f32.mrb[15].mxu0  ;;  %v2294_v7 = vpop.f32.mrb[17].mxu1 }
 0x26d   : > { %v4150_v59 = vmax.f32 %v20299_v47, 0.0  ;;  %v20301_v16 = vadd.f32 %v4030_v20, %v23544_v50  ;;  %v18337_v19 = vpop.f32.mrb[18].mxu1 }
 0x26e   : > { %v4216_v39 = vadd.f32 %v4184_v24, %v4152_v14  ;;  %v4153_v10 = vmax.f32 %v20300_v28, 0.0  ;;  %v2297_v25 = vpop.f32.mrb[19].mxu1  ;;  %v4191_v24 = vld [vmem:[%s22606_s21 + $0xa8] sm:$0xff] }
 0x26f   : > { %v4214_v43 = vadd.f32 %v4182_v34, %v4150_v59  ;;  %v4151_v13 = vmax.f32 %v20301_v16, 0.0 }
 0x270   : > { %4248 = vst [vmem:[%s22606_s21 + $0x70] sm:$0xff] %v4216_v39  ;;  %v4217_v9 = vadd.f32 %v4185_v37, %v4153_v10  ;;  %v4273_v61 = vpack.c.bf16 %v4153_v10, %v4152_v14 }
 0x271   : > { %4246 = vst [vmem:[%s22606_s21 + $0x60] sm:$0xff] %v4214_v43  ;;  %v4215_v56 = vadd.f32 %v4183_v33, %v4151_v13  ;;  %v4272_v46 = vpack.c.bf16 %v4151_v13, %v4150_v59  ;;  %v18528_v52 = vpop.f32.mrb[16].mxu0  ;;  %v4196_v43 = vld [vmem:[%s22606_s21 + $0xd0] sm:$0xff] }
 0x272   : > { %4249 = vst [vmem:[%s22606_s21 + $0x78] sm:$0xff] %v4217_v9  ;;  %4289 = vst [vmem:[#allocation2 + $0x230] sm:$0xff] %v4273_v61  ;;  %v20302_v50 = vadd.f32 %v18528_v52, %v18336_v55  ;;  %v4043_v8 = vpop.f32.mrb[17].mxu0 }
 0x273   : > { %4247 = vst [vmem:[%s22606_s21 + $0x68] sm:$0xff] %v4215_v56  ;;  %4288 = vst [vmem:[#allocation2 + $0x218] sm:$0xff] %v4272_v46  ;;  %v20303_v54 = vadd.f32 %v4043_v8, %v2294_v7  ;;  %v18529_v45 = vpop.f32.mrb[18].mxu0  ;;  %v18340_v0 = vpop.f32.mrb[20].mxu1  ;;  %v4194_v56 = vld [vmem:[%s22606_s21 + $0xc0] sm:$0xff] }
 0x274   : > { %v4156_v1 = vmax.f32 %v20302_v50, 0.0  ;;  %v20304_v63 = vadd.f32 %v18529_v45, %v18337_v19  ;;  %v4046_v23 = vpop.f32.mrb[19].mxu0  ;;  %v2310_v30 = vpop.f32.mrb[21].mxu1  ;;  %v4197_v50 = vld [vmem:[%s22606_s21 + $0xd8] sm:$0xff] }
 0x275   : > { %v4154_v22 = vmax.f32 %v20303_v54, 0.0  ;;  %v20305_v44 = vadd.f32 %v4046_v23, %v2297_v25  ;;  %v18341_v57 = vpop.f32.mrb[22].mxu1  ;;  %v4195_v54 = vld [vmem:[%s22606_s21 + $0xc8] sm:$0xff] }
 0x276   : > { %v4220_v2 = vadd.f32 %v4188_v12, %v4156_v1  ;;  %v4157_v60 = vmax.f32 %v20304_v63, 0.0  ;;  %v2313_v3 = vpop.f32.mrb[23].mxu1 }
 0x277   : > { %v4218_v4 = vadd.f32 %v4186_v27, %v4154_v22  ;;  %v4155_v35 = vmax.f32 %v20305_v44, 0.0 }
 0x278   : > { %4252 = vst [vmem:[%s22606_s21 + $0x90] sm:$0xff] %v4220_v2  ;;  %v4221_v38 = vadd.f32 %v4189_v41, %v4157_v60  ;;  %v4275_v58 = vpack.c.bf16 %v4157_v60, %v4156_v1 }
 0x279   : > { %4250 = vst [vmem:[%s22606_s21 + $0x80] sm:$0xff] %v4218_v4  ;;  %v4219_v32 = vadd.f32 %v4187_v36, %v4155_v35  ;;  %v4274_v31 = vpack.c.bf16 %v4155_v35, %v4154_v22  ;;  %v18532_v51 = vpop.f32.mrb[20].mxu0  ;;  %v4200_v4 = vld [vmem:[%s22606_s21 + $0xf0] sm:$0xff] }
 0x27a   : > { %4253 = vst [vmem:[%s22606_s21 + $0x98] sm:$0xff] %v4221_v38  ;;  %4291 = vst [vmem:[#allocation2 + $0x260] sm:$0xff] %v4275_v58  ;;  %v20306_v53 = vadd.f32 %v18532_v51, %v18340_v0  ;;  %v4059_v40 = vpop.f32.mrb[21].mxu0 }
 0x27b   : > { %4251 = vst [vmem:[%s22606_s21 + $0x88] sm:$0xff] %v4219_v32  ;;  %4290 = vst [vmem:[#allocation2 + $0x248] sm:$0xff] %v4274_v31  ;;  %v20307_v42 = vadd.f32 %v4059_v40, %v2310_v30  ;;  %v18533_v62 = vpop.f32.mrb[22].mxu0  ;;  %v18344_v28 = vpop.f32.mrb[24].mxu1  ;;  %v4198_v32 = vld [vmem:[%s22606_s21 + $0xe0] sm:$0xff] }
 0x27c   : > { %v4160_v6 = vmax.f32 %v20306_v53, 0.0  ;;  %v20308_v17 = vadd.f32 %v18533_v62, %v18341_v57  ;;  %v4062_v5 = vpop.f32.mrb[23].mxu0  ;;  %v2326_v16 = vpop.f32.mrb[25].mxu1  ;;  %v4201_v53 = vld [vmem:[%s22606_s21 + $0xf8] sm:$0xff] }
 0x27d   : > { %v4158_v29 = vmax.f32 %v20307_v42, 0.0  ;;  %v20309_v26 = vadd.f32 %v4062_v5, %v2313_v3  ;;  %v18345_v33 = vpop.f32.mrb[26].mxu1  ;;  %v4199_v42 = vld [vmem:[%s22606_s21 + $0xe8] sm:$0xff] }
 0x27e   : > { %v4224_v21 = vadd.f32 %v4192_v15, %v4160_v6  ;;  %v4161_v18 = vmax.f32 %v20308_v17, 0.0  ;;  %v2329_v61 = vpop.f32.mrb[27].mxu1 }
 0x27f   : > { %v4222_v47 = vadd.f32 %v4190_v48, %v4158_v29  ;;  %v4159_v49 = vmax.f32 %v20309_v26, 0.0 }
 0x280   : > { %4256 = vst [vmem:[%s22606_s21 + $0xb0] sm:$0xff] %v4224_v21  ;;  %v4225_v14 = vadd.f32 %v4193_v11, %v4161_v18  ;;  %v4277_v34 = vpack.c.bf16 %v4161_v18, %v4160_v6 }
 0x281   : > { %4254 = vst [vmem:[%s22606_s21 + $0xa0] sm:$0xff] %v4222_v47  ;;  %v4223_v20 = vadd.f32 %v4191_v24, %v4159_v49  ;;  %v4276_v59 = vpack.c.bf16 %v4159_v49, %v4158_v29  ;;  %v18536_v37 = vpop.f32.mrb[24].mxu0 }
 0x282   : > { %4257 = vst [vmem:[%s22606_s21 + $0xb8] sm:$0xff] %v4225_v14  ;;  %4293 = vst [vmem:[#allocation2 + $0x290] sm:$0xff] %v4277_v34  ;;  %v20310_v39 = vadd.f32 %v18536_v37, %v18344_v28  ;;  %v4075_v10 = vpop.f32.mrb[25].mxu0 }
 0x283   : > { %4255 = vst [vmem:[%s22606_s21 + $0xa8] sm:$0xff] %v4223_v20  ;;  %4292 = vst [vmem:[#allocation2 + $0x278] sm:$0xff] %v4276_v59  ;;  %v20311_v13 = vadd.f32 %v4075_v10, %v2326_v16  ;;  %v18537_v9 = vpop.f32.mrb[26].mxu0  ;;  %v18348_v63 = vpop.f32.mrb[28].mxu1 }
 0x284   : > { %v4164_v55 = vmax.f32 %v20310_v39, 0.0  ;;  %v20312_v46 = vadd.f32 %v18537_v9, %v18345_v33  ;;  %v4078_v52 = vpop.f32.mrb[27].mxu0  ;;  %v2342_v44 = vpop.f32.mrb[29].mxu1 }
 0x285   : > { %v4162_v7 = vmax.f32 %v20311_v13, 0.0  ;;  %v20313_v8 = vadd.f32 %v4078_v52, %v2329_v61  ;;  %v18349_v36 = vpop.f32.mrb[30].mxu1 }
 0x286   : > { %v4228_v19 = vadd.f32 %v4196_v43, %v4164_v55  ;;  %v4165_v12 = vmax.f32 %v20312_v46, 0.0  ;;  %v2345_v58 = vpop.f32.mrb[31].mxu1 }
 0x287   : > { %v4226_v45 = vadd.f32 %v4194_v56, %v4162_v7  ;;  %v4163_v25 = vmax.f32 %v20313_v8, 0.0 }
 0x288   : > { %4260 = vst [vmem:[%s22606_s21 + $0xd0] sm:$0xff] %v4228_v19  ;;  %v4229_v1 = vadd.f32 %v4197_v50, %v4165_v12  ;;  %v4279_v27 = vpack.c.bf16 %v4165_v12, %v4164_v55 }
 0x289   : > { %4258 = vst [vmem:[%s22606_s21 + $0xc0] sm:$0xff] %v4226_v45  ;;  %v4227_v23 = vadd.f32 %v4195_v54, %v4163_v25  ;;  %v4278_v22 = vpack.c.bf16 %v4163_v25, %v4162_v7  ;;  %v18540_v41 = vpop.f32.mrb[28].mxu0 }
 0x28a   : > { %4261 = vst [vmem:[%s22606_s21 + $0xd8] sm:$0xff] %v4229_v1  ;;  %4295 = vst [vmem:[#allocation2 + $0x2c0] sm:$0xff] %v4279_v27  ;;  %v20314_v2 = vadd.f32 %v18540_v41, %v18348_v63  ;;  %v4091_v60 = vpop.f32.mrb[29].mxu0 }
 0x28b   : > { %4259 = vst [vmem:[%s22606_s21 + $0xc8] sm:$0xff] %v4227_v23  ;;  %4294 = vst [vmem:[#allocation2 + $0x2a8] sm:$0xff] %v4278_v22  ;;  %v20315_v35 = vadd.f32 %v4091_v60, %v2342_v44  ;;  %v18541_v38 = vpop.f32.mrb[30].mxu0 }
 0x28c   : > { %v4168_v0 = vmax.f32 %v20314_v2, 0.0  ;;  %v20316_v31 = vadd.f32 %v18541_v38, %v18349_v36  ;;  %v4094_v51 = vpop.f32.mrb[31].mxu0 }
 0x28d   : > { %v4166_v30 = vmax.f32 %v20315_v35, 0.0  ;;  %v20317_v40 = vadd.f32 %v4094_v51, %v2345_v58 }
 0x28e   : > { %v4232_v57 = vadd.f32 %v4200_v4, %v4168_v0  ;;  %v4169_v15 = vmax.f32 %v20316_v31, 0.0 }
 0x28f   : > { %v4230_v62 = vadd.f32 %v4198_v32, %v4166_v30  ;;  %v4167_v3 = vmax.f32 %v20317_v40, 0.0 }
 0x290   : > { %4264 = vst [vmem:[%s22606_s21 + $0xf0] sm:$0xff] %v4232_v57  ;;  %v4233_v6 = vadd.f32 %v4201_v53, %v4169_v15  ;;  %v4281_v48 = vpack.c.bf16 %v4169_v15, %v4168_v0 }
 0x291   : > { %4262 = vst [vmem:[%s22606_s21 + $0xe0] sm:$0xff] %v4230_v62  ;;  %v4231_v17 = vadd.f32 %v4199_v42, %v4167_v3  ;;  %v4280_v5 = vpack.c.bf16 %v4167_v3, %v4166_v30 }
 0x292   : > { %4265 = vst [vmem:[%s22606_s21 + $0xf8] sm:$0xff] %v4233_v6  ;;  %4297 = vst [vmem:[#allocation2 + $0x2f0] sm:$0xff] %v4281_v48 }
 0x293   : > { %4263 = vst [vmem:[%s22606_s21 + $0xe8] sm:$0xff] %v4231_v17  ;;  %4296 = vst [vmem:[#allocation2 + $0x2d8] sm:$0xff] %v4280_v5 }
 0x294 PF: > { %p16731_p6 = scmp.ne.s32.totalorder %s22327_s15, 1 }
 0x295   : > { %v21837_v29 = vld [vmem:[%s22600_s30 + $0x40] sm:$0xff] (!%p16731_p6)   ;;  %v21839_v26 = vld [vmem:[%s22600_s30 + $0x48] sm:$0xff] (!%p16731_p6)   ;;  %v21841_v18 = vld [vmem:[%s22600_s30 + $0x50] sm:$0xff] (!%p16731_p6)   ;;  %vm4962_vm2 = vcmask (!%p16731_p6), 1046528   ;;  %vm4367_vm3 = vcmask (!%p16731_p6), 1040384  }
 0x296   : > { %4301 = sbr.rel (%p16731_p6) target bundleno = 1197 (0x4ad), region = 44  ;;  %v21838_v11 = vld [vmem:[%s22600_s30 + $0x100] sm:$0xff] (!%p16731_p6)   ;;  %18542 = vmatprep.subr.bf16.mxu1 (!%p16731_p6), %v21837_v29  ;;  %v21840_v21 = vld [vmem:[%s22600_s30 + $0x108] sm:$0xff] (!%p16731_p6)   ;;  %v21842_v24 = vld [vmem:[%s22600_s30 + $0x110] sm:$0xff] (!%p16731_p6)  }
 0x297   : > { %18734 = vmatprep.subr.bf16.mxu0 (!%p16731_p6), %v21838_v11  ;;  %18543 = vmatpush3.bf16.msra.mxu1 (!%p16731_p6), %v21837_v29  ;;  %v21843_v47 = vld [vmem:[%s22600_s30 + $0x58] sm:$0xff] (!%p16731_p6)   ;;  %v21845_v14 = vld [vmem:[%s22600_s30 + $0x60] sm:$0xff] (!%p16731_p6)   ;;  %v21847_v28 = vld [vmem:[%s22600_s30 + $0x68] sm:$0xff] (!%p16731_p6)  }
 0x298   : > { %18735 = vmatpush3.bf16.msra.mxu0 (!%p16731_p6), %v21838_v11  ;;  %18544 = vmatprep.subr.bf16.mxu1 (!%p16731_p6), %v21839_v26  ;;  %v21844_v49 = vld [vmem:[%s22600_s30 + $0x118] sm:$0xff] (!%p16731_p6)   ;;  %v21846_v34 = vld [vmem:[%s22600_s30 + $0x120] sm:$0xff] (!%p16731_p6)   ;;  %v5670_v59 = vld [vmem:[#allocation2 + $0x188] sm:$0xff] (!%p16731_p6) }
 0x299   : > { %18736 = vmatprep.subr.bf16.mxu0 (!%p16731_p6), %v21840_v21  ;;  %v4448_v20 = vld [vmem:[#allocation2 + $0x158] sm:$0xff] (!%p16731_p6)  ;;  %v21848_v37 = vld [vmem:[%s22600_s30 + $0x128] sm:$0xff] (!%p16731_p6)   ;;  %18750 = vmatprep.mubr.bf16.mxu0 (!%p16731_p6), %v5670_v59  ;;  %v21849_v16 = vld [vmem:[%s22600_s30 + $0x70] sm:$0xff] (!%p16731_p6)  }
 0x29a   : > { %18558 = vmatprep.mubr.bf16.mxu1 (!%p16731_p6), %v4448_v20  ;;  %v21850_v39 = vld [vmem:[%s22600_s30 + $0x130] sm:$0xff] (!%p16731_p6)   ;;  %v21851_v10 = vld [vmem:[%s22600_s30 + $0x78] sm:$0xff] (!%p16731_p6)   ;;  %v21853_v43 = vld [vmem:[%s22600_s30] sm:$0xff] (!%p16731_p6)  }
 0x29b   : > { %18545 = vmatpush3.bf16.msra.mxu1 (!%p16731_p6), %v21839_v26  ;;  %v21852_v33 = vld [vmem:[%s22600_s30 + $0x138] sm:$0xff] (!%p16731_p6)   ;;  %v21854_v13 = vld [vmem:[%s22600_s30 + $0x140] sm:$0xff] (!%p16731_p6)   ;;  %v4449_v9 = vld [vmem:[#allocation2 + $0x170] sm:$0xff] (!%p16731_p6) }
 0x29c   : > { %18737 = vmatpush3.bf16.msra.mxu0 (!%p16731_p6), %v21840_v21  ;;  %18546 = vmatprep.subr.bf16.mxu1 (!%p16731_p6), %v21841_v18  ;;  %v5671_v61 = vld [vmem:[#allocation2 + $0x1a0] sm:$0xff] (!%p16731_p6)  ;;  %v21855_v55 = vld [vmem:[%s22600_s30 + $0x148] sm:$0xff] (!%p16731_p6)   ;;  %v5672_v56 = vld [vmem:[#allocation2 + $0x1b8] sm:$0xff] (!%p16731_p6) }
 0x29d   : > { %18738 = vmatprep.subr.bf16.mxu0 %v21842_v24  ;;  %v21856_v46 = vld [vmem:[%s22600_s30 + $0x8] sm:$0xff]   ;;  %v21859_v52 = vld [vmem:[%s22600_s30 + $0x10] sm:$0xff]   ;;  %v21858_v8 = vld [vmem:[%s22600_s30 + $0x158] sm:$0xff]  }
 0x29e   : > { %v21857_v7 = vld [vmem:[%s22600_s30 + $0x150] sm:$0xff]   ;;  %v5674_v19 = vld [vmem:[#allocation2 + $0x1e8] sm:$0xff]  ;;  %v21862_v12 = vld [vmem:[%s22600_s30 + $0x18] sm:$0xff]  }
 0x29f   : > { %18547 = vmatpush3.bf16.msra.mxu1 %v21841_v18  ;;  %v5673_v50 = vld [vmem:[#allocation2 + $0x1d0] sm:$0xff]  ;;  %v21860_v54 = vld [vmem:[%s22600_s30 + $0x160] sm:$0xff]   ;;  %v21861_v1 = vld [vmem:[%s22600_s30 + $0x168] sm:$0xff]  }
 0x2a0   : > { %18739 = vmatpush3.bf16.msra.mxu0 %v21842_v24  ;;  %18548 = vmatprep.subr.bf16.mxu1 %v21843_v47  ;;  %v21865_v45 = vld [vmem:[%s22600_s30 + $0x20] sm:$0xff]   ;;  %v5676_v27 = vld [vmem:[#allocation2 + $0x218] sm:$0xff]  ;;  %v5943_v63 = vld [vmem:[#allocation2 + $0x188] sm:$0xfe] }
 0x2a1   : > { %18740 = vmatprep.subr.bf16.mxu0 %v21844_v49  ;;  %v5675_v25 = vld [vmem:[#allocation2 + $0x200] sm:$0xff]  ;;  %v5944_v23 = vld [vmem:[#allocation2 + $0x190] sm:$0x1]  ;;  %v21867_v22 = vld [vmem:[%s22600_s30 + $0x28] sm:$0xff]   ;;  %v6007_v44 = vrot.slane %v5943_v63, 1 }
 0x2a2   : > { %v21863_v41 = vld [vmem:[%s22600_s30 + $0x170] sm:$0xff]   ;;  %v6008_v2 = vrot.slane %v5944_v23, 1  ;;  %v21864_v4 = vld [vmem:[%s22600_s30 + $0x178] sm:$0xff]   ;;  %v5945_v35 = vld [vmem:[#allocation2 + $0x1a0] sm:$0xfe] }
 0x2a3   : > { %18549 = vmatpush3.bf16.msra.mxu1 %v21843_v47  ;;  %v21869_v60 = vld [vmem:[%s22600_s30 + $0x30] sm:$0xff]   ;;  %v5946_v58 = vld [vmem:[#allocation2 + $0x1a8] sm:$0x1]  ;;  %v5947_v0 = vld [vmem:[#allocation2 + $0x1b8] sm:$0xfe]  ;;  %v6010_v51 = vrot.slane %v5945_v35, 1 }
 0x2a4   : > { %18741 = vmatpush3.bf16.msra.mxu0 %v21844_v49  ;;  %18550 = vmatprep.subr.bf16.mxu1 %v21845_v14  ;;  %v5677_v36 = vld [vmem:[#allocation2 + $0x230] sm:$0xff]  ;;  %v6009_v38 = vsel %vm4962_vm2, %v6007_v44, %v6008_v2  ;;  %v5948_v32 = vld [vmem:[#allocation2 + $0x1c0] sm:$0x1]  ;;  %v21871_v31 = vld [vmem:[%s22600_s30 + $0x38] sm:$0xff]   ;;  %v6011_v30 = vrot.slane %v5946_v58, 1  ;;  %v6013_v40 = vrot.slane %v5947_v0, 1 }
 0x2a5   : > { %18742 = vmatprep.subr.bf16.mxu0 %v21846_v34  ;;  %v21866_v53 = vld [vmem:[%s22600_s30 + $0x180] sm:$0xff]   ;;  %v6014_v57 = vrot.slane %v5948_v32, 1  ;;  %v4458_v62 = vld [vmem:[#allocation2 + $0x248] sm:$0xff]  ;;  %v5949_v3 = vld [vmem:[#allocation2 + $0x1d0] sm:$0xfe] }
 0x2a6   : > { %v23654_v15 = vld [vmem:[%s22600_s30 + $0x80] sm:$0xff]   ;;  %v6012_v42 = vsel %vm4962_vm2, %v6010_v51, %v6011_v30  ;;  %v5950_v48 = vld [vmem:[#allocation2 + $0x1d8] sm:$0x1]  ;;  %v21868_v17 = vld [vmem:[%s22600_s30 + $0x188] sm:$0xff]   ;;  %v6016_v11 = vrot.slane %v5949_v3, 1 }
 0x2a7   : > { %18551 = vmatpush3.bf16.msra.mxu1 %v21845_v14  ;;  %v6015_v6 = vsel %vm4962_vm2, %v6013_v40, %v6014_v57  ;;  %v5951_v5 = vld [vmem:[#allocation2 + $0x1e8] sm:$0xfe]  ;;  %v5952_v29 = vld [vmem:[#allocation2 + $0x1f0] sm:$0x1]  ;;  %v6017_v26 = vrot.slane %v5950_v48, 1  ;;  %v4459_v47 = vld [vmem:[#allocation2 + $0x260] sm:$0xff] }
 0x2a8   : > { %18743 = vmatpush3.bf16.msra.mxu0 %v21846_v34  ;;  %18552 = vmatprep.subr.bf16.mxu1 %v21847_v28  ;;  %v6019_v21 = vrot.slane %v5951_v5, 1  ;;  %v6020_v18 = vrot.slane %v5952_v29, 1  ;;  %v21870_v24 = vld [vmem:[%s22600_s30 + $0x190] sm:$0xff]   ;;  %v4460_v14 = vld [vmem:[#allocation2 + $0x278] sm:$0xff]  ;;  %v5954_v20 = vld [vmem:[#allocation2 + $0x208] sm:$0x1] }
 0x2a9   : > { %18744 = vmatprep.subr.bf16.mxu0 %v21848_v37  ;;  %v6018_v49 = vsel %vm4962_vm2, %v6016_v11, %v6017_v26  ;;  %v21878_v23 = vld [vmem:[%s22600_s30 + $0x1b0] sm:$0xff]   ;;  %v21880_v58 = vld [vmem:[%s22600_s30 + $0x1b8] sm:$0xff]   ;;  %v4308_v0 = vld [vmem:[#allocation2 + $0x188] sm:$0x7f] }
 0x2aa   : > { %v6021_v34 = vsel %vm4962_vm2, %v6019_v21, %v6020_v18  ;;  %v4306_v44 = vld [vmem:[#allocation2 + $0x170] sm:$0x7f]  ;;  %v5963_v32 = vld [vmem:[#allocation2 + $0x278] sm:$0xfe]  ;;  %v4310_v11 = vld [vmem:[#allocation2 + $0x1a0] sm:$0x7f] }
 0x2ab   : > { %18553 = vmatpush3.bf16.msra.mxu1 %v21847_v28  ;;  %v5953_v28 = vld [vmem:[#allocation2 + $0x200] sm:$0xfe]  ;;  %v4372_v30 = vrot.slane %v4306_v44, 7  ;;  %v4309_v29 = vld [vmem:[#allocation2 + $0x198] sm:$0x80] }
 0x2ac   : > { %18745 = vmatpush3.bf16.msra.mxu0 %v21848_v37  ;;  %18554 = vmatprep.subr.bf16.mxu1 %v21849_v16  ;;  %v5955_v37 = vld [vmem:[#allocation2 + $0x218] sm:$0xfe]  ;;  %v5965_v26 = vld [vmem:[#allocation2 + $0x290] sm:$0xfe] }
 0x2ad   : > { %18746 = vmatprep.subr.bf16.mxu0 %v21850_v39 }
 0x2af   : > { %18555 = vmatpush3.bf16.msra.mxu1 %v21849_v16  ;;  %v5956_v16 = vld [vmem:[#allocation2 + $0x220] sm:$0x1] }
 0x2b0   : > { %18747 = vmatpush3.bf16.msra.mxu0 %v21850_v39  ;;  %18556 = vmatprep.subr.bf16.mxu1 %v21851_v10  ;;  %v6022_v39 = vrot.slane %v5953_v28, 1  ;;  %v4377_v28 = vrot.slane %v4309_v29, 7 }
 0x2b1   : > { %18748 = vmatprep.subr.bf16.mxu0 %v21852_v33 }
 0x2b3   : > { %18557 = vmatpush3.bf16.msra.mxu1 %v21851_v10  ;;  %v6023_v10 = vrot.slane %v5954_v20, 1  ;;  %v4378_v20 = vrot.slane %v4310_v11, 7  ;;  %v4321_v11 = vld [vmem:[#allocation2 + $0x228] sm:$0x80] }
 0x2b4   : > { %18749 = vmatpush3.bf16.msra.mxu0 %v21852_v33  ;;  %18590 = vmatprep.subr.bf16.mxu1 %v21853_v43  ;;  %v6025_v33 = vrot.slane %v5955_v37, 1  ;;  %v6040_v37 = vrot.slane %v5965_v26, 1  ;;  %v4322_v26 = vld [vmem:[#allocation2 + $0x230] sm:$0x7f] }
 0x2b5   : > { %18782 = vmatprep.subr.bf16.mxu0 %v21854_v13 }
 0x2b6   : > { %18559 = vmatmul.mubr.bf16.vlgmr.msra.gmra.mrb[0].mxu1 %v4449_v9  ;;  %v4461_v9 = vld [vmem:[#allocation2 + $0x290] sm:$0xff] }
 0x2b7   : > { %18751 = vmatmul.mubr.bf16.vlgmr.msra.gmra.mrb[0].mxu0 %v5671_v61  ;;  %18591 = vmatpush3.bf16.msra.mxu1 %v21853_v43  ;;  %v6026_v43 = vrot.slane %v5956_v16, 1 }
 0x2b8   : > { %18783 = vmatpush3.bf16.msra.mxu0 %v21854_v13  ;;  %18562 = vmatprep.mubr.bf16.mxu1 %v5670_v59  ;;  %v21872_v59 = vld [vmem:[%s22600_s30 + $0x198] sm:$0xff]   ;;  %v21874_v13 = vld [vmem:[%s22600_s30 + $0x1a0] sm:$0xff]  }
 0x2b9   : > { %18784 = vmatprep.subr.bf16.mxu0 %v21855_v55  ;;  %18754 = vmatprep.mubr.bf16.mxu0 %v5672_v56 }
 0x2ba   : > { %18592 = vmatprep.subr.bf16.mxu1 %v21856_v46 }
 0x2bb   : > { %18593 = vmatpush3.bf16.msra.mxu1 %v21856_v46  ;;  %v5958_v46 = vld [vmem:[#allocation2 + $0x238] sm:$0x1] }
 0x2bc   : > { %18785 = vmatpush3.bf16.msra.mxu0 %v21855_v55  ;;  %18594 = vmatprep.subr.bf16.mxu1 %v21859_v52  ;;  %v5957_v55 = vld [vmem:[#allocation2 + $0x230] sm:$0xfe] }
 0x2bd   : > { %18786 = vmatprep.subr.bf16.mxu0 %v21857_v7 }
 0x2be   : > { %18563 = vmatmul.mubr.bf16.gmra.mrb[4].mxu1 %v5671_v61  ;;  %v4462_v61 = vld [vmem:[#allocation2 + $0x2a8] sm:$0xff] }
 0x2bf   : > { %18755 = vmatmul.mubr.bf16.gmra.mrb[4].mxu0 %v5673_v50  ;;  %18566 = vmatprep.mubr.bf16.mxu1 %v5672_v56  ;;  %v6024_v56 = vsel %vm4962_vm2, %v6022_v39, %v6023_v10 }
 0x2c0   : > { %18787 = vmatpush3.bf16.msra.mxu0 %v21857_v7  ;;  %18758 = vmatprep.mubr.bf16.mxu0 %v5674_v19  ;;  %v6027_v7 = vsel %vm4962_vm2, %v6025_v33, %v6026_v43 }
 0x2c1   : > { %18788 = vmatprep.subr.bf16.mxu0 %v21858_v8  ;;  %18595 = vmatpush3.bf16.msra.mxu1 %v21859_v52  ;;  %v4303_v52 = vld [vmem:[#allocation2 + $0x150] sm:$0x80] }
 0x2c2   : > { %18596 = vmatprep.subr.bf16.mxu1 %v21862_v12 }
 0x2c4   : > { %18789 = vmatpush3.bf16.msra.mxu0 %v21858_v8  ;;  %v21876_v8 = vld [vmem:[%s22600_s30 + $0x1a8] sm:$0xff]  }
 0x2c5   : > { %18790 = vmatprep.subr.bf16.mxu0 %v21860_v54  ;;  %18597 = vmatpush3.bf16.msra.mxu1 %v21862_v12  ;;  %v5960_v12 = vld [vmem:[#allocation2 + $0x250] sm:$0x1] }
 0x2c6   : > { %18567 = vmatmul.mubr.bf16.gmra.mrb[8].mxu1 %v5673_v50  ;;  %18598 = vmatprep.subr.bf16.mxu1 %v21865_v45  ;;  %v4304_v50 = vld [vmem:[#allocation2 + $0x158] sm:$0x7f]  ;;  %v6032_v63 = vrot.slane %v5960_v12, 1  ;;  %v5972_v12 = vld [vmem:[#allocation2 + $0x2e0] sm:$0x1] }
 0x2c7   : > { %18759 = vmatmul.mubr.bf16.gmra.mrb[8].mxu0 %v5675_v25  ;;  %18570 = vmatprep.mubr.bf16.mxu1 %v5674_v19  ;;  %v5959_v19 = vld [vmem:[#allocation2 + $0x248] sm:$0xfe] }
 0x2c8   : > { %18791 = vmatpush3.bf16.msra.mxu0 %v21860_v54  ;;  %18762 = vmatprep.mubr.bf16.mxu0 %v5676_v27  ;;  %v6028_v54 = vrot.slane %v5957_v55, 1  ;;  %v21879_v55 = vld [vmem:[%s22600_s30 + $0x98] sm:$0xff]  }
 0x2c9   : > { %18792 = vmatprep.subr.bf16.mxu0 %v21861_v1  ;;  %18599 = vmatpush3.bf16.msra.mxu1 %v21865_v45  ;;  %v6029_v45 = vrot.slane %v5958_v46, 1  ;;  %v5969_v46 = vld [vmem:[#allocation2 + $0x2c0] sm:$0xfe] }
 0x2ca   : > { %18600 = vmatprep.subr.bf16.mxu1 %v21867_v22 }
 0x2cb   : > { %v6030_v2 = vsel %vm4962_vm2, %v6028_v54, %v6029_v45 }
 0x2cc   : > { %18793 = vmatpush3.bf16.msra.mxu0 %v21861_v1  ;;  %v4369_v1 = vrot.slane %v4304_v50, 7  ;;  %v4315_v50 = vld [vmem:[#allocation2 + $0x1e0] sm:$0x80] }
 0x2cd   : > { %18794 = vmatprep.subr.bf16.mxu0 %v21863_v41  ;;  %18601 = vmatpush3.bf16.msra.mxu1 %v21867_v22  ;;  %v4463_v22 = vld [vmem:[#allocation2 + $0x2c0] sm:$0xff] }
 0x2ce   : > { %18571 = vmatmul.mubr.bf16.gmra.mrb[12].mxu1 %v5675_v25  ;;  %18602 = vmatprep.subr.bf16.mxu1 %v21869_v60  ;;  %v4368_v25 = vrot.slane %v4303_v52, 7  ;;  %v5970_v52 = vld [vmem:[#allocation2 + $0x2c8] sm:$0x1] }
 0x2cf   : > { %18763 = vmatmul.mubr.bf16.gmra.mrb[12].mxu0 %v5677_v36  ;;  %18574 = vmatprep.mubr.bf16.mxu1 %v5676_v27  ;;  %v6031_v27 = vrot.slane %v5959_v19, 1  ;;  %v5971_v19 = vld [vmem:[#allocation2 + $0x2d8] sm:$0xfe] }
 0x2d0   : > { %18795 = vmatpush3.bf16.msra.mxu0 %v21863_v41  ;;  %18798 = vmatprep.mubr.bf16.mxu0 %v6009_v38  ;;  %v4305_v41 = vld [vmem:[#allocation2 + $0x168] sm:$0x80]  ;;  %v4307_v38 = vld [vmem:[#allocation2 + $0x180] sm:$0x80] }
 0x2d1   : > { %18796 = vmatprep.subr.bf16.mxu0 %v21864_v4  ;;  %18603 = vmatpush3.bf16.msra.mxu1 %v21869_v60  ;;  %v4370_v60 = vsel %vm4367_vm3, %v4368_v25, %v4369_v1  ;;  %v6033_v35 = vsel %vm4962_vm2, %v6031_v27, %v6032_v63  ;;  %v4371_v51 = vrot.slane %v4305_v41, 7  ;;  %v4374_v57 = vrot.slane %v4307_v38, 7  ;;  %v21881_v41 = vld [vmem:[%s22600_s30 + $0xa0] sm:$0xff]   ;;  %v5973_v38 = vld [vmem:[#allocation2 + $0x2f0] sm:$0xfe] }
 0x2d2   : > { %18604 = vmatprep.subr.bf16.mxu1 %v21871_v31  ;;  %v6046_v25 = vrot.slane %v5969_v46, 1  ;;  %v6047_v1 = vrot.slane %v5970_v52, 1  ;;  %v4386_v27 = vrot.slane %v4315_v50, 7  ;;  %v6335_v46 = vld [vmem:[#allocation2 + $0x1f8] sm:$0x80]  ;;  %v21884_v52 = vld [vmem:[%s22600_s30 + $0x1c8] sm:$0xff]  }
 0x2d3   : > { %v4373_v48 = vsel %vm4367_vm3, %v4371_v51, %v4372_v30  ;;  %v6329_v51 = vld [vmem:[#allocation2 + $0x1b0] sm:$0x80]  ;;  %v6330_v30 = vld [vmem:[#allocation2 + $0x1b8] sm:$0x7f] }
 0x2d4   : > { %18797 = vmatpush3.bf16.msra.mxu0 %v21864_v4  ;;  %v5962_v4 = vld [vmem:[#allocation2 + $0x268] sm:$0x1] }
 0x2d5   : > { %18830 = vmatprep.subr.bf16.mxu0 %v21866_v53  ;;  %18605 = vmatpush3.bf16.msra.mxu1 %v21871_v31  ;;  %v5964_v31 = vld [vmem:[#allocation2 + $0x280] sm:$0x1]  ;;  %v6035_v40 = vrot.slane %v5962_v4, 1  ;;  %v6048_v4 = vsel %vm4962_vm2, %v6046_v25, %v6047_v1  ;;  %v6338_v25 = vld [vmem:[#allocation2 + $0x218] sm:$0x7f] }
 0x2d6   : > { %18575 = vmatmul.mubr.bf16.gmra.mrb[16].mxu1 %v5677_v36  ;;  %18638 = vmatprep.subr.bf16.mxu1 %v23654_v15  ;;  %v5961_v36 = vld [vmem:[#allocation2 + $0x260] sm:$0xfe]  ;;  %v6038_v3 = vrot.slane %v5964_v31, 1  ;;  %v4320_v31 = vld [vmem:[#allocation2 + $0x218] sm:$0x7f] }
 0x2d7   : > { %18799 = vmatmul.mubr.bf16.vlgmr.msra.gmra.mrb[0].mxu0 %v6012_v42  ;;  %18578 = vmatprep.mubr.bf16.mxu1 %v4458_v62  ;;  %v4375_v42 = vrot.slane %v4308_v0, 7  ;;  %v6037_v62 = vrot.slane %v5963_v32, 1  ;;  %v4319_v32 = vld [vmem:[#allocation2 + $0x210] sm:$0x80] }
 0x2d8   : > { %18831 = vmatpush3.bf16.msra.mxu0 %v21866_v53  ;;  %18802 = vmatprep.mubr.bf16.mxu0 %v6015_v6  ;;  %v6034_v53 = vrot.slane %v5961_v36, 1  ;;  %v23674_v6 = vld [vmem:[%s22600_s30 + $0x1c0] sm:$0xff]   ;;  %v21883_v36 = vld [vmem:[%s22600_s30 + $0xa8] sm:$0xff]  }
 0x2d9   : > { %18832 = vmatprep.subr.bf16.mxu0 %v21868_v17  ;;  %v4376_v21 = vsel %vm4367_vm3, %v4374_v57, %v4375_v42  ;;  %v6039_v18 = vsel %vm4962_vm2, %v6037_v62, %v6038_v3  ;;  %v6052_v57 = vrot.slane %v5973_v38, 1  ;;  %v4392_v62 = vrot.slane %v4319_v32, 7  ;;  %v6339_v32 = vld [vmem:[#allocation2 + $0x228] sm:$0x80] }
 0x2da   : > { %v6036_v5 = vsel %vm4962_vm2, %v6034_v53, %v6035_v40  ;;  %v4393_v3 = vrot.slane %v4320_v31, 7 }
 0x2dc   : > { %18833 = vmatpush3.bf16.msra.mxu0 %v21868_v17  ;;  %v21875_v17 = vld [vmem:[%s22600_s30 + $0x88] sm:$0xff]  }
 0x2dd   : > { %18834 = vmatprep.subr.bf16.mxu0 %v21870_v24 }
 0x2de   : > { %18579 = vmatmul.mubr.bf16.gmra.mrb[20].mxu1 %v4459_v47  ;;  %v4311_v47 = vld [vmem:[#allocation2 + $0x1b0] sm:$0x80] }
 0x2df   : > { %18803 = vmatmul.mubr.bf16.gmra.mrb[4].mxu0 %v6018_v49  ;;  %18582 = vmatprep.mubr.bf16.mxu1 %v4460_v14  ;;  %v4312_v49 = vld [vmem:[#allocation2 + $0x1b8] sm:$0x7f]  ;;  %v5967_v14 = vld [vmem:[#allocation2 + $0x2a8] sm:$0xfe]  ;;  %v4380_v39 = vrot.slane %v4311_v47, 7 }
 0x2e0   : > { %18806 = vmatprep.mubr.bf16.mxu0 %v6021_v34  ;;  %18835 = vmatpush3.bf16.msra.mxu0 %v21870_v24  ;;  %v5966_v24 = vld [vmem:[#allocation2 + $0x298] sm:$0x1]  ;;  %v5968_v34 = vld [vmem:[#allocation2 + $0x2b0] sm:$0x1]  ;;  %v4381_v10 = vrot.slane %v4312_v49, 7  ;;  %v6043_v33 = vrot.slane %v5967_v14, 1 }
 0x2e1   : > { %18836 = vmatprep.subr.bf16.mxu0 %v21872_v59  ;;  %v6041_v16 = vrot.slane %v5966_v24, 1  ;;  %v6044_v43 = vrot.slane %v5968_v34, 1  ;;  %v4394_v24 = vsel %vm4367_vm3, %v4392_v62, %v4393_v3  ;;  %v6331_v47 = vld [vmem:[#allocation2 + $0x1c8] sm:$0x80]  ;;  %v6332_v49 = vld [vmem:[#allocation2 + $0x1d0] sm:$0x7f] }
 0x2e2   : > { %v4323_v14 = vld [vmem:[#allocation2 + $0x240] sm:$0x80]  ;;  %v6408_v62 = vrot.slane %v6339_v32, 7 }
 0x2e3   : > { %v4904_v32 = vld [vmem:[#allocation2 + $0x1a0] sm:$0xfe] }
 0x2e4   : > { %18837 = vmatpush3.bf16.msra.mxu0 %v21872_v59  ;;  %v21877_v59 = vld [vmem:[%s22600_s30 + $0x90] sm:$0xff]  }
 0x2e5   : > { %18838 = vmatprep.subr.bf16.mxu0 %v21874_v13 }
 0x2e6   : > { %18583 = vmatmul.mubr.bf16.gmra.mrb[24].mxu1 %v4461_v9  ;;  %v4313_v9 = vld [vmem:[#allocation2 + $0x1c8] sm:$0x80] }
 0x2e7   : > { %18807 = vmatmul.mubr.bf16.gmra.mrb[8].mxu0 %v6024_v56  ;;  %18586 = vmatprep.mubr.bf16.mxu1 %v4462_v61  ;;  %v4314_v61 = vld [vmem:[#allocation2 + $0x1d0] sm:$0x7f]  ;;  %v4382_v56 = vsel %vm4367_vm3, %v4380_v39, %v4381_v10  ;;  %v4383_v54 = vrot.slane %v4313_v9, 7  ;;  %v6396_v39 = vrot.slane %v6331_v47, 7  ;;  %v6397_v10 = vrot.slane %v6332_v49, 7 }
 0x2e8   : > { %18810 = vmatprep.mubr.bf16.mxu0 %v6027_v7  ;;  %18839 = vmatpush3.bf16.msra.mxu0 %v21874_v13  ;;  %v4379_v13 = vsel %vm4367_vm3, %v4377_v28, %v4378_v20  ;;  %v6045_v7 = vsel %vm4962_vm2, %v6043_v33, %v6044_v43  ;;  %v4384_v45 = vrot.slane %v4314_v61, 7  ;;  %v4324_v28 = vld [vmem:[#allocation2 + $0x248] sm:$0x7f]  ;;  %v6333_v20 = vld [vmem:[#allocation2 + $0x1e0] sm:$0x80]  ;;  %v4398_v33 = vrot.slane %v4323_v14, 7 }
 0x2e9   : > { %18840 = vmatprep.subr.bf16.mxu0 %v21876_v8  ;;  %v4399_v43 = vrot.slane %v4324_v28, 7  ;;  %v6399_v9 = vrot.slane %v6333_v20, 7  ;;  %v6343_v14 = vld [vmem:[#allocation2 + $0x258] sm:$0x80] }
 0x2ea   : > { %v4385_v44 = vsel %vm4367_vm3, %v4383_v54, %v4384_v45  ;;  %v4328_v54 = vld [vmem:[#allocation2 + $0x278] sm:$0x7f]  ;;  %v6337_v45 = vld [vmem:[#allocation2 + $0x210] sm:$0x80] }
 0x2eb   : > { %v4400_v50 = vsel %vm4367_vm3, %v4398_v33, %v4399_v43  ;;  %v4898_v20 = vld [vmem:[#allocation2 + $0x158] sm:$0xfe]  ;;  %v6414_v33 = vrot.slane %v6343_v14, 7  ;;  %v4908_v14 = vld [vmem:[#allocation2 + $0x1d0] sm:$0xfe] }
 0x2ec   : > { %18841 = vmatpush3.bf16.msra.mxu0 %v21876_v8  ;;  %v4316_v8 = vld [vmem:[#allocation2 + $0x1e8] sm:$0x7f] }
 0x2ed   : > { %18842 = vmatprep.subr.bf16.mxu0 %v21878_v23  ;;  %v4387_v63 = vrot.slane %v4316_v8, 7  ;;  %v6336_v8 = vld [vmem:[#allocation2 + $0x200] sm:$0x7f] }
 0x2ee   : > { %18587 = vmatmul.mubr.bf16.gmra.mrb[28].mxu1 %v4463_v22  ;;  %v6050_v22 = vrot.slane %v5972_v12, 1 }
 0x2ef   : > { %18811 = vmatmul.mubr.bf16.gmra.mrb[12].mxu0 %v6030_v2  ;;  %18606 = vmatprep.mubr.bf16.mxu1 %v4370_v60  ;;  %v4317_v2 = vld [vmem:[#allocation2 + $0x1f8] sm:$0x80]  ;;  %v4318_v60 = vld [vmem:[#allocation2 + $0x200] sm:$0x7f] }
 0x2f0   : > { %18814 = vmatprep.mubr.bf16.mxu0 %v6033_v35  ;;  %18843 = vmatpush3.bf16.msra.mxu0 %v21878_v23  ;;  %v6049_v23 = vrot.slane %v5971_v19, 1  ;;  %v4388_v35 = vsel %vm4367_vm3, %v4386_v27, %v4387_v63  ;;  %v4389_v53 = vrot.slane %v4317_v2, 7  ;;  %v4390_v40 = vrot.slane %v4318_v60, 7  ;;  %v4327_v19 = vld [vmem:[#allocation2 + $0x270] sm:$0x80] }
 0x2f1   : > { %18844 = vmatprep.subr.bf16.mxu0 %v21880_v58  ;;  %v6402_v63 = vrot.slane %v6335_v46, 7  ;;  %v6405_v2 = vrot.slane %v6337_v45, 7  ;;  %v6406_v60 = vrot.slane %v6338_v25, 7  ;;  %v6348_v45 = vld [vmem:[#allocation2 + $0x290] sm:$0x7f] }
 0x2f2   : > { %v6051_v0 = vsel %vm4962_vm2, %v6049_v23, %v6050_v22  ;;  %v4391_v29 = vsel %vm4367_vm3, %v4389_v53, %v4390_v40  ;;  %v6403_v23 = vrot.slane %v6336_v8, 7  ;;  %v21886_v22 = vld [vmem:[%s22600_s30 + $0x1d0] sm:$0xff]   ;;  %v6341_v53 = vld [vmem:[#allocation2 + $0x240] sm:$0x80]  ;;  %v6342_v40 = vld [vmem:[#allocation2 + $0x248] sm:$0x7f] }
 0x2f3   : > { %v6407_v31 = vsel %vm4367_vm3, %v6405_v2, %v6406_v60  ;;  %v4901_v8 = vld [vmem:[#allocation2 + $0x178] sm:$0x1]  ;;  %v4902_v25 = vld [vmem:[#allocation2 + $0x188] sm:$0xfe] }
 0x2f4   : > { %18845 = vmatpush3.bf16.msra.mxu0 %v21880_v58  ;;  %v5974_v58 = vld [vmem:[#allocation2 + $0x2f8] sm:$0x1]  ;;  %v6404_v38 = vsel %vm4367_vm3, %v6402_v63, %v6403_v23  ;;  %v6350_v63 = vld [vmem:[#allocation2 + $0x2a8] sm:$0x7f]  ;;  %v4969_v2 = vrot.slane %v4902_v25, 1 }
 0x2f5   : > { %18878 = vmatprep.subr.bf16.mxu0 %v23674_v6  ;;  %v6053_v42 = vrot.slane %v5974_v58, 1 }
 0x2f6   : > { %18607 = vmatmul.mubr.bf16.vlgmr.msra.gmra.mrb[0].mxu1 %v4373_v48  ;;  %v6393_v48 = vrot.slane %v6329_v51, 7  ;;  %v4331_v51 = vld [vmem:[#allocation2 + $0x2a0] sm:$0x80] }
 0x2f7   : > { %18815 = vmatmul.mubr.bf16.gmra.mrb[16].mxu0 %v6036_v5  ;;  %18639 = vmatpush3.bf16.msra.mxu1 %v23654_v15  ;;  %v6042_v15 = vsel %vm4962_vm2, %v6040_v37, %v6041_v16  ;;  %v21885_v5 = vld [vmem:[%s22600_s30 + $0xb0] sm:$0xff]   ;;  %v4395_v37 = vrot.slane %v4321_v11, 7  ;;  %v4396_v16 = vrot.slane %v4322_v26, 7  ;;  %v21890_v11 = vld [vmem:[%s22600_s30 + $0x1e0] sm:$0xff]  }
 0x2f8   : > { %18610 = vmatprep.mubr.bf16.mxu1 %v4376_v21  ;;  %18818 = vmatprep.mubr.bf16.mxu0 %v6039_v18  ;;  %v21887_v21 = vld [vmem:[%s22600_s30 + $0xb8] sm:$0xff]   ;;  %v6054_v18 = vsel %vm4962_vm2, %v6052_v57, %v6053_v42 }
 0x2f9   : > { %18640 = vmatprep.subr.bf16.mxu1 %v21875_v17 }
 0x2fb   : > { %18641 = vmatpush3.bf16.msra.mxu1 %v21875_v17  ;;  %v6394_v17 = vrot.slane %v6330_v30, 7  ;;  %v4332_v30 = vld [vmem:[#allocation2 + $0x2a8] sm:$0x7f] }
 0x2fc   : > { %18642 = vmatprep.subr.bf16.mxu1 %v21877_v59 }
 0x2fd   : > { %v6395_v34 = vsel %vm4367_vm3, %v6393_v48, %v6394_v17  ;;  %v4410_v48 = vrot.slane %v4331_v51, 7  ;;  %v4411_v17 = vrot.slane %v4332_v30, 7 }
 0x2fe   : > { %18611 = vmatmul.mubr.bf16.gmra.mrb[4].mxu1 %v4379_v13  ;;  %v23702_v13 = vld [vmem:[%s22600_s30 + $0xc0] sm:$0xff]  }
 0x2ff   : > { %18819 = vmatmul.mubr.bf16.gmra.mrb[20].mxu0 %v6042_v15  ;;  %18614 = vmatprep.mubr.bf16.mxu1 %v4382_v56  ;;  %v4325_v15 = vld [vmem:[#allocation2 + $0x258] sm:$0x80]  ;;  %v4326_v56 = vld [vmem:[#allocation2 + $0x260] sm:$0x7f]  ;;  %v4412_v49 = vsel %vm4367_vm3, %v4410_v48, %v4411_v17 }
 0x300   : > { %18822 = vmatprep.mubr.bf16.mxu0 %v6045_v7  ;;  %18643 = vmatpush3.bf16.msra.mxu1 %v21877_v59  ;;  %v6334_v59 = vld [vmem:[#allocation2 + $0x1e8] sm:$0x7f]  ;;  %v6398_v7 = vsel %vm4367_vm3, %v6396_v39, %v6397_v10  ;;  %v4401_v1 = vrot.slane %v4325_v15, 7  ;;  %v4402_v27 = vrot.slane %v4326_v56, 7  ;;  %v21894_v56 = vld [vmem:[%s22600_s30 + $0x1f0] sm:$0xff]  }
 0x301   : > { %18644 = vmatprep.subr.bf16.mxu1 %v21879_v55  ;;  %v6400_v61 = vrot.slane %v6334_v59, 7  ;;  %v4899_v59 = vld [vmem:[#allocation2 + $0x160] sm:$0x1] }
 0x303   : > { %v6401_v12 = vsel %vm4367_vm3, %v6399_v9, %v6400_v61  ;;  %v4963_v9 = vrot.slane %v4898_v20, 1  ;;  %v4964_v61 = vrot.slane %v4899_v59, 1  ;;  %v6356_v59 = vld [vmem:[#allocation2 + $0x2f0] sm:$0x7f] }
 0x304   : > { %18645 = vmatpush3.bf16.msra.mxu1 %v21879_v55  ;;  %v4397_v55 = vsel %vm4367_vm3, %v4395_v37, %v4396_v16  ;;  %v6345_v37 = vld [vmem:[#allocation2 + $0x270] sm:$0x80]  ;;  %v6346_v16 = vld [vmem:[#allocation2 + $0x278] sm:$0x7f] }
 0x305   : > { %18646 = vmatprep.subr.bf16.mxu1 %v21881_v41  ;;  %v6418_v15 = vrot.slane %v6346_v16, 7  ;;  %v4911_v16 = vld [vmem:[#allocation2 + $0x1f0] sm:$0x1] }
 0x306   : > { %18615 = vmatmul.mubr.bf16.gmra.mrb[8].mxu1 %v4385_v44  ;;  %v4405_v44 = vrot.slane %v4328_v54, 7  ;;  %v6347_v54 = vld [vmem:[#allocation2 + $0x288] sm:$0x80] }
 0x307   : > { %18823 = vmatmul.mubr.bf16.gmra.mrb[24].mxu0 %v6048_v4  ;;  %18618 = vmatprep.mubr.bf16.mxu1 %v4388_v35  ;;  %v4329_v4 = vld [vmem:[#allocation2 + $0x288] sm:$0x80]  ;;  %v21888_v35 = vld [vmem:[%s22600_s30 + $0x1d8] sm:$0xff]  }
 0x308   : > { %18826 = vmatprep.mubr.bf16.mxu0 %v6051_v0  ;;  %18647 = vmatpush3.bf16.msra.mxu1 %v21881_v41  ;;  %v4404_v41 = vrot.slane %v4327_v19, 7  ;;  %v4330_v0 = vld [vmem:[#allocation2 + $0x290] sm:$0x7f]  ;;  %v4407_v57 = vrot.slane %v4329_v4, 7  ;;  %v21896_v19 = vld [vmem:[%s22600_s30 + $0x1f8] sm:$0xff]   ;;  %v6424_v4 = vrot.slane %v6350_v63, 7 }
 0x309   : > { %18648 = vmatprep.subr.bf16.mxu1 %v21883_v36  ;;  %v4408_v42 = vrot.slane %v4330_v0, 7  ;;  %v4915_v63 = vld [vmem:[#allocation2 + $0x220] sm:$0x1] }
 0x30a   : > { %v4406_v58 = vsel %vm4367_vm3, %v4404_v41, %v4405_v44  ;;  %v6420_v41 = vrot.slane %v6347_v54, 7  ;;  %v6421_v44 = vrot.slane %v6348_v45, 7  ;;  %v4913_v54 = vld [vmem:[#allocation2 + $0x208] sm:$0x1]  ;;  %v6359_v45 = vld [vmem:[#allocation2 + $0x318] sm:$0x80] }
 0x30b   : > { %v4409_v26 = vsel %vm4367_vm3, %v4407_v57, %v4408_v42  ;;  %v4907_v57 = vld [vmem:[#allocation2 + $0x1c0] sm:$0x1]  ;;  %v6353_v42 = vld [vmem:[#allocation2 + $0x2d0] sm:$0x80] }
 0x30c   : > { %18649 = vmatpush3.bf16.msra.mxu1 %v21883_v36  ;;  %v4403_v36 = vsel %vm4367_vm3, %v4401_v1, %v4402_v27  ;;  %v4903_v1 = vld [vmem:[#allocation2 + $0x190] sm:$0x1]  ;;  %v6349_v27 = vld [vmem:[#allocation2 + $0x2a0] sm:$0x80]  ;;  %v6422_v0 = vsel %vm4367_vm3, %v6420_v41, %v6421_v44  ;;  %v6438_v41 = vrot.slane %v6359_v45, 7 }
 0x30d   : > { %18650 = vmatprep.subr.bf16.mxu1 %v21885_v5  ;;  %v4970_v60 = vrot.slane %v4903_v1, 1  ;;  %v6360_v1 = vld [vmem:[#allocation2 + $0x320] sm:$0x7f] }
 0x30e   : > { %18619 = vmatmul.mubr.bf16.gmra.mrb[12].mxu1 %v4391_v29  ;;  %v6412_v29 = vrot.slane %v6342_v40, 7  ;;  %v4906_v40 = vld [vmem:[#allocation2 + $0x1b8] sm:$0xfe]  ;;  %v6439_v44 = vrot.slane %v6360_v1, 7 }
 0x30f   : > { %18827 = vmatmul.mubr.bf16.gmra.mrb[28].mxu0 %v6054_v18  ;;  %18622 = vmatprep.mubr.bf16.mxu1 %v4394_v24  ;;  %v4334_v18 = vld [vmem:[#allocation2 + $0x2c0] sm:$0x7f]  ;;  %v21892_v24 = vld [vmem:[%s22600_s30 + $0x1e8] sm:$0xff]   ;;  %v4971_v51 = vsel %vm4962_vm2, %v4969_v2, %v4970_v60  ;;  %v4988_v60 = vrot.slane %v4915_v63, 1 }
 0x310   : > { %18846 = vmatprep.mubr.bf16.mxu0 %v6395_v34  ;;  %18651 = vmatpush3.bf16.msra.mxu1 %v21885_v5  ;;  %v6411_v5 = vrot.slane %v6341_v53, 7  ;;  %v6344_v34 = vld [vmem:[#allocation2 + $0x260] sm:$0x7f]  ;;  %v4414_v10 = vrot.slane %v4334_v18, 7 }
 0x311   : > { %18652 = vmatprep.subr.bf16.mxu1 %v21887_v21  ;;  %v6415_v43 = vrot.slane %v6344_v34, 7  ;;  %v6352_v53 = vld [vmem:[#allocation2 + $0x2c0] sm:$0x7f]  ;;  %v4909_v34 = vld [vmem:[#allocation2 + $0x1d8] sm:$0x1] }
 0x312   : > { %v6413_v28 = vsel %vm4367_vm3, %v6411_v5, %v6412_v29  ;;  %v6427_v5 = vrot.slane %v6352_v53, 7  ;;  %v4975_v29 = vrot.slane %v4906_v40, 1 }
 0x314   : > { %18653 = vmatpush3.bf16.msra.mxu1 %v21887_v21  ;;  %v4333_v21 = vld [vmem:[#allocation2 + $0x2b8] sm:$0x80] }
 0x315   : > { %18686 = vmatprep.subr.bf16.mxu1 %v23702_v13  ;;  %v4413_v39 = vrot.slane %v4333_v21, 7  ;;  %v6429_v21 = vrot.slane %v6353_v42, 7 }
 0x316   : > { %18623 = vmatmul.mubr.bf16.gmra.mrb[16].mxu1 %v4397_v55  ;;  %v6417_v55 = vrot.slane %v6345_v37, 7  ;;  %v4910_v37 = vld [vmem:[#allocation2 + $0x1e8] sm:$0xfe] }
 0x317   : > { %18847 = vmatmul.mubr.bf16.vlgmr.msra.gmra.mrb[0].mxu0 %v6398_v7  ;;  %18626 = vmatprep.mubr.bf16.mxu1 %v4400_v50  ;;  %v4415_v46 = vsel %vm4367_vm3, %v4413_v39, %v4414_v10  ;;  %v4965_v7 = vsel %vm4962_vm2, %v4963_v9, %v4964_v61  ;;  %v4900_v50 = vld [vmem:[#allocation2 + $0x170] sm:$0xfe]  ;;  %v6357_v39 = vld [vmem:[#allocation2 + $0x300] sm:$0x80]  ;;  %v6358_v10 = vld [vmem:[#allocation2 + $0x308] sm:$0x7f] }
 0x318   : > { %18879 = vmatpush3.bf16.msra.mxu0 %v23674_v6  ;;  %18850 = vmatprep.mubr.bf16.mxu0 %v6401_v12  ;;  %v6340_v6 = vld [vmem:[#allocation2 + $0x230] sm:$0x7f]  ;;  %v6419_v12 = vsel %vm4367_vm3, %v6417_v55, %v6418_v15  ;;  %v4966_v23 = vrot.slane %v4900_v50, 1  ;;  %v6433_v61 = vrot.slane %v6356_v59, 7  ;;  %v4981_v55 = vrot.slane %v4910_v37, 1  ;;  %v21899_v50 = vld [vmem:[%s22600_s30 + $0xe8] sm:$0xff]  }
 0x319   : > { %18880 = vmatprep.subr.bf16.mxu0 %v21884_v52  ;;  %v6409_v3 = vrot.slane %v6340_v6, 7  ;;  %v6351_v6 = vld [vmem:[#allocation2 + $0x2b8] sm:$0x80]  ;;  %v4982_v15 = vrot.slane %v4911_v16, 1  ;;  %v4924_v37 = vld [vmem:[#allocation2 + $0x290] sm:$0xfe] }
 0x31a   : > { %v6426_v17 = vrot.slane %v6351_v6, 7  ;;  %v4918_v6 = vld [vmem:[#allocation2 + $0x248] sm:$0xfe]  ;;  %v6718_v59 = vld [vmem:[#allocation2 + $0x218] sm:$0xff] }
 0x31b   : > { %v6410_v47 = vsel %vm4367_vm3, %v6408_v62, %v6409_v3  ;;  %v6354_v62 = vld [vmem:[#allocation2 + $0x2d8] sm:$0x7f]  ;;  %v4972_v3 = vrot.slane %v4904_v32, 1  ;;  %v4916_v32 = vld [vmem:[#allocation2 + $0x230] sm:$0xfe] }
 0x31c   : > { %18881 = vmatpush3.bf16.msra.mxu0 %v21884_v52  ;;  %v6416_v52 = vsel %vm4367_vm3, %v6414_v33, %v6415_v43  ;;  %v6430_v18 = vrot.slane %v6354_v62, 7  ;;  %v4978_v33 = vrot.slane %v4908_v14, 1  ;;  %v4979_v43 = vrot.slane %v4909_v34, 1  ;;  %v21902_v14 = vld [vmem:[%s22600_s30 + $0x210] sm:$0xff]   ;;  %v4925_v16 = vld [vmem:[#allocation2 + $0x298] sm:$0x1] }
 0x31d   : > { %18882 = vmatprep.subr.bf16.mxu0 %v21886_v22  ;;  %v4990_v53 = vrot.slane %v4916_v32, 1 }
 0x31e   : > { %18627 = vmatmul.mubr.bf16.gmra.mrb[20].mxu1 %v4403_v36  ;;  %v6423_v36 = vrot.slane %v6349_v27, 7  ;;  %v6431_v20 = vsel %vm4367_vm3, %v6429_v21, %v6430_v18  ;;  %v4914_v27 = vld [vmem:[#allocation2 + $0x218] sm:$0xfe]  ;;  %v4923_v21 = vld [vmem:[#allocation2 + $0x280] sm:$0x1] }
 0x31f   : > { %18851 = vmatmul.mubr.bf16.gmra.mrb[4].mxu0 %v6404_v38  ;;  %18630 = vmatprep.mubr.bf16.mxu1 %v4406_v58  ;;  %v21891_v58 = vld [vmem:[%s22600_s30 + $0xc8] sm:$0xff]   ;;  %v4987_v2 = vrot.slane %v4914_v27, 1  ;;  %v23760_v18 = vld [vmem:[%s22600_s30 + $0x100] sm:$0xff]   ;;  %v21907_v27 = vld [vmem:[%s22600_s30 + $0x230] sm:$0xff]  }
 0x320   : > { %18854 = vmatprep.mubr.bf16.mxu0 %v6407_v31  ;;  %18883 = vmatpush3.bf16.msra.mxu0 %v21886_v22  ;;  %v4967_v22 = vrot.slane %v4901_v8, 1  ;;  %v4905_v31 = vld [vmem:[#allocation2 + $0x1a8] sm:$0x1]  ;;  %v6425_v30 = vsel %vm4367_vm3, %v6423_v36, %v6424_v4  ;;  %v21901_v36 = vld [vmem:[%s22600_s30 + $0xf0] sm:$0xff]  }
 0x321   : > { %18884 = vmatprep.subr.bf16.mxu0 %v21888_v35  ;;  %v4973_v48 = vrot.slane %v4905_v31, 1  ;;  %v4917_v31 = vld [vmem:[#allocation2 + $0x238] sm:$0x1] }
 0x322   : > { %v4968_v38 = vsel %vm4962_vm2, %v4966_v23, %v4967_v22  ;;  %v4985_v22 = vrot.slane %v4913_v54, 1  ;;  %v4991_v40 = vrot.slane %v4917_v31, 1 }
 0x324   : > { %18885 = vmatpush3.bf16.msra.mxu0 %v21888_v35  ;;  %v23730_v35 = vld [vmem:[%s22600_s30 + $0x200] sm:$0xff]   ;;  %v4992_v62 = vsel %vm4962_vm2, %v4990_v53, %v4991_v40  ;;  %v23789_v40 = vld [vmem:[#allocation2 + $0x2a8] sm:$0xff] }
 0x325   : > { %18886 = vmatprep.subr.bf16.mxu0 %v21890_v11 }
 0x326   : > { %18631 = vmatmul.mubr.bf16.gmra.mrb[24].mxu1 %v4409_v26  ;;  %v21893_v26 = vld [vmem:[%s22600_s30 + $0xd0] sm:$0xff]  }
 0x327   : > { %18855 = vmatmul.mubr.bf16.gmra.mrb[8].mxu0 %v6410_v47  ;;  %18634 = vmatprep.mubr.bf16.mxu1 %v4412_v49  ;;  %v21895_v47 = vld [vmem:[%s22600_s30 + $0xd8] sm:$0xff]   ;;  %v6428_v49 = vsel %vm4367_vm3, %v6426_v17, %v6427_v5  ;;  %v6716_v17 = vld [vmem:[#allocation2 + $0x1e8] sm:$0xff]  ;;  %v4920_v5 = vld [vmem:[#allocation2 + $0x260] sm:$0xfe] }
 0x328   : > { %18858 = vmatprep.mubr.bf16.mxu0 %v6413_v28  ;;  %18887 = vmatpush3.bf16.msra.mxu0 %v21890_v11  ;;  %v4976_v11 = vrot.slane %v4907_v57, 1  ;;  %v6355_v28 = vld [vmem:[#allocation2 + $0x2e8] sm:$0x80]  ;;  %v4993_v57 = vrot.slane %v4918_v6, 1  ;;  %v23786_v6 = vld [vmem:[#allocation2 + $0x290] sm:$0xff] }
 0x329   : > { %18888 = vmatprep.subr.bf16.mxu0 %v21892_v24  ;;  %v6432_v9 = vrot.slane %v6355_v28, 7  ;;  %v6717_v28 = vld [vmem:[#allocation2 + $0x200] sm:$0xff] }
 0x32b   : > { %v6434_v8 = vsel %vm4367_vm3, %v6432_v9, %v6433_v61 }
 0x32c   : > { %18889 = vmatpush3.bf16.msra.mxu0 %v21892_v24  ;;  %v4974_v24 = vsel %vm4962_vm2, %v4972_v3, %v4973_v48  ;;  %v6715_v3 = vld [vmem:[#allocation2 + $0x1d0] sm:$0xff] }
 0x32d   : > { %18890 = vmatprep.subr.bf16.mxu0 %v21894_v56 }
 0x32e   : > { %18635 = vmatmul.mubr.bf16.gmra.mrb[28].mxu1 %v4415_v46  ;;  %v6436_v46 = vrot.slane %v6358_v10, 7  ;;  %v4927_v10 = vld [vmem:[#allocation2 + $0x2b0] sm:$0x1] }
 0x32f   : > { %18859 = vmatmul.mubr.bf16.gmra.mrb[12].mxu0 %v6416_v52  ;;  %18654 = vmatprep.mubr.bf16.mxu1 %v4965_v7  ;;  %v21897_v52 = vld [vmem:[%s22600_s30 + $0xe0] sm:$0xff]   ;;  %v4980_v7 = vsel %vm4962_vm2, %v4978_v33, %v4979_v43  ;;  %v5002_v33 = vrot.slane %v4924_v37, 1  ;;  %v5003_v43 = vrot.slane %v4925_v16, 1  ;;  %v5006_v61 = vrot.slane %v4927_v10, 1  ;;  %v23806_v16 = vld [vmem:[#allocation2 + $0x2f0] sm:$0xff] }
 0x330   : > { %18862 = vmatprep.mubr.bf16.mxu0 %v6419_v12  ;;  %18891 = vmatpush3.bf16.msra.mxu0 %v21894_v56  ;;  %v6435_v56 = vrot.slane %v6357_v39, 7  ;;  %v4912_v12 = vld [vmem:[#allocation2 + $0x200] sm:$0xfe]  ;;  %v4926_v39 = vld [vmem:[#allocation2 + $0x2a8] sm:$0xfe] }
 0x331   : > { %18892 = vmatprep.subr.bf16.mxu0 %v21896_v19  ;;  %v4984_v23 = vrot.slane %v4912_v12, 1  ;;  %v5005_v9 = vrot.slane %v4926_v39, 1  ;;  %v21906_v12 = vld [vmem:[%s22600_s30 + $0x228] sm:$0xff]  }
 0x332   : > { %v6437_v25 = vsel %vm4367_vm3, %v6435_v56, %v6436_v46  ;;  %v6719_v56 = vld [vmem:[#allocation2 + $0x230] sm:$0xff]  ;;  %v5299_v10 = vld [vmem:[#allocation2 + $0x228] sm:$0x80] }
 0x333   : > { %v4986_v4 = vsel %vm4962_vm2, %v4984_v23, %v4985_v22  ;;  %v5007_v46 = vsel %vm4962_vm2, %v5005_v9, %v5006_v61  ;;  %v23777_v23 = vld [vmem:[#allocation2 + $0x260] sm:$0xff]  ;;  %v5302_v9 = vld [vmem:[#allocation2 + $0x248] sm:$0x7f] }
 0x334   : > { %18893 = vmatpush3.bf16.msra.mxu0 %v21896_v19  ;;  %v4983_v19 = vsel %vm4962_vm2, %v4981_v55, %v4982_v15  ;;  %v21905_v55 = vld [vmem:[%s22600_s30 + $0x220] sm:$0xff]   ;;  %v5004_v15 = vsel %vm4962_vm2, %v5002_v33, %v5003_v43  ;;  %v6728_v33 = vld [vmem:[#allocation2 + $0x308] sm:$0xff] }
 0x335   : > { %18926 = vmatprep.subr.bf16.mxu0 %v23730_v35  ;;  %v5301_v43 = vld [vmem:[#allocation2 + $0x240] sm:$0x80] }
 0x336   : > { %18655 = vmatmul.mubr.bf16.vlgmr.msra.gmra.mrb[0].mxu1 %v4968_v38  ;;  %v6440_v38 = vsel %vm4367_vm3, %v6438_v41, %v6439_v44  ;;  %v5287_v41 = vld [vmem:[#allocation2 + $0x198] sm:$0x80]  ;;  %v5288_v44 = vld [vmem:[#allocation2 + $0x1a0] sm:$0x7f] }
 0x337   : > { %18863 = vmatmul.mubr.bf16.gmra.mrb[16].mxu0 %v6422_v0  ;;  %18687 = vmatpush3.bf16.msra.mxu1 %v23702_v13  ;;  %v4977_v13 = vsel %vm4962_vm2, %v4975_v29, %v4976_v11  ;;  %v6714_v0 = vld [vmem:[#allocation2 + $0x1b8] sm:$0xff]  ;;  %v4921_v29 = vld [vmem:[#allocation2 + $0x268] sm:$0x1]  ;;  %v21913_v61 = vld [vmem:[%s22600_s30 + $0x120] sm:$0xff]  }
 0x338   : > { %18658 = vmatprep.mubr.bf16.mxu1 %v4971_v51  ;;  %18866 = vmatprep.mubr.bf16.mxu0 %v6425_v30  ;;  %v4919_v51 = vld [vmem:[#allocation2 + $0x250] sm:$0x1]  ;;  %v21903_v30 = vld [vmem:[%s22600_s30 + $0xf8] sm:$0xff]   ;;  %v21900_v11 = vld [vmem:[%s22600_s30 + $0x208] sm:$0xff]  }
 0x339   : > { %18688 = vmatprep.subr.bf16.mxu1 %v21891_v58  ;;  %v4994_v42 = vrot.slane %v4919_v51, 1  ;;  %v5291_v51 = vld [vmem:[#allocation2 + $0x1c8] sm:$0x80] }
 0x33b   : > { %18689 = vmatpush3.bf16.msra.mxu1 %v21891_v58  ;;  %v4989_v58 = vsel %vm4962_vm2, %v4987_v2, %v4988_v60  ;;  %v4995_v48 = vsel %vm4962_vm2, %v4993_v57, %v4994_v42  ;;  %v23780_v2 = vld [vmem:[#allocation2 + $0x278] sm:$0xff]  ;;  %v5293_v57 = vld [vmem:[#allocation2 + $0x1e0] sm:$0x80]  ;;  %v5294_v42 = vld [vmem:[#allocation2 + $0x1e8] sm:$0x7f] }
 0x33c   : > { %18690 = vmatprep.subr.bf16.mxu1 %v21893_v26  ;;  %v21908_v60 = vld [vmem:[%s22600_s30 + $0x238] sm:$0xff]  }
 0x33e   : > { %18659 = vmatmul.mubr.bf16.gmra.mrb[4].mxu1 %v4974_v24  ;;  %v4996_v24 = vrot.slane %v4920_v5, 1  ;;  %v21910_v5 = vld [vmem:[%s22600_s30 + $0x108] sm:$0xff]  }
 0x33f   : > { %18867 = vmatmul.mubr.bf16.gmra.mrb[20].mxu0 %v6428_v49  ;;  %18662 = vmatprep.mubr.bf16.mxu1 %v4977_v13  ;;  %v5000_v13 = vrot.slane %v4923_v21, 1  ;;  %v5295_v21 = vld [vmem:[#allocation2 + $0x1f8] sm:$0x80] }
 0x340   : > { %18870 = vmatprep.mubr.bf16.mxu0 %v6431_v20  ;;  %18691 = vmatpush3.bf16.msra.mxu1 %v21893_v26  ;;  %v4922_v26 = vld [vmem:[#allocation2 + $0x278] sm:$0xfe] }
 0x341   : > { %18692 = vmatprep.subr.bf16.mxu1 %v21895_v47  ;;  %v4999_v49 = vrot.slane %v4922_v26, 1 }
 0x343   : > { %v5001_v20 = vsel %vm4962_vm2, %v4999_v49, %v5000_v13  ;;  %v5297_v49 = vld [vmem:[#allocation2 + $0x210] sm:$0x80]  ;;  %v5298_v13 = vld [vmem:[#allocation2 + $0x218] sm:$0x7f] }
 0x344   : > { %18693 = vmatpush3.bf16.msra.mxu1 %v21895_v47  ;;  %v4997_v47 = vrot.slane %v4921_v29, 1 }
 0x345   : > { %18694 = vmatprep.subr.bf16.mxu1 %v21897_v52 }
 0x346   : > { %18663 = vmatmul.mubr.bf16.gmra.mrb[8].mxu1 %v4980_v7  ;;  %v4998_v34 = vsel %vm4962_vm2, %v4996_v24, %v4997_v47  ;;  %v4928_v7 = vld [vmem:[#allocation2 + $0x2c0] sm:$0xfe]  ;;  %v23800_v47 = vld [vmem:[#allocation2 + $0x2d8] sm:$0xff] }
 0x347   : > { %18871 = vmatmul.mubr.bf16.gmra.mrb[24].mxu0 %v6434_v8  ;;  %18666 = vmatprep.mubr.bf16.mxu1 %v4983_v19  ;;  %v5285_v8 = vld [vmem:[#allocation2 + $0x180] sm:$0x80]  ;;  %v5286_v19 = vld [vmem:[#allocation2 + $0x188] sm:$0x7f]  ;;  %v5008_v54 = vrot.slane %v4928_v7, 1  ;;  %v5373_v7 = vrot.slane %v5301_v43, 7 }
 0x348   : > { %18874 = vmatprep.mubr.bf16.mxu0 %v6437_v25  ;;  %18695 = vmatpush3.bf16.msra.mxu1 %v21897_v52  ;;  %v23771_v52 = vld [vmem:[#allocation2 + $0x248] sm:$0xff]  ;;  %v5349_v25 = vrot.slane %v5285_v8, 7  ;;  %v5350_v1 = vrot.slane %v5286_v19, 7  ;;  %v5296_v24 = vld [vmem:[#allocation2 + $0x200] sm:$0x7f] }
 0x349   : > { %18696 = vmatprep.subr.bf16.mxu1 %v21899_v50 }
 0x34a   : > { %v5351_v22 = vsel %vm4367_vm3, %v5349_v25, %v5350_v1  ;;  %v5303_v1 = vld [vmem:[#allocation2 + $0x258] sm:$0x80] }
 0x34c   : > { %18697 = vmatpush3.bf16.msra.mxu1 %v21899_v50  ;;  %v4929_v50 = vld [vmem:[#allocation2 + $0x2c8] sm:$0x1] }
 0x34d   : > { %18698 = vmatprep.subr.bf16.mxu1 %v21901_v36  ;;  %v5009_v45 = vrot.slane %v4929_v50, 1  ;;  %v5374_v50 = vrot.slane %v5302_v9, 7  ;;  %v5311_v9 = vld [vmem:[#allocation2 + $0x2b8] sm:$0x80] }
 0x34e   : > { %18667 = vmatmul.mubr.bf16.gmra.mrb[12].mxu1 %v4986_v4  ;;  %v5290_v4 = vld [vmem:[#allocation2 + $0x1b8] sm:$0x7f] }
 0x34f   : > { %18875 = vmatmul.mubr.bf16.gmra.mrb[28].mxu0 %v6440_v38  ;;  %18670 = vmatprep.mubr.bf16.mxu1 %v4989_v58  ;;  %v5010_v63 = vsel %vm4962_vm2, %v5008_v54, %v5009_v45  ;;  %v5352_v38 = vrot.slane %v5287_v41, 7  ;;  %v5353_v58 = vrot.slane %v5288_v44, 7  ;;  %v5356_v32 = vrot.slane %v5290_v4, 7  ;;  %v6729_v45 = vld [vmem:[#allocation2 + $0x320] sm:$0xff]  ;;  %v6990_v41 = vld [vmem:[#allocation2 + $0x1d8] sm:$0x1] }
 0x350   : > { %18894 = vmatprep.mubr.bf16.mxu0 %v6714_v0  ;;  %18699 = vmatpush3.bf16.msra.mxu1 %v21901_v36  ;;  %v5289_v36 = vld [vmem:[#allocation2 + $0x1b0] sm:$0x80]  ;;  %v5375_v25 = vsel %vm4367_vm3, %v5373_v7, %v5374_v50  ;;  %v6991_v4 = vld [vmem:[#allocation2 + $0x1e8] sm:$0xfe]  ;;  %v5314_v7 = vld [vmem:[#allocation2 + $0x2d8] sm:$0x7f] }
 0x351   : > { %18700 = vmatprep.subr.bf16.mxu1 %v21903_v30  ;;  %v5355_v0 = vrot.slane %v5289_v36, 7  ;;  %v5354_v31 = vsel %vm4367_vm3, %v5352_v38, %v5353_v58  ;;  %v5305_v44 = vld [vmem:[#allocation2 + $0x270] sm:$0x80]  ;;  %v6992_v38 = vld [vmem:[#allocation2 + $0x1f0] sm:$0x1]  ;;  %v5376_v58 = vrot.slane %v5303_v1, 7 }
 0x352   : > { %v21915_v36 = vld [vmem:[%s22600_s30 + $0x130] sm:$0xff]   ;;  %v6999_v50 = vld [vmem:[#allocation2 + $0x248] sm:$0xfe]  ;;  %v5392_v1 = vrot.slane %v5314_v7, 7 }
 0x353   : > { %v5357_v53 = vsel %vm4367_vm3, %v5355_v0, %v5356_v32 }
 0x354   : > { %18701 = vmatpush3.bf16.msra.mxu1 %v21903_v30  ;;  %v5292_v30 = vld [vmem:[#allocation2 + $0x1d0] sm:$0x7f] }
 0x355   : > { %20542 = vmatprep.subr.bf16.mxu1 %v23760_v18 }
 0x356   : > { %18671 = vmatmul.mubr.bf16.gmra.mrb[16].mxu1 %v4992_v62  ;;  %v5358_v62 = vrot.slane %v5291_v51, 7  ;;  %v5379_v51 = vrot.slane %v5305_v44, 7 }
 0x357   : > { %18895 = vmatmul.mubr.bf16.vlgmr.msra.gmra.mrb[0].mxu0 %v6715_v3  ;;  %18674 = vmatprep.mubr.bf16.mxu1 %v4995_v48  ;;  %v5359_v3 = vrot.slane %v5292_v30, 7  ;;  %v5361_v48 = vrot.slane %v5293_v57, 7  ;;  %v7058_v57 = vrot.slane %v6992_v38, 1  ;;  %v7001_v38 = vld [vmem:[#allocation2 + $0x260] sm:$0xfe] }
 0x358   : > { %18927 = vmatpush3.bf16.msra.mxu0 %v23730_v35  ;;  %18898 = vmatprep.mubr.bf16.mxu0 %v6716_v17  ;;  %v21904_v35 = vld [vmem:[%s22600_s30 + $0x218] sm:$0xff]   ;;  %v5362_v17 = vrot.slane %v5294_v42, 7 }
 0x359   : > { %18928 = vmatprep.subr.bf16.mxu0 %v21900_v11  ;;  %v5360_v29 = vsel %vm4367_vm3, %v5358_v62, %v5359_v3  ;;  %v21916_v42 = vld [vmem:[%s22600_s30 + $0x138] sm:$0xff]  }
 0x35a   : > { %v5363_v26 = vsel %vm4367_vm3, %v5361_v48, %v5362_v17  ;;  %v5307_v17 = vld [vmem:[#allocation2 + $0x288] sm:$0x80] }
 0x35c   : > { %18929 = vmatpush3.bf16.msra.mxu0 %v21900_v11  ;;  %v23796_v11 = vld [vmem:[#allocation2 + $0x2c0] sm:$0xff] }
 0x35d   : > { %18930 = vmatprep.subr.bf16.mxu0 %v21902_v14 }
 0x35e   : > { %18675 = vmatmul.mubr.bf16.gmra.mrb[20].mxu1 %v4998_v34  ;;  %v5365_v34 = vrot.slane %v5296_v24, 7  ;;  %v5309_v24 = vld [vmem:[#allocation2 + $0x2a0] sm:$0x80] }
 0x35f   : > { %18899 = vmatmul.mubr.bf16.gmra.mrb[4].mxu0 %v6717_v28  ;;  %18678 = vmatprep.mubr.bf16.mxu1 %v5001_v20  ;;  %v5367_v28 = vrot.slane %v5297_v49, 7  ;;  %v5368_v20 = vrot.slane %v5298_v13, 7  ;;  %v6995_v49 = vld [vmem:[#allocation2 + $0x218] sm:$0xfe]  ;;  %v6996_v13 = vld [vmem:[#allocation2 + $0x220] sm:$0x1] }
 0x360   : > { %18902 = vmatprep.mubr.bf16.mxu0 %v6718_v59  ;;  %18931 = vmatpush3.bf16.msra.mxu0 %v21902_v14  ;;  %v5364_v14 = vrot.slane %v5295_v21, 7  ;;  %v21912_v59 = vld [vmem:[%s22600_s30 + $0x118] sm:$0xff]   ;;  %v6994_v21 = vld [vmem:[#allocation2 + $0x208] sm:$0x1] }
 0x361   : > { %18932 = vmatprep.subr.bf16.mxu0 %v21904_v35  ;;  %v5369_v39 = vsel %vm4367_vm3, %v5367_v28, %v5368_v20  ;;  %v7061_v20 = vrot.slane %v6994_v21, 1 }
 0x362   : > { %v5366_v37 = vsel %vm4367_vm3, %v5364_v14, %v5365_v34  ;;  %v5382_v14 = vrot.slane %v5307_v17, 7  ;;  %v7005_v17 = vld [vmem:[#allocation2 + $0x290] sm:$0xfe] }
 0x363   : > { %v7078_v21 = vrot.slane %v7005_v17, 1 }
 0x364   : > { %18933 = vmatpush3.bf16.msra.mxu0 %v21904_v35  ;;  %v5300_v35 = vld [vmem:[#allocation2 + $0x230] sm:$0x7f] }
 0x365   : > { %18934 = vmatprep.subr.bf16.mxu0 %v21905_v55 }
 0x366   : > { %18679 = vmatmul.mubr.bf16.gmra.mrb[24].mxu1 %v5004_v15  ;;  %v6988_v15 = vld [vmem:[#allocation2 + $0x1c0] sm:$0x1] }
 0x367   : > { %18903 = vmatmul.mubr.bf16.gmra.mrb[8].mxu0 %v6719_v56  ;;  %18682 = vmatprep.mubr.bf16.mxu1 %v5007_v46  ;;  %v5370_v56 = vrot.slane %v5299_v10, 7  ;;  %v5371_v46 = vrot.slane %v5300_v35, 7  ;;  %v7052_v19 = vrot.slane %v6988_v15, 1  ;;  %v7064_v10 = vrot.slane %v6996_v13, 1 }
 0x368   : > { %18906 = vmatprep.mubr.bf16.mxu0 %v23771_v52  ;;  %18935 = vmatpush3.bf16.msra.mxu0 %v21905_v55  ;;  %v6987_v55 = vld [vmem:[#allocation2 + $0x1b8] sm:$0xfe] }
 0x369   : > { %18936 = vmatprep.subr.bf16.mxu0 %v21906_v12  ;;  %v7051_v8 = vrot.slane %v6987_v55, 1  ;;  %v5372_v54 = vsel %vm4367_vm3, %v5370_v56, %v5371_v46  ;;  %v6997_v55 = vld [vmem:[#allocation2 + $0x230] sm:$0xfe]  ;;  %v6998_v56 = vld [vmem:[#allocation2 + $0x238] sm:$0x1] }
 0x36a   : > { %v5313_v46 = vld [vmem:[#allocation2 + $0x2d0] sm:$0x80] }
 0x36c   : > { %18937 = vmatpush3.bf16.msra.mxu0 %v21906_v12  ;;  %v21914_v12 = vld [vmem:[%s22600_s30 + $0x128] sm:$0xff]  }
 0x36d   : > { %18938 = vmatprep.subr.bf16.mxu0 %v21907_v27 }
 0x36e   : > { %18683 = vmatmul.mubr.bf16.gmra.mrb[28].mxu1 %v5010_v63  ;;  %v6989_v63 = vld [vmem:[#allocation2 + $0x1d0] sm:$0xfe] }
 0x36f   : > { %18907 = vmatmul.mubr.bf16.gmra.mrb[12].mxu0 %v23777_v23  ;;  %18702 = vmatprep.mubr.bf16.mxu1 %v5351_v22  ;;  %v7053_v22 = vsel %vm4962_vm2, %v7051_v8, %v7052_v19  ;;  %v7054_v32 = vrot.slane %v6989_v63, 1  ;;  %v7000_v8 = vld [vmem:[#allocation2 + $0x250] sm:$0x1]  ;;  %v5388_v19 = vrot.slane %v5311_v9, 7  ;;  %v7014_v9 = vld [vmem:[#allocation2 + $0x2f8] sm:$0x1] }
 0x370   : > { %18910 = vmatprep.mubr.bf16.mxu0 %v23780_v2  ;;  %18939 = vmatpush3.bf16.msra.mxu0 %v21907_v27  ;;  %v5304_v27 = vld [vmem:[#allocation2 + $0x260] sm:$0x7f]  ;;  %v7070_v63 = vrot.slane %v7000_v8, 1  ;;  %v7018_v8 = vld [vmem:[#allocation2 + $0x328] sm:$0x1] }
 0x371   : > { %18940 = vmatprep.subr.bf16.mxu0 %v21908_v60  ;;  %v5377_v0 = vrot.slane %v5304_v27, 7  ;;  %v7069_v27 = vrot.slane %v6999_v50, 1  ;;  %v7017_v50 = vld [vmem:[#allocation2 + $0x320] sm:$0xfe] }
 0x373   : > { %v5378_v62 = vsel %vm4367_vm3, %v5376_v58, %v5377_v0  ;;  %v7002_v58 = vld [vmem:[#allocation2 + $0x268] sm:$0x1]  ;;  %v7003_v0 = vld [vmem:[#allocation2 + $0x278] sm:$0xfe] }
 0x374   : > { %18941 = vmatpush3.bf16.msra.mxu0 %v21908_v60  ;;  %v5306_v60 = vld [vmem:[#allocation2 + $0x278] sm:$0x7f] }
 0x375   : > { %v5380_v30 = vrot.slane %v5306_v60, 7  ;;  %v5315_v60 = vld [vmem:[#allocation2 + $0x2e8] sm:$0x80] }
 0x376   : > { %18703 = vmatmul.mubr.bf16.vlgmr.msra.gmra.mrb[0].mxu1 %v5354_v31  ;;  %v7055_v31 = vrot.slane %v6990_v41, 1 }
 0x377   : > { %18911 = vmatmul.mubr.bf16.gmra.mrb[16].mxu0 %v23786_v6  ;;  %20550 = vmatpush3.bf16.msra.mxu1 %v23760_v18  ;;  %v21911_v18 = vld [vmem:[%s22600_s30 + $0x110] sm:$0xff]   ;;  %v5381_v48 = vsel %vm4367_vm3, %v5379_v51, %v5380_v30  ;;  %v7072_v30 = vrot.slane %v7001_v38, 1 }
 0x378   : > { %18706 = vmatprep.mubr.bf16.mxu1 %v5357_v53  ;;  %18914 = vmatprep.mubr.bf16.mxu0 %v23789_v40  ;;  %v7057_v53 = vrot.slane %v6991_v4, 1  ;;  %v7056_v3 = vsel %vm4962_vm2, %v7054_v32, %v7055_v31  ;;  %v7071_v4 = vsel %vm4962_vm2, %v7069_v27, %v7070_v63  ;;  %v7004_v32 = vld [vmem:[#allocation2 + $0x280] sm:$0x1]  ;;  %v5394_v31 = vrot.slane %v5315_v60, 7 }
 0x379   : > { %20543 = vmatprep.subr.bf16.mxu1 %v21910_v5 }
 0x37b   : > { %20551 = vmatpush3.bf16.msra.mxu1 %v21910_v5  ;;  %v5308_v5 = vld [vmem:[#allocation2 + $0x290] sm:$0x7f] }
 0x37c   : > { %20544 = vmatprep.subr.bf16.mxu1 %v21911_v18  ;;  %v5383_v34 = vrot.slane %v5308_v5, 7  ;;  %v7006_v5 = vld [vmem:[#allocation2 + $0x298] sm:$0x1] }
 0x37e   : > { %18707 = vmatmul.mubr.bf16.gmra.mrb[4].mxu1 %v5360_v29  ;;  %v6993_v29 = vld [vmem:[#allocation2 + $0x200] sm:$0xfe]  ;;  %v5384_v35 = vsel %vm4367_vm3, %v5382_v14, %v5383_v34 }
 0x37f   : > { %18915 = vmatmul.mubr.bf16.gmra.mrb[20].mxu0 %v23796_v11  ;;  %18710 = vmatprep.mubr.bf16.mxu1 %v5363_v26  ;;  %v7059_v26 = vsel %vm4962_vm2, %v7057_v53, %v7058_v57  ;;  %v7060_v28 = vrot.slane %v6993_v29, 1  ;;  %v7073_v53 = vrot.slane %v7002_v58, 1  ;;  %v7075_v57 = vrot.slane %v7003_v0, 1  ;;  %v7007_v29 = vld [vmem:[#allocation2 + $0x2a8] sm:$0xfe] }
 0x380   : > { %18918 = vmatprep.mubr.bf16.mxu0 %v23800_v47  ;;  %20552 = vmatpush3.bf16.msra.mxu1 %v21911_v18  ;;  %v5310_v18 = vld [vmem:[#allocation2 + $0x2a8] sm:$0x7f]  ;;  %v7009_v34 = vld [vmem:[#allocation2 + $0x2c0] sm:$0xfe] }
 0x381   : > { %20545 = vmatprep.subr.bf16.mxu1 %v21912_v59 }
 0x384   : > { %20553 = vmatpush3.bf16.msra.mxu1 %v21912_v59  ;;  %v5385_v59 = vrot.slane %v5309_v24, 7  ;;  %v7079_v24 = vrot.slane %v7006_v5, 1 }
 0x385   : > { %20546 = vmatprep.subr.bf16.mxu1 %v21913_v61 }
 0x386   : > { %18711 = vmatmul.mubr.bf16.gmra.mrb[8].mxu1 %v5366_v37  ;;  %v5386_v37 = vrot.slane %v5310_v18, 7  ;;  %v7081_v18 = vrot.slane %v7007_v29, 1  ;;  %v7080_v13 = vsel %vm4962_vm2, %v7078_v21, %v7079_v24  ;;  %v7405_v29 = vld [vmem:[%s22606_s21 + $0x8] sm:$0xff] }
 0x387   : > { %18919 = vmatmul.mubr.bf16.gmra.mrb[24].mxu0 %v23806_v16  ;;  %18714 = vmatprep.mubr.bf16.mxu1 %v5369_v39  ;;  %v7063_v39 = vrot.slane %v6995_v49, 1 }
 0x388   : > { %18922 = vmatprep.mubr.bf16.mxu0 %v6728_v33  ;;  %20554 = vmatpush3.bf16.msra.mxu1 %v21913_v61  ;;  %v7062_v33 = vsel %vm4962_vm2, %v7060_v28, %v7061_v20  ;;  %v5387_v43 = vsel %vm4367_vm3, %v5385_v59, %v5386_v37  ;;  %v5312_v61 = vld [vmem:[#allocation2 + $0x2c0] sm:$0x7f]  ;;  %v7010_v28 = vld [vmem:[#allocation2 + $0x2c8] sm:$0x1]  ;;  %v7011_v20 = vld [vmem:[#allocation2 + $0x2d8] sm:$0xfe] }
 0x389   : > { %20547 = vmatprep.subr.bf16.mxu1 %v21914_v12  ;;  %v7065_v15 = vsel %vm4962_vm2, %v7063_v39, %v7064_v10  ;;  %v7012_v59 = vld [vmem:[#allocation2 + $0x2e0] sm:$0x1]  ;;  %v7085_v37 = vrot.slane %v7010_v28, 1  ;;  %v7087_v39 = vrot.slane %v7011_v20, 1  ;;  %v7410_v20 = vld [vmem:[%s22606_s21 + $0x30] sm:$0xff] }
 0x38a   : > { %v7088_v10 = vrot.slane %v7012_v59, 1 }
 0x38c   : > { %20555 = vmatpush3.bf16.msra.mxu1 %v21914_v12  ;;  %v5389_v12 = vrot.slane %v5312_v61, 7  ;;  %v7015_v61 = vld [vmem:[#allocation2 + $0x308] sm:$0xfe] }
 0x38d   : > { %20548 = vmatprep.subr.bf16.mxu1 %v21915_v36 }
 0x38e   : > { %18715 = vmatmul.mubr.bf16.gmra.mrb[12].mxu1 %v5372_v54  ;;  %v7066_v54 = vrot.slane %v6997_v55, 1  ;;  %v7091_v55 = vrot.slane %v7014_v9, 1 }
 0x38f   : > { %18923 = vmatmul.mubr.bf16.gmra.mrb[28].mxu0 %v6729_v45  ;;  %18718 = vmatprep.mubr.bf16.mxu1 %v5375_v25  ;;  %v7067_v45 = vrot.slane %v6998_v56, 1  ;;  %v5391_v25 = vrot.slane %v5313_v46, 7 }
 0x390   : > { %18942 = vmatprep.mubr.bf16.mxu0 %v7053_v22  ;;  %20556 = vmatpush3.bf16.msra.mxu1 %v21915_v36  ;;  %v5390_v22 = vsel %vm4367_vm3, %v5388_v19, %v5389_v12  ;;  %v5316_v36 = vld [vmem:[#allocation2 + $0x2f0] sm:$0x7f]  ;;  %v7097_v19 = vrot.slane %v7018_v8, 1 }
 0x391   : > { %20549 = vmatprep.subr.bf16.mxu1 %v21916_v42  ;;  %v7068_v41 = vsel %vm4962_vm2, %v7066_v54, %v7067_v45  ;;  %v5393_v44 = vsel %vm4367_vm3, %v5391_v25, %v5392_v1  ;;  %v5395_v51 = vrot.slane %v5316_v36, 7 }
 0x394   : > { %20557 = vmatpush3.bf16.msra.mxu1 %v21916_v42  ;;  %v7076_v42 = vrot.slane %v7004_v32, 1  ;;  %v7406_v32 = vld [vmem:[%s22606_s21 + $0x10] sm:$0xff] }
 0x396   : > { %18719 = vmatmul.mubr.bf16.gmra.mrb[16].mxu1 %v5378_v62  ;;  %v5396_v62 = vsel %vm4367_vm3, %v5394_v31, %v5395_v51 }
 0x397   : > { %18943 = vmatmul.mubr.bf16.vlgmr.msra.gmra.mrb[0].mxu0 %v7056_v3  ;;  %18722 = vmatprep.mubr.bf16.mxu1 %v5381_v48  ;;  %v7074_v3 = vsel %vm4962_vm2, %v7072_v30, %v7073_v53  ;;  %v7077_v48 = vsel %vm4962_vm2, %v7075_v57, %v7076_v42  ;;  %v7404_v53 = vld [vmem:[%s22606_s21] sm:$0xff] }
 0x398   : > { %18946 = vmatprep.mubr.bf16.mxu0 %v7059_v26  ;;  %v7008_v26 = vld [vmem:[#allocation2 + $0x2b0] sm:$0x1] }
 0x399   : > { %v7082_v49 = vrot.slane %v7008_v26, 1 }
 0x39b   : > { %v7083_v14 = vsel %vm4962_vm2, %v7081_v18, %v7082_v49 }
 0x39e   : > { %18723 = vmatmul.mubr.bf16.gmra.mrb[20].mxu1 %v5384_v35 }
 0x39f   : > { %18947 = vmatmul.mubr.bf16.gmra.mrb[4].mxu0 %v7062_v33  ;;  %18726 = vmatprep.mubr.bf16.mxu1 %v5387_v43  ;;  %v7089_v33 = vsel %vm4962_vm2, %v7087_v39, %v7088_v10  ;;  %v7013_v43 = vld [vmem:[#allocation2 + $0x2f0] sm:$0xfe]  ;;  %v7408_v39 = vld [vmem:[%s22606_s21 + $0x20] sm:$0xff] }
 0x3a0   : > { %18950 = vmatprep.mubr.bf16.mxu0 %v7065_v15  ;;  %v7093_v15 = vrot.slane %v7015_v61, 1 }
 0x3a6   : > { %18727 = vmatmul.mubr.bf16.gmra.mrb[24].mxu1 %v5390_v22 }
 0x3a7   : > { %18951 = vmatmul.mubr.bf16.gmra.mrb[8].mxu0 %v7068_v41  ;;  %18730 = vmatprep.mubr.bf16.mxu1 %v5393_v44 }
 0x3a8   : > { %18954 = vmatprep.mubr.bf16.mxu0 %v7071_v4 }
 0x3ae   : > { %18731 = vmatmul.mubr.bf16.gmra.mrb[28].mxu1 %v5396_v62 }
 0x3af   : > { %18955 = vmatmul.mubr.bf16.gmra.mrb[12].mxu0 %v7074_v3  ;;  %18766 = vmatprep.mubr.bf16.mxu1 %v23771_v52  ;;  %v7084_v52 = vrot.slane %v7009_v34, 1  ;;  %v7407_v3 = vld [vmem:[%s22606_s21 + $0x18] sm:$0xff] }
 0x3b0   : > { %18958 = vmatprep.mubr.bf16.mxu0 %v7077_v48 }
 0x3b1   : > { %v7086_v35 = vsel %vm4962_vm2, %v7084_v52, %v7085_v37 }
 0x3b6   : > { %18767 = vmatmul.mubr.bf16.vlgmr.msra.gmra.mrb[16].mxu1 %v23777_v23  ;;  %v7016_v23 = vld [vmem:[#allocation2 + $0x310] sm:$0x1] }
 0x3b7   : > { %18959 = vmatmul.mubr.bf16.gmra.mrb[16].mxu0 %v7080_v13  ;;  %18770 = vmatprep.mubr.bf16.mxu1 %v23780_v2  ;;  %v7090_v2 = vrot.slane %v7013_v43, 1  ;;  %v7094_v56 = vrot.slane %v7016_v23, 1  ;;  %v7411_v43 = vld [vmem:[%s22606_s21 + $0x38] sm:$0xff] }
 0x3b8   : > { %18962 = vmatprep.mubr.bf16.mxu0 %v7083_v14 }
 0x3b9   : > { %v7092_v46 = vsel %vm4962_vm2, %v7090_v2, %v7091_v55  ;;  %v7095_v7 = vsel %vm4962_vm2, %v7093_v15, %v7094_v56  ;;  %v7409_v2 = vld [vmem:[%s22606_s21 + $0x28] sm:$0xff] }
 0x3be   : > { %18771 = vmatmul.mubr.bf16.gmra.mrb[20].mxu1 %v23786_v6  ;;  %v7096_v6 = vrot.slane %v7017_v50, 1 }
 0x3bf   : > { %18963 = vmatmul.mubr.bf16.gmra.mrb[20].mxu0 %v7086_v35  ;;  %18774 = vmatprep.mubr.bf16.mxu1 %v23789_v40 }
 0x3c0   : > { %18966 = vmatprep.mubr.bf16.mxu0 %v7089_v33  ;;  %v7098_v40 = vsel %vm4962_vm2, %v7096_v6, %v7097_v19 }
 0x3c6   : > { %18775 = vmatmul.mubr.bf16.gmra.mrb[24].mxu1 %v23796_v11 }
 0x3c7   : > { %18967 = vmatmul.mubr.bf16.gmra.mrb[24].mxu0 %v7092_v46  ;;  %18778 = vmatprep.mubr.bf16.mxu1 %v23800_v47 }
 0x3c8   : > { %18970 = vmatprep.mubr.bf16.mxu0 %v7095_v7 }
 0x3ce   : > { %18779 = vmatmul.mubr.bf16.gmra.mrb[28].mxu1 %v23806_v16 }
 0x3cf   : > { %18971 = vmatmul.mubr.bf16.gmra.mrb[28].mxu0 %v7098_v40  ;;  %v7414_v40 = vld [vmem:[%s22606_s21 + $0x50] sm:$0xff] }
 0x449   : > { %v18704_v12 = vpop.f32.mrb[0].mxu1 }
 0x44a   : > { %v5511_v54 = vpop.f32.mrb[1].mxu1 }
 0x44b   : > { %v18705_v45 = vpop.f32.mrb[2].mxu1 }
 0x44c   : > { %v5514_v25 = vpop.f32.mrb[3].mxu1 }
 0x451   : > { %v18708_v1 = vpop.f32.mrb[4].mxu1 }
 0x452   : > { %v5527_v27 = vpop.f32.mrb[5].mxu1 }
 0x453   : > { %v18709_v63 = vpop.f32.mrb[6].mxu1 }
 0x454   : > { %v5530_v11 = vpop.f32.mrb[7].mxu1 }
 0x459   : > { %v23847_v22 = vpop.f32.mrb[8].mxu1 }
 0x45a   : > { %v23849_v47 = vpop.f32.mrb[9].mxu1 }
 0x45b   : > { %v23851_v41 = vpop.f32.mrb[10].mxu1 }
 0x45c   : > { %v23853_v44 = vpop.f32.mrb[11].mxu1 }
 0x461   : > { %v23855_v16 = vpop.f32.mrb[12].mxu1 }
 0x462   : > { %v23857_v60 = vpop.f32.mrb[13].mxu1 }
 0x463   : > { %v23859_v36 = vpop.f32.mrb[14].mxu1 }
 0x464   : > { %v23861_v4 = vpop.f32.mrb[15].mxu1 }
 0x46a   : > { %v18944_v38 = vpop.f32.mrb[0].mxu0 }
 0x46b   : > { %v20558_v58 = vadd.f32 %v18944_v38, %v18704_v12  ;;  %v7213_v0 = vpop.f32.mrb[1].mxu0 }
 0x46c   : > { %v20559_v31 = vadd.f32 %v7213_v0, %v5511_v54  ;;  %v18945_v51 = vpop.f32.mrb[2].mxu0  ;;  %v7413_v0 = vld [vmem:[%s22606_s21 + $0x48] sm:$0xff] }
 0x46d   : > { %v7374_v30 = vmax.f32 %v20558_v58, 0.0  ;;  %v20560_v57 = vadd.f32 %v18945_v51, %v18705_v45  ;;  %v7216_v42 = vpop.f32.mrb[3].mxu0 }
 0x46e   : > { %v7372_v62 = vmax.f32 %v20559_v31, 0.0  ;;  %v20561_v48 = vadd.f32 %v7216_v42, %v5514_v25  ;;  %v7412_v25 = vld [vmem:[%s22606_s21 + $0x40] sm:$0xff]  ;;  %v7418_v42 = vld [vmem:[%s22606_s21 + $0x70] sm:$0xff] }
 0x46f   : > { %v7438_v17 = vadd.f32 %v7406_v32, %v7374_v30  ;;  %v7375_v5 = vmax.f32 %v20560_v57, 0.0 }
 0x470   : > { %v7436_v26 = vadd.f32 %v7404_v53, %v7372_v62  ;;  %v7373_v21 = vmax.f32 %v20561_v48, 0.0 }
 0x471   : > { %7470 = vst [vmem:[%s22606_s21 + $0x10] sm:$0xff] %v7438_v17  ;;  %v7439_v24 = vadd.f32 %v7407_v3, %v7375_v5  ;;  %v7501_v18 = vpack.c.bf16 %v7375_v5, %v7374_v30  ;;  %v7416_v17 = vld [vmem:[%s22606_s21 + $0x60] sm:$0xff] }
 0x472   : > { %7468 = vst [vmem:[%s22606_s21] sm:$0xff] %v7436_v26  ;;  %v7437_v49 = vadd.f32 %v7405_v29, %v7373_v21  ;;  %v7500_v13 = vpack.c.bf16 %v7373_v21, %v7372_v62  ;;  %v18948_v14 = vpop.f32.mrb[4].mxu0  ;;  %v7419_v21 = vld [vmem:[%s22606_s21 + $0x78] sm:$0xff] }
 0x473   : > { %7471 = vst [vmem:[%s22606_s21 + $0x18] sm:$0xff] %v7439_v24  ;;  %7517 = vst [vmem:[#allocation2 + $0x1a0] sm:$0xff] %v7501_v18  ;;  %v20562_v34 = vadd.f32 %v18948_v14, %v18708_v1  ;;  %v7229_v28 = vpop.f32.mrb[5].mxu0 }
 0x474   : > { %7469 = vst [vmem:[%s22606_s21 + $0x8] sm:$0xff] %v7437_v49  ;;  %7516 = vst [vmem:[#allocation2 + $0x188] sm:$0xff] %v7500_v13  ;;  %v20563_v59 = vadd.f32 %v7229_v28, %v5527_v27  ;;  %v18949_v52 = vpop.f32.mrb[6].mxu0  ;;  %v7417_v49 = vld [vmem:[%s22606_s21 + $0x68] sm:$0xff] }
 0x475   : > { %v7378_v37 = vmax.f32 %v20562_v34, 0.0  ;;  %v20564_v10 = vadd.f32 %v18949_v52, %v18709_v63  ;;  %v7232_v35 = vpop.f32.mrb[7].mxu0 }
 0x476   : > { %v7376_v33 = vmax.f32 %v20563_v59, 0.0  ;;  %v20565_v9 = vadd.f32 %v7232_v35, %v5530_v11  ;;  %v7415_v11 = vld [vmem:[%s22606_s21 + $0x58] sm:$0xff] }
 0x477   : > { %v7442_v61 = vadd.f32 %v7410_v20, %v7378_v37  ;;  %v7379_v23 = vmax.f32 %v20564_v10, 0.0  ;;  %v7422_v10 = vld [vmem:[%s22606_s21 + $0x90] sm:$0xff] }
 0x478   : > { %v7440_v55 = vadd.f32 %v7408_v39, %v7376_v33  ;;  %v7377_v15 = vmax.f32 %v20565_v9, 0.0 }
 0x479   : > { %7474 = vst [vmem:[%s22606_s21 + $0x30] sm:$0xff] %v7442_v61  ;;  %v7443_v56 = vadd.f32 %v7411_v43, %v7379_v23  ;;  %v7503_v46 = vpack.c.bf16 %v7379_v23, %v7378_v37  ;;  %v7420_v61 = vld [vmem:[%s22606_s21 + $0x80] sm:$0xff] }
 0x47a   : > { %7472 = vst [vmem:[%s22606_s21 + $0x20] sm:$0xff] %v7440_v55  ;;  %v7441_v7 = vadd.f32 %v7409_v2, %v7377_v15  ;;  %v7502_v50 = vpack.c.bf16 %v7377_v15, %v7376_v33  ;;  %v18952_v8 = vpop.f32.mrb[8].mxu0  ;;  %v7423_v15 = vld [vmem:[%s22606_s21 + $0x98] sm:$0xff] }
 0x47b   : > { %7475 = vst [vmem:[%s22606_s21 + $0x38] sm:$0xff] %v7443_v56  ;;  %7519 = vst [vmem:[#allocation2 + $0x1d0] sm:$0xff] %v7503_v46  ;;  %v20566_v6 = vadd.f32 %v18952_v8, %v23847_v22  ;;  %v7245_v19 = vpop.f32.mrb[9].mxu0 }
 0x47c   : > { %7473 = vst [vmem:[%s22606_s21 + $0x28] sm:$0xff] %v7441_v7  ;;  %7518 = vst [vmem:[#allocation2 + $0x1b8] sm:$0xff] %v7502_v50  ;;  %v20567_v12 = vadd.f32 %v7245_v19, %v23849_v47  ;;  %v18953_v54 = vpop.f32.mrb[10].mxu0  ;;  %v7421_v50 = vld [vmem:[%s22606_s21 + $0x88] sm:$0xff] }
 0x47d   : > { %v7382_v45 = vmax.f32 %v20566_v6, 0.0  ;;  %v20568_v1 = vadd.f32 %v18953_v54, %v23851_v41  ;;  %v7248_v27 = vpop.f32.mrb[11].mxu0 }
 0x47e   : > { %v7380_v63 = vmax.f32 %v20567_v12, 0.0  ;;  %v20569_v22 = vadd.f32 %v7248_v27, %v23853_v44 }
 0x47f   : > { %v7446_v38 = vadd.f32 %v7414_v40, %v7382_v45  ;;  %v7383_v58 = vmax.f32 %v20568_v1, 0.0 }
 0x480   : > { %v7444_v32 = vadd.f32 %v7412_v25, %v7380_v63  ;;  %v7381_v31 = vmax.f32 %v20569_v22, 0.0  ;;  %v7426_v22 = vld [vmem:[%s22606_s21 + $0xb0] sm:$0xff] }
 0x481   : > { %7478 = vst [vmem:[%s22606_s21 + $0x50] sm:$0xff] %v7446_v38  ;;  %v7447_v47 = vadd.f32 %v7415_v11, %v7383_v58  ;;  %v7505_v51 = vpack.c.bf16 %v7383_v58, %v7382_v45 }
 0x482   : > { %7476 = vst [vmem:[%s22606_s21 + $0x40] sm:$0xff] %v7444_v32  ;;  %v7445_v30 = vadd.f32 %v7413_v0, %v7381_v31  ;;  %v7504_v41 = vpack.c.bf16 %v7381_v31, %v7380_v63  ;;  %v18956_v53 = vpop.f32.mrb[12].mxu0  ;;  %v7424_v31 = vld [vmem:[%s22606_s21 + $0xa0] sm:$0xff] }
 0x483   : > { %7479 = vst [vmem:[%s22606_s21 + $0x58] sm:$0xff] %v7447_v47  ;;  %7521 = vst [vmem:[#allocation2 + $0x200] sm:$0xff] %v7505_v51  ;;  %v20570_v44 = vadd.f32 %v18956_v53, %v23855_v16  ;;  %v7261_v57 = vpop.f32.mrb[13].mxu0 }
 0x484   : > { %7477 = vst [vmem:[%s22606_s21 + $0x48] sm:$0xff] %v7445_v30  ;;  %7520 = vst [vmem:[#allocation2 + $0x1e8] sm:$0xff] %v7504_v41  ;;  %v20571_v62 = vadd.f32 %v7261_v57, %v23857_v60  ;;  %v18957_v3 = vpop.f32.mrb[14].mxu0  ;;  %v7427_v41 = vld [vmem:[%s22606_s21 + $0xb8] sm:$0xff] }
 0x485   : > { %v7386_v48 = vmax.f32 %v20570_v44, 0.0  ;;  %v20572_v5 = vadd.f32 %v18957_v3, %v23859_v36  ;;  %v7264_v29 = vpop.f32.mrb[15].mxu0 }
 0x486   : > { %v7384_v26 = vmax.f32 %v20571_v62, 0.0  ;;  %v20573_v16 = vadd.f32 %v7264_v29, %v23861_v4 }
 0x487   : > { %v7450_v24 = vadd.f32 %v7418_v42, %v7386_v48  ;;  %v7387_v18 = vmax.f32 %v20572_v5, 0.0  ;;  %v7425_v42 = vld [vmem:[%s22606_s21 + $0xa8] sm:$0xff] }
 0x488   : > { %v7448_v13 = vadd.f32 %v7416_v17, %v7384_v26  ;;  %v7385_v14 = vmax.f32 %v20573_v16, 0.0 }
 0x489   : > { %7482 = vst [vmem:[%s22606_s21 + $0x70] sm:$0xff] %v7450_v24  ;;  %v7451_v60 = vadd.f32 %v7419_v21, %v7387_v18  ;;  %v7507_v34 = vpack.c.bf16 %v7387_v18, %v7386_v48  ;;  %v18768_v28 = vpop.f32.mrb[16].mxu1 }
 0x48a   : > { %7480 = vst [vmem:[%s22606_s21 + $0x60] sm:$0xff] %v7448_v13  ;;  %v7449_v20 = vadd.f32 %v7417_v49, %v7385_v14  ;;  %v7506_v36 = vpack.c.bf16 %v7385_v14, %v7384_v26  ;;  %v18960_v59 = vpop.f32.mrb[16].mxu0  ;;  %v5848_v52 = vpop.f32.mrb[17].mxu1  ;;  %v7430_v13 = vld [vmem:[%s22606_s21 + $0xd0] sm:$0xff] }
 0x48b   : > { %7483 = vst [vmem:[%s22606_s21 + $0x78] sm:$0xff] %v7451_v60  ;;  %7523 = vst [vmem:[#allocation2 + $0x230] sm:$0xff] %v7507_v34  ;;  %v20574_v4 = vadd.f32 %v18960_v59, %v18768_v28  ;;  %v7277_v37 = vpop.f32.mrb[17].mxu0  ;;  %v18769_v39 = vpop.f32.mrb[18].mxu1 }
 0x48c   : > { %7481 = vst [vmem:[%s22606_s21 + $0x68] sm:$0xff] %v7449_v20  ;;  %7522 = vst [vmem:[#allocation2 + $0x218] sm:$0xff] %v7506_v36  ;;  %v20575_v35 = vadd.f32 %v7277_v37, %v5848_v52  ;;  %v18961_v33 = vpop.f32.mrb[18].mxu0  ;;  %v5851_v43 = vpop.f32.mrb[19].mxu1  ;;  %v7428_v20 = vld [vmem:[%s22606_s21 + $0xc0] sm:$0xff] }
 0x48d   : > { %v7390_v9 = vmax.f32 %v20574_v4, 0.0  ;;  %v20576_v23 = vadd.f32 %v18961_v33, %v18769_v39  ;;  %v7280_v2 = vpop.f32.mrb[19].mxu0  ;;  %v7431_v4 = vld [vmem:[%s22606_s21 + $0xd8] sm:$0xff] }
 0x48e   : > { %v7388_v55 = vmax.f32 %v20575_v35, 0.0  ;;  %v20577_v56 = vadd.f32 %v7280_v2, %v5851_v43  ;;  %v7429_v35 = vld [vmem:[%s22606_s21 + $0xc8] sm:$0xff] }
 0x48f   : > { %v7454_v46 = vadd.f32 %v7422_v10, %v7390_v9  ;;  %v7391_v7 = vmax.f32 %v20576_v23, 0.0 }
 0x490   : > { %v7452_v8 = vadd.f32 %v7420_v61, %v7388_v55  ;;  %v7389_v6 = vmax.f32 %v20577_v56, 0.0 }
 0x491   : > { %7486 = vst [vmem:[%s22606_s21 + $0x90] sm:$0xff] %v7454_v46  ;;  %v7455_v19 = vadd.f32 %v7423_v15, %v7391_v7  ;;  %v7509_v40 = vpack.c.bf16 %v7391_v7, %v7390_v9  ;;  %v18772_v12 = vpop.f32.mrb[20].mxu1 }
 0x492   : > { %7484 = vst [vmem:[%s22606_s21 + $0x80] sm:$0xff] %v7452_v8  ;;  %v7453_v54 = vadd.f32 %v7421_v50, %v7389_v6  ;;  %v7508_v45 = vpack.c.bf16 %v7389_v6, %v7388_v55  ;;  %v18964_v25 = vpop.f32.mrb[20].mxu0  ;;  %v5864_v1 = vpop.f32.mrb[21].mxu1  ;;  %v7434_v8 = vld [vmem:[%s22606_s21 + $0xf0] sm:$0xff] }
 0x493   : > { %7487 = vst [vmem:[%s22606_s21 + $0x98] sm:$0xff] %v7455_v19  ;;  %7525 = vst [vmem:[#allocation2 + $0x260] sm:$0xff] %v7509_v40  ;;  %v20578_v27 = vadd.f32 %v18964_v25, %v18772_v12  ;;  %v7293_v63 = vpop.f32.mrb[21].mxu0  ;;  %v18773_v11 = vpop.f32.mrb[22].mxu1 }
 0x494   : > { %7485 = vst [vmem:[%s22606_s21 + $0x88] sm:$0xff] %v7453_v54  ;;  %7524 = vst [vmem:[#allocation2 + $0x248] sm:$0xff] %v7508_v45  ;;  %v20579_v38 = vadd.f32 %v7293_v63, %v5864_v1  ;;  %v18965_v58 = vpop.f32.mrb[22].mxu0  ;;  %v5867_v0 = vpop.f32.mrb[23].mxu1  ;;  %v7432_v54 = vld [vmem:[%s22606_s21 + $0xe0] sm:$0xff] }
 0x495   : > { %v7394_v32 = vmax.f32 %v20578_v27, 0.0  ;;  %v20580_v47 = vadd.f32 %v18965_v58, %v18773_v11  ;;  %v7296_v51 = vpop.f32.mrb[23].mxu0  ;;  %v7435_v27 = vld [vmem:[%s22606_s21 + $0xf8] sm:$0xff] }
 0x496   : > { %v7392_v30 = vmax.f32 %v20579_v38, 0.0  ;;  %v20581_v53 = vadd.f32 %v7296_v51, %v5867_v0  ;;  %v7433_v38 = vld [vmem:[%s22606_s21 + $0xe8] sm:$0xff] }
 0x497   : > { %v7458_v44 = vadd.f32 %v7426_v22, %v7394_v32  ;;  %v7395_v57 = vmax.f32 %v20580_v47, 0.0 }
 0x498   : > { %v7456_v62 = vadd.f32 %v7424_v31, %v7392_v30  ;;  %v7393_v3 = vmax.f32 %v20581_v53, 0.0 }
 0x499   : > { %7490 = vst [vmem:[%s22606_s21 + $0xb0] sm:$0xff] %v7458_v44  ;;  %v7459_v48 = vadd.f32 %v7427_v41, %v7395_v57  ;;  %v7511_v17 = vpack.c.bf16 %v7395_v57, %v7394_v32  ;;  %v18776_v5 = vpop.f32.mrb[24].mxu1 }
 0x49a   : > { %7488 = vst [vmem:[%s22606_s21 + $0xa0] sm:$0xff] %v7456_v62  ;;  %v7457_v29 = vadd.f32 %v7425_v42, %v7393_v3  ;;  %v7510_v26 = vpack.c.bf16 %v7393_v3, %v7392_v30  ;;  %v18968_v21 = vpop.f32.mrb[24].mxu0  ;;  %v5880_v16 = vpop.f32.mrb[25].mxu1 }
 0x49b   : > { %7491 = vst [vmem:[%s22606_s21 + $0xb8] sm:$0xff] %v7459_v48  ;;  %7527 = vst [vmem:[#allocation2 + $0x290] sm:$0xff] %v7511_v17  ;;  %v20582_v24 = vadd.f32 %v18968_v21, %v18776_v5  ;;  %v7309_v18 = vpop.f32.mrb[25].mxu0  ;;  %v18777_v49 = vpop.f32.mrb[26].mxu1 }
 0x49c   : > { %7489 = vst [vmem:[%s22606_s21 + $0xa8] sm:$0xff] %v7457_v29  ;;  %7526 = vst [vmem:[#allocation2 + $0x278] sm:$0xff] %v7510_v26  ;;  %v20583_v14 = vadd.f32 %v7309_v18, %v5880_v16  ;;  %v18969_v60 = vpop.f32.mrb[26].mxu0  ;;  %v5883_v34 = vpop.f32.mrb[27].mxu1 }
 0x49d   : > { %v7398_v28 = vmax.f32 %v20582_v24, 0.0  ;;  %v20584_v36 = vadd.f32 %v18969_v60, %v18777_v49  ;;  %v7312_v59 = vpop.f32.mrb[27].mxu0 }
 0x49e   : > { %v7396_v52 = vmax.f32 %v20583_v14, 0.0  ;;  %v20585_v37 = vadd.f32 %v7312_v59, %v5883_v34 }
 0x49f   : > { %v7462_v39 = vadd.f32 %v7430_v13, %v7398_v28  ;;  %v7399_v10 = vmax.f32 %v20584_v36, 0.0 }
 0x4a0   : > { %v7460_v33 = vadd.f32 %v7428_v20, %v7396_v52  ;;  %v7397_v43 = vmax.f32 %v20585_v37, 0.0 }
 0x4a1   : > { %7494 = vst [vmem:[%s22606_s21 + $0xd0] sm:$0xff] %v7462_v39  ;;  %v7463_v9 = vadd.f32 %v7431_v4, %v7399_v10  ;;  %v7513_v61 = vpack.c.bf16 %v7399_v10, %v7398_v28  ;;  %v18780_v23 = vpop.f32.mrb[28].mxu1 }
 0x4a2   : > { %7492 = vst [vmem:[%s22606_s21 + $0xc0] sm:$0xff] %v7460_v33  ;;  %v7461_v2 = vadd.f32 %v7429_v35, %v7397_v43  ;;  %v7512_v55 = vpack.c.bf16 %v7397_v43, %v7396_v52  ;;  %v18972_v15 = vpop.f32.mrb[28].mxu0  ;;  %v5896_v56 = vpop.f32.mrb[29].mxu1 }
 0x4a3   : > { %7495 = vst [vmem:[%s22606_s21 + $0xd8] sm:$0xff] %v7463_v9  ;;  %7529 = vst [vmem:[#allocation2 + $0x2c0] sm:$0xff] %v7513_v61  ;;  %v20586_v46 = vadd.f32 %v18972_v15, %v18780_v23  ;;  %v7325_v7 = vpop.f32.mrb[29].mxu0  ;;  %v18781_v50 = vpop.f32.mrb[30].mxu1 }
 0x4a4   : > { %7493 = vst [vmem:[%s22606_s21 + $0xc8] sm:$0xff] %v7461_v2  ;;  %7528 = vst [vmem:[#allocation2 + $0x2a8] sm:$0xff] %v7512_v55  ;;  %v20587_v6 = vadd.f32 %v7325_v7, %v5896_v56  ;;  %v18973_v19 = vpop.f32.mrb[30].mxu0  ;;  %v5899_v40 = vpop.f32.mrb[31].mxu1 }
 0x4a5   : > { %v7402_v12 = vmax.f32 %v20586_v46, 0.0  ;;  %v20588_v45 = vadd.f32 %v18973_v19, %v18781_v50  ;;  %v7328_v25 = vpop.f32.mrb[31].mxu0 }
 0x4a6   : > { %v7400_v1 = vmax.f32 %v20587_v6, 0.0  ;;  %v20589_v63 = vadd.f32 %v7328_v25, %v5899_v40 }
 0x4a7   : > { %v7466_v11 = vadd.f32 %v7434_v8, %v7402_v12  ;;  %v7403_v22 = vmax.f32 %v20588_v45, 0.0 }
 0x4a8   : > { %v7464_v58 = vadd.f32 %v7432_v54, %v7400_v1  ;;  %v7401_v0 = vmax.f32 %v20589_v63, 0.0 }
 0x4a9   : > { %7498 = vst [vmem:[%s22606_s21 + $0xf0] sm:$0xff] %v7466_v11  ;;  %v7467_v32 = vadd.f32 %v7435_v27, %v7403_v22  ;;  %v7515_v31 = vpack.c.bf16 %v7403_v22, %v7402_v12 }
 0x4aa   : > { %7496 = vst [vmem:[%s22606_s21 + $0xe0] sm:$0xff] %v7464_v58  ;;  %v7465_v47 = vadd.f32 %v7433_v38, %v7401_v0  ;;  %v7514_v51 = vpack.c.bf16 %v7401_v0, %v7400_v1 }
 0x4ab   : > { %7499 = vst [vmem:[%s22606_s21 + $0xf8] sm:$0xff] %v7467_v32  ;;  %7531 = vst [vmem:[#allocation2 + $0x2f0] sm:$0xff] %v7515_v31 }
 0x4ac   : > { %7497 = vst [vmem:[%s22606_s21 + $0xe8] sm:$0xff] %v7465_v47  ;;  %7530 = vst [vmem:[#allocation2 + $0x2d8] sm:$0xff] %v7514_v51 }
 0x4ad PF: > { %p16804_p13 = scmp.ne.s32.totalorder %s22327_s15, 2 }
 0x4ae   : > { %v21917_v30 = vld [vmem:[%s22600_s30 + $0x40] sm:$0xff] (!%p16804_p13)   ;;  %v21919_v53 = vld [vmem:[%s22600_s30 + $0x48] sm:$0xff] (!%p16804_p13)   ;;  %v21921_v57 = vld [vmem:[%s22600_s30 + $0x50] sm:$0xff] (!%p16804_p13)   ;;  %vm8196_vm4 = vcmask (!%p16804_p13), 1045504   ;;  %vm7601_vm5 = vcmask (!%p16804_p13), 1041408  }
 0x4af   : > { %7535 = sbr.rel (%p16804_p13) target bundleno = 1734 (0x6c6), region = 48  ;;  %v21918_v41 = vld [vmem:[%s22600_s30 + $0x100] sm:$0xff] (!%p16804_p13)   ;;  %18974 = vmatprep.subr.bf16.mxu1 (!%p16804_p13), %v21917_v30  ;;  %v21920_v44 = vld [vmem:[%s22600_s30 + $0x108] sm:$0xff] (!%p16804_p13)   ;;  %v21922_v42 = vld [vmem:[%s22600_s30 + $0x110] sm:$0xff] (!%p16804_p13)  }
 0x4b0   : > { %19166 = vmatprep.subr.bf16.mxu0 (!%p16804_p13), %v21918_v41  ;;  %18975 = vmatpush3.bf16.msra.mxu1 (!%p16804_p13), %v21917_v30  ;;  %v21923_v62 = vld [vmem:[%s22600_s30 + $0x58] sm:$0xff] (!%p16804_p13)   ;;  %v21925_v48 = vld [vmem:[%s22600_s30 + $0x60] sm:$0xff] (!%p16804_p13)   ;;  %v21927_v5 = vld [vmem:[%s22600_s30 + $0x68] sm:$0xff] (!%p16804_p13)  }
 0x4b1   : > { %19167 = vmatpush3.bf16.msra.mxu0 (!%p16804_p13), %v21918_v41  ;;  %18976 = vmatprep.subr.bf16.mxu1 (!%p16804_p13), %v21919_v53  ;;  %v21924_v3 = vld [vmem:[%s22600_s30 + $0x118] sm:$0xff] (!%p16804_p13)   ;;  %v21926_v17 = vld [vmem:[%s22600_s30 + $0x120] sm:$0xff] (!%p16804_p13)   ;;  %v7682_v29 = vld [vmem:[#allocation2 + $0x128] sm:$0xff] (!%p16804_p13) }
 0x4b2   : > { %19168 = vmatprep.subr.bf16.mxu0 (!%p16804_p13), %v21920_v44  ;;  %v8904_v26 = vld [vmem:[#allocation2 + $0x188] sm:$0xff] (!%p16804_p13)  ;;  %18990 = vmatprep.mubr.bf16.mxu1 (!%p16804_p13), %v7682_v29  ;;  %v21929_v16 = vld [vmem:[%s22600_s30 + $0x70] sm:$0xff] (!%p16804_p13)   ;;  %v21931_v18 = vld [vmem:[%s22600_s30 + $0x78] sm:$0xff] (!%p16804_p13)  }
 0x4b3   : > { %v21928_v21 = vld [vmem:[%s22600_s30 + $0x128] sm:$0xff] (!%p16804_p13)   ;;  %19182 = vmatprep.mubr.bf16.mxu0 (!%p16804_p13), %v8904_v26  ;;  %v21930_v24 = vld [vmem:[%s22600_s30 + $0x130] sm:$0xff] (!%p16804_p13)   ;;  %v21932_v49 = vld [vmem:[%s22600_s30 + $0x138] sm:$0xff] (!%p16804_p13)  }
 0x4b4   : > { %18977 = vmatpush3.bf16.msra.mxu1 (!%p16804_p13), %v21919_v53  ;;  %v21933_v13 = vld [vmem:[%s22600_s30] sm:$0xff] (!%p16804_p13)   ;;  %v21935_v28 = vld [vmem:[%s22600_s30 + $0x148] sm:$0xff] (!%p16804_p13)   ;;  %v7684_v20 = vld [vmem:[#allocation2 + $0x158] sm:$0xff] (!%p16804_p13) }
 0x4b5   : > { %19169 = vmatpush3.bf16.msra.mxu0 (!%p16804_p13), %v21920_v44  ;;  %18978 = vmatprep.subr.bf16.mxu1 (!%p16804_p13), %v21921_v57  ;;  %v21934_v14 = vld [vmem:[%s22600_s30 + $0x140] sm:$0xff] (!%p16804_p13)   ;;  %v8906_v36 = vld [vmem:[#allocation2 + $0x1b8] sm:$0xff] (!%p16804_p13)  ;;  %v21936_v59 = vld [vmem:[%s22600_s30 + $0x8] sm:$0xff] (!%p16804_p13)  }
 0x4b6   : > { %19170 = vmatprep.subr.bf16.mxu0 %v21922_v42  ;;  %v7683_v60 = vld [vmem:[#allocation2 + $0x140] sm:$0xff]  ;;  %v21939_v52 = vld [vmem:[%s22600_s30 + $0x10] sm:$0xff]   ;;  %v21938_v10 = vld [vmem:[%s22600_s30 + $0x158] sm:$0xff]  }
 0x4b7   : > { %v8905_v34 = vld [vmem:[#allocation2 + $0x1a0] sm:$0xff]  ;;  %v21937_v4 = vld [vmem:[%s22600_s30 + $0x150] sm:$0xff]   ;;  %v8908_v35 = vld [vmem:[#allocation2 + $0x1e8] sm:$0xff] }
 0x4b8   : > { %18979 = vmatpush3.bf16.msra.mxu1 %v21921_v57  ;;  %v7685_v37 = vld [vmem:[#allocation2 + $0x170] sm:$0xff]  ;;  %v21942_v33 = vld [vmem:[%s22600_s30 + $0x18] sm:$0xff]   ;;  %v21940_v43 = vld [vmem:[%s22600_s30 + $0x160] sm:$0xff]  }
 0x4b9   : > { %19171 = vmatpush3.bf16.msra.mxu0 %v21922_v42  ;;  %18980 = vmatprep.subr.bf16.mxu1 %v21923_v62  ;;  %v8907_v39 = vld [vmem:[#allocation2 + $0x1d0] sm:$0xff]  ;;  %v21945_v9 = vld [vmem:[%s22600_s30 + $0x20] sm:$0xff]   ;;  %v21941_v23 = vld [vmem:[%s22600_s30 + $0x168] sm:$0xff]  }
 0x4ba   : > { %19172 = vmatprep.subr.bf16.mxu0 %v21924_v3  ;;  %v8909_v61 = vld [vmem:[#allocation2 + $0x200] sm:$0xff]  ;;  %v8910_v2 = vld [vmem:[#allocation2 + $0x218] sm:$0xff]  ;;  %v9177_v55 = vld [vmem:[#allocation2 + $0x188] sm:$0xfc] }
 0x4bb   : > { %v9178_v15 = vld [vmem:[#allocation2 + $0x190] sm:$0x3]  ;;  %v21947_v56 = vld [vmem:[%s22600_s30 + $0x28] sm:$0xff]   ;;  %v9241_v7 = vrot.slane %v9177_v55, 2  ;;  %v21944_v19 = vld [vmem:[%s22600_s30 + $0x178] sm:$0xff]  }
 0x4bc   : > { %18981 = vmatpush3.bf16.msra.mxu1 %v21923_v62  ;;  %v21943_v46 = vld [vmem:[%s22600_s30 + $0x170] sm:$0xff]   ;;  %v9242_v50 = vrot.slane %v9178_v15, 2  ;;  %v9179_v40 = vld [vmem:[#allocation2 + $0x1a0] sm:$0xfc]  ;;  %v9180_v54 = vld [vmem:[#allocation2 + $0x1a8] sm:$0x3] }
 0x4bd   : > { %19173 = vmatpush3.bf16.msra.mxu0 %v21924_v3  ;;  %18982 = vmatprep.subr.bf16.mxu1 %v21925_v48  ;;  %v21949_v8 = vld [vmem:[%s22600_s30 + $0x30] sm:$0xff]   ;;  %v9181_v45 = vld [vmem:[#allocation2 + $0x1b8] sm:$0xfc]  ;;  %v9182_v25 = vld [vmem:[#allocation2 + $0x1c0] sm:$0x3]  ;;  %v9244_v27 = vrot.slane %v9179_v40, 2 }
 0x4be   : > { %19174 = vmatprep.subr.bf16.mxu0 %v21926_v17  ;;  %v8911_v6 = vld [vmem:[#allocation2 + $0x230] sm:$0xff]  ;;  %v9243_v12 = vsel %vm8196_vm4, %v9241_v7, %v9242_v50  ;;  %v21951_v1 = vld [vmem:[%s22600_s30 + $0x38] sm:$0xff]   ;;  %v9245_v63 = vrot.slane %v9180_v54, 2  ;;  %v21946_v11 = vld [vmem:[%s22600_s30 + $0x180] sm:$0xff]   ;;  %v9247_v22 = vrot.slane %v9181_v45, 2  ;;  %v9248_v38 = vrot.slane %v9182_v25, 2 }
 0x4bf   : > { %v23971_v58 = vld [vmem:[%s22600_s30 + $0x80] sm:$0xff]   ;;  %v9183_v32 = vld [vmem:[#allocation2 + $0x1d0] sm:$0xfc]  ;;  %v9184_v47 = vld [vmem:[#allocation2 + $0x1d8] sm:$0x3] }
 0x4c0   : > { %18983 = vmatpush3.bf16.msra.mxu1 %v21925_v48  ;;  %v9246_v0 = vsel %vm8196_vm4, %v9244_v27, %v9245_v63  ;;  %v9249_v31 = vsel %vm8196_vm4, %v9247_v22, %v9248_v38  ;;  %v21948_v51 = vld [vmem:[%s22600_s30 + $0x188] sm:$0xff]   ;;  %v9186_v41 = vld [vmem:[#allocation2 + $0x1f0] sm:$0x3]  ;;  %v9250_v53 = vrot.slane %v9183_v32, 2  ;;  %v9251_v44 = vrot.slane %v9184_v47, 2  ;;  %v21960_v40 = vld [vmem:[%s22600_s30 + $0x1b8] sm:$0xff]  }
 0x4c1   : > { %19175 = vmatpush3.bf16.msra.mxu0 %v21926_v17  ;;  %18984 = vmatprep.subr.bf16.mxu1 %v21927_v5  ;;  %v9185_v30 = vld [vmem:[#allocation2 + $0x1e8] sm:$0xfc]  ;;  %v9254_v42 = vrot.slane %v9186_v41, 2  ;;  %v21950_v62 = vld [vmem:[%s22600_s30 + $0x190] sm:$0xff]   ;;  %v9188_v29 = vld [vmem:[#allocation2 + $0x208] sm:$0x3] }
 0x4c2   : > { %19176 = vmatprep.subr.bf16.mxu0 %v21928_v21  ;;  %v9253_v57 = vrot.slane %v9185_v30, 2  ;;  %v9252_v3 = vsel %vm8196_vm4, %v9250_v53, %v9251_v44  ;;  %v7694_v48 = vld [vmem:[#allocation2 + $0x248] sm:$0xff]  ;;  %v7697_v55 = vld [vmem:[#allocation2 + $0x290] sm:$0xff]  ;;  %v7539_v15 = vld [vmem:[#allocation2 + $0x138] sm:$0xc0] }
 0x4c3   : > { %v9195_v50 = vld [vmem:[#allocation2 + $0x260] sm:$0xfc]  ;;  %v9197_v54 = vld [vmem:[#allocation2 + $0x278] sm:$0xfc]  ;;  %v9198_v45 = vld [vmem:[#allocation2 + $0x280] sm:$0x3] }
 0x4c4   : > { %18985 = vmatpush3.bf16.msra.mxu1 %v21927_v5  ;;  %v9255_v17 = vsel %vm8196_vm4, %v9253_v57, %v9254_v42  ;;  %v9187_v5 = vld [vmem:[#allocation2 + $0x200] sm:$0xfc]  ;;  %v7605_v25 = vrot.slane %v7539_v15, 6  ;;  %v9268_v27 = vrot.slane %v9195_v50, 2  ;;  %v9271_v38 = vrot.slane %v9197_v54, 2  ;;  %v21955_v47 = vld [vmem:[%s22600_s30 + $0x88] sm:$0xff]  }
 0x4c5   : > { %19177 = vmatpush3.bf16.msra.mxu0 %v21928_v21  ;;  %18986 = vmatprep.subr.bf16.mxu1 %v21929_v16  ;;  %v9189_v21 = vld [vmem:[#allocation2 + $0x218] sm:$0xfc]  ;;  %v23991_v32 = vld [vmem:[%s22600_s30 + $0x1c0] sm:$0xff]   ;;  %v7543_v30 = vld [vmem:[#allocation2 + $0x168] sm:$0xc0] }
 0x4c6   : > { %19178 = vmatprep.subr.bf16.mxu0 %v21930_v24  ;;  %v7544_v41 = vld [vmem:[#allocation2 + $0x170] sm:$0x3f]  ;;  %v9200_v42 = vld [vmem:[#allocation2 + $0x298] sm:$0x3]  ;;  %v21961_v15 = vld [vmem:[%s22600_s30 + $0xa0] sm:$0xff]  }
 0x4c7   : > { %v9199_v53 = vld [vmem:[#allocation2 + $0x290] sm:$0xfc]  ;;  %v21963_v50 = vld [vmem:[%s22600_s30 + $0xa8] sm:$0xff]   ;;  %v7553_v54 = vld [vmem:[#allocation2 + $0x1e0] sm:$0xc0] }
 0x4c8   : > { %18987 = vmatpush3.bf16.msra.mxu1 %v21929_v16  ;;  %v9190_v16 = vld [vmem:[#allocation2 + $0x220] sm:$0x3] }
 0x4c9   : > { %19179 = vmatpush3.bf16.msra.mxu0 %v21930_v24  ;;  %18988 = vmatprep.subr.bf16.mxu1 %v21931_v18  ;;  %v9256_v24 = vrot.slane %v9187_v5, 2  ;;  %v7611_v5 = vrot.slane %v7543_v30, 6 }
 0x4ca   : > { %19180 = vmatprep.subr.bf16.mxu0 %v21932_v49 }
 0x4cc   : > { %18989 = vmatpush3.bf16.msra.mxu1 %v21931_v18  ;;  %v9257_v18 = vrot.slane %v9188_v29, 2  ;;  %v7612_v29 = vrot.slane %v7544_v41, 6  ;;  %v7555_v41 = vld [vmem:[#allocation2 + $0x1f8] sm:$0xc0] }
 0x4cd   : > { %19181 = vmatpush3.bf16.msra.mxu0 %v21932_v49  ;;  %19022 = vmatprep.subr.bf16.mxu1 %v21933_v13  ;;  %v9259_v49 = vrot.slane %v9189_v21, 2  ;;  %v9274_v21 = vrot.slane %v9199_v53, 2  ;;  %v7556_v53 = vld [vmem:[#allocation2 + $0x200] sm:$0x3f] }
 0x4ce   : > { %19214 = vmatprep.subr.bf16.mxu0 %v21934_v14 }
 0x4cf   : > { %18991 = vmatmul.mubr.bf16.vlgmr.msra.gmra.mrb[0].mxu1 %v7683_v60  ;;  %v7695_v60 = vld [vmem:[#allocation2 + $0x260] sm:$0xff] }
 0x4d0   : > { %19183 = vmatmul.mubr.bf16.vlgmr.msra.gmra.mrb[0].mxu0 %v8905_v34  ;;  %19023 = vmatpush3.bf16.msra.mxu1 %v21933_v13  ;;  %v9260_v13 = vrot.slane %v9190_v16, 2  ;;  %v9275_v16 = vrot.slane %v9200_v42, 2 }
 0x4d1   : > { %19215 = vmatpush3.bf16.msra.mxu0 %v21934_v14  ;;  %18994 = vmatprep.mubr.bf16.mxu1 %v7684_v20  ;;  %v21954_v14 = vld [vmem:[%s22600_s30 + $0x1a0] sm:$0xff]   ;;  %v9258_v20 = vsel %vm8196_vm4, %v9256_v24, %v9257_v18 }
 0x4d2   : > { %19216 = vmatprep.subr.bf16.mxu0 %v21935_v28  ;;  %19186 = vmatprep.mubr.bf16.mxu0 %v8906_v36 }
 0x4d3   : > { %19024 = vmatprep.subr.bf16.mxu1 %v21936_v59 }
 0x4d4   : > { %19025 = vmatpush3.bf16.msra.mxu1 %v21936_v59  ;;  %v7537_v59 = vld [vmem:[#allocation2 + $0x120] sm:$0xc0] }
 0x4d5   : > { %19217 = vmatpush3.bf16.msra.mxu0 %v21935_v28  ;;  %19026 = vmatprep.subr.bf16.mxu1 %v21939_v52  ;;  %v9191_v28 = vld [vmem:[#allocation2 + $0x230] sm:$0xfc] }
 0x4d6   : > { %19218 = vmatprep.subr.bf16.mxu0 %v21937_v4 }
 0x4d7   : > { %18995 = vmatmul.mubr.bf16.gmra.mrb[4].mxu1 %v7685_v37  ;;  %v21956_v37 = vld [vmem:[%s22600_s30 + $0x1a8] sm:$0xff]  }
 0x4d8   : > { %19187 = vmatmul.mubr.bf16.gmra.mrb[4].mxu0 %v8907_v39  ;;  %18998 = vmatprep.mubr.bf16.mxu1 %v8904_v26  ;;  %v21952_v26 = vld [vmem:[%s22600_s30 + $0x198] sm:$0xff]  }
 0x4d9   : > { %19219 = vmatpush3.bf16.msra.mxu0 %v21937_v4  ;;  %19190 = vmatprep.mubr.bf16.mxu0 %v8908_v35  ;;  %v7538_v4 = vld [vmem:[#allocation2 + $0x128] sm:$0x3f] }
 0x4da   : > { %19220 = vmatprep.subr.bf16.mxu0 %v21938_v10  ;;  %19027 = vmatpush3.bf16.msra.mxu1 %v21939_v52  ;;  %v9261_v52 = vsel %vm8196_vm4, %v9259_v49, %v9260_v13 }
 0x4db   : > { %19028 = vmatprep.subr.bf16.mxu1 %v21942_v33 }
 0x4dd   : > { %19221 = vmatpush3.bf16.msra.mxu0 %v21938_v10  ;;  %v9194_v10 = vld [vmem:[#allocation2 + $0x250] sm:$0x3] }
 0x4de   : > { %19222 = vmatprep.subr.bf16.mxu0 %v21940_v43  ;;  %19029 = vmatpush3.bf16.msra.mxu1 %v21942_v33 }
 0x4df   : > { %18999 = vmatmul.mubr.bf16.gmra.mrb[8].mxu1 %v8905_v34  ;;  %19030 = vmatprep.subr.bf16.mxu1 %v21945_v9  ;;  %v7696_v34 = vld [vmem:[#allocation2 + $0x278] sm:$0xff] }
 0x4e0   : > { %19191 = vmatmul.mubr.bf16.gmra.mrb[8].mxu0 %v8909_v61  ;;  %19002 = vmatprep.mubr.bf16.mxu1 %v8906_v36  ;;  %v9192_v36 = vld [vmem:[#allocation2 + $0x238] sm:$0x3] }
 0x4e1   : > { %19223 = vmatpush3.bf16.msra.mxu0 %v21940_v43  ;;  %19194 = vmatprep.mubr.bf16.mxu0 %v8910_v2  ;;  %v9263_v33 = vrot.slane %v9192_v36, 2  ;;  %v7602_v43 = vrot.slane %v7537_v59, 6  ;;  %v9203_v36 = vld [vmem:[#allocation2 + $0x2c0] sm:$0xfc]  ;;  %v9204_v59 = vld [vmem:[#allocation2 + $0x2c8] sm:$0x3] }
 0x4e2   : > { %19224 = vmatprep.subr.bf16.mxu0 %v21941_v23  ;;  %19031 = vmatpush3.bf16.msra.mxu1 %v21945_v9  ;;  %v7603_v9 = vrot.slane %v7538_v4, 6  ;;  %v7549_v4 = vld [vmem:[#allocation2 + $0x1b0] sm:$0xc0] }
 0x4e3   : > { %19032 = vmatprep.subr.bf16.mxu1 %v21947_v56 }
 0x4e4   : > { %v7604_v7 = vsel %vm7601_vm5, %v7602_v43, %v7603_v9  ;;  %v9280_v43 = vrot.slane %v9203_v36, 2  ;;  %v9281_v9 = vrot.slane %v9204_v59, 2  ;;  %v9569_v36 = vld [vmem:[#allocation2 + $0x228] sm:$0xc0] }
 0x4e5   : > { %19225 = vmatpush3.bf16.msra.mxu0 %v21941_v23  ;;  %v9266_v23 = vrot.slane %v9194_v10, 2  ;;  %v9206_v10 = vld [vmem:[#allocation2 + $0x2e0] sm:$0x3]  ;;  %v21964_v59 = vld [vmem:[%s22600_s30 + $0x1c8] sm:$0xff]  }
 0x4e6   : > { %19226 = vmatprep.subr.bf16.mxu0 %v21943_v46  ;;  %19033 = vmatpush3.bf16.msra.mxu1 %v21947_v56  ;;  %v7540_v56 = vld [vmem:[#allocation2 + $0x140] sm:$0x3f] }
 0x4e7   : > { %19003 = vmatmul.mubr.bf16.gmra.mrb[12].mxu1 %v8907_v39  ;;  %19034 = vmatprep.subr.bf16.mxu1 %v21949_v8  ;;  %v9193_v39 = vld [vmem:[#allocation2 + $0x248] sm:$0xfc] }
 0x4e8   : > { %19195 = vmatmul.mubr.bf16.gmra.mrb[12].mxu0 %v8911_v6  ;;  %19006 = vmatprep.mubr.bf16.mxu1 %v8908_v35  ;;  %v9262_v35 = vrot.slane %v9191_v28, 2  ;;  %v21959_v28 = vld [vmem:[%s22600_s30 + $0x98] sm:$0xff]  }
 0x4e9   : > { %19227 = vmatpush3.bf16.msra.mxu0 %v21943_v46  ;;  %19230 = vmatprep.mubr.bf16.mxu0 %v9243_v12  ;;  %v7542_v12 = vld [vmem:[#allocation2 + $0x158] sm:$0x3f] }
 0x4ea   : > { %19228 = vmatprep.subr.bf16.mxu0 %v21944_v19  ;;  %19035 = vmatpush3.bf16.msra.mxu1 %v21949_v8  ;;  %v9264_v46 = vsel %vm8196_vm4, %v9262_v35, %v9263_v33  ;;  %v9196_v8 = vld [vmem:[#allocation2 + $0x268] sm:$0x3]  ;;  %v7609_v22 = vrot.slane %v7542_v12, 6 }
 0x4eb   : > { %19036 = vmatprep.subr.bf16.mxu1 %v21951_v1  ;;  %v9269_v63 = vrot.slane %v9196_v8, 2  ;;  %v9282_v8 = vsel %vm8196_vm4, %v9280_v43, %v9281_v9  ;;  %v9572_v43 = vld [vmem:[#allocation2 + $0x248] sm:$0x3f] }
 0x4ed   : > { %19229 = vmatpush3.bf16.msra.mxu0 %v21944_v19  ;;  %v7541_v19 = vld [vmem:[#allocation2 + $0x150] sm:$0xc0] }
 0x4ee   : > { %19262 = vmatprep.subr.bf16.mxu0 %v21946_v11  ;;  %19037 = vmatpush3.bf16.msra.mxu1 %v21951_v1  ;;  %v7606_v1 = vrot.slane %v7540_v56, 6 }
 0x4ef   : > { %19007 = vmatmul.mubr.bf16.gmra.mrb[16].mxu1 %v8909_v61  ;;  %19070 = vmatprep.subr.bf16.mxu1 %v23971_v58  ;;  %v9265_v61 = vrot.slane %v9193_v39, 2  ;;  %v9205_v39 = vld [vmem:[#allocation2 + $0x2d8] sm:$0xfc] }
 0x4f0   : > { %19231 = vmatmul.mubr.bf16.vlgmr.msra.gmra.mrb[0].mxu0 %v9246_v0  ;;  %19010 = vmatprep.mubr.bf16.mxu1 %v8910_v2  ;;  %v21958_v2 = vld [vmem:[%s22600_s30 + $0x1b0] sm:$0xff]   ;;  %v9272_v0 = vrot.slane %v9198_v45, 2  ;;  %v7554_v45 = vld [vmem:[#allocation2 + $0x1e8] sm:$0x3f] }
 0x4f1   : > { %19263 = vmatpush3.bf16.msra.mxu0 %v21946_v11  ;;  %19234 = vmatprep.mubr.bf16.mxu0 %v9249_v31  ;;  %v7608_v11 = vrot.slane %v7541_v19, 6  ;;  %v7607_v31 = vsel %vm7601_vm5, %v7605_v25, %v7606_v1  ;;  %v9207_v19 = vld [vmem:[#allocation2 + $0x2f0] sm:$0xfc]  ;;  %v9563_v25 = vld [vmem:[#allocation2 + $0x1e0] sm:$0xc0] }
 0x4f2   : > { %19264 = vmatprep.subr.bf16.mxu0 %v21948_v51  ;;  %v9273_v57 = vsel %vm8196_vm4, %v9271_v38, %v9272_v0  ;;  %v9564_v1 = vld [vmem:[#allocation2 + $0x1e8] sm:$0x3f]  ;;  %v7626_v38 = vrot.slane %v7553_v54, 6  ;;  %v7627_v0 = vrot.slane %v7554_v45, 6  ;;  %v9573_v54 = vld [vmem:[#allocation2 + $0x258] sm:$0xc0] }
 0x4f3   : > { %v7610_v44 = vsel %vm7601_vm5, %v7608_v11, %v7609_v22  ;;  %v9286_v11 = vrot.slane %v9207_v19, 2 }
 0x4f4   : > { %v7628_v42 = vsel %vm7601_vm5, %v7626_v38, %v7627_v0  ;;  %v9642_v38 = vrot.slane %v9573_v54, 6  ;;  %v8138_v54 = vld [vmem:[#allocation2 + $0x170] sm:$0xfc] }
 0x4f5   : > { %19265 = vmatpush3.bf16.msra.mxu0 %v21948_v51  ;;  %v9270_v51 = vsel %vm8196_vm4, %v9268_v27, %v9269_v63 }
 0x4f6   : > { %19266 = vmatprep.subr.bf16.mxu0 %v21950_v62 }
 0x4f7   : > { %19011 = vmatmul.mubr.bf16.gmra.mrb[20].mxu1 %v8911_v6  ;;  %v9267_v6 = vsel %vm8196_vm4, %v9265_v61, %v9266_v23  ;;  %v7620_v61 = vrot.slane %v7549_v4, 6 }
 0x4f8   : > { %19235 = vmatmul.mubr.bf16.gmra.mrb[4].mxu0 %v9252_v3  ;;  %19014 = vmatprep.mubr.bf16.mxu1 %v7694_v48  ;;  %v7546_v3 = vld [vmem:[#allocation2 + $0x188] sm:$0x3f] }
 0x4f9   : > { %19238 = vmatprep.mubr.bf16.mxu0 %v9255_v17  ;;  %19267 = vmatpush3.bf16.msra.mxu0 %v21950_v62  ;;  %v7545_v62 = vld [vmem:[#allocation2 + $0x180] sm:$0xc0]  ;;  %v9201_v48 = vld [vmem:[#allocation2 + $0x2a8] sm:$0xfc]  ;;  %v9202_v17 = vld [vmem:[#allocation2 + $0x2b0] sm:$0x3] }
 0x4fa   : > { %19268 = vmatprep.subr.bf16.mxu0 %v21952_v26  ;;  %v7614_v24 = vrot.slane %v7545_v62, 6  ;;  %v7615_v18 = vrot.slane %v7546_v3, 6  ;;  %v9277_v49 = vrot.slane %v9201_v48, 2  ;;  %v9278_v13 = vrot.slane %v9202_v17, 2  ;;  %v9565_v62 = vld [vmem:[#allocation2 + $0x1f8] sm:$0xc0] }
 0x4fb   : > { %v9566_v3 = vld [vmem:[#allocation2 + $0x200] sm:$0x3f]  ;;  %v7557_v48 = vld [vmem:[#allocation2 + $0x210] sm:$0xc0] }
 0x4fd   : > { %19269 = vmatpush3.bf16.msra.mxu0 %v21952_v26  ;;  %v21957_v26 = vld [vmem:[%s22600_s30 + $0x90] sm:$0xff]  }
 0x4fe   : > { %19270 = vmatprep.subr.bf16.mxu0 %v21954_v14 }
 0x4ff   : > { %19015 = vmatmul.mubr.bf16.gmra.mrb[24].mxu1 %v7695_v60  ;;  %v7547_v60 = vld [vmem:[#allocation2 + $0x198] sm:$0xc0] }
 0x500   : > { %19239 = vmatmul.mubr.bf16.gmra.mrb[8].mxu0 %v9258_v20  ;;  %19018 = vmatprep.mubr.bf16.mxu1 %v7696_v34  ;;  %v7548_v34 = vld [vmem:[#allocation2 + $0x1a0] sm:$0x3f]  ;;  %v7616_v20 = vsel %vm7601_vm5, %v7614_v24, %v7615_v18  ;;  %v7617_v35 = vrot.slane %v7547_v60, 6  ;;  %v9630_v24 = vrot.slane %v9565_v62, 6  ;;  %v9631_v18 = vrot.slane %v9566_v3, 6 }
 0x501   : > { %19242 = vmatprep.mubr.bf16.mxu0 %v9261_v52  ;;  %19271 = vmatpush3.bf16.msra.mxu0 %v21954_v14  ;;  %v7613_v14 = vsel %vm7601_vm5, %v7611_v5, %v7612_v29  ;;  %v9279_v52 = vsel %vm8196_vm4, %v9277_v49, %v9278_v13  ;;  %v7618_v33 = vrot.slane %v7548_v34, 6  ;;  %v7558_v5 = vld [vmem:[#allocation2 + $0x218] sm:$0x3f]  ;;  %v9567_v29 = vld [vmem:[#allocation2 + $0x210] sm:$0xc0]  ;;  %v7632_v49 = vrot.slane %v7557_v48, 6 }
 0x502   : > { %19272 = vmatprep.subr.bf16.mxu0 %v21956_v37  ;;  %v7633_v13 = vrot.slane %v7558_v5, 6  ;;  %v9633_v60 = vrot.slane %v9567_v29, 6  ;;  %v9577_v48 = vld [vmem:[#allocation2 + $0x288] sm:$0xc0] }
 0x503   : > { %v7619_v56 = vsel %vm7601_vm5, %v7617_v35, %v7618_v33  ;;  %v7562_v35 = vld [vmem:[#allocation2 + $0x248] sm:$0x3f]  ;;  %v9571_v33 = vld [vmem:[#allocation2 + $0x240] sm:$0xc0] }
 0x504   : > { %v7634_v4 = vsel %vm7601_vm5, %v7632_v49, %v7633_v13  ;;  %v8132_v29 = vld [vmem:[#allocation2 + $0x128] sm:$0xfc]  ;;  %v9648_v49 = vrot.slane %v9577_v48, 6  ;;  %v8142_v48 = vld [vmem:[#allocation2 + $0x1a0] sm:$0xfc] }
 0x505   : > { %19273 = vmatpush3.bf16.msra.mxu0 %v21956_v37  ;;  %v7550_v37 = vld [vmem:[#allocation2 + $0x1b8] sm:$0x3f] }
 0x506   : > { %19274 = vmatprep.subr.bf16.mxu0 %v21958_v2  ;;  %v7621_v23 = vrot.slane %v7550_v37, 6  ;;  %v9570_v37 = vld [vmem:[#allocation2 + $0x230] sm:$0x3f] }
 0x507   : > { %19019 = vmatmul.mubr.bf16.gmra.mrb[28].mxu1 %v7697_v55  ;;  %v9284_v55 = vrot.slane %v9206_v10, 2 }
 0x508   : > { %19243 = vmatmul.mubr.bf16.gmra.mrb[12].mxu0 %v9264_v46  ;;  %19038 = vmatprep.mubr.bf16.mxu1 %v7604_v7  ;;  %v7551_v46 = vld [vmem:[#allocation2 + $0x1c8] sm:$0xc0]  ;;  %v7552_v7 = vld [vmem:[#allocation2 + $0x1d0] sm:$0x3f] }
 0x509   : > { %19246 = vmatprep.mubr.bf16.mxu0 %v9267_v6  ;;  %19275 = vmatpush3.bf16.msra.mxu0 %v21958_v2  ;;  %v9283_v2 = vrot.slane %v9205_v39, 2  ;;  %v7622_v6 = vsel %vm7601_vm5, %v7620_v61, %v7621_v23  ;;  %v7623_v27 = vrot.slane %v7551_v46, 6  ;;  %v7624_v63 = vrot.slane %v7552_v7, 6  ;;  %v7561_v39 = vld [vmem:[#allocation2 + $0x240] sm:$0xc0] }
 0x50a   : > { %19276 = vmatprep.subr.bf16.mxu0 %v21960_v40  ;;  %v9636_v23 = vrot.slane %v9569_v36, 6  ;;  %v9639_v46 = vrot.slane %v9571_v33, 6  ;;  %v9640_v7 = vrot.slane %v9572_v43, 6  ;;  %v9582_v33 = vld [vmem:[#allocation2 + $0x2c0] sm:$0x3f] }
 0x50b   : > { %v9285_v12 = vsel %vm8196_vm4, %v9283_v2, %v9284_v55  ;;  %v7625_v30 = vsel %vm7601_vm5, %v7623_v27, %v7624_v63  ;;  %v9637_v2 = vrot.slane %v9570_v37, 6  ;;  %v21966_v55 = vld [vmem:[%s22600_s30 + $0x1d0] sm:$0xff]   ;;  %v9576_v63 = vld [vmem:[#allocation2 + $0x278] sm:$0x3f]  ;;  %v8135_v37 = vld [vmem:[#allocation2 + $0x148] sm:$0x3] }
 0x50c   : > { %v9641_v45 = vsel %vm7601_vm5, %v9639_v46, %v9640_v7  ;;  %v9575_v27 = vld [vmem:[#allocation2 + $0x270] sm:$0xc0]  ;;  %v8136_v43 = vld [vmem:[#allocation2 + $0x158] sm:$0xfc] }
 0x50d   : > { %19277 = vmatpush3.bf16.msra.mxu0 %v21960_v40  ;;  %v9208_v40 = vld [vmem:[#allocation2 + $0x2f8] sm:$0x3]  ;;  %v9638_v19 = vsel %vm7601_vm5, %v9636_v23, %v9637_v2  ;;  %v8203_v46 = vrot.slane %v8136_v43, 2 }
 0x50e   : > { %19310 = vmatprep.subr.bf16.mxu0 %v23991_v32  ;;  %v9287_v22 = vrot.slane %v9208_v40, 2  ;;  %v9584_v23 = vld [vmem:[#allocation2 + $0x2d8] sm:$0x3f] }
 0x50f   : > { %19039 = vmatmul.mubr.bf16.vlgmr.msra.gmra.mrb[0].mxu1 %v7607_v31  ;;  %v9627_v31 = vrot.slane %v9563_v25, 6  ;;  %v7565_v25 = vld [vmem:[#allocation2 + $0x270] sm:$0xc0] }
 0x510   : > { %19247 = vmatmul.mubr.bf16.gmra.mrb[16].mxu0 %v9270_v51  ;;  %19071 = vmatpush3.bf16.msra.mxu1 %v23971_v58  ;;  %v9276_v58 = vsel %vm8196_vm4, %v9274_v21, %v9275_v16  ;;  %v21965_v51 = vld [vmem:[%s22600_s30 + $0xb0] sm:$0xff]   ;;  %v7629_v21 = vrot.slane %v7555_v41, 6  ;;  %v7630_v16 = vrot.slane %v7556_v53, 6  ;;  %v21970_v41 = vld [vmem:[%s22600_s30 + $0x1e0] sm:$0xff]  }
 0x511   : > { %19042 = vmatprep.mubr.bf16.mxu1 %v7610_v44  ;;  %19250 = vmatprep.mubr.bf16.mxu0 %v9273_v57  ;;  %v21967_v44 = vld [vmem:[%s22600_s30 + $0xb8] sm:$0xff]   ;;  %v9288_v57 = vsel %vm8196_vm4, %v9286_v11, %v9287_v22 }
 0x512   : > { %19072 = vmatprep.subr.bf16.mxu1 %v21955_v47 }
 0x514   : > { %19073 = vmatpush3.bf16.msra.mxu1 %v21955_v47  ;;  %v9628_v47 = vrot.slane %v9564_v1, 6  ;;  %v7566_v1 = vld [vmem:[#allocation2 + $0x278] sm:$0x3f] }
 0x515   : > { %19074 = vmatprep.subr.bf16.mxu1 %v21957_v26 }
 0x516   : > { %v9629_v17 = vsel %vm7601_vm5, %v9627_v31, %v9628_v47  ;;  %v7644_v31 = vrot.slane %v7565_v25, 6  ;;  %v7645_v47 = vrot.slane %v7566_v1, 6 }
 0x517   : > { %19043 = vmatmul.mubr.bf16.gmra.mrb[4].mxu1 %v7613_v14  ;;  %v24019_v14 = vld [vmem:[%s22600_s30 + $0xc0] sm:$0xff]  }
 0x518   : > { %19251 = vmatmul.mubr.bf16.gmra.mrb[20].mxu0 %v9276_v58  ;;  %19046 = vmatprep.mubr.bf16.mxu1 %v7616_v20  ;;  %v7559_v58 = vld [vmem:[#allocation2 + $0x228] sm:$0xc0]  ;;  %v7560_v20 = vld [vmem:[#allocation2 + $0x230] sm:$0x3f]  ;;  %v7646_v3 = vsel %vm7601_vm5, %v7644_v31, %v7645_v47 }
 0x519   : > { %19254 = vmatprep.mubr.bf16.mxu0 %v9279_v52  ;;  %19075 = vmatpush3.bf16.msra.mxu1 %v21957_v26  ;;  %v9568_v26 = vld [vmem:[#allocation2 + $0x218] sm:$0x3f]  ;;  %v9632_v52 = vsel %vm7601_vm5, %v9630_v24, %v9631_v18  ;;  %v7635_v9 = vrot.slane %v7559_v58, 6  ;;  %v7636_v61 = vrot.slane %v7560_v20, 6  ;;  %v21974_v20 = vld [vmem:[%s22600_s30 + $0x1f0] sm:$0xff]  }
 0x51a   : > { %19076 = vmatprep.subr.bf16.mxu1 %v21959_v28  ;;  %v9634_v34 = vrot.slane %v9568_v26, 6  ;;  %v8133_v26 = vld [vmem:[#allocation2 + $0x130] sm:$0x3] }
 0x51c   : > { %v9635_v10 = vsel %vm7601_vm5, %v9633_v60, %v9634_v34  ;;  %v8197_v60 = vrot.slane %v8132_v29, 2  ;;  %v8198_v34 = vrot.slane %v8133_v26, 2  ;;  %v9590_v26 = vld [vmem:[#allocation2 + $0x320] sm:$0x3f] }
 0x51d   : > { %19077 = vmatpush3.bf16.msra.mxu1 %v21959_v28  ;;  %v7631_v28 = vsel %vm7601_vm5, %v7629_v21, %v7630_v16  ;;  %v9579_v21 = vld [vmem:[#allocation2 + $0x2a0] sm:$0xc0]  ;;  %v9580_v16 = vld [vmem:[#allocation2 + $0x2a8] sm:$0x3f] }
 0x51e   : > { %19078 = vmatprep.subr.bf16.mxu1 %v21961_v15  ;;  %v9652_v58 = vrot.slane %v9580_v16, 6  ;;  %v8145_v16 = vld [vmem:[#allocation2 + $0x1c0] sm:$0x3] }
 0x51f   : > { %19047 = vmatmul.mubr.bf16.gmra.mrb[8].mxu1 %v7619_v56  ;;  %v7639_v56 = vrot.slane %v7562_v35, 6  ;;  %v9581_v35 = vld [vmem:[#allocation2 + $0x2b8] sm:$0xc0] }
 0x520   : > { %19255 = vmatmul.mubr.bf16.gmra.mrb[24].mxu0 %v9282_v8  ;;  %19050 = vmatprep.mubr.bf16.mxu1 %v7622_v6  ;;  %v7563_v8 = vld [vmem:[#allocation2 + $0x258] sm:$0xc0] }
 0x521   : > { %19258 = vmatprep.mubr.bf16.mxu0 %v9285_v12  ;;  %19079 = vmatpush3.bf16.msra.mxu1 %v21961_v15  ;;  %v7638_v15 = vrot.slane %v7561_v39, 6  ;;  %v21968_v6 = vld [vmem:[%s22600_s30 + $0x1d8] sm:$0xff]   ;;  %v7564_v12 = vld [vmem:[#allocation2 + $0x260] sm:$0x3f]  ;;  %v7641_v11 = vrot.slane %v7563_v8, 6  ;;  %v9658_v8 = vrot.slane %v9584_v23, 6 }
 0x522   : > { %19080 = vmatprep.subr.bf16.mxu1 %v21963_v50  ;;  %v7642_v22 = vrot.slane %v7564_v12, 6  ;;  %v21976_v39 = vld [vmem:[%s22600_s30 + $0x1f8] sm:$0xff]   ;;  %v8149_v23 = vld [vmem:[#allocation2 + $0x1f0] sm:$0x3] }
 0x523   : > { %v7640_v40 = vsel %vm7601_vm5, %v7638_v15, %v7639_v56  ;;  %v9654_v15 = vrot.slane %v9581_v35, 6  ;;  %v9655_v56 = vrot.slane %v9582_v33, 6  ;;  %v8147_v35 = vld [vmem:[#allocation2 + $0x1d8] sm:$0x3]  ;;  %v9593_v33 = vld [vmem:[#allocation2 + $0x348] sm:$0xc0] }
 0x524   : > { %v7643_v53 = vsel %vm7601_vm5, %v7641_v11, %v7642_v22  ;;  %v8141_v11 = vld [vmem:[#allocation2 + $0x190] sm:$0x3]  ;;  %v9587_v22 = vld [vmem:[#allocation2 + $0x300] sm:$0xc0] }
 0x525   : > { %19081 = vmatpush3.bf16.msra.mxu1 %v21963_v50  ;;  %v7637_v50 = vsel %vm7601_vm5, %v7635_v9, %v7636_v61  ;;  %v8137_v9 = vld [vmem:[#allocation2 + $0x160] sm:$0x3]  ;;  %v9583_v61 = vld [vmem:[#allocation2 + $0x2d0] sm:$0xc0]  ;;  %v9656_v12 = vsel %vm7601_vm5, %v9654_v15, %v9655_v56  ;;  %v9672_v15 = vrot.slane %v9593_v33, 6 }
 0x526   : > { %19082 = vmatprep.subr.bf16.mxu1 %v21965_v51  ;;  %v8204_v7 = vrot.slane %v8137_v9, 2  ;;  %v9594_v9 = vld [vmem:[#allocation2 + $0x350] sm:$0x3f] }
 0x527   : > { %19051 = vmatmul.mubr.bf16.gmra.mrb[12].mxu1 %v7625_v30  ;;  %v9646_v30 = vrot.slane %v9576_v63, 6  ;;  %v8140_v63 = vld [vmem:[#allocation2 + $0x188] sm:$0xfc]  ;;  %v9673_v56 = vrot.slane %v9594_v9, 6 }
 0x528   : > { %19259 = vmatmul.mubr.bf16.gmra.mrb[28].mxu0 %v9288_v57  ;;  %19054 = vmatprep.mubr.bf16.mxu1 %v7628_v42  ;;  %v7568_v57 = vld [vmem:[#allocation2 + $0x290] sm:$0x3f]  ;;  %v21972_v42 = vld [vmem:[%s22600_s30 + $0x1e8] sm:$0xff]   ;;  %v8205_v25 = vsel %vm8196_vm4, %v8203_v46, %v8204_v7  ;;  %v8222_v7 = vrot.slane %v8149_v23, 2 }
 0x529   : > { %19278 = vmatprep.mubr.bf16.mxu0 %v9629_v17  ;;  %19083 = vmatpush3.bf16.msra.mxu1 %v21965_v51  ;;  %v9645_v51 = vrot.slane %v9575_v27, 6  ;;  %v9578_v17 = vld [vmem:[#allocation2 + $0x290] sm:$0x3f]  ;;  %v7648_v18 = vrot.slane %v7568_v57, 6 }
 0x52a   : > { %19084 = vmatprep.subr.bf16.mxu1 %v21967_v44  ;;  %v9649_v13 = vrot.slane %v9578_v17, 6  ;;  %v9586_v27 = vld [vmem:[#allocation2 + $0x2f0] sm:$0x3f]  ;;  %v8143_v17 = vld [vmem:[#allocation2 + $0x1a8] sm:$0x3] }
 0x52b   : > { %v9647_v5 = vsel %vm7601_vm5, %v9645_v51, %v9646_v30  ;;  %v9661_v51 = vrot.slane %v9586_v27, 6  ;;  %v8209_v30 = vrot.slane %v8140_v63, 2 }
 0x52d   : > { %19085 = vmatpush3.bf16.msra.mxu1 %v21967_v44  ;;  %v7567_v44 = vld [vmem:[#allocation2 + $0x288] sm:$0xc0] }
 0x52e   : > { %19118 = vmatprep.subr.bf16.mxu1 %v24019_v14  ;;  %v7647_v24 = vrot.slane %v7567_v44, 6  ;;  %v9663_v44 = vrot.slane %v9587_v22, 6 }
 0x52f   : > { %19055 = vmatmul.mubr.bf16.gmra.mrb[16].mxu1 %v7631_v28  ;;  %v9651_v28 = vrot.slane %v9579_v21, 6  ;;  %v8144_v21 = vld [vmem:[#allocation2 + $0x1b8] sm:$0xfc] }
 0x530   : > { %19279 = vmatmul.mubr.bf16.vlgmr.msra.gmra.mrb[0].mxu0 %v9632_v52  ;;  %19058 = vmatprep.mubr.bf16.mxu1 %v7634_v4  ;;  %v7649_v36 = vsel %vm7601_vm5, %v7647_v24, %v7648_v18  ;;  %v8199_v52 = vsel %vm8196_vm4, %v8197_v60, %v8198_v34  ;;  %v8134_v4 = vld [vmem:[#allocation2 + $0x140] sm:$0xfc]  ;;  %v9591_v24 = vld [vmem:[#allocation2 + $0x330] sm:$0xc0]  ;;  %v9592_v18 = vld [vmem:[#allocation2 + $0x338] sm:$0x3f] }
 0x531   : > { %19311 = vmatpush3.bf16.msra.mxu0 %v23991_v32  ;;  %19282 = vmatprep.mubr.bf16.mxu0 %v9635_v10  ;;  %v9574_v32 = vld [vmem:[#allocation2 + $0x260] sm:$0x3f]  ;;  %v9653_v10 = vsel %vm7601_vm5, %v9651_v28, %v9652_v58  ;;  %v8200_v2 = vrot.slane %v8134_v4, 2  ;;  %v9667_v34 = vrot.slane %v9590_v26, 6  ;;  %v8215_v28 = vrot.slane %v8144_v21, 2  ;;  %v21979_v4 = vld [vmem:[%s22600_s30 + $0xe8] sm:$0xff]  }
 0x532   : > { %19312 = vmatprep.subr.bf16.mxu0 %v21964_v59  ;;  %v9643_v0 = vrot.slane %v9574_v32, 6  ;;  %v9585_v32 = vld [vmem:[#allocation2 + $0x2e8] sm:$0xc0]  ;;  %v8216_v58 = vrot.slane %v8145_v16, 2  ;;  %v8158_v21 = vld [vmem:[#allocation2 + $0x260] sm:$0xfc] }
 0x533   : > { %v9660_v47 = vrot.slane %v9585_v32, 6  ;;  %v8152_v32 = vld [vmem:[#allocation2 + $0x218] sm:$0xfc]  ;;  %v24084_v26 = vld [vmem:[#allocation2 + $0x248] sm:$0xff] }
 0x534   : > { %v9644_v62 = vsel %vm7601_vm5, %v9642_v38, %v9643_v0  ;;  %v9588_v38 = vld [vmem:[#allocation2 + $0x308] sm:$0x3f]  ;;  %v8206_v0 = vrot.slane %v8138_v54, 2  ;;  %v8150_v54 = vld [vmem:[#allocation2 + $0x200] sm:$0xfc] }
 0x535   : > { %19313 = vmatpush3.bf16.msra.mxu0 %v21964_v59  ;;  %v9650_v59 = vsel %vm7601_vm5, %v9648_v49, %v9649_v13  ;;  %v9664_v57 = vrot.slane %v9588_v38, 6  ;;  %v8212_v49 = vrot.slane %v8142_v48, 2  ;;  %v8213_v13 = vrot.slane %v8143_v17, 2  ;;  %v21982_v48 = vld [vmem:[%s22600_s30 + $0x210] sm:$0xff]   ;;  %v8159_v16 = vld [vmem:[#allocation2 + $0x268] sm:$0x3] }
 0x536   : > { %19314 = vmatprep.subr.bf16.mxu0 %v21966_v55  ;;  %v8224_v27 = vrot.slane %v8150_v54, 2 }
 0x537   : > { %19059 = vmatmul.mubr.bf16.gmra.mrb[20].mxu1 %v7637_v50  ;;  %v9657_v50 = vrot.slane %v9583_v61, 6  ;;  %v9665_v29 = vsel %vm7601_vm5, %v9663_v44, %v9664_v57  ;;  %v8148_v61 = vld [vmem:[#allocation2 + $0x1e8] sm:$0xfc]  ;;  %v8157_v44 = vld [vmem:[#allocation2 + $0x250] sm:$0x3]  ;;  %v24077_v57 = vld [vmem:[%s22600_s30 + $0x100] sm:$0xff]  }
 0x538   : > { %19283 = vmatmul.mubr.bf16.gmra.mrb[4].mxu0 %v9638_v19  ;;  %19062 = vmatprep.mubr.bf16.mxu1 %v7640_v40  ;;  %v21971_v40 = vld [vmem:[%s22600_s30 + $0xc8] sm:$0xff]   ;;  %v8221_v46 = vrot.slane %v8148_v61, 2  ;;  %v21987_v61 = vld [vmem:[%s22600_s30 + $0x230] sm:$0xff]  }
 0x539   : > { %19286 = vmatprep.mubr.bf16.mxu0 %v9641_v45  ;;  %19315 = vmatpush3.bf16.msra.mxu0 %v21966_v55  ;;  %v8201_v55 = vrot.slane %v8135_v37, 2  ;;  %v8139_v45 = vld [vmem:[#allocation2 + $0x178] sm:$0x3]  ;;  %v9659_v1 = vsel %vm7601_vm5, %v9657_v50, %v9658_v8  ;;  %v21981_v50 = vld [vmem:[%s22600_s30 + $0xf0] sm:$0xff]  }
 0x53a   : > { %19316 = vmatprep.subr.bf16.mxu0 %v21968_v6  ;;  %v8207_v31 = vrot.slane %v8139_v45, 2  ;;  %v8151_v45 = vld [vmem:[#allocation2 + $0x208] sm:$0x3] }
 0x53b   : > { %v8202_v19 = vsel %vm8196_vm4, %v8200_v2, %v8201_v55  ;;  %v8219_v55 = vrot.slane %v8147_v35, 2  ;;  %v8225_v63 = vrot.slane %v8151_v45, 2 }
 0x53d   : > { %19317 = vmatpush3.bf16.msra.mxu0 %v21968_v6  ;;  %v24047_v6 = vld [vmem:[%s22600_s30 + $0x200] sm:$0xff]   ;;  %v8226_v38 = vsel %vm8196_vm4, %v8224_v27, %v8225_v63  ;;  %v24112_v63 = vld [vmem:[#allocation2 + $0x2d8] sm:$0xff] }
 0x53e   : > { %19318 = vmatprep.subr.bf16.mxu0 %v21970_v41 }
 0x53f   : > { %19063 = vmatmul.mubr.bf16.gmra.mrb[24].mxu1 %v7643_v53  ;;  %v21973_v53 = vld [vmem:[%s22600_s30 + $0xd0] sm:$0xff]  }
 0x540   : > { %19287 = vmatmul.mubr.bf16.gmra.mrb[8].mxu0 %v9644_v62  ;;  %19066 = vmatprep.mubr.bf16.mxu1 %v7646_v3  ;;  %v21975_v62 = vld [vmem:[%s22600_s30 + $0xd8] sm:$0xff]   ;;  %v9662_v3 = vsel %vm7601_vm5, %v9660_v47, %v9661_v51  ;;  %v8154_v51 = vld [vmem:[#allocation2 + $0x230] sm:$0xfc] }
 0x541   : > { %19290 = vmatprep.mubr.bf16.mxu0 %v9647_v5  ;;  %19319 = vmatpush3.bf16.msra.mxu0 %v21970_v41  ;;  %v8210_v41 = vrot.slane %v8141_v11, 2  ;;  %v9589_v5 = vld [vmem:[#allocation2 + $0x318] sm:$0xc0]  ;;  %v8227_v11 = vrot.slane %v8152_v32, 2  ;;  %v24109_v32 = vld [vmem:[#allocation2 + $0x2c0] sm:$0xff] }
 0x542   : > { %19320 = vmatprep.subr.bf16.mxu0 %v21972_v42  ;;  %v9666_v60 = vrot.slane %v9589_v5, 6  ;;  %v9950_v47 = vld [vmem:[#allocation2 + $0x218] sm:$0xff]  ;;  %v9951_v5 = vld [vmem:[#allocation2 + $0x230] sm:$0xff] }
 0x544   : > { %v9668_v37 = vsel %vm7601_vm5, %v9666_v60, %v9667_v34 }
 0x545   : > { %19321 = vmatpush3.bf16.msra.mxu0 %v21972_v42  ;;  %v8208_v42 = vsel %vm8196_vm4, %v8206_v0, %v8207_v31  ;;  %v9949_v0 = vld [vmem:[#allocation2 + $0x200] sm:$0xff] }
 0x546   : > { %19322 = vmatprep.subr.bf16.mxu0 %v21974_v20 }
 0x547   : > { %19067 = vmatmul.mubr.bf16.gmra.mrb[28].mxu1 %v7649_v36  ;;  %v9670_v36 = vrot.slane %v9592_v18, 6  ;;  %v21984_v18 = vld [vmem:[%s22600_s30 + $0x218] sm:$0xff]  }
 0x548   : > { %19291 = vmatmul.mubr.bf16.gmra.mrb[12].mxu0 %v9650_v59  ;;  %19086 = vmatprep.mubr.bf16.mxu1 %v8199_v52  ;;  %v21977_v59 = vld [vmem:[%s22600_s30 + $0xe0] sm:$0xff]   ;;  %v8214_v52 = vsel %vm8196_vm4, %v8212_v49, %v8213_v13  ;;  %v8236_v49 = vrot.slane %v8158_v21, 2  ;;  %v8237_v13 = vrot.slane %v8159_v16, 2  ;;  %v21992_v21 = vld [vmem:[%s22600_s30 + $0x118] sm:$0xff]  }
 0x549   : > { %19294 = vmatprep.mubr.bf16.mxu0 %v9653_v10  ;;  %19323 = vmatpush3.bf16.msra.mxu0 %v21974_v20  ;;  %v9669_v20 = vrot.slane %v9591_v24, 6  ;;  %v8146_v10 = vld [vmem:[#allocation2 + $0x1d0] sm:$0xfc]  ;;  %v8160_v24 = vld [vmem:[#allocation2 + $0x278] sm:$0xfc] }
 0x54a   : > { %19324 = vmatprep.subr.bf16.mxu0 %v21976_v39  ;;  %v8218_v2 = vrot.slane %v8146_v10, 2  ;;  %v8239_v60 = vrot.slane %v8160_v24, 2  ;;  %v21986_v10 = vld [vmem:[%s22600_s30 + $0x228] sm:$0xff]   ;;  %v9961_v24 = vld [vmem:[#allocation2 + $0x320] sm:$0xff] }
 0x54b   : > { %v9671_v43 = vsel %vm7601_vm5, %v9669_v20, %v9670_v36  ;;  %v24090_v20 = vld [vmem:[#allocation2 + $0x260] sm:$0xff] }
 0x54c   : > { %v8220_v8 = vsel %vm8196_vm4, %v8218_v2, %v8219_v55  ;;  %v24100_v2 = vld [vmem:[#allocation2 + $0x290] sm:$0xff] }
 0x54d   : > { %19325 = vmatpush3.bf16.msra.mxu0 %v21976_v39  ;;  %v8217_v39 = vsel %vm8196_vm4, %v8215_v28, %v8216_v58  ;;  %v21985_v28 = vld [vmem:[%s22600_s30 + $0x220] sm:$0xff]   ;;  %v8238_v58 = vsel %vm8196_vm4, %v8236_v49, %v8237_v13  ;;  %v8534_v49 = vld [vmem:[#allocation2 + $0x230] sm:$0x3f]  ;;  %v9962_v13 = vld [vmem:[#allocation2 + $0x338] sm:$0xff] }
 0x54e   : > { %19358 = vmatprep.subr.bf16.mxu0 %v24047_v6 }
 0x54f   : > { %19087 = vmatmul.mubr.bf16.vlgmr.msra.gmra.mrb[0].mxu1 %v8202_v19  ;;  %v9674_v19 = vsel %vm7601_vm5, %v9672_v15, %v9673_v56  ;;  %v8521_v15 = vld [vmem:[#allocation2 + $0x198] sm:$0xc0]  ;;  %v8522_v56 = vld [vmem:[#allocation2 + $0x1a0] sm:$0x3f] }
 0x550   : > { %19295 = vmatmul.mubr.bf16.gmra.mrb[16].mxu0 %v9656_v12  ;;  %19119 = vmatpush3.bf16.msra.mxu1 %v24019_v14  ;;  %v8211_v14 = vsel %vm8196_vm4, %v8209_v30, %v8210_v41  ;;  %v9948_v12 = vld [vmem:[#allocation2 + $0x1e8] sm:$0xff]  ;;  %v8155_v30 = vld [vmem:[#allocation2 + $0x238] sm:$0x3] }
 0x551   : > { %19090 = vmatprep.mubr.bf16.mxu1 %v8205_v25  ;;  %19298 = vmatprep.mubr.bf16.mxu0 %v9659_v1  ;;  %v8153_v25 = vld [vmem:[#allocation2 + $0x220] sm:$0x3]  ;;  %v21983_v1 = vld [vmem:[%s22600_s30 + $0xf8] sm:$0xff]   ;;  %v21980_v41 = vld [vmem:[%s22600_s30 + $0x208] sm:$0xff]  }
 0x552   : > { %19120 = vmatprep.subr.bf16.mxu1 %v21971_v40  ;;  %v8228_v22 = vrot.slane %v8153_v25, 2  ;;  %v8525_v25 = vld [vmem:[#allocation2 + $0x1c8] sm:$0xc0] }
 0x554   : > { %19121 = vmatpush3.bf16.msra.mxu1 %v21971_v40  ;;  %v8223_v40 = vsel %vm8196_vm4, %v8221_v46, %v8222_v7  ;;  %v8229_v31 = vsel %vm8196_vm4, %v8227_v11, %v8228_v22  ;;  %v24103_v46 = vld [vmem:[#allocation2 + $0x2a8] sm:$0xff]  ;;  %v21988_v7 = vld [vmem:[%s22600_s30 + $0x238] sm:$0xff]   ;;  %v8527_v11 = vld [vmem:[#allocation2 + $0x1e0] sm:$0xc0] }
 0x555   : > { %19122 = vmatprep.subr.bf16.mxu1 %v21973_v53  ;;  %v8528_v22 = vld [vmem:[#allocation2 + $0x1e8] sm:$0x3f] }
 0x557   : > { %19091 = vmatmul.mubr.bf16.gmra.mrb[4].mxu1 %v8208_v42  ;;  %v8230_v42 = vrot.slane %v8154_v51, 2  ;;  %v21990_v51 = vld [vmem:[%s22600_s30 + $0x108] sm:$0xff]  }
 0x558   : > { %19299 = vmatmul.mubr.bf16.gmra.mrb[20].mxu0 %v9662_v3  ;;  %19094 = vmatprep.mubr.bf16.mxu1 %v8211_v14  ;;  %v8234_v14 = vrot.slane %v8157_v44, 2  ;;  %v8529_v44 = vld [vmem:[#allocation2 + $0x1f8] sm:$0xc0] }
 0x559   : > { %19302 = vmatprep.mubr.bf16.mxu0 %v9665_v29  ;;  %19123 = vmatpush3.bf16.msra.mxu1 %v21973_v53  ;;  %v8156_v53 = vld [vmem:[#allocation2 + $0x248] sm:$0xfc] }
 0x55a   : > { %19124 = vmatprep.subr.bf16.mxu1 %v21975_v62  ;;  %v8233_v3 = vrot.slane %v8156_v53, 2 }
 0x55c   : > { %v8235_v29 = vsel %vm8196_vm4, %v8233_v3, %v8234_v14  ;;  %v8531_v3 = vld [vmem:[#allocation2 + $0x210] sm:$0xc0]  ;;  %v8532_v14 = vld [vmem:[#allocation2 + $0x218] sm:$0x3f] }
 0x55d   : > { %19125 = vmatpush3.bf16.msra.mxu1 %v21975_v62  ;;  %v8231_v62 = vrot.slane %v8155_v30, 2 }
 0x55e   : > { %19126 = vmatprep.subr.bf16.mxu1 %v21977_v59 }
 0x55f   : > { %19095 = vmatmul.mubr.bf16.gmra.mrb[8].mxu1 %v8214_v52  ;;  %v8232_v17 = vsel %vm8196_vm4, %v8230_v42, %v8231_v62  ;;  %v8162_v52 = vld [vmem:[#allocation2 + $0x290] sm:$0xfc]  ;;  %v8530_v42 = vld [vmem:[#allocation2 + $0x200] sm:$0x3f]  ;;  %v9960_v62 = vld [vmem:[#allocation2 + $0x308] sm:$0xff] }
 0x560   : > { %19303 = vmatmul.mubr.bf16.gmra.mrb[24].mxu0 %v9668_v37  ;;  %19098 = vmatprep.mubr.bf16.mxu1 %v8217_v39  ;;  %v8519_v37 = vld [vmem:[#allocation2 + $0x180] sm:$0xc0]  ;;  %v8520_v39 = vld [vmem:[#allocation2 + $0x188] sm:$0x3f]  ;;  %v8242_v35 = vrot.slane %v8162_v52, 2 }
 0x561   : > { %19306 = vmatprep.mubr.bf16.mxu0 %v9671_v43  ;;  %19127 = vmatpush3.bf16.msra.mxu1 %v21977_v59  ;;  %v24093_v59 = vld [vmem:[#allocation2 + $0x278] sm:$0xff]  ;;  %v8583_v43 = vrot.slane %v8519_v37, 6  ;;  %v8584_v9 = vrot.slane %v8520_v39, 6 }
 0x562   : > { %19128 = vmatprep.subr.bf16.mxu1 %v21979_v4 }
 0x563   : > { %v8585_v55 = vsel %vm7601_vm5, %v8583_v43, %v8584_v9  ;;  %v9963_v9 = vld [vmem:[#allocation2 + $0x350] sm:$0xff] }
 0x565   : > { %19129 = vmatpush3.bf16.msra.mxu1 %v21979_v4  ;;  %v8163_v4 = vld [vmem:[#allocation2 + $0x298] sm:$0x3] }
 0x566   : > { %19130 = vmatprep.subr.bf16.mxu1 %v21981_v50  ;;  %v8243_v33 = vrot.slane %v8163_v4, 2  ;;  %v8605_v4 = vrot.slane %v8534_v49, 6 }
 0x567   : > { %19099 = vmatmul.mubr.bf16.gmra.mrb[12].mxu1 %v8220_v8  ;;  %v8524_v8 = vld [vmem:[#allocation2 + $0x1b8] sm:$0x3f] }
 0x568   : > { %19307 = vmatmul.mubr.bf16.gmra.mrb[28].mxu0 %v9674_v19  ;;  %19102 = vmatprep.mubr.bf16.mxu1 %v8223_v40  ;;  %v8244_v23 = vsel %vm8196_vm4, %v8242_v35, %v8243_v33  ;;  %v8586_v19 = vrot.slane %v8521_v15, 6  ;;  %v8587_v40 = vrot.slane %v8522_v56, 6  ;;  %v8590_v54 = vrot.slane %v8524_v8, 6  ;;  %v21994_v33 = vld [vmem:[%s22600_s30 + $0x128] sm:$0xff]   ;;  %v10223_v15 = vld [vmem:[#allocation2 + $0x200] sm:$0xfc] }
 0x569   : > { %19326 = vmatprep.mubr.bf16.mxu0 %v9948_v12  ;;  %19131 = vmatpush3.bf16.msra.mxu1 %v21981_v50  ;;  %v8523_v50 = vld [vmem:[#allocation2 + $0x1b0] sm:$0xc0]  ;;  %v8540_v8 = vld [vmem:[#allocation2 + $0x278] sm:$0x3f] }
 0x56a   : > { %19132 = vmatprep.subr.bf16.mxu1 %v21983_v1  ;;  %v8589_v12 = vrot.slane %v8523_v50, 6  ;;  %v8588_v45 = vsel %vm7601_vm5, %v8586_v19, %v8587_v40  ;;  %v8539_v50 = vld [vmem:[#allocation2 + $0x270] sm:$0xc0]  ;;  %v10225_v40 = vld [vmem:[#allocation2 + $0x218] sm:$0xfc] }
 0x56b   : > { %v21995_v19 = vld [vmem:[%s22600_s30 + $0x130] sm:$0xff]  }
 0x56c   : > { %v8591_v27 = vsel %vm7601_vm5, %v8589_v12, %v8590_v54  ;;  %v10226_v12 = vld [vmem:[#allocation2 + $0x220] sm:$0x3] }
 0x56d   : > { %19133 = vmatpush3.bf16.msra.mxu1 %v21983_v1  ;;  %v8526_v1 = vld [vmem:[#allocation2 + $0x1d0] sm:$0x3f] }
 0x56e   : > { %20814 = vmatprep.subr.bf16.mxu1 %v24077_v57 }
 0x56f   : > { %19103 = vmatmul.mubr.bf16.gmra.mrb[16].mxu1 %v8226_v38  ;;  %v8592_v38 = vrot.slane %v8525_v25, 6  ;;  %v10288_v25 = vrot.slane %v10223_v15, 2 }
 0x570   : > { %19327 = vmatmul.mubr.bf16.vlgmr.msra.gmra.mrb[0].mxu0 %v9949_v0  ;;  %19106 = vmatprep.mubr.bf16.mxu1 %v8229_v31  ;;  %v8593_v0 = vrot.slane %v8526_v1, 6  ;;  %v8595_v31 = vrot.slane %v8527_v11, 6  ;;  %v8614_v11 = vrot.slane %v8540_v8, 6  ;;  %v8549_v8 = vld [vmem:[#allocation2 + $0x2e8] sm:$0xc0] }
 0x571   : > { %19359 = vmatpush3.bf16.msra.mxu0 %v24047_v6  ;;  %19330 = vmatprep.mubr.bf16.mxu0 %v9950_v47  ;;  %v8161_v6 = vld [vmem:[#allocation2 + $0x280] sm:$0x3]  ;;  %v8596_v47 = vrot.slane %v8528_v22, 6  ;;  %v10291_v22 = vrot.slane %v10225_v40, 2 }
 0x572   : > { %19360 = vmatprep.subr.bf16.mxu0 %v21980_v41  ;;  %v8240_v34 = vrot.slane %v8161_v6, 2  ;;  %v8594_v30 = vsel %vm7601_vm5, %v8592_v38, %v8593_v0  ;;  %v10292_v38 = vrot.slane %v10226_v12, 2  ;;  %v21996_v0 = vld [vmem:[%s22600_s30 + $0x138] sm:$0xff]   ;;  %v10235_v12 = vld [vmem:[#allocation2 + $0x290] sm:$0xfc] }
 0x573   : > { %v8597_v53 = vsel %vm7601_vm5, %v8595_v31, %v8596_v47 }
 0x574   : > { %v8241_v36 = vsel %vm8196_vm4, %v8239_v60, %v8240_v34  ;;  %v8535_v60 = vld [vmem:[#allocation2 + $0x240] sm:$0xc0]  ;;  %v8536_v34 = vld [vmem:[#allocation2 + $0x248] sm:$0x3f] }
 0x575   : > { %19361 = vmatpush3.bf16.msra.mxu0 %v21980_v41  ;;  %v24119_v41 = vld [vmem:[#allocation2 + $0x2f0] sm:$0xff]  ;;  %v8607_v37 = vrot.slane %v8535_v60, 6  ;;  %v8608_v39 = vrot.slane %v8536_v34, 6  ;;  %v8545_v34 = vld [vmem:[#allocation2 + $0x2b8] sm:$0xc0] }
 0x576   : > { %19362 = vmatprep.subr.bf16.mxu0 %v21982_v48 }
 0x577   : > { %19107 = vmatmul.mubr.bf16.gmra.mrb[20].mxu1 %v8232_v17  ;;  %v8599_v17 = vrot.slane %v8530_v42, 6  ;;  %v10293_v42 = vsel %vm8196_vm4, %v10291_v22, %v10292_v38 }
 0x578   : > { %19331 = vmatmul.mubr.bf16.gmra.mrb[4].mxu0 %v9951_v5  ;;  %19110 = vmatprep.mubr.bf16.mxu1 %v8235_v29  ;;  %v8601_v5 = vrot.slane %v8531_v3, 6  ;;  %v8602_v29 = vrot.slane %v8532_v14, 6  ;;  %v8544_v3 = vld [vmem:[#allocation2 + $0x2a8] sm:$0x3f] }
 0x579   : > { %19334 = vmatprep.mubr.bf16.mxu0 %v24084_v26  ;;  %19363 = vmatpush3.bf16.msra.mxu0 %v21982_v48  ;;  %v8598_v48 = vrot.slane %v8529_v44, 6  ;;  %v10227_v44 = vld [vmem:[#allocation2 + $0x230] sm:$0xfc]  ;;  %v10229_v14 = vld [vmem:[#allocation2 + $0x248] sm:$0xfc] }
 0x57a   : > { %19364 = vmatprep.subr.bf16.mxu0 %v21984_v18  ;;  %v8603_v6 = vsel %vm7601_vm5, %v8601_v5, %v8602_v29  ;;  %v10294_v29 = vrot.slane %v10227_v44, 2  ;;  %v10241_v44 = vld [vmem:[#allocation2 + $0x2d8] sm:$0xfc] }
 0x57b   : > { %v8600_v16 = vsel %vm7601_vm5, %v8598_v48, %v8599_v17  ;;  %v10230_v48 = vld [vmem:[#allocation2 + $0x250] sm:$0x3] }
 0x57d   : > { %19365 = vmatpush3.bf16.msra.mxu0 %v21984_v18  ;;  %v8533_v18 = vld [vmem:[#allocation2 + $0x228] sm:$0xc0] }
 0x57e   : > { %19366 = vmatprep.subr.bf16.mxu0 %v21985_v28  ;;  %v8604_v52 = vrot.slane %v8533_v18, 6  ;;  %v10298_v18 = vrot.slane %v10230_v48, 2 }
 0x57f   : > { %19111 = vmatmul.mubr.bf16.gmra.mrb[24].mxu1 %v8238_v58  ;;  %v10221_v58 = vld [vmem:[#allocation2 + $0x1e8] sm:$0xfc] }
 0x580   : > { %19335 = vmatmul.mubr.bf16.gmra.mrb[8].mxu0 %v24090_v20  ;;  %19114 = vmatprep.mubr.bf16.mxu1 %v8241_v36  ;;  %v10222_v36 = vld [vmem:[#allocation2 + $0x1f0] sm:$0x3]  ;;  %v8606_v43 = vsel %vm7601_vm5, %v8604_v52, %v8605_v4  ;;  %v10232_v52 = vld [vmem:[#allocation2 + $0x268] sm:$0x3]  ;;  %v8547_v4 = vld [vmem:[#allocation2 + $0x2d0] sm:$0xc0] }
 0x581   : > { %19338 = vmatprep.mubr.bf16.mxu0 %v24093_v59  ;;  %19367 = vmatpush3.bf16.msra.mxu0 %v21985_v28  ;;  %v21993_v28 = vld [vmem:[%s22600_s30 + $0x120] sm:$0xff]   ;;  %v10286_v35 = vrot.slane %v10222_v36, 2 }
 0x582   : > { %19368 = vmatprep.subr.bf16.mxu0 %v21986_v10 }
 0x585   : > { %19369 = vmatpush3.bf16.msra.mxu0 %v21986_v10  ;;  %v10285_v10 = vrot.slane %v10221_v58, 2  ;;  %v10231_v58 = vld [vmem:[#allocation2 + $0x260] sm:$0xfc] }
 0x586   : > { %19370 = vmatprep.subr.bf16.mxu0 %v21987_v61 }
 0x587   : > { %19115 = vmatmul.mubr.bf16.gmra.mrb[28].mxu1 %v8244_v23  ;;  %v8537_v23 = vld [vmem:[#allocation2 + $0x258] sm:$0xc0]  ;;  %v10287_v56 = vsel %vm8196_vm4, %v10285_v10, %v10286_v35  ;;  %v10234_v10 = vld [vmem:[#allocation2 + $0x280] sm:$0x3]  ;;  %v8622_v35 = vrot.slane %v8545_v34, 6 }
 0x588   : > { %19339 = vmatmul.mubr.bf16.gmra.mrb[12].mxu0 %v24100_v2  ;;  %19134 = vmatprep.mubr.bf16.mxu1 %v8585_v55  ;;  %v8538_v55 = vld [vmem:[#allocation2 + $0x260] sm:$0x3f]  ;;  %v8610_v54 = vrot.slane %v8537_v23, 6  ;;  %v10304_v15 = vrot.slane %v10234_v10, 2  ;;  %v10248_v34 = vld [vmem:[#allocation2 + $0x328] sm:$0x3] }
 0x589   : > { %19342 = vmatprep.mubr.bf16.mxu0 %v24103_v46  ;;  %19371 = vmatpush3.bf16.msra.mxu0 %v21987_v61  ;;  %v8609_v61 = vsel %vm7601_vm5, %v8607_v37, %v8608_v39  ;;  %v8548_v37 = vld [vmem:[#allocation2 + $0x2d8] sm:$0x3f] }
 0x58a   : > { %19372 = vmatprep.subr.bf16.mxu0 %v21988_v7  ;;  %v10233_v39 = vld [vmem:[#allocation2 + $0x278] sm:$0xfc]  ;;  %v8626_v23 = vrot.slane %v8548_v37, 6  ;;  %v10252_v10 = vld [vmem:[#allocation2 + $0x358] sm:$0x3] }
 0x58d   : > { %19373 = vmatpush3.bf16.msra.mxu0 %v21988_v7  ;;  %v10224_v7 = vld [vmem:[#allocation2 + $0x208] sm:$0x3] }
 0x58e   : > { %v10289_v1 = vrot.slane %v10224_v7, 2 }
 0x58f   : > { %19135 = vmatmul.mubr.bf16.vlgmr.msra.gmra.mrb[0].mxu1 %v8588_v45  ;;  %v8611_v45 = vrot.slane %v8538_v55, 6  ;;  %v10303_v55 = vrot.slane %v10233_v39, 2  ;;  %v10251_v39 = vld [vmem:[#allocation2 + $0x350] sm:$0xfc] }
 0x590   : > { %19343 = vmatmul.mubr.bf16.gmra.mrb[16].mxu0 %v24109_v32  ;;  %20822 = vmatpush3.bf16.msra.mxu1 %v24077_v57  ;;  %v21991_v57 = vld [vmem:[%s22600_s30 + $0x110] sm:$0xff]   ;;  %v10290_v47 = vsel %vm8196_vm4, %v10288_v25, %v10289_v1  ;;  %v8628_v1 = vrot.slane %v8549_v8, 6 }
 0x591   : > { %19138 = vmatprep.mubr.bf16.mxu1 %v8591_v27  ;;  %19346 = vmatprep.mubr.bf16.mxu0 %v24112_v63  ;;  %v8613_v27 = vrot.slane %v8539_v50, 6  ;;  %v8612_v31 = vsel %vm7601_vm5, %v8610_v54, %v8611_v45  ;;  %v10305_v40 = vsel %vm8196_vm4, %v10303_v55, %v10304_v15  ;;  %v10236_v54 = vld [vmem:[#allocation2 + $0x298] sm:$0x3]  ;;  %v10237_v45 = vld [vmem:[#allocation2 + $0x2a8] sm:$0xfc] }
 0x592   : > { %20815 = vmatprep.subr.bf16.mxu1 %v21990_v51  ;;  %v10238_v25 = vld [vmem:[#allocation2 + $0x2b0] sm:$0x3]  ;;  %v10307_v22 = vrot.slane %v10236_v54, 2  ;;  %v10309_v38 = vrot.slane %v10237_v45, 2 }
 0x594   : > { %20823 = vmatpush3.bf16.msra.mxu1 %v21990_v51  ;;  %v8615_v51 = vsel %vm7601_vm5, %v8613_v27, %v8614_v11  ;;  %v10306_v11 = vrot.slane %v10235_v12, 2 }
 0x595   : > { %20816 = vmatprep.subr.bf16.mxu1 %v21991_v57 }
 0x597   : > { %19139 = vmatmul.mubr.bf16.gmra.mrb[4].mxu1 %v8594_v30  ;;  %v8541_v30 = vld [vmem:[#allocation2 + $0x288] sm:$0xc0] }
 0x598   : > { %19347 = vmatmul.mubr.bf16.gmra.mrb[20].mxu0 %v24119_v41  ;;  %19142 = vmatprep.mubr.bf16.mxu1 %v8597_v53  ;;  %v8542_v53 = vld [vmem:[#allocation2 + $0x290] sm:$0x3f]  ;;  %v8616_v17 = vrot.slane %v8541_v30, 6  ;;  %v10239_v30 = vld [vmem:[#allocation2 + $0x2c0] sm:$0xfc] }
 0x599   : > { %19350 = vmatprep.mubr.bf16.mxu0 %v9960_v62  ;;  %20824 = vmatpush3.bf16.msra.mxu1 %v21991_v57  ;;  %v10228_v57 = vld [vmem:[#allocation2 + $0x238] sm:$0x3]  ;;  %v8543_v62 = vld [vmem:[#allocation2 + $0x2a0] sm:$0xc0]  ;;  %v8617_v5 = vrot.slane %v8542_v53, 6 }
 0x59a   : > { %20817 = vmatprep.subr.bf16.mxu1 %v21992_v21  ;;  %v10240_v53 = vld [vmem:[#allocation2 + $0x2c8] sm:$0x3] }
 0x59b   : > { %v8618_v49 = vsel %vm7601_vm5, %v8616_v17, %v8617_v5  ;;  %v10243_v5 = vld [vmem:[#allocation2 + $0x2f0] sm:$0xfc] }
 0x59d   : > { %20825 = vmatpush3.bf16.msra.mxu1 %v21992_v21  ;;  %v10295_v21 = vrot.slane %v10228_v57, 2  ;;  %v10312_v57 = vrot.slane %v10239_v30, 2 }
 0x59e   : > { %20818 = vmatprep.subr.bf16.mxu1 %v21993_v28 }
 0x59f   : > { %19143 = vmatmul.mubr.bf16.gmra.mrb[8].mxu1 %v8600_v16  ;;  %v8619_v16 = vrot.slane %v8543_v62, 6  ;;  %v10313_v62 = vrot.slane %v10240_v53, 2 }
 0x5a0   : > { %19351 = vmatmul.mubr.bf16.gmra.mrb[24].mxu0 %v9961_v24  ;;  %19146 = vmatprep.mubr.bf16.mxu1 %v8603_v6  ;;  %v8620_v24 = vrot.slane %v8544_v3, 6  ;;  %v10297_v6 = vrot.slane %v10229_v14, 2  ;;  %v10315_v3 = vrot.slane %v10241_v44, 2  ;;  %v10639_v44 = vld [vmem:[%s22606_s21 + $0x8] sm:$0xff] }
 0x5a1   : > { %19354 = vmatprep.mubr.bf16.mxu0 %v9962_v13  ;;  %20826 = vmatpush3.bf16.msra.mxu1 %v21993_v28  ;;  %v10296_v13 = vsel %vm8196_vm4, %v10294_v29, %v10295_v21  ;;  %v8546_v28 = vld [vmem:[#allocation2 + $0x2c0] sm:$0x3f]  ;;  %v10314_v48 = vsel %vm8196_vm4, %v10312_v57, %v10313_v62  ;;  %v10244_v29 = vld [vmem:[#allocation2 + $0x2f8] sm:$0x3]  ;;  %v10245_v21 = vld [vmem:[#allocation2 + $0x308] sm:$0xfc] }
 0x5a2   : > { %20819 = vmatprep.subr.bf16.mxu1 %v21994_v33  ;;  %v8621_v60 = vsel %vm7601_vm5, %v8619_v16, %v8620_v24  ;;  %v10299_v36 = vsel %vm8196_vm4, %v10297_v6, %v10298_v18  ;;  %v10246_v16 = vld [vmem:[#allocation2 + $0x310] sm:$0x3]  ;;  %v10319_v24 = vrot.slane %v10244_v29, 2  ;;  %v10321_v6 = vrot.slane %v10245_v21, 2 }
 0x5a3   : > { %v10322_v18 = vrot.slane %v10246_v16, 2  ;;  %v10644_v21 = vld [vmem:[%s22606_s21 + $0x30] sm:$0xff] }
 0x5a5   : > { %20827 = vmatpush3.bf16.msra.mxu1 %v21994_v33  ;;  %v8623_v33 = vrot.slane %v8546_v28, 6  ;;  %v10249_v28 = vld [vmem:[#allocation2 + $0x338] sm:$0xfc] }
 0x5a6   : > { %20820 = vmatprep.subr.bf16.mxu1 %v21995_v19 }
 0x5a7   : > { %19147 = vmatmul.mubr.bf16.gmra.mrb[12].mxu1 %v8606_v43  ;;  %v10300_v43 = vrot.slane %v10231_v58, 2  ;;  %v10325_v58 = vrot.slane %v10248_v34, 2 }
 0x5a8   : > { %19355 = vmatmul.mubr.bf16.gmra.mrb[28].mxu0 %v9963_v9  ;;  %19150 = vmatprep.mubr.bf16.mxu1 %v8609_v61  ;;  %v10301_v9 = vrot.slane %v10232_v52, 2  ;;  %v8625_v61 = vrot.slane %v8547_v4, 6 }
 0x5a9   : > { %19374 = vmatprep.mubr.bf16.mxu0 %v10287_v56  ;;  %20828 = vmatpush3.bf16.msra.mxu1 %v21995_v19  ;;  %v8624_v56 = vsel %vm7601_vm5, %v8622_v35, %v8623_v33  ;;  %v8550_v19 = vld [vmem:[#allocation2 + $0x2f0] sm:$0x3f]  ;;  %v10331_v35 = vrot.slane %v10252_v10, 2 }
 0x5aa   : > { %20821 = vmatprep.subr.bf16.mxu1 %v21996_v0  ;;  %v10302_v7 = vsel %vm8196_vm4, %v10300_v43, %v10301_v9  ;;  %v8627_v50 = vsel %vm7601_vm5, %v8625_v61, %v8626_v23  ;;  %v8629_v27 = vrot.slane %v8550_v19, 6 }
 0x5ad   : > { %20829 = vmatpush3.bf16.msra.mxu1 %v21996_v0  ;;  %v10310_v0 = vrot.slane %v10238_v25, 2  ;;  %v10640_v25 = vld [vmem:[%s22606_s21 + $0x10] sm:$0xff] }
 0x5af   : > { %19151 = vmatmul.mubr.bf16.gmra.mrb[16].mxu1 %v8612_v31  ;;  %v8630_v31 = vsel %vm7601_vm5, %v8628_v1, %v8629_v27 }
 0x5b0   : > { %19375 = vmatmul.mubr.bf16.vlgmr.msra.gmra.mrb[0].mxu0 %v10290_v47  ;;  %19154 = vmatprep.mubr.bf16.mxu1 %v8615_v51  ;;  %v10308_v47 = vsel %vm8196_vm4, %v10306_v11, %v10307_v22  ;;  %v10311_v51 = vsel %vm8196_vm4, %v10309_v38, %v10310_v0  ;;  %v10638_v22 = vld [vmem:[%s22606_s21] sm:$0xff] }
 0x5b1   : > { %19378 = vmatprep.mubr.bf16.mxu0 %v10293_v42  ;;  %v10242_v42 = vld [vmem:[#allocation2 + $0x2e0] sm:$0x3] }
 0x5b2   : > { %v10316_v14 = vrot.slane %v10242_v42, 2 }
 0x5b4   : > { %v10317_v17 = vsel %vm8196_vm4, %v10315_v3, %v10316_v14 }
 0x5b7   : > { %19155 = vmatmul.mubr.bf16.gmra.mrb[20].mxu1 %v8618_v49 }
 0x5b8   : > { %19379 = vmatmul.mubr.bf16.gmra.mrb[4].mxu0 %v10296_v13  ;;  %19158 = vmatprep.mubr.bf16.mxu1 %v8621_v60  ;;  %v10323_v13 = vsel %vm8196_vm4, %v10321_v6, %v10322_v18  ;;  %v10247_v60 = vld [vmem:[#allocation2 + $0x320] sm:$0xfc] }
 0x5b9   : > { %19382 = vmatprep.mubr.bf16.mxu0 %v10299_v36  ;;  %v10327_v36 = vrot.slane %v10249_v28, 2  ;;  %v10642_v6 = vld [vmem:[%s22606_s21 + $0x20] sm:$0xff] }
 0x5bf   : > { %19159 = vmatmul.mubr.bf16.gmra.mrb[24].mxu1 %v8624_v56 }
 0x5c0   : > { %19383 = vmatmul.mubr.bf16.gmra.mrb[8].mxu0 %v10302_v7  ;;  %19162 = vmatprep.mubr.bf16.mxu1 %v8627_v50 }
 0x5c1   : > { %19386 = vmatprep.mubr.bf16.mxu0 %v10305_v40 }
 0x5c7   : > { %19163 = vmatmul.mubr.bf16.gmra.mrb[28].mxu1 %v8630_v31 }
 0x5c8   : > { %19387 = vmatmul.mubr.bf16.gmra.mrb[12].mxu0 %v10308_v47  ;;  %19198 = vmatprep.mubr.bf16.mxu1 %v24084_v26  ;;  %v10318_v26 = vrot.slane %v10243_v5, 2  ;;  %v10641_v47 = vld [vmem:[%s22606_s21 + $0x18] sm:$0xff] }
 0x5c9   : > { %19390 = vmatprep.mubr.bf16.mxu0 %v10311_v51 }
 0x5ca   : > { %v10320_v49 = vsel %vm8196_vm4, %v10318_v26, %v10319_v24 }
 0x5cf   : > { %19199 = vmatmul.mubr.bf16.vlgmr.msra.gmra.mrb[16].mxu1 %v24090_v20  ;;  %v10250_v20 = vld [vmem:[#allocation2 + $0x340] sm:$0x3] }
 0x5d0   : > { %19391 = vmatmul.mubr.bf16.gmra.mrb[16].mxu0 %v10314_v48  ;;  %19202 = vmatprep.mubr.bf16.mxu1 %v24093_v59  ;;  %v10324_v59 = vrot.slane %v10247_v60, 2  ;;  %v10328_v52 = vrot.slane %v10250_v20, 2  ;;  %v10645_v60 = vld [vmem:[%s22606_s21 + $0x38] sm:$0xff] }
 0x5d1   : > { %19394 = vmatprep.mubr.bf16.mxu0 %v10317_v17 }
 0x5d2   : > { %v10326_v4 = vsel %vm8196_vm4, %v10324_v59, %v10325_v58  ;;  %v10329_v37 = vsel %vm8196_vm4, %v10327_v36, %v10328_v52  ;;  %v10643_v59 = vld [vmem:[%s22606_s21 + $0x28] sm:$0xff] }
 0x5d7   : > { %19203 = vmatmul.mubr.bf16.gmra.mrb[20].mxu1 %v24100_v2  ;;  %v10330_v2 = vrot.slane %v10251_v39, 2 }
 0x5d8   : > { %19395 = vmatmul.mubr.bf16.gmra.mrb[20].mxu0 %v10320_v49  ;;  %19206 = vmatprep.mubr.bf16.mxu1 %v24103_v46 }
 0x5d9   : > { %19398 = vmatprep.mubr.bf16.mxu0 %v10323_v13  ;;  %v10332_v46 = vsel %vm8196_vm4, %v10330_v2, %v10331_v35 }
 0x5df   : > { %19207 = vmatmul.mubr.bf16.gmra.mrb[24].mxu1 %v24109_v32 }
 0x5e0   : > { %19399 = vmatmul.mubr.bf16.gmra.mrb[24].mxu0 %v10326_v4  ;;  %19210 = vmatprep.mubr.bf16.mxu1 %v24112_v63 }
 0x5e1   : > { %19402 = vmatprep.mubr.bf16.mxu0 %v10329_v37 }
 0x5e7   : > { %19211 = vmatmul.mubr.bf16.gmra.mrb[28].mxu1 %v24119_v41 }
 0x5e8   : > { %19403 = vmatmul.mubr.bf16.gmra.mrb[28].mxu0 %v10332_v46  ;;  %v10648_v46 = vld [vmem:[%s22606_s21 + $0x50] sm:$0xff] }
 0x662   : > { %v19136_v33 = vpop.f32.mrb[0].mxu1 }
 0x663   : > { %v8745_v43 = vpop.f32.mrb[1].mxu1 }
 0x664   : > { %v19137_v9 = vpop.f32.mrb[2].mxu1 }
 0x665   : > { %v8748_v61 = vpop.f32.mrb[3].mxu1 }
 0x66a   : > { %v19140_v23 = vpop.f32.mrb[4].mxu1 }
 0x66b   : > { %v8761_v55 = vpop.f32.mrb[5].mxu1 }
 0x66c   : > { %v19141_v15 = vpop.f32.mrb[6].mxu1 }
 0x66d   : > { %v8764_v32 = vpop.f32.mrb[7].mxu1 }
 0x672   : > { %v24164_v56 = vpop.f32.mrb[8].mxu1 }
 0x673   : > { %v24166_v63 = vpop.f32.mrb[9].mxu1 }
 0x674   : > { %v24168_v7 = vpop.f32.mrb[10].mxu1 }
 0x675   : > { %v24170_v50 = vpop.f32.mrb[11].mxu1 }
 0x67a   : > { %v24172_v41 = vpop.f32.mrb[12].mxu1 }
 0x67b   : > { %v24174_v8 = vpop.f32.mrb[13].mxu1 }
 0x67c   : > { %v24176_v19 = vpop.f32.mrb[14].mxu1 }
 0x67d   : > { %v24178_v40 = vpop.f32.mrb[15].mxu1 }
 0x683   : > { %v19376_v12 = vpop.f32.mrb[0].mxu0 }
 0x684   : > { %v20830_v54 = vadd.f32 %v19376_v12, %v19136_v33  ;;  %v10447_v45 = vpop.f32.mrb[1].mxu0 }
 0x685   : > { %v20831_v1 = vadd.f32 %v10447_v45, %v8745_v43  ;;  %v19377_v27 = vpop.f32.mrb[2].mxu0  ;;  %v10647_v45 = vld [vmem:[%s22606_s21 + $0x48] sm:$0xff] }
 0x686   : > { %v10608_v11 = vmax.f32 %v20830_v54, 0.0  ;;  %v20832_v38 = vadd.f32 %v19377_v27, %v19137_v9  ;;  %v10450_v0 = vpop.f32.mrb[3].mxu0 }
 0x687   : > { %v10606_v31 = vmax.f32 %v20831_v1, 0.0  ;;  %v20833_v51 = vadd.f32 %v10450_v0, %v8748_v61  ;;  %v10646_v61 = vld [vmem:[%s22606_s21 + $0x40] sm:$0xff]  ;;  %v10652_v0 = vld [vmem:[%s22606_s21 + $0x70] sm:$0xff] }
 0x688   : > { %v10672_v30 = vadd.f32 %v10640_v25, %v10608_v11  ;;  %v10609_v53 = vmax.f32 %v20832_v38, 0.0 }
 0x689   : > { %v10670_v42 = vadd.f32 %v10638_v22, %v10606_v31  ;;  %v10607_v57 = vmax.f32 %v20833_v51, 0.0 }
 0x68a   : > { %10704 = vst [vmem:[%s22606_s21 + $0x10] sm:$0xff] %v10672_v30  ;;  %v10673_v62 = vadd.f32 %v10641_v47, %v10609_v53  ;;  %v10735_v3 = vpack.c.bf16 %v10609_v53, %v10608_v11  ;;  %v10650_v30 = vld [vmem:[%s22606_s21 + $0x60] sm:$0xff] }
 0x68b   : > { %10702 = vst [vmem:[%s22606_s21] sm:$0xff] %v10670_v42  ;;  %v10671_v14 = vadd.f32 %v10639_v44, %v10607_v57  ;;  %v10734_v48 = vpack.c.bf16 %v10607_v57, %v10606_v31  ;;  %v19380_v17 = vpop.f32.mrb[4].mxu0  ;;  %v10653_v57 = vld [vmem:[%s22606_s21 + $0x78] sm:$0xff] }
 0x68c   : > { %10705 = vst [vmem:[%s22606_s21 + $0x18] sm:$0xff] %v10673_v62  ;;  %10751 = vst [vmem:[#allocation2 + $0x1a0] sm:$0xff] %v10735_v3  ;;  %v20834_v5 = vadd.f32 %v19380_v17, %v19140_v23  ;;  %v10463_v29 = vpop.f32.mrb[5].mxu0 }
 0x68d   : > { %10703 = vst [vmem:[%s22606_s21 + $0x8] sm:$0xff] %v10671_v14  ;;  %10750 = vst [vmem:[#allocation2 + $0x188] sm:$0xff] %v10734_v48  ;;  %v20835_v16 = vadd.f32 %v10463_v29, %v8761_v55  ;;  %v19381_v26 = vpop.f32.mrb[6].mxu0  ;;  %v10651_v14 = vld [vmem:[%s22606_s21 + $0x68] sm:$0xff] }
 0x68e   : > { %v10612_v24 = vmax.f32 %v20834_v5, 0.0  ;;  %v20836_v18 = vadd.f32 %v19381_v26, %v19141_v15  ;;  %v10466_v49 = vpop.f32.mrb[7].mxu0 }
 0x68f   : > { %v10610_v13 = vmax.f32 %v20835_v16, 0.0  ;;  %v20837_v34 = vadd.f32 %v10466_v49, %v8764_v32  ;;  %v10649_v32 = vld [vmem:[%s22606_s21 + $0x58] sm:$0xff] }
 0x690   : > { %v10676_v28 = vadd.f32 %v10644_v21, %v10612_v24  ;;  %v10613_v20 = vmax.f32 %v20836_v18, 0.0  ;;  %v10656_v18 = vld [vmem:[%s22606_s21 + $0x90] sm:$0xff] }
 0x691   : > { %v10674_v58 = vadd.f32 %v10642_v6, %v10610_v13  ;;  %v10611_v36 = vmax.f32 %v20837_v34, 0.0 }
 0x692   : > { %10708 = vst [vmem:[%s22606_s21 + $0x30] sm:$0xff] %v10676_v28  ;;  %v10677_v52 = vadd.f32 %v10645_v60, %v10613_v20  ;;  %v10737_v4 = vpack.c.bf16 %v10613_v20, %v10612_v24  ;;  %v10654_v28 = vld [vmem:[%s22606_s21 + $0x80] sm:$0xff] }
 0x693   : > { %10706 = vst [vmem:[%s22606_s21 + $0x20] sm:$0xff] %v10674_v58  ;;  %v10675_v37 = vadd.f32 %v10643_v59, %v10611_v36  ;;  %v10736_v39 = vpack.c.bf16 %v10611_v36, %v10610_v13  ;;  %v19384_v10 = vpop.f32.mrb[8].mxu0  ;;  %v10657_v36 = vld [vmem:[%s22606_s21 + $0x98] sm:$0xff] }
 0x694   : > { %10709 = vst [vmem:[%s22606_s21 + $0x38] sm:$0xff] %v10677_v52  ;;  %10753 = vst [vmem:[#allocation2 + $0x1d0] sm:$0xff] %v10737_v4  ;;  %v20838_v2 = vadd.f32 %v19384_v10, %v24164_v56  ;;  %v10479_v35 = vpop.f32.mrb[9].mxu0 }
 0x695   : > { %10707 = vst [vmem:[%s22606_s21 + $0x28] sm:$0xff] %v10675_v37  ;;  %10752 = vst [vmem:[#allocation2 + $0x1b8] sm:$0xff] %v10736_v39  ;;  %v20839_v33 = vadd.f32 %v10479_v35, %v24166_v63  ;;  %v19385_v43 = vpop.f32.mrb[10].mxu0  ;;  %v10655_v39 = vld [vmem:[%s22606_s21 + $0x88] sm:$0xff] }
 0x696   : > { %v10616_v9 = vmax.f32 %v20838_v2, 0.0  ;;  %v20840_v23 = vadd.f32 %v19385_v43, %v24168_v7  ;;  %v10482_v55 = vpop.f32.mrb[11].mxu0 }
 0x697   : > { %v10614_v15 = vmax.f32 %v20839_v33, 0.0  ;;  %v20841_v56 = vadd.f32 %v10482_v55, %v24170_v50 }
 0x698   : > { %v10680_v12 = vadd.f32 %v10648_v46, %v10616_v9  ;;  %v10617_v54 = vmax.f32 %v20840_v23, 0.0 }
 0x699   : > { %v10678_v25 = vadd.f32 %v10646_v61, %v10614_v15  ;;  %v10615_v1 = vmax.f32 %v20841_v56, 0.0  ;;  %v10660_v56 = vld [vmem:[%s22606_s21 + $0xb0] sm:$0xff] }
 0x69a   : > { %10712 = vst [vmem:[%s22606_s21 + $0x50] sm:$0xff] %v10680_v12  ;;  %v10681_v63 = vadd.f32 %v10649_v32, %v10617_v54  ;;  %v10739_v27 = vpack.c.bf16 %v10617_v54, %v10616_v9 }
 0x69b   : > { %10710 = vst [vmem:[%s22606_s21 + $0x40] sm:$0xff] %v10678_v25  ;;  %v10679_v11 = vadd.f32 %v10647_v45, %v10615_v1  ;;  %v10738_v7 = vpack.c.bf16 %v10615_v1, %v10614_v15  ;;  %v19388_v22 = vpop.f32.mrb[12].mxu0  ;;  %v10658_v1 = vld [vmem:[%s22606_s21 + $0xa0] sm:$0xff] }
 0x69c   : > { %10713 = vst [vmem:[%s22606_s21 + $0x58] sm:$0xff] %v10681_v63  ;;  %10755 = vst [vmem:[#allocation2 + $0x200] sm:$0xff] %v10739_v27  ;;  %v20842_v50 = vadd.f32 %v19388_v22, %v24172_v41  ;;  %v10495_v38 = vpop.f32.mrb[13].mxu0 }
 0x69d   : > { %10711 = vst [vmem:[%s22606_s21 + $0x48] sm:$0xff] %v10679_v11  ;;  %10754 = vst [vmem:[#allocation2 + $0x1e8] sm:$0xff] %v10738_v7  ;;  %v20843_v31 = vadd.f32 %v10495_v38, %v24174_v8  ;;  %v19389_v47 = vpop.f32.mrb[14].mxu0  ;;  %v10661_v7 = vld [vmem:[%s22606_s21 + $0xb8] sm:$0xff] }
 0x69e   : > { %v10620_v51 = vmax.f32 %v20842_v50, 0.0  ;;  %v20844_v53 = vadd.f32 %v19389_v47, %v24176_v19  ;;  %v10498_v44 = vpop.f32.mrb[15].mxu0 }
 0x69f   : > { %v10618_v42 = vmax.f32 %v20843_v31, 0.0  ;;  %v20845_v41 = vadd.f32 %v10498_v44, %v24178_v40 }
 0x6a0   : > { %v10684_v62 = vadd.f32 %v10652_v0, %v10620_v51  ;;  %v10621_v3 = vmax.f32 %v20844_v53, 0.0  ;;  %v10659_v0 = vld [vmem:[%s22606_s21 + $0xa8] sm:$0xff] }
 0x6a1   : > { %v10682_v48 = vadd.f32 %v10650_v30, %v10618_v42  ;;  %v10619_v17 = vmax.f32 %v20845_v41, 0.0 }
 0x6a2   : > { %10716 = vst [vmem:[%s22606_s21 + $0x70] sm:$0xff] %v10684_v62  ;;  %v10685_v8 = vadd.f32 %v10653_v57, %v10621_v3  ;;  %v10741_v5 = vpack.c.bf16 %v10621_v3, %v10620_v51  ;;  %v19200_v29 = vpop.f32.mrb[16].mxu1 }
 0x6a3   : > { %10714 = vst [vmem:[%s22606_s21 + $0x60] sm:$0xff] %v10682_v48  ;;  %v10683_v21 = vadd.f32 %v10651_v14, %v10619_v17  ;;  %v10740_v19 = vpack.c.bf16 %v10619_v17, %v10618_v42  ;;  %v19392_v16 = vpop.f32.mrb[16].mxu0  ;;  %v9082_v26 = vpop.f32.mrb[17].mxu1  ;;  %v10664_v48 = vld [vmem:[%s22606_s21 + $0xd0] sm:$0xff] }
 0x6a4   : > { %10717 = vst [vmem:[%s22606_s21 + $0x78] sm:$0xff] %v10685_v8  ;;  %10757 = vst [vmem:[#allocation2 + $0x230] sm:$0xff] %v10741_v5  ;;  %v20846_v40 = vadd.f32 %v19392_v16, %v19200_v29  ;;  %v10511_v24 = vpop.f32.mrb[17].mxu0  ;;  %v19201_v6 = vpop.f32.mrb[18].mxu1 }
 0x6a5   : > { %10715 = vst [vmem:[%s22606_s21 + $0x68] sm:$0xff] %v10683_v21  ;;  %10756 = vst [vmem:[#allocation2 + $0x218] sm:$0xff] %v10740_v19  ;;  %v20847_v49 = vadd.f32 %v10511_v24, %v9082_v26  ;;  %v19393_v13 = vpop.f32.mrb[18].mxu0  ;;  %v9085_v60 = vpop.f32.mrb[19].mxu1  ;;  %v10662_v21 = vld [vmem:[%s22606_s21 + $0xc0] sm:$0xff] }
 0x6a6   : > { %v10624_v34 = vmax.f32 %v20846_v40, 0.0  ;;  %v20848_v20 = vadd.f32 %v19393_v13, %v19201_v6  ;;  %v10514_v59 = vpop.f32.mrb[19].mxu0  ;;  %v10665_v40 = vld [vmem:[%s22606_s21 + $0xd8] sm:$0xff] }
 0x6a7   : > { %v10622_v58 = vmax.f32 %v20847_v49, 0.0  ;;  %v20849_v52 = vadd.f32 %v10514_v59, %v9085_v60  ;;  %v10663_v49 = vld [vmem:[%s22606_s21 + $0xc8] sm:$0xff] }
 0x6a8   : > { %v10688_v4 = vadd.f32 %v10656_v18, %v10624_v34  ;;  %v10625_v37 = vmax.f32 %v20848_v20, 0.0 }
 0x6a9   : > { %v10686_v10 = vadd.f32 %v10654_v28, %v10622_v58  ;;  %v10623_v2 = vmax.f32 %v20849_v52, 0.0 }
 0x6aa   : > { %10720 = vst [vmem:[%s22606_s21 + $0x90] sm:$0xff] %v10688_v4  ;;  %v10689_v35 = vadd.f32 %v10657_v36, %v10625_v37  ;;  %v10743_v46 = vpack.c.bf16 %v10625_v37, %v10624_v34  ;;  %v19204_v33 = vpop.f32.mrb[20].mxu1 }
 0x6ab   : > { %10718 = vst [vmem:[%s22606_s21 + $0x80] sm:$0xff] %v10686_v10  ;;  %v10687_v43 = vadd.f32 %v10655_v39, %v10623_v2  ;;  %v10742_v9 = vpack.c.bf16 %v10623_v2, %v10622_v58  ;;  %v19396_v61 = vpop.f32.mrb[20].mxu0  ;;  %v9098_v23 = vpop.f32.mrb[21].mxu1  ;;  %v10668_v10 = vld [vmem:[%s22606_s21 + $0xf0] sm:$0xff] }
 0x6ac   : > { %10721 = vst [vmem:[%s22606_s21 + $0x98] sm:$0xff] %v10689_v35  ;;  %10759 = vst [vmem:[#allocation2 + $0x260] sm:$0xff] %v10743_v46  ;;  %v20850_v55 = vadd.f32 %v19396_v61, %v19204_v33  ;;  %v10527_v15 = vpop.f32.mrb[21].mxu0  ;;  %v19205_v32 = vpop.f32.mrb[22].mxu1 }
 0x6ad   : > { %10719 = vst [vmem:[%s22606_s21 + $0x88] sm:$0xff] %v10687_v43  ;;  %10758 = vst [vmem:[#allocation2 + $0x248] sm:$0xff] %v10742_v9  ;;  %v20851_v12 = vadd.f32 %v10527_v15, %v9098_v23  ;;  %v19397_v54 = vpop.f32.mrb[22].mxu0  ;;  %v9101_v45 = vpop.f32.mrb[23].mxu1  ;;  %v10666_v43 = vld [vmem:[%s22606_s21 + $0xe0] sm:$0xff] }
 0x6ae   : > { %v10628_v25 = vmax.f32 %v20850_v55, 0.0  ;;  %v20852_v63 = vadd.f32 %v19397_v54, %v19205_v32  ;;  %v10530_v27 = vpop.f32.mrb[23].mxu0  ;;  %v10669_v55 = vld [vmem:[%s22606_s21 + $0xf8] sm:$0xff] }
 0x6af   : > { %v10626_v11 = vmax.f32 %v20851_v12, 0.0  ;;  %v20853_v22 = vadd.f32 %v10530_v27, %v9101_v45  ;;  %v10667_v12 = vld [vmem:[%s22606_s21 + $0xe8] sm:$0xff] }
 0x6b0   : > { %v10692_v50 = vadd.f32 %v10660_v56, %v10628_v25  ;;  %v10629_v38 = vmax.f32 %v20852_v63, 0.0 }
 0x6b1   : > { %v10690_v31 = vadd.f32 %v10658_v1, %v10626_v11  ;;  %v10627_v47 = vmax.f32 %v20853_v22, 0.0 }
 0x6b2   : > { %10724 = vst [vmem:[%s22606_s21 + $0xb0] sm:$0xff] %v10692_v50  ;;  %v10693_v51 = vadd.f32 %v10661_v7, %v10629_v38  ;;  %v10745_v30 = vpack.c.bf16 %v10629_v38, %v10628_v25  ;;  %v19208_v53 = vpop.f32.mrb[24].mxu1 }
 0x6b3   : > { %10722 = vst [vmem:[%s22606_s21 + $0xa0] sm:$0xff] %v10690_v31  ;;  %v10691_v44 = vadd.f32 %v10659_v0, %v10627_v47  ;;  %v10744_v42 = vpack.c.bf16 %v10627_v47, %v10626_v11  ;;  %v19400_v57 = vpop.f32.mrb[24].mxu0  ;;  %v9114_v41 = vpop.f32.mrb[25].mxu1 }
 0x6b4   : > { %10725 = vst [vmem:[%s22606_s21 + $0xb8] sm:$0xff] %v10693_v51  ;;  %10761 = vst [vmem:[#allocation2 + $0x290] sm:$0xff] %v10745_v30  ;;  %v20854_v62 = vadd.f32 %v19400_v57, %v19208_v53  ;;  %v10543_v3 = vpop.f32.mrb[25].mxu0  ;;  %v19209_v14 = vpop.f32.mrb[26].mxu1 }
 0x6b5   : > { %10723 = vst [vmem:[%s22606_s21 + $0xa8] sm:$0xff] %v10691_v44  ;;  %10760 = vst [vmem:[#allocation2 + $0x278] sm:$0xff] %v10744_v42  ;;  %v20855_v17 = vadd.f32 %v10543_v3, %v9114_v41  ;;  %v19401_v8 = vpop.f32.mrb[26].mxu0  ;;  %v9117_v5 = vpop.f32.mrb[27].mxu1 }
 0x6b6   : > { %v10632_v29 = vmax.f32 %v20854_v62, 0.0  ;;  %v20856_v19 = vadd.f32 %v19401_v8, %v19209_v14  ;;  %v10546_v16 = vpop.f32.mrb[27].mxu0 }
 0x6b7   : > { %v10630_v26 = vmax.f32 %v20855_v17, 0.0  ;;  %v20857_v24 = vadd.f32 %v10546_v16, %v9117_v5 }
 0x6b8   : > { %v10696_v6 = vadd.f32 %v10664_v48, %v10632_v29  ;;  %v10633_v18 = vmax.f32 %v20856_v19, 0.0 }
 0x6b9   : > { %v10694_v13 = vadd.f32 %v10662_v21, %v10630_v26  ;;  %v10631_v60 = vmax.f32 %v20857_v24, 0.0 }
 0x6ba   : > { %10728 = vst [vmem:[%s22606_s21 + $0xd0] sm:$0xff] %v10696_v6  ;;  %v10697_v34 = vadd.f32 %v10665_v40, %v10633_v18  ;;  %v10747_v28 = vpack.c.bf16 %v10633_v18, %v10632_v29  ;;  %v19212_v20 = vpop.f32.mrb[28].mxu1 }
 0x6bb   : > { %10726 = vst [vmem:[%s22606_s21 + $0xc0] sm:$0xff] %v10694_v13  ;;  %v10695_v59 = vadd.f32 %v10663_v49, %v10631_v60  ;;  %v10746_v58 = vpack.c.bf16 %v10631_v60, %v10630_v26  ;;  %v19404_v36 = vpop.f32.mrb[28].mxu0  ;;  %v9130_v52 = vpop.f32.mrb[29].mxu1 }
 0x6bc   : > { %10729 = vst [vmem:[%s22606_s21 + $0xd8] sm:$0xff] %v10697_v34  ;;  %10763 = vst [vmem:[#allocation2 + $0x2c0] sm:$0xff] %v10747_v28  ;;  %v20858_v4 = vadd.f32 %v19404_v36, %v19212_v20  ;;  %v10559_v37 = vpop.f32.mrb[29].mxu0  ;;  %v19213_v39 = vpop.f32.mrb[30].mxu1 }
 0x6bd   : > { %10727 = vst [vmem:[%s22606_s21 + $0xc8] sm:$0xff] %v10695_v59  ;;  %10762 = vst [vmem:[#allocation2 + $0x2a8] sm:$0xff] %v10746_v58  ;;  %v20859_v2 = vadd.f32 %v10559_v37, %v9130_v52  ;;  %v19405_v35 = vpop.f32.mrb[30].mxu0  ;;  %v9133_v46 = vpop.f32.mrb[31].mxu1 }
 0x6be   : > { %v10636_v33 = vmax.f32 %v20858_v4, 0.0  ;;  %v20860_v9 = vadd.f32 %v19405_v35, %v19213_v39  ;;  %v10562_v61 = vpop.f32.mrb[31].mxu0 }
 0x6bf   : > { %v10634_v23 = vmax.f32 %v20859_v2, 0.0  ;;  %v20861_v15 = vadd.f32 %v10562_v61, %v9133_v46 }
 0x6c0   : > { %v10700_v32 = vadd.f32 %v10668_v10, %v10636_v33  ;;  %v10637_v56 = vmax.f32 %v20860_v9, 0.0 }
 0x6c1   : > { %v10698_v54 = vadd.f32 %v10666_v43, %v10634_v23  ;;  %v10635_v45 = vmax.f32 %v20861_v15, 0.0 }
 0x6c2   : > { %10732 = vst [vmem:[%s22606_s21 + $0xf0] sm:$0xff] %v10700_v32  ;;  %v10701_v25 = vadd.f32 %v10669_v55, %v10637_v56  ;;  %v10749_v1 = vpack.c.bf16 %v10637_v56, %v10636_v33 }
 0x6c3   : > { %10730 = vst [vmem:[%s22606_s21 + $0xe0] sm:$0xff] %v10698_v54  ;;  %v10699_v63 = vadd.f32 %v10667_v12, %v10635_v45  ;;  %v10748_v27 = vpack.c.bf16 %v10635_v45, %v10634_v23 }
 0x6c4   : > { %10733 = vst [vmem:[%s22606_s21 + $0xf8] sm:$0xff] %v10701_v25  ;;  %10765 = vst [vmem:[#allocation2 + $0x2f0] sm:$0xff] %v10749_v1 }
 0x6c5   : > { %10731 = vst [vmem:[%s22606_s21 + $0xe8] sm:$0xff] %v10699_v63  ;;  %10764 = vst [vmem:[#allocation2 + $0x2d8] sm:$0xff] %v10748_v27 }
 0x6c6 PF: > { %p16877_p12 = scmp.ne.s32.totalorder %s22327_s15, 3 }
 0x6c7   : > { %v21997_v11 = vld [vmem:[%s22600_s30 + $0x40] sm:$0xff] (!%p16877_p12)   ;;  %v21999_v22 = vld [vmem:[%s22600_s30 + $0x48] sm:$0xff] (!%p16877_p12)   ;;  %v22001_v38 = vld [vmem:[%s22600_s30 + $0x50] sm:$0xff] (!%p16877_p12)   ;;  %vm10835_vm6 = vcmask (!%p16877_p12), 1043456  }
 0x6c8   : > { %10769 = sbr.rel (%p16877_p12) target bundleno = 2271 (0x8df), region = 52  ;;  %v21998_v7 = vld [vmem:[%s22600_s30 + $0x100] sm:$0xff] (!%p16877_p12)   ;;  %19406 = vmatprep.subr.bf16.mxu1 (!%p16877_p12), %v21997_v11  ;;  %v22000_v50 = vld [vmem:[%s22600_s30 + $0x108] sm:$0xff] (!%p16877_p12)   ;;  %v22002_v0 = vld [vmem:[%s22600_s30 + $0x110] sm:$0xff] (!%p16877_p12)  }
 0x6c9   : > { %19598 = vmatprep.subr.bf16.mxu0 (!%p16877_p12), %v21998_v7  ;;  %19407 = vmatpush3.bf16.msra.mxu1 (!%p16877_p12), %v21997_v11  ;;  %v22003_v31 = vld [vmem:[%s22600_s30 + $0x58] sm:$0xff] (!%p16877_p12)   ;;  %v22005_v51 = vld [vmem:[%s22600_s30 + $0x60] sm:$0xff] (!%p16877_p12)   ;;  %v22007_v53 = vld [vmem:[%s22600_s30 + $0x68] sm:$0xff] (!%p16877_p12)  }
 0x6ca   : > { %19599 = vmatpush3.bf16.msra.mxu0 (!%p16877_p12), %v21998_v7  ;;  %19408 = vmatprep.subr.bf16.mxu1 (!%p16877_p12), %v21999_v22  ;;  %v22004_v47 = vld [vmem:[%s22600_s30 + $0x118] sm:$0xff] (!%p16877_p12)   ;;  %v22006_v30 = vld [vmem:[%s22600_s30 + $0x120] sm:$0xff] (!%p16877_p12)   ;;  %v10916_v44 = vld [vmem:[#allocation2 + $0xc8] sm:$0xff] (!%p16877_p12) }
 0x6cb   : > { %19600 = vmatprep.subr.bf16.mxu0 (!%p16877_p12), %v22000_v50  ;;  %v24264_v42 = vld [vmem:[#allocation2 + $0x188] sm:$0xff] (!%p16877_p12)  ;;  %19422 = vmatprep.mubr.bf16.mxu1 (!%p16877_p12), %v10916_v44  ;;  %v22009_v41 = vld [vmem:[%s22600_s30 + $0x70] sm:$0xff] (!%p16877_p12)   ;;  %v22011_v3 = vld [vmem:[%s22600_s30 + $0x78] sm:$0xff] (!%p16877_p12)  }
 0x6cc   : > { %v22008_v57 = vld [vmem:[%s22600_s30 + $0x128] sm:$0xff] (!%p16877_p12)   ;;  %19614 = vmatprep.mubr.bf16.mxu0 (!%p16877_p12), %v24264_v42  ;;  %v22010_v62 = vld [vmem:[%s22600_s30 + $0x130] sm:$0xff] (!%p16877_p12)   ;;  %v22012_v14 = vld [vmem:[%s22600_s30 + $0x138] sm:$0xff] (!%p16877_p12)  }
 0x6cd   : > { %19409 = vmatpush3.bf16.msra.mxu1 (!%p16877_p12), %v21999_v22  ;;  %v22013_v48 = vld [vmem:[%s22600_s30] sm:$0xff] (!%p16877_p12)   ;;  %v22015_v29 = vld [vmem:[%s22600_s30 + $0x148] sm:$0xff] (!%p16877_p12)   ;;  %v10918_v21 = vld [vmem:[#allocation2 + $0xf8] sm:$0xff] (!%p16877_p12) }
 0x6ce   : > { %19601 = vmatpush3.bf16.msra.mxu0 (!%p16877_p12), %v22000_v50  ;;  %19410 = vmatprep.subr.bf16.mxu1 (!%p16877_p12), %v22001_v38  ;;  %v22014_v17 = vld [vmem:[%s22600_s30 + $0x140] sm:$0xff] (!%p16877_p12)   ;;  %v24277_v19 = vld [vmem:[#allocation2 + $0x1b8] sm:$0xff] (!%p16877_p12)  ;;  %v22016_v16 = vld [vmem:[%s22600_s30 + $0x8] sm:$0xff] (!%p16877_p12)  }
 0x6cf   : > { %19602 = vmatprep.subr.bf16.mxu0 %v22002_v0  ;;  %v10917_v8 = vld [vmem:[#allocation2 + $0xe0] sm:$0xff]  ;;  %v22019_v26 = vld [vmem:[%s22600_s30 + $0x10] sm:$0xff]   ;;  %v10920_v18 = vld [vmem:[#allocation2 + $0x128] sm:$0xff] }
 0x6d0   : > { %v24274_v5 = vld [vmem:[#allocation2 + $0x1a0] sm:$0xff]  ;;  %v22017_v40 = vld [vmem:[%s22600_s30 + $0x150] sm:$0xff]   ;;  %v22018_v49 = vld [vmem:[%s22600_s30 + $0x158] sm:$0xff]  }
 0x6d1   : > { %19411 = vmatpush3.bf16.msra.mxu1 %v22001_v38  ;;  %v10919_v24 = vld [vmem:[#allocation2 + $0x110] sm:$0xff]  ;;  %v24287_v13 = vld [vmem:[#allocation2 + $0x1e8] sm:$0xff]  ;;  %v22022_v60 = vld [vmem:[%s22600_s30 + $0x18] sm:$0xff]  }
 0x6d2   : > { %19603 = vmatpush3.bf16.msra.mxu0 %v22002_v0  ;;  %19412 = vmatprep.subr.bf16.mxu1 %v22003_v31  ;;  %v24284_v6 = vld [vmem:[#allocation2 + $0x1d0] sm:$0xff]  ;;  %v22020_v34 = vld [vmem:[%s22600_s30 + $0x160] sm:$0xff]   ;;  %v10922_v58 = vld [vmem:[#allocation2 + $0x158] sm:$0xff] }
 0x6d3   : > { %19604 = vmatprep.subr.bf16.mxu0 %v22004_v47  ;;  %v22025_v28 = vld [vmem:[%s22600_s30 + $0x20] sm:$0xff]   ;;  %v22021_v36 = vld [vmem:[%s22600_s30 + $0x168] sm:$0xff]   ;;  %v24297_v52 = vld [vmem:[#allocation2 + $0x218] sm:$0xff] }
 0x6d4   : > { %v10921_v20 = vld [vmem:[#allocation2 + $0x140] sm:$0xff]  ;;  %v12410_v4 = vld [vmem:[#allocation2 + $0x188] sm:$0xf0]  ;;  %v12411_v37 = vld [vmem:[#allocation2 + $0x190] sm:$0xf] }
 0x6d5   : > { %19413 = vmatpush3.bf16.msra.mxu1 %v22003_v31  ;;  %v24294_v59 = vld [vmem:[#allocation2 + $0x200] sm:$0xff]  ;;  %v22027_v39 = vld [vmem:[%s22600_s30 + $0x28] sm:$0xff]   ;;  %v22023_v10 = vld [vmem:[%s22600_s30 + $0x170] sm:$0xff]   ;;  %v12474_v2 = vrot.slane %v12410_v4, 4  ;;  %v12475_v35 = vrot.slane %v12411_v37, 4 }
 0x6d6   : > { %19605 = vmatpush3.bf16.msra.mxu0 %v22004_v47  ;;  %19414 = vmatprep.subr.bf16.mxu1 %v22005_v51  ;;  %v22029_v46 = vld [vmem:[%s22600_s30 + $0x30] sm:$0xff]   ;;  %v22024_v9 = vld [vmem:[%s22600_s30 + $0x178] sm:$0xff]   ;;  %v12412_v61 = vld [vmem:[#allocation2 + $0x1a0] sm:$0xf0] }
 0x6d7   : > { %19606 = vmatprep.subr.bf16.mxu0 %v22006_v30  ;;  %v10923_v33 = vld [vmem:[#allocation2 + $0x170] sm:$0xff]  ;;  %v12476_v23 = vsel %vm10835_vm6, %v12474_v2, %v12475_v35  ;;  %v12413_v55 = vld [vmem:[#allocation2 + $0x1a8] sm:$0xf]  ;;  %v12414_v15 = vld [vmem:[#allocation2 + $0x1b8] sm:$0xf0]  ;;  %v12477_v12 = vrot.slane %v12412_v61, 4 }
 0x6d8   : > { %v24304_v43 = vld [vmem:[#allocation2 + $0x230] sm:$0xff]  ;;  %v12415_v32 = vld [vmem:[#allocation2 + $0x1c0] sm:$0xf]  ;;  %v22031_v56 = vld [vmem:[%s22600_s30 + $0x38] sm:$0xff]   ;;  %v12478_v54 = vrot.slane %v12413_v55, 4  ;;  %v12480_v25 = vrot.slane %v12414_v15, 4 }
 0x6d9   : > { %19415 = vmatpush3.bf16.msra.mxu1 %v22005_v51  ;;  %v22026_v45 = vld [vmem:[%s22600_s30 + $0x180] sm:$0xff]   ;;  %v12481_v1 = vrot.slane %v12415_v32, 4  ;;  %v12416_v11 = vld [vmem:[#allocation2 + $0x1d0] sm:$0xf0]  ;;  %v12417_v22 = vld [vmem:[#allocation2 + $0x1d8] sm:$0xf] }
 0x6da   : > { %19607 = vmatpush3.bf16.msra.mxu0 %v22006_v30  ;;  %19416 = vmatprep.subr.bf16.mxu1 %v22007_v53  ;;  %v24313_v63 = vld [vmem:[%s22600_s30 + $0x80] sm:$0xff]   ;;  %v12479_v27 = vsel %vm10835_vm6, %v12477_v12, %v12478_v54  ;;  %v22028_v50 = vld [vmem:[%s22600_s30 + $0x188] sm:$0xff]   ;;  %v12419_v0 = vld [vmem:[#allocation2 + $0x1f0] sm:$0xf]  ;;  %v12483_v31 = vrot.slane %v12416_v11, 4  ;;  %v12484_v47 = vrot.slane %v12417_v22, 4 }
 0x6db   : > { %19608 = vmatprep.subr.bf16.mxu0 %v22008_v57  ;;  %v12482_v7 = vsel %vm10835_vm6, %v12480_v25, %v12481_v1  ;;  %v12418_v38 = vld [vmem:[#allocation2 + $0x1e8] sm:$0xf0]  ;;  %v12487_v30 = vrot.slane %v12419_v0, 4  ;;  %v10773_v4 = vld [vmem:[#allocation2 + $0xd8] sm:$0xf0]  ;;  %v24340_v25 = vld [vmem:[%s22600_s30 + $0x1c0] sm:$0xff]  }
 0x6dc   : > { %v12486_v51 = vrot.slane %v12418_v38, 4  ;;  %v12485_v44 = vsel %vm10835_vm6, %v12483_v31, %v12484_v47  ;;  %v10774_v37 = vld [vmem:[#allocation2 + $0xe0] sm:$0xf]  ;;  %v10777_v1 = vld [vmem:[#allocation2 + $0x108] sm:$0xf0] }
 0x6dd   : > { %19417 = vmatpush3.bf16.msra.mxu1 %v22007_v53  ;;  %v22030_v53 = vld [vmem:[%s22600_s30 + $0x190] sm:$0xff]   ;;  %v12431_v61 = vld [vmem:[#allocation2 + $0x280] sm:$0xf]  ;;  %v10840_v55 = vrot.slane %v10774_v37, 4  ;;  %v22035_v31 = vld [vmem:[%s22600_s30 + $0x88] sm:$0xff]  }
 0x6de   : > { %19609 = vmatpush3.bf16.msra.mxu0 %v22008_v57  ;;  %19418 = vmatprep.subr.bf16.mxu1 %v22009_v41  ;;  %v12420_v57 = vld [vmem:[#allocation2 + $0x200] sm:$0xf0]  ;;  %v12432_v11 = vld [vmem:[#allocation2 + $0x290] sm:$0xf0]  ;;  %v10780_v47 = vld [vmem:[#allocation2 + $0x128] sm:$0xf] }
 0x6df   : > { %19610 = vmatprep.subr.bf16.mxu0 %v22010_v62  ;;  %v10785_v37 = vld [vmem:[#allocation2 + $0x168] sm:$0xf0] }
 0x6e1   : > { %19419 = vmatpush3.bf16.msra.mxu1 %v22009_v41  ;;  %v12421_v41 = vld [vmem:[#allocation2 + $0x208] sm:$0xf] }
 0x6e2   : > { %19611 = vmatpush3.bf16.msra.mxu0 %v22010_v62  ;;  %19420 = vmatprep.subr.bf16.mxu1 %v22011_v3  ;;  %v22032_v62 = vld [vmem:[%s22600_s30 + $0x198] sm:$0xff]  }
 0x6e3   : > { %19612 = vmatprep.subr.bf16.mxu0 %v22012_v14 }
 0x6e5   : > { %19421 = vmatpush3.bf16.msra.mxu1 %v22011_v3  ;;  %v12422_v3 = vld [vmem:[#allocation2 + $0x218] sm:$0xf0] }
 0x6e6   : > { %19613 = vmatpush3.bf16.msra.mxu0 %v22012_v14  ;;  %19454 = vmatprep.subr.bf16.mxu1 %v22013_v48  ;;  %v12423_v14 = vld [vmem:[#allocation2 + $0x220] sm:$0xf] }
 0x6e7   : > { %19646 = vmatprep.subr.bf16.mxu0 %v22014_v17 }
 0x6e8   : > { %19423 = vmatmul.mubr.bf16.vlgmr.msra.gmra.mrb[0].mxu1 %v10917_v8  ;;  %v12492_v8 = vrot.slane %v12422_v3, 4  ;;  %v22037_v3 = vld [vmem:[%s22600_s30 + $0x90] sm:$0xff]  }
 0x6e9   : > { %19615 = vmatmul.mubr.bf16.vlgmr.msra.gmra.mrb[0].mxu0 %v24274_v5  ;;  %19455 = vmatpush3.bf16.msra.mxu1 %v22013_v48  ;;  %v12489_v48 = vrot.slane %v12420_v57, 4 }
 0x6ea   : > { %19647 = vmatpush3.bf16.msra.mxu0 %v22014_v17  ;;  %19426 = vmatprep.mubr.bf16.mxu1 %v10918_v21  ;;  %v12490_v17 = vrot.slane %v12421_v41, 4 }
 0x6eb   : > { %19648 = vmatprep.subr.bf16.mxu0 %v22015_v29  ;;  %19618 = vmatprep.mubr.bf16.mxu0 %v24277_v19 }
 0x6ec   : > { %19456 = vmatprep.subr.bf16.mxu1 %v22016_v16  ;;  %v12491_v21 = vsel %vm10835_vm6, %v12489_v48, %v12490_v17 }
 0x6ed   : > { %19457 = vmatpush3.bf16.msra.mxu1 %v22016_v16  ;;  %v12425_v16 = vld [vmem:[#allocation2 + $0x238] sm:$0xf] }
 0x6ee   : > { %19649 = vmatpush3.bf16.msra.mxu0 %v22015_v29  ;;  %19458 = vmatprep.subr.bf16.mxu1 %v22019_v26  ;;  %v22034_v29 = vld [vmem:[%s22600_s30 + $0x1a0] sm:$0xff]  }
 0x6ef   : > { %19650 = vmatprep.subr.bf16.mxu0 %v22017_v40 }
 0x6f0   : > { %19427 = vmatmul.mubr.bf16.gmra.mrb[4].mxu1 %v10919_v24  ;;  %v10772_v24 = vld [vmem:[#allocation2 + $0xc8] sm:$0xf] }
 0x6f1   : > { %19619 = vmatmul.mubr.bf16.gmra.mrb[4].mxu0 %v24284_v6  ;;  %19430 = vmatprep.mubr.bf16.mxu1 %v10920_v18  ;;  %v22036_v18 = vld [vmem:[%s22600_s30 + $0x1a8] sm:$0xff]  }
 0x6f2   : > { %19651 = vmatpush3.bf16.msra.mxu0 %v22017_v40  ;;  %19622 = vmatprep.mubr.bf16.mxu0 %v24287_v13 }
 0x6f3   : > { %19652 = vmatprep.subr.bf16.mxu0 %v22018_v49  ;;  %19459 = vmatpush3.bf16.msra.mxu1 %v22019_v26  ;;  %v10771_v26 = vld [vmem:[#allocation2 + $0xc0] sm:$0xf0] }
 0x6f4   : > { %19460 = vmatprep.subr.bf16.mxu1 %v22022_v60 }
 0x6f6   : > { %19653 = vmatpush3.bf16.msra.mxu0 %v22018_v49  ;;  %v12427_v49 = vld [vmem:[#allocation2 + $0x250] sm:$0xf] }
 0x6f7   : > { %19654 = vmatprep.subr.bf16.mxu0 %v22020_v34  ;;  %19461 = vmatpush3.bf16.msra.mxu1 %v22022_v60  ;;  %v12496_v60 = vrot.slane %v12425_v16, 4  ;;  %v10783_v16 = vld [vmem:[#allocation2 + $0x150] sm:$0xf0] }
 0x6f8   : > { %19431 = vmatmul.mubr.bf16.gmra.mrb[8].mxu1 %v10921_v20  ;;  %19462 = vmatprep.subr.bf16.mxu1 %v22025_v28 }
 0x6f9   : > { %19623 = vmatmul.mubr.bf16.gmra.mrb[8].mxu0 %v24294_v59  ;;  %19434 = vmatprep.mubr.bf16.mxu1 %v10922_v58  ;;  %v12499_v58 = vrot.slane %v12427_v49, 4 }
 0x6fa   : > { %19655 = vmatpush3.bf16.msra.mxu0 %v22020_v34  ;;  %19626 = vmatprep.mubr.bf16.mxu0 %v24297_v52  ;;  %v10836_v34 = vrot.slane %v10771_v26, 4 }
 0x6fb   : > { %19656 = vmatprep.subr.bf16.mxu0 %v22021_v36  ;;  %19463 = vmatpush3.bf16.msra.mxu1 %v22025_v28  ;;  %v10837_v28 = vrot.slane %v10772_v24, 4  ;;  %v12438_v24 = vld [vmem:[#allocation2 + $0x2d8] sm:$0xf0] }
 0x6fc   : > { %19464 = vmatprep.subr.bf16.mxu1 %v22027_v39 }
 0x6fd   : > { %v10838_v2 = vsel %vm10835_vm6, %v10836_v34, %v10837_v28  ;;  %v10854_v28 = vrot.slane %v10783_v16, 4  ;;  %v12803_v16 = vld [vmem:[#allocation2 + $0x290] sm:$0xf] }
 0x6fe   : > { %19657 = vmatpush3.bf16.msra.mxu0 %v22021_v36  ;;  %v22038_v36 = vld [vmem:[%s22600_s30 + $0x1b0] sm:$0xff]  }
 0x6ff   : > { %19658 = vmatprep.subr.bf16.mxu0 %v22023_v10  ;;  %19465 = vmatpush3.bf16.msra.mxu1 %v22027_v39  ;;  %v12428_v39 = vld [vmem:[#allocation2 + $0x260] sm:$0xf0] }
 0x700   : > { %19435 = vmatmul.mubr.bf16.gmra.mrb[12].mxu1 %v10923_v33  ;;  %19466 = vmatprep.subr.bf16.mxu1 %v22029_v46  ;;  %v12430_v33 = vld [vmem:[#allocation2 + $0x278] sm:$0xf0]  ;;  %v12501_v15 = vrot.slane %v12428_v39, 4 }
 0x701   : > { %19627 = vmatmul.mubr.bf16.gmra.mrb[12].mxu0 %v24304_v43  ;;  %19438 = vmatprep.mubr.bf16.mxu1 %v24264_v42  ;;  %v12488_v42 = vsel %vm10835_vm6, %v12486_v51, %v12487_v30  ;;  %v12504_v54 = vrot.slane %v12430_v33, 4  ;;  %v10845_v51 = vrot.slane %v10777_v1, 4  ;;  %v12434_v30 = vld [vmem:[#allocation2 + $0x2a8] sm:$0xf0] }
 0x702   : > { %19659 = vmatpush3.bf16.msra.mxu0 %v22023_v10  ;;  %19662 = vmatprep.mubr.bf16.mxu0 %v12476_v23  ;;  %v12429_v10 = vld [vmem:[#allocation2 + $0x268] sm:$0xf]  ;;  %v10839_v23 = vrot.slane %v10773_v4, 4  ;;  %v22041_v4 = vld [vmem:[%s22600_s30 + $0xa0] sm:$0xff]  }
 0x703   : > { %19660 = vmatprep.subr.bf16.mxu0 %v22024_v9  ;;  %19467 = vmatpush3.bf16.msra.mxu1 %v22029_v46  ;;  %v10776_v46 = vld [vmem:[#allocation2 + $0xf8] sm:$0xf]  ;;  %v12502_v32 = vrot.slane %v12429_v10, 4  ;;  %v10786_v10 = vld [vmem:[#allocation2 + $0x170] sm:$0xf] }
 0x704   : > { %19468 = vmatprep.subr.bf16.mxu1 %v22031_v56  ;;  %v10843_v12 = vrot.slane %v10776_v46, 4  ;;  %v10787_v46 = vld [vmem:[#allocation2 + $0x180] sm:$0xf0] }
 0x705   : > { %v12503_v22 = vsel %vm10835_vm6, %v12501_v15, %v12502_v32  ;;  %v10857_v15 = vrot.slane %v10785_v37, 4  ;;  %v10858_v32 = vrot.slane %v10786_v10, 4  ;;  %v22046_v10 = vld [vmem:[%s22600_s30 + $0x1d0] sm:$0xff]  }
 0x706   : > { %19661 = vmatpush3.bf16.msra.mxu0 %v22024_v9  ;;  %v22040_v9 = vld [vmem:[%s22600_s30 + $0x1b8] sm:$0xff]  }
 0x707   : > { %19694 = vmatprep.subr.bf16.mxu0 %v22026_v45  ;;  %19469 = vmatpush3.bf16.msra.mxu1 %v22031_v56 }
 0x708   : > { %19439 = vmatmul.mubr.bf16.gmra.mrb[16].mxu1 %v24274_v5  ;;  %19502 = vmatprep.subr.bf16.mxu1 %v24313_v63  ;;  %v12493_v5 = vrot.slane %v12423_v14, 4  ;;  %v12510_v14 = vrot.slane %v12434_v30, 4  ;;  %v10792_v30 = vld [vmem:[#allocation2 + $0x1b8] sm:$0xf] }
 0x709   : > { %19663 = vmatmul.mubr.bf16.vlgmr.msra.gmra.mrb[0].mxu0 %v12479_v27  ;;  %19442 = vmatprep.mubr.bf16.mxu1 %v24277_v19  ;;  %v12424_v19 = vld [vmem:[#allocation2 + $0x230] sm:$0xf0]  ;;  %v10778_v27 = vld [vmem:[#allocation2 + $0x110] sm:$0xf] }
 0x70a   : > { %19695 = vmatpush3.bf16.msra.mxu0 %v22026_v45  ;;  %19666 = vmatprep.mubr.bf16.mxu0 %v12482_v7  ;;  %v12494_v40 = vsel %vm10835_vm6, %v12492_v8, %v12493_v5  ;;  %v12505_v45 = vrot.slane %v12431_v61, 4  ;;  %v12433_v7 = vld [vmem:[#allocation2 + $0x298] sm:$0xf]  ;;  %v10781_v8 = vld [vmem:[#allocation2 + $0x138] sm:$0xf0] }
 0x70b   : > { %19696 = vmatprep.subr.bf16.mxu0 %v22028_v50  ;;  %v12508_v57 = vrot.slane %v12433_v7, 4  ;;  %v10782_v5 = vld [vmem:[#allocation2 + $0x140] sm:$0xf]  ;;  %v10851_v49 = vrot.slane %v10781_v8, 4  ;;  %v12796_v61 = vld [vmem:[#allocation2 + $0x240] sm:$0xf0] }
 0x70c   : > { %v12506_v0 = vsel %vm10835_vm6, %v12504_v54, %v12505_v45  ;;  %v10860_v54 = vrot.slane %v10787_v46, 4  ;;  %v12860_v1 = vrot.slane %v12796_v61, 4  ;;  %v10789_v7 = vld [vmem:[#allocation2 + $0x198] sm:$0xf0]  ;;  %v12807_v46 = vld [vmem:[#allocation2 + $0x2c0] sm:$0xf] }
 0x70e   : > { %19697 = vmatpush3.bf16.msra.mxu0 %v22028_v50  ;;  %v10779_v50 = vld [vmem:[#allocation2 + $0x120] sm:$0xf0] }
 0x70f   : > { %19698 = vmatprep.subr.bf16.mxu0 %v22030_v53  ;;  %v10848_v41 = vrot.slane %v10779_v50, 4  ;;  %v12798_v50 = vld [vmem:[#allocation2 + $0x258] sm:$0xf0] }
 0x710   : > { %19443 = vmatmul.mubr.bf16.gmra.mrb[20].mxu1 %v24284_v6  ;;  %v12426_v6 = vld [vmem:[#allocation2 + $0x248] sm:$0xf0] }
 0x711   : > { %19667 = vmatmul.mubr.bf16.gmra.mrb[4].mxu0 %v12485_v44  ;;  %19446 = vmatprep.mubr.bf16.mxu1 %v24287_v13  ;;  %v12495_v13 = vrot.slane %v12424_v19, 4  ;;  %v12498_v20 = vrot.slane %v12426_v6, 4  ;;  %v10846_v44 = vrot.slane %v10778_v27, 4  ;;  %v12437_v19 = vld [vmem:[#allocation2 + $0x2c8] sm:$0xf]  ;;  %v22039_v6 = vld [vmem:[%s22600_s30 + $0x98] sm:$0xff]  }
 0x712   : > { %19670 = vmatprep.mubr.bf16.mxu0 %v12488_v42  ;;  %19699 = vmatpush3.bf16.msra.mxu0 %v22030_v53  ;;  %v12435_v53 = vld [vmem:[#allocation2 + $0x2b0] sm:$0xf]  ;;  %v12507_v42 = vrot.slane %v12432_v11, 4  ;;  %v12514_v34 = vrot.slane %v12437_v19, 4  ;;  %v10859_v11 = vsel %vm10835_vm6, %v10857_v15, %v10858_v32  ;;  %v12802_v19 = vld [vmem:[#allocation2 + $0x288] sm:$0xf0] }
 0x713   : > { %19700 = vmatprep.subr.bf16.mxu0 %v22032_v62  ;;  %v12500_v35 = vsel %vm10835_vm6, %v12498_v20, %v12499_v58  ;;  %v12511_v48 = vrot.slane %v12435_v53, 4  ;;  %v10847_v17 = vsel %vm10835_vm6, %v10845_v51, %v10846_v44  ;;  %v12516_v58 = vrot.slane %v12438_v24, 4  ;;  %v22045_v27 = vld [vmem:[%s22600_s30 + $0xb0] sm:$0xff]   ;;  %v22047_v53 = vld [vmem:[%s22600_s30 + $0xb8] sm:$0xff]   ;;  %v22044_v24 = vld [vmem:[%s22600_s30 + $0x1c8] sm:$0xff]  }
 0x714   : > { %v10791_v51 = vld [vmem:[#allocation2 + $0x1b0] sm:$0xf0]  ;;  %v12809_v32 = vld [vmem:[#allocation2 + $0x2d8] sm:$0xf] }
 0x715   : > { %v12512_v26 = vsel %vm10835_vm6, %v12510_v14, %v12511_v48  ;;  %v12800_v44 = vld [vmem:[#allocation2 + $0x270] sm:$0xf0]  ;;  %v10866_v14 = vrot.slane %v10791_v51, 4  ;;  %v10867_v48 = vrot.slane %v10792_v30, 4  ;;  %v12811_v51 = vld [vmem:[#allocation2 + $0x2f0] sm:$0xf] }
 0x716   : > { %19701 = vmatpush3.bf16.msra.mxu0 %v22032_v62  ;;  %v10849_v62 = vrot.slane %v10780_v47, 4  ;;  %v12808_v15 = vld [vmem:[#allocation2 + $0x2d0] sm:$0xf0]  ;;  %v11366_v30 = vld [vmem:[#allocation2 + $0xc8] sm:$0xf0] }
 0x717   : > { %19702 = vmatprep.subr.bf16.mxu0 %v22034_v29 }
 0x718   : > { %19447 = vmatmul.mubr.bf16.gmra.mrb[24].mxu1 %v24294_v59  ;;  %v12497_v59 = vsel %vm10835_vm6, %v12495_v13, %v12496_v60  ;;  %v10852_v13 = vrot.slane %v10782_v5, 4  ;;  %v24368_v5 = vld [vmem:[%s22600_s30 + $0xc0] sm:$0xff]  }
 0x719   : > { %19671 = vmatmul.mubr.bf16.gmra.mrb[8].mxu0 %v12491_v21  ;;  %19450 = vmatprep.mubr.bf16.mxu1 %v24297_v52  ;;  %v10775_v52 = vld [vmem:[#allocation2 + $0xf0] sm:$0xf0]  ;;  %v12436_v21 = vld [vmem:[#allocation2 + $0x2c0] sm:$0xf0] }
 0x71a   : > { %19674 = vmatprep.mubr.bf16.mxu0 %v12494_v40  ;;  %19703 = vmatpush3.bf16.msra.mxu0 %v22034_v29  ;;  %v10842_v56 = vrot.slane %v10775_v52, 4  ;;  %v12509_v29 = vsel %vm10835_vm6, %v12507_v42, %v12508_v57  ;;  %v10784_v40 = vld [vmem:[#allocation2 + $0x158] sm:$0xf]  ;;  %v12513_v60 = vrot.slane %v12436_v21, 4  ;;  %v10853_v39 = vsel %vm10835_vm6, %v10851_v49, %v10852_v13  ;;  %v10796_v49 = vld [vmem:[#allocation2 + $0x1e8] sm:$0xf] }
 0x71b   : > { %19704 = vmatprep.subr.bf16.mxu0 %v22036_v18  ;;  %v10855_v20 = vrot.slane %v10784_v40, 4  ;;  %v12801_v42 = vld [vmem:[#allocation2 + $0x278] sm:$0xf]  ;;  %v10863_v57 = vrot.slane %v10789_v7, 4  ;;  %v10868_v40 = vsel %vm10835_vm6, %v10866_v14, %v10867_v48  ;;  %v12804_v13 = vld [vmem:[#allocation2 + $0x2a0] sm:$0xf0] }
 0x71c   : > { %v10844_v38 = vsel %vm10835_vm6, %v10842_v56, %v10843_v12  ;;  %v12515_v52 = vsel %vm10835_vm6, %v12513_v60, %v12514_v34  ;;  %v12867_v8 = vrot.slane %v12801_v42, 4  ;;  %v12805_v60 = vld [vmem:[#allocation2 + $0x2a8] sm:$0xf]  ;;  %v12872_v37 = vrot.slane %v12804_v13, 4  ;;  %v22050_v7 = vld [vmem:[%s22600_s30 + $0x1e0] sm:$0xff]  }
 0x71d   : > { %v12812_v42 = vld [vmem:[#allocation2 + $0x300] sm:$0xf0]  ;;  %v12882_v48 = vrot.slane %v12811_v51, 4  ;;  %v11370_v13 = vld [vmem:[#allocation2 + $0xf8] sm:$0xf0] }
 0x71e   : > { %19705 = vmatpush3.bf16.msra.mxu0 %v22036_v18  ;;  %v12439_v18 = vld [vmem:[#allocation2 + $0x2e0] sm:$0xf]  ;;  %v11377_v51 = vld [vmem:[#allocation2 + $0x148] sm:$0xf] }
 0x71f   : > { %19706 = vmatprep.subr.bf16.mxu0 %v22038_v36 }
 0x720   : > { %19451 = vmatmul.mubr.bf16.gmra.mrb[28].mxu1 %v24304_v43  ;;  %v10841_v43 = vsel %vm10835_vm6, %v10839_v23, %v10840_v55  ;;  %v22043_v23 = vld [vmem:[%s22600_s30 + $0xa8] sm:$0xff]  }
 0x721   : > { %19675 = vmatmul.mubr.bf16.gmra.mrb[12].mxu0 %v12497_v59  ;;  %19470 = vmatprep.mubr.bf16.mxu1 %v10838_v2  ;;  %v12440_v59 = vld [vmem:[#allocation2 + $0x2f0] sm:$0xf0]  ;;  %v12441_v2 = vld [vmem:[#allocation2 + $0x2f8] sm:$0xf]  ;;  %v12797_v55 = vld [vmem:[#allocation2 + $0x248] sm:$0xf] }
 0x722   : > { %19678 = vmatprep.mubr.bf16.mxu0 %v12500_v35  ;;  %19707 = vmatpush3.bf16.msra.mxu0 %v22038_v36  ;;  %v12517_v36 = vrot.slane %v12439_v18, 4  ;;  %v10856_v35 = vsel %vm10835_vm6, %v10854_v28, %v10855_v20  ;;  %v12519_v56 = vrot.slane %v12440_v59, 4  ;;  %v12520_v12 = vrot.slane %v12441_v2, 4  ;;  %v10795_v18 = vld [vmem:[#allocation2 + $0x1e0] sm:$0xf0] }
 0x723   : > { %19708 = vmatprep.subr.bf16.mxu0 %v22040_v9  ;;  %v12869_v20 = vrot.slane %v12802_v19, 4  ;;  %v10797_v59 = vld [vmem:[#allocation2 + $0x1f8] sm:$0xf0]  ;;  %v10798_v2 = vld [vmem:[#allocation2 + $0x200] sm:$0xf] }
 0x724   : > { %v12518_v33 = vsel %vm10835_vm6, %v12516_v58, %v12517_v36  ;;  %v12870_v58 = vrot.slane %v12803_v16, 4  ;;  %v10872_v36 = vrot.slane %v10795_v18, 4 }
 0x726   : > { %19709 = vmatpush3.bf16.msra.mxu0 %v22040_v9  ;;  %v10788_v9 = vld [vmem:[#allocation2 + $0x188] sm:$0xf] }
 0x727   : > { %19742 = vmatprep.subr.bf16.mxu0 %v24340_v25  ;;  %v10861_v45 = vrot.slane %v10788_v9, 4 }
 0x728   : > { %19471 = vmatmul.mubr.bf16.vlgmr.msra.gmra.mrb[0].mxu1 %v10841_v43  ;;  %v12861_v43 = vrot.slane %v12797_v55, 4  ;;  %v22048_v55 = vld [vmem:[%s22600_s30 + $0x1d8] sm:$0xff]  }
 0x729   : > { %19679 = vmatmul.mubr.bf16.gmra.mrb[16].mxu0 %v12503_v22  ;;  %19503 = vmatpush3.bf16.msra.mxu1 %v24313_v63  ;;  %v10850_v63 = vsel %vm10835_vm6, %v10848_v41, %v10849_v62  ;;  %v10790_v22 = vld [vmem:[#allocation2 + $0x1a0] sm:$0xf]  ;;  %v12863_v62 = vrot.slane %v12798_v50, 4  ;;  %v10801_v50 = vld [vmem:[#allocation2 + $0x228] sm:$0xf0] }
 0x72a   : > { %19474 = vmatprep.mubr.bf16.mxu1 %v10844_v38  ;;  %19682 = vmatprep.mubr.bf16.mxu0 %v12506_v0  ;;  %v12521_v38 = vsel %vm10835_vm6, %v12519_v56, %v12520_v12  ;;  %v10862_v0 = vsel %vm10835_vm6, %v10860_v54, %v10861_v45  ;;  %v12862_v47 = vsel %vm10835_vm6, %v12860_v1, %v12861_v43  ;;  %v10864_v41 = vrot.slane %v10790_v22, 4 }
 0x72b   : > { %19504 = vmatprep.subr.bf16.mxu1 %v22035_v31  ;;  %v10875_v56 = vrot.slane %v10797_v59, 4  ;;  %v10876_v12 = vrot.slane %v10798_v2, 4  ;;  %v12876_v45 = vrot.slane %v12807_v46, 4  ;;  %v11372_v46 = vld [vmem:[#allocation2 + $0x110] sm:$0xf0] }
 0x72c   : > { %v10865_v21 = vsel %vm10835_vm6, %v10863_v57, %v10864_v41  ;;  %v22052_v57 = vld [vmem:[%s22600_s30 + $0x1e8] sm:$0xff]  }
 0x72d   : > { %19505 = vmatpush3.bf16.msra.mxu1 %v22035_v31  ;;  %v12799_v31 = vld [vmem:[#allocation2 + $0x260] sm:$0xf]  ;;  %v10877_v22 = vsel %vm10835_vm6, %v10875_v56, %v10876_v12  ;;  %v12813_v41 = vld [vmem:[#allocation2 + $0x308] sm:$0xf]  ;;  %v11375_v56 = vld [vmem:[#allocation2 + $0x130] sm:$0xf] }
 0x72e   : > { %19506 = vmatprep.subr.bf16.mxu1 %v22037_v3  ;;  %v12820_v12 = vld [vmem:[#allocation2 + $0x360] sm:$0xf0] }
 0x730   : > { %19475 = vmatmul.mubr.bf16.gmra.mrb[4].mxu1 %v10847_v17  ;;  %v12866_v17 = vrot.slane %v12800_v44, 4  ;;  %v11367_v44 = vld [vmem:[#allocation2 + $0xd0] sm:$0xf] }
 0x731   : > { %19683 = vmatmul.mubr.bf16.gmra.mrb[20].mxu0 %v12509_v29  ;;  %19478 = vmatprep.mubr.bf16.mxu1 %v10850_v63  ;;  %v10793_v29 = vld [vmem:[#allocation2 + $0x1c8] sm:$0xf0]  ;;  %v10794_v63 = vld [vmem:[#allocation2 + $0x1d0] sm:$0xf] }
 0x732   : > { %19686 = vmatprep.mubr.bf16.mxu0 %v12512_v26  ;;  %19507 = vmatpush3.bf16.msra.mxu1 %v22037_v3  ;;  %v12864_v3 = vrot.slane %v12799_v31, 4  ;;  %v10869_v34 = vrot.slane %v10793_v29, 4  ;;  %v10870_v28 = vrot.slane %v10794_v63, 4  ;;  %v12884_v29 = vrot.slane %v12812_v42, 4  ;;  %v11378_v42 = vld [vmem:[#allocation2 + $0x158] sm:$0xf0] }
 0x733   : > { %19508 = vmatprep.subr.bf16.mxu1 %v22039_v6  ;;  %v12885_v63 = vrot.slane %v12813_v41, 4  ;;  %v22055_v41 = vld [vmem:[%s22600_s30 + $0xd8] sm:$0xff]  }
 0x734   : > { %v12865_v26 = vsel %vm10835_vm6, %v12863_v62, %v12864_v3  ;;  %v10881_v62 = vrot.slane %v10801_v50, 4  ;;  %v12896_v50 = vrot.slane %v12820_v12, 4 }
 0x735   : > { %v12886_v18 = vsel %vm10835_vm6, %v12884_v29, %v12885_v63  ;;  %v11448_v29 = vrot.slane %v11378_v42, 4  ;;  %v24444_v42 = vld [vmem:[#allocation2 + $0x2a8] sm:$0xff] }
 0x736   : > { %19509 = vmatpush3.bf16.msra.mxu1 %v22039_v6  ;;  %v12868_v6 = vsel %vm10835_vm6, %v12866_v17, %v12867_v8  ;;  %v11430_v17 = vrot.slane %v11366_v30, 4  ;;  %v11431_v8 = vrot.slane %v11367_v44, 4  ;;  %v12822_v30 = vld [vmem:[#allocation2 + $0x378] sm:$0xf0] }
 0x737   : > { %19510 = vmatprep.subr.bf16.mxu1 %v22041_v4 }
 0x738   : > { %19479 = vmatmul.mubr.bf16.gmra.mrb[8].mxu1 %v10853_v39  ;;  %v12873_v39 = vrot.slane %v12805_v60, 4  ;;  %v22056_v60 = vld [vmem:[%s22600_s30 + $0x1f8] sm:$0xff]  }
 0x739   : > { %19687 = vmatmul.mubr.bf16.gmra.mrb[24].mxu0 %v12515_v52  ;;  %19482 = vmatprep.mubr.bf16.mxu1 %v10856_v35  ;;  %v10871_v52 = vsel %vm10835_vm6, %v10869_v34, %v10870_v28  ;;  %v12806_v35 = vld [vmem:[#allocation2 + $0x2b8] sm:$0xf0]  ;;  %v11371_v34 = vld [vmem:[#allocation2 + $0x100] sm:$0xf]  ;;  %v12816_v28 = vld [vmem:[#allocation2 + $0x330] sm:$0xf0] }
 0x73a   : > { %19690 = vmatprep.mubr.bf16.mxu0 %v12518_v33  ;;  %19511 = vmatpush3.bf16.msra.mxu1 %v22041_v4  ;;  %v10873_v4 = vrot.slane %v10796_v49, 4  ;;  %v12871_v33 = vsel %vm10835_vm6, %v12869_v20, %v12870_v58  ;;  %v12874_v61 = vsel %vm10835_vm6, %v12872_v37, %v12873_v39  ;;  %v12875_v54 = vrot.slane %v12806_v35, 4  ;;  %v12815_v49 = vld [vmem:[#allocation2 + $0x320] sm:$0xf]  ;;  %v12817_v20 = vld [vmem:[#allocation2 + $0x338] sm:$0xf] }
 0x73b   : > { %19512 = vmatprep.subr.bf16.mxu1 %v22043_v23  ;;  %v12888_v37 = vrot.slane %v12815_v49, 4  ;;  %v11436_v39 = vrot.slane %v11370_v13, 4  ;;  %v12890_v59 = vrot.slane %v12816_v28, 4  ;;  %v12891_v2 = vrot.slane %v12817_v20, 4  ;;  %v12826_v49 = vld [vmem:[#allocation2 + $0x3a8] sm:$0xf0] }
 0x73c   : > { %v10874_v9 = vsel %vm10835_vm6, %v10872_v36, %v10873_v4  ;;  %v12827_v13 = vld [vmem:[#allocation2 + $0x3b0] sm:$0xf]  ;;  %v22059_v20 = vld [vmem:[%s22600_s30 + $0xe8] sm:$0xff]  }
 0x73d   : > { %v11383_v28 = vld [vmem:[#allocation2 + $0x190] sm:$0xf] }
 0x73e   : > { %19513 = vmatpush3.bf16.msra.mxu1 %v22043_v23  ;;  %v10800_v23 = vld [vmem:[#allocation2 + $0x218] sm:$0xf] }
 0x73f   : > { %19514 = vmatprep.subr.bf16.mxu1 %v22045_v27  ;;  %v10879_v43 = vrot.slane %v10800_v23, 4 }
 0x740   : > { %19483 = vmatmul.mubr.bf16.gmra.mrb[12].mxu1 %v10859_v11  ;;  %v12879_v11 = vrot.slane %v12809_v32, 4  ;;  %v11374_v32 = vld [vmem:[#allocation2 + $0x128] sm:$0xf0] }
 0x741   : > { %19691 = vmatmul.mubr.bf16.gmra.mrb[28].mxu0 %v12521_v38  ;;  %19486 = vmatprep.mubr.bf16.mxu1 %v10862_v0  ;;  %v10802_v38 = vld [vmem:[#allocation2 + $0x230] sm:$0xf]  ;;  %v12877_v0 = vsel %vm10835_vm6, %v12875_v54, %v12876_v45  ;;  %v12821_v54 = vld [vmem:[#allocation2 + $0x368] sm:$0xf]  ;;  %v11439_v45 = vrot.slane %v11372_v46, 4 }
 0x742   : > { %19710 = vmatprep.mubr.bf16.mxu0 %v12862_v47  ;;  %19515 = vmatpush3.bf16.msra.mxu1 %v22045_v27  ;;  %v12878_v27 = vrot.slane %v12808_v15, 4  ;;  %v12810_v47 = vld [vmem:[#allocation2 + $0x2e8] sm:$0xf0]  ;;  %v10882_v3 = vrot.slane %v10802_v38, 4  ;;  %v12819_v15 = vld [vmem:[#allocation2 + $0x350] sm:$0xf] }
 0x743   : > { %19516 = vmatprep.subr.bf16.mxu1 %v22047_v53  ;;  %v12881_v14 = vrot.slane %v12810_v47, 4  ;;  %v12897_v38 = vrot.slane %v12821_v54, 4 }
 0x744   : > { %v10883_v19 = vsel %vm10835_vm6, %v10881_v62, %v10882_v3  ;;  %v12824_v62 = vld [vmem:[#allocation2 + $0x390] sm:$0xf0]  ;;  %v12825_v3 = vld [vmem:[#allocation2 + $0x398] sm:$0xf] }
 0x745   : > { %v12883_v16 = vsel %vm10835_vm6, %v12881_v14, %v12882_v48  ;;  %v12898_v44 = vsel %vm10835_vm6, %v12896_v50, %v12897_v38  ;;  %v11446_v48 = vrot.slane %v11377_v51, 4  ;;  %v11391_v50 = vld [vmem:[#allocation2 + $0x1f0] sm:$0xf]  ;;  %v24433_v38 = vld [vmem:[%s22600_s30 + $0x100] sm:$0xff]  }
 0x746   : > { %19517 = vmatpush3.bf16.msra.mxu1 %v22047_v53  ;;  %v12880_v53 = vsel %vm10835_vm6, %v12878_v27, %v12879_v11  ;;  %v12894_v27 = vrot.slane %v12819_v15, 4  ;;  %v11442_v11 = vrot.slane %v11374_v32, 4  ;;  %v22062_v51 = vld [vmem:[%s22600_s30 + $0x210] sm:$0xff]  }
 0x747   : > { %19550 = vmatprep.subr.bf16.mxu1 %v24368_v5 }
 0x748   : > { %19487 = vmatmul.mubr.bf16.gmra.mrb[16].mxu1 %v10865_v21  ;;  %v22054_v21 = vld [vmem:[%s22600_s30 + $0x1f0] sm:$0xff]  }
 0x749   : > { %19711 = vmatmul.mubr.bf16.vlgmr.msra.gmra.mrb[0].mxu0 %v12865_v26  ;;  %19490 = vmatprep.mubr.bf16.mxu1 %v10868_v40  ;;  %v11432_v26 = vsel %vm10835_vm6, %v11430_v17, %v11431_v8  ;;  %v11368_v40 = vld [vmem:[#allocation2 + $0xe0] sm:$0xf0]  ;;  %v12899_v17 = vrot.slane %v12822_v30, 4 }
 0x74a   : > { %19743 = vmatpush3.bf16.msra.mxu0 %v24340_v25  ;;  %19714 = vmatprep.mubr.bf16.mxu0 %v12868_v6  ;;  %v10799_v25 = vld [vmem:[#allocation2 + $0x210] sm:$0xf0]  ;;  %v12814_v6 = vld [vmem:[#allocation2 + $0x318] sm:$0xf0]  ;;  %v11433_v58 = vrot.slane %v11368_v40, 4 }
 0x74b   : > { %19744 = vmatprep.subr.bf16.mxu0 %v22044_v24  ;;  %v10878_v1 = vrot.slane %v10799_v25, 4  ;;  %v12887_v4 = vrot.slane %v12814_v6, 4  ;;  %v22051_v25 = vld [vmem:[%s22600_s30 + $0xc8] sm:$0xff]   ;;  %v11380_v40 = vld [vmem:[#allocation2 + $0x170] sm:$0xf0] }
 0x74d   : > { %v10880_v31 = vsel %vm10835_vm6, %v10878_v1, %v10879_v43 }
 0x74e   : > { %19745 = vmatpush3.bf16.msra.mxu0 %v22044_v24  ;;  %v11369_v24 = vld [vmem:[#allocation2 + $0xe8] sm:$0xf] }
 0x74f   : > { %19746 = vmatprep.subr.bf16.mxu0 %v22046_v10  ;;  %v11434_v36 = vrot.slane %v11369_v24, 4 }
 0x750   : > { %19491 = vmatmul.mubr.bf16.gmra.mrb[20].mxu1 %v10871_v52  ;;  %v24396_v52 = vld [vmem:[%s22600_s30 + $0x200] sm:$0xff]  }
 0x751   : > { %19715 = vmatmul.mubr.bf16.gmra.mrb[4].mxu0 %v12871_v33  ;;  %19494 = vmatprep.mubr.bf16.mxu1 %v10874_v9  ;;  %v11435_v35 = vsel %vm10835_vm6, %v11433_v58, %v11434_v36  ;;  %v12889_v33 = vsel %vm10835_vm6, %v12887_v4, %v12888_v37  ;;  %v11373_v9 = vld [vmem:[#allocation2 + $0x118] sm:$0xf]  ;;  %v11451_v58 = vrot.slane %v11380_v40, 4  ;;  %v12905_v4 = vrot.slane %v12826_v49, 4 }
 0x752   : > { %19718 = vmatprep.mubr.bf16.mxu0 %v12874_v61  ;;  %19747 = vmatpush3.bf16.msra.mxu0 %v22046_v10  ;;  %v11437_v10 = vrot.slane %v11371_v34, 4  ;;  %v12818_v61 = vld [vmem:[#allocation2 + $0x348] sm:$0xf0]  ;;  %v11440_v1 = vrot.slane %v11373_v9, 4  ;;  %v12906_v37 = vrot.slane %v12827_v13, 4 }
 0x753   : > { %19748 = vmatprep.subr.bf16.mxu0 %v22048_v55  ;;  %v12893_v43 = vrot.slane %v12818_v61, 4  ;;  %v11382_v34 = vld [vmem:[#allocation2 + $0x188] sm:$0xf0]  ;;  %v11384_v9 = vld [vmem:[#allocation2 + $0x1a0] sm:$0xf0] }
 0x754   : > { %v11438_v23 = vsel %vm10835_vm6, %v11436_v39, %v11437_v10  ;;  %v11454_v39 = vrot.slane %v11382_v34, 4  ;;  %v11455_v10 = vrot.slane %v11383_v28, 4  ;;  %v11386_v61 = vld [vmem:[#allocation2 + $0x1b8] sm:$0xf0]  ;;  %v11457_v15 = vrot.slane %v11384_v9, 4  ;;  %v22067_v28 = vld [vmem:[%s22600_s30 + $0x230] sm:$0xff]  }
 0x755   : > { %v12895_v47 = vsel %vm10835_vm6, %v12893_v43, %v12894_v27  ;;  %v24429_v43 = vld [vmem:[#allocation2 + $0x278] sm:$0xff]  ;;  %v11388_v27 = vld [vmem:[#allocation2 + $0x1d0] sm:$0xf0] }
 0x756   : > { %19749 = vmatpush3.bf16.msra.mxu0 %v22048_v55  ;;  %v12892_v55 = vsel %vm10835_vm6, %v12890_v59, %v12891_v2  ;;  %v22061_v59 = vld [vmem:[%s22600_s30 + $0xf0] sm:$0xff]   ;;  %v11456_v46 = vsel %vm10835_vm6, %v11454_v39, %v11455_v10  ;;  %v11397_v40 = vld [vmem:[#allocation2 + $0x238] sm:$0xf]  ;;  %v13189_v39 = vld [vmem:[#allocation2 + $0x308] sm:$0xff] }
 0x757   : > { %19750 = vmatprep.subr.bf16.mxu0 %v22050_v7  ;;  %v11476_v13 = vrot.slane %v11397_v40, 4  ;;  %v22068_v10 = vld [vmem:[%s22600_s30 + $0x238] sm:$0xff]   ;;  %v22073_v40 = vld [vmem:[%s22600_s30 + $0x120] sm:$0xff]  }
 0x758   : > { %19495 = vmatmul.mubr.bf16.gmra.mrb[24].mxu1 %v10877_v22  ;;  %v22053_v22 = vld [vmem:[%s22600_s30 + $0xd0] sm:$0xff]  }
 0x759   : > { %19719 = vmatmul.mubr.bf16.gmra.mrb[8].mxu0 %v12877_v0  ;;  %19498 = vmatprep.mubr.bf16.mxu1 %v10880_v31  ;;  %v11441_v0 = vsel %vm10835_vm6, %v11439_v45, %v11440_v1  ;;  %v11376_v31 = vld [vmem:[#allocation2 + $0x140] sm:$0xf0] }
 0x75a   : > { %19722 = vmatprep.mubr.bf16.mxu0 %v12880_v53  ;;  %19751 = vmatpush3.bf16.msra.mxu0 %v22050_v7  ;;  %v11443_v7 = vrot.slane %v11375_v56, 4  ;;  %v12823_v53 = vld [vmem:[#allocation2 + $0x380] sm:$0xf]  ;;  %v11445_v14 = vrot.slane %v11376_v31, 4  ;;  %v11460_v56 = vrot.slane %v11386_v61, 4 }
 0x75b   : > { %19752 = vmatprep.subr.bf16.mxu0 %v22052_v57  ;;  %v12900_v8 = vrot.slane %v12823_v53, 4  ;;  %v24426_v45 = vld [vmem:[#allocation2 + $0x260] sm:$0xff]  ;;  %v24441_v53 = vld [vmem:[#allocation2 + $0x290] sm:$0xff] }
 0x75d   : > { %v12901_v24 = vsel %vm10835_vm6, %v12899_v17, %v12900_v8 }
 0x75e   : > { %19753 = vmatpush3.bf16.msra.mxu0 %v22052_v57  ;;  %v11379_v57 = vld [vmem:[#allocation2 + $0x160] sm:$0xf] }
 0x75f   : > { %19754 = vmatprep.subr.bf16.mxu0 %v22054_v21  ;;  %v11449_v63 = vrot.slane %v11379_v57, 4  ;;  %v11392_v57 = vld [vmem:[#allocation2 + $0x200] sm:$0xf0] }
 0x760   : > { %19499 = vmatmul.mubr.bf16.gmra.mrb[28].mxu1 %v10883_v19  ;;  %v12903_v19 = vrot.slane %v12825_v3, 4  ;;  %v22064_v3 = vld [vmem:[%s22600_s30 + $0x218] sm:$0xff]  }
 0x761   : > { %19723 = vmatmul.mubr.bf16.gmra.mrb[12].mxu0 %v12883_v16  ;;  %19518 = vmatprep.mubr.bf16.mxu1 %v11432_v26  ;;  %v22057_v16 = vld [vmem:[%s22600_s30 + $0xe0] sm:$0xff]   ;;  %v11447_v26 = vsel %vm10835_vm6, %v11445_v14, %v11446_v48  ;;  %v11450_v6 = vsel %vm10835_vm6, %v11448_v29, %v11449_v63  ;;  %v11469_v14 = vrot.slane %v11392_v57, 4 }
 0x762   : > { %19726 = vmatprep.mubr.bf16.mxu0 %v12886_v18  ;;  %19755 = vmatpush3.bf16.msra.mxu0 %v22054_v21  ;;  %v12902_v21 = vrot.slane %v12824_v62, 4  ;;  %v11381_v18 = vld [vmem:[#allocation2 + $0x178] sm:$0xf]  ;;  %v11395_v62 = vld [vmem:[#allocation2 + $0x220] sm:$0xf] }
 0x763   : > { %19756 = vmatprep.subr.bf16.mxu0 %v22056_v60  ;;  %v11452_v36 = vrot.slane %v11381_v18, 4  ;;  %v11473_v8 = vrot.slane %v11395_v62, 4  ;;  %v22065_v29 = vld [vmem:[%s22600_s30 + $0x220] sm:$0xff]   ;;  %v22066_v18 = vld [vmem:[%s22600_s30 + $0x228] sm:$0xff]  }
 0x765   : > { %v11453_v2 = vsel %vm10835_vm6, %v11451_v58, %v11452_v36  ;;  %v24461_v58 = vld [vmem:[#allocation2 + $0x2f0] sm:$0xff] }
 0x766   : > { %19757 = vmatpush3.bf16.msra.mxu0 %v22056_v60  ;;  %v12904_v60 = vsel %vm10835_vm6, %v12902_v21, %v12903_v19  ;;  %v24451_v21 = vld [vmem:[#allocation2 + $0x2c0] sm:$0xff] }
 0x767   : > { %19790 = vmatprep.subr.bf16.mxu0 %v24396_v52 }
 0x768   : > { %19519 = vmatmul.mubr.bf16.vlgmr.msra.gmra.mrb[0].mxu1 %v11435_v35  ;;  %v12907_v35 = vsel %vm10835_vm6, %v12905_v4, %v12906_v37  ;;  %v11754_v4 = vld [vmem:[#allocation2 + $0x198] sm:$0xf0]  ;;  %v11755_v37 = vld [vmem:[#allocation2 + $0x1a0] sm:$0xf] }
 0x769   : > { %19727 = vmatmul.mubr.bf16.gmra.mrb[16].mxu0 %v12889_v33  ;;  %19551 = vmatpush3.bf16.msra.mxu1 %v24368_v5  ;;  %v11444_v5 = vsel %vm10835_vm6, %v11442_v11, %v11443_v7  ;;  %v24421_v33 = vld [vmem:[#allocation2 + $0x248] sm:$0xff]  ;;  %v11389_v11 = vld [vmem:[#allocation2 + $0x1d8] sm:$0xf] }
 0x76a   : > { %19522 = vmatprep.mubr.bf16.mxu1 %v11438_v23  ;;  %19730 = vmatprep.mubr.bf16.mxu0 %v12892_v55  ;;  %v11387_v23 = vld [vmem:[#allocation2 + $0x1c0] sm:$0xf]  ;;  %v22063_v55 = vld [vmem:[%s22600_s30 + $0xf8] sm:$0xff]   ;;  %v22060_v7 = vld [vmem:[%s22600_s30 + $0x208] sm:$0xff]   ;;  %v11464_v31 = vrot.slane %v11389_v11, 4 }
 0x76b   : > { %19552 = vmatprep.subr.bf16.mxu1 %v22051_v25  ;;  %v11461_v12 = vrot.slane %v11387_v23, 4  ;;  %v13190_v23 = vld [vmem:[#allocation2 + $0x320] sm:$0xff] }
 0x76d   : > { %19553 = vmatpush3.bf16.msra.mxu1 %v22051_v25  ;;  %v11385_v25 = vld [vmem:[#allocation2 + $0x1a8] sm:$0xf]  ;;  %v11462_v1 = vsel %vm10835_vm6, %v11460_v56, %v11461_v12  ;;  %v13191_v56 = vld [vmem:[#allocation2 + $0x338] sm:$0xff]  ;;  %v11760_v12 = vld [vmem:[#allocation2 + $0x1e0] sm:$0xf0] }
 0x76e   : > { %19554 = vmatprep.subr.bf16.mxu1 %v22053_v22  ;;  %v11458_v32 = vrot.slane %v11385_v25, 4  ;;  %v11828_v11 = vrot.slane %v11760_v12, 4 }
 0x770   : > { %19523 = vmatmul.mubr.bf16.gmra.mrb[4].mxu1 %v11441_v0  ;;  %v11459_v54 = vsel %vm10835_vm6, %v11457_v15, %v11458_v32  ;;  %v11463_v0 = vrot.slane %v11388_v27, 4  ;;  %v11759_v15 = vld [vmem:[#allocation2 + $0x1d0] sm:$0xf] }
 0x771   : > { %19731 = vmatmul.mubr.bf16.gmra.mrb[20].mxu0 %v12895_v47  ;;  %19526 = vmatprep.mubr.bf16.mxu1 %v11444_v5  ;;  %v11467_v5 = vrot.slane %v11391_v50, 4  ;;  %v11826_v27 = vrot.slane %v11759_v15, 4 }
 0x772   : > { %19734 = vmatprep.mubr.bf16.mxu0 %v12898_v44  ;;  %19555 = vmatpush3.bf16.msra.mxu1 %v22053_v22  ;;  %v11390_v22 = vld [vmem:[#allocation2 + $0x1e8] sm:$0xf0]  ;;  %v11465_v30 = vsel %vm10835_vm6, %v11463_v0, %v11464_v31  ;;  %v13192_v0 = vld [vmem:[#allocation2 + $0x350] sm:$0xff] }
 0x773   : > { %19556 = vmatprep.subr.bf16.mxu1 %v22055_v41  ;;  %v11466_v47 = vrot.slane %v11390_v22, 4  ;;  %v22070_v22 = vld [vmem:[%s22600_s30 + $0x108] sm:$0xff]  }
 0x775   : > { %v11468_v44 = vsel %vm10835_vm6, %v11466_v47, %v11467_v5  ;;  %v11762_v47 = vld [vmem:[#allocation2 + $0x1f8] sm:$0xf0]  ;;  %v11763_v5 = vld [vmem:[#allocation2 + $0x200] sm:$0xf] }
 0x776   : > { %19557 = vmatpush3.bf16.msra.mxu1 %v22055_v41  ;;  %v11393_v41 = vld [vmem:[#allocation2 + $0x208] sm:$0xf]  ;;  %v11831_v57 = vrot.slane %v11762_v47, 4  ;;  %v13460_v47 = vld [vmem:[#allocation2 + $0x290] sm:$0xf0] }
 0x777   : > { %19558 = vmatprep.subr.bf16.mxu1 %v22057_v16  ;;  %v11470_v48 = vrot.slane %v11393_v41, 4  ;;  %v11832_v41 = vrot.slane %v11763_v5, 4 }
 0x778   : > { %19527 = vmatmul.mubr.bf16.gmra.mrb[8].mxu1 %v11447_v26  ;;  %v11396_v26 = vld [vmem:[#allocation2 + $0x230] sm:$0xf0] }
 0x779   : > { %19735 = vmatmul.mubr.bf16.gmra.mrb[24].mxu0 %v12901_v24  ;;  %19530 = vmatprep.mubr.bf16.mxu1 %v11450_v6  ;;  %v11471_v63 = vsel %vm10835_vm6, %v11469_v14, %v11470_v48  ;;  %v11752_v24 = vld [vmem:[#allocation2 + $0x180] sm:$0xf0]  ;;  %v11753_v6 = vld [vmem:[#allocation2 + $0x188] sm:$0xf]  ;;  %v11475_v49 = vrot.slane %v11396_v26, 4  ;;  %v11833_v14 = vsel %vm10835_vm6, %v11831_v57, %v11832_v41 }
 0x77a   : > { %19738 = vmatprep.mubr.bf16.mxu0 %v12904_v60  ;;  %19559 = vmatpush3.bf16.msra.mxu1 %v22057_v16  ;;  %v24454_v16 = vld [vmem:[#allocation2 + $0x2d8] sm:$0xff]  ;;  %v11816_v60 = vrot.slane %v11752_v24, 4  ;;  %v11817_v34 = vrot.slane %v11753_v6, 4  ;;  %v13194_v48 = vld [vmem:[#allocation2 + $0x380] sm:$0xff]  ;;  %v11769_v26 = vld [vmem:[#allocation2 + $0x248] sm:$0xf] }
 0x77b   : > { %19560 = vmatprep.subr.bf16.mxu1 %v22059_v20  ;;  %v13454_v24 = vld [vmem:[#allocation2 + $0x248] sm:$0xf0]  ;;  %v13455_v6 = vld [vmem:[#allocation2 + $0x250] sm:$0xf] }
 0x77c   : > { %v11818_v36 = vsel %vm10835_vm6, %v11816_v60, %v11817_v34  ;;  %v11841_v60 = vrot.slane %v11769_v26, 4  ;;  %v13518_v34 = vrot.slane %v13454_v24, 4  ;;  %v13463_v57 = vld [vmem:[#allocation2 + $0x2b0] sm:$0xf]  ;;  %v11778_v26 = vld [vmem:[#allocation2 + $0x2b8] sm:$0xf0] }
 0x77d   : > { %v13464_v24 = vld [vmem:[#allocation2 + $0x2c0] sm:$0xf0] }
 0x77e   : > { %19561 = vmatpush3.bf16.msra.mxu1 %v22059_v20  ;;  %v11477_v20 = vsel %vm10835_vm6, %v11475_v49, %v11476_v13 }
 0x77f   : > { %19562 = vmatprep.subr.bf16.mxu1 %v22061_v59 }
 0x780   : > { %19531 = vmatmul.mubr.bf16.gmra.mrb[12].mxu1 %v11453_v2  ;;  %v11757_v2 = vld [vmem:[#allocation2 + $0x1b8] sm:$0xf] }
 0x781   : > { %19739 = vmatmul.mubr.bf16.gmra.mrb[28].mxu0 %v12907_v35  ;;  %19534 = vmatprep.mubr.bf16.mxu1 %v11456_v46  ;;  %v11819_v35 = vrot.slane %v11754_v4, 4  ;;  %v11820_v46 = vrot.slane %v11755_v37, 4  ;;  %v11823_v25 = vrot.slane %v11757_v2, 4  ;;  %v13196_v4 = vld [vmem:[#allocation2 + $0x3b0] sm:$0xff] }
 0x782   : > { %19758 = vmatprep.mubr.bf16.mxu0 %v24421_v33  ;;  %19563 = vmatpush3.bf16.msra.mxu1 %v22061_v59  ;;  %v11756_v59 = vld [vmem:[#allocation2 + $0x1b0] sm:$0xf0] }
 0x783   : > { %19564 = vmatprep.subr.bf16.mxu1 %v22063_v55  ;;  %v11822_v9 = vrot.slane %v11756_v59, 4  ;;  %v11821_v61 = vsel %vm10835_vm6, %v11819_v35, %v11820_v46  ;;  %v13456_v59 = vld [vmem:[#allocation2 + $0x260] sm:$0xf0]  ;;  %v13457_v35 = vld [vmem:[#allocation2 + $0x268] sm:$0xf] }
 0x784   : > { %v11772_v46 = vld [vmem:[#allocation2 + $0x270] sm:$0xf0] }
 0x785   : > { %v11824_v32 = vsel %vm10835_vm6, %v11822_v9, %v11823_v25  ;;  %v11773_v9 = vld [vmem:[#allocation2 + $0x278] sm:$0xf]  ;;  %v22075_v25 = vld [vmem:[%s22600_s30 + $0x130] sm:$0xff]   ;;  %v11846_v12 = vrot.slane %v11772_v46, 4 }
 0x786   : > { %19565 = vmatpush3.bf16.msra.mxu1 %v22063_v55  ;;  %v11758_v55 = vld [vmem:[#allocation2 + $0x1c8] sm:$0xf0] }
 0x787   : > { %21086 = vmatprep.subr.bf16.mxu1 %v24433_v38 }
 0x788   : > { %19535 = vmatmul.mubr.bf16.gmra.mrb[16].mxu1 %v11459_v54  ;;  %v11761_v54 = vld [vmem:[#allocation2 + $0x1e8] sm:$0xf] }
 0x789   : > { %19759 = vmatmul.mubr.bf16.vlgmr.msra.gmra.mrb[0].mxu0 %v24426_v45  ;;  %19538 = vmatprep.mubr.bf16.mxu1 %v11462_v1  ;;  %v11825_v1 = vrot.slane %v11758_v55, 4 }
 0x78a   : > { %19791 = vmatpush3.bf16.msra.mxu0 %v24396_v52  ;;  %19762 = vmatprep.mubr.bf16.mxu0 %v24429_v43  ;;  %v11394_v52 = vld [vmem:[#allocation2 + $0x218] sm:$0xf0] }
 0x78b   : > { %19792 = vmatprep.subr.bf16.mxu0 %v22060_v7  ;;  %v11472_v17 = vrot.slane %v11394_v52, 4  ;;  %v11827_v50 = vsel %vm10835_vm6, %v11825_v1, %v11826_v27 }
 0x78d   : > { %v11474_v19 = vsel %vm10835_vm6, %v11472_v17, %v11473_v8  ;;  %v11766_v8 = vld [vmem:[#allocation2 + $0x228] sm:$0xf0] }
 0x78e   : > { %19793 = vmatpush3.bf16.msra.mxu0 %v22060_v7  ;;  %v11829_v7 = vrot.slane %v11761_v54, 4  ;;  %v11847_v54 = vrot.slane %v11773_v9, 4  ;;  %v11782_v9 = vld [vmem:[#allocation2 + $0x2e8] sm:$0xf0] }
 0x78f   : > { %19794 = vmatprep.subr.bf16.mxu0 %v22062_v51 }
 0x790   : > { %19539 = vmatmul.mubr.bf16.gmra.mrb[20].mxu1 %v11465_v30  ;;  %v11830_v31 = vsel %vm10835_vm6, %v11828_v11, %v11829_v7  ;;  %v11764_v30 = vld [vmem:[#allocation2 + $0x210] sm:$0xf0]  ;;  %v22076_v11 = vld [vmem:[%s22600_s30 + $0x138] sm:$0xff]  }
 0x791   : > { %19763 = vmatmul.mubr.bf16.gmra.mrb[4].mxu0 %v24441_v53  ;;  %19542 = vmatprep.mubr.bf16.mxu1 %v11468_v44  ;;  %v11765_v44 = vld [vmem:[#allocation2 + $0x218] sm:$0xf]  ;;  %v11834_v52 = vrot.slane %v11764_v30, 4  ;;  %v11777_v30 = vld [vmem:[#allocation2 + $0x2a8] sm:$0xf] }
 0x792   : > { %19766 = vmatprep.mubr.bf16.mxu0 %v24444_v42  ;;  %19795 = vmatpush3.bf16.msra.mxu0 %v22062_v51  ;;  %v22071_v51 = vld [vmem:[%s22600_s30 + $0x110] sm:$0xff]   ;;  %v11835_v62 = vrot.slane %v11765_v44, 4  ;;  %v13462_v44 = vld [vmem:[#allocation2 + $0x2a8] sm:$0xf0] }
 0x793   : > { %19796 = vmatprep.subr.bf16.mxu0 %v22064_v3 }
 0x794   : > { %v11836_v17 = vsel %vm10835_vm6, %v11834_v52, %v11835_v62  ;;  %v13527_v62 = vrot.slane %v13460_v47, 4  ;;  %v13474_v47 = vld [vmem:[#allocation2 + $0x338] sm:$0xf0] }
 0x796   : > { %19797 = vmatpush3.bf16.msra.mxu0 %v22064_v3  ;;  %v22072_v3 = vld [vmem:[%s22600_s30 + $0x118] sm:$0xff]  }
 0x797   : > { %19798 = vmatprep.subr.bf16.mxu0 %v22065_v29 }
 0x798   : > { %19543 = vmatmul.mubr.bf16.gmra.mrb[24].mxu1 %v11471_v63  ;;  %v13195_v63 = vld [vmem:[#allocation2 + $0x398] sm:$0xff] }
 0x799   : > { %19767 = vmatmul.mubr.bf16.gmra.mrb[8].mxu0 %v24451_v21  ;;  %19546 = vmatprep.mubr.bf16.mxu1 %v11474_v19  ;;  %v11768_v19 = vld [vmem:[#allocation2 + $0x240] sm:$0xf0] }
 0x79a   : > { %19770 = vmatprep.mubr.bf16.mxu0 %v24454_v16  ;;  %19799 = vmatpush3.bf16.msra.mxu0 %v22065_v29  ;;  %v11767_v29 = vld [vmem:[#allocation2 + $0x230] sm:$0xf]  ;;  %v11840_v13 = vrot.slane %v11768_v19, 4 }
 0x79b   : > { %19800 = vmatprep.subr.bf16.mxu0 %v22066_v18  ;;  %v11838_v49 = vrot.slane %v11767_v29, 4 }
 0x79c   : > { %v11842_v37 = vsel %vm10835_vm6, %v11840_v13, %v11841_v60  ;;  %v11781_v13 = vld [vmem:[#allocation2 + $0x2d8] sm:$0xf]  ;;  %v13466_v60 = vld [vmem:[#allocation2 + $0x2d8] sm:$0xf0] }
 0x79e   : > { %19801 = vmatpush3.bf16.msra.mxu0 %v22066_v18  ;;  %v11837_v18 = vrot.slane %v11766_v8, 4  ;;  %v13531_v8 = vrot.slane %v13463_v57, 4 }
 0x79f   : > { %19802 = vmatprep.subr.bf16.mxu0 %v22067_v28 }
 0x7a0   : > { %19547 = vmatmul.mubr.bf16.gmra.mrb[28].mxu1 %v11477_v20  ;;  %v22074_v20 = vld [vmem:[%s22600_s30 + $0x128] sm:$0xff]  }
 0x7a1   : > { %19771 = vmatmul.mubr.bf16.gmra.mrb[12].mxu0 %v24461_v58  ;;  %19566 = vmatprep.mubr.bf16.mxu1 %v11818_v36  ;;  %v11839_v36 = vsel %vm10835_vm6, %v11837_v18, %v11838_v49  ;;  %v13465_v18 = vld [vmem:[#allocation2 + $0x2c8] sm:$0xf]  ;;  %v11780_v49 = vld [vmem:[#allocation2 + $0x2d0] sm:$0xf0] }
 0x7a2   : > { %19774 = vmatprep.mubr.bf16.mxu0 %v13189_v39  ;;  %19803 = vmatpush3.bf16.msra.mxu0 %v22067_v28  ;;  %v13519_v28 = vrot.slane %v13455_v6, 4  ;;  %v11770_v39 = vld [vmem:[#allocation2 + $0x258] sm:$0xf0] }
 0x7a3   : > { %19804 = vmatprep.subr.bf16.mxu0 %v22068_v10  ;;  %v11843_v55 = vrot.slane %v11770_v39, 4  ;;  %v11859_v39 = vrot.slane %v11781_v13, 4 }
 0x7a4   : > { %v13520_v2 = vsel %vm10835_vm6, %v13518_v34, %v13519_v28  ;;  %v13467_v34 = vld [vmem:[#allocation2 + $0x2e0] sm:$0xf]  ;;  %v11855_v28 = vrot.slane %v11778_v26, 4  ;;  %v13481_v26 = vld [vmem:[#allocation2 + $0x388] sm:$0xf] }
 0x7a6   : > { %19805 = vmatpush3.bf16.msra.mxu0 %v22068_v10  ;;  %v11771_v10 = vld [vmem:[#allocation2 + $0x260] sm:$0xf] }
 0x7a7   : > { %v11844_v15 = vrot.slane %v11771_v10, 4  ;;  %v13536_v10 = vrot.slane %v13466_v60, 4  ;;  %v13484_v60 = vld [vmem:[#allocation2 + $0x3b0] sm:$0xf0] }
 0x7a8   : > { %19567 = vmatmul.mubr.bf16.vlgmr.msra.gmra.mrb[0].mxu1 %v11821_v61  ;;  %v13458_v61 = vld [vmem:[#allocation2 + $0x278] sm:$0xf0] }
 0x7a9   : > { %19775 = vmatmul.mubr.bf16.gmra.mrb[16].mxu0 %v13190_v23  ;;  %21094 = vmatpush3.bf16.msra.mxu1 %v24433_v38  ;;  %v13193_v38 = vld [vmem:[#allocation2 + $0x368] sm:$0xff]  ;;  %v13459_v23 = vld [vmem:[#allocation2 + $0x280] sm:$0xf]  ;;  %v13524_v1 = vrot.slane %v13458_v61, 4  ;;  %v11845_v7 = vsel %vm10835_vm6, %v11843_v55, %v11844_v15  ;;  %v13469_v55 = vld [vmem:[#allocation2 + $0x2f8] sm:$0xf] }
 0x7aa   : > { %19570 = vmatprep.mubr.bf16.mxu1 %v11824_v32  ;;  %19778 = vmatprep.mubr.bf16.mxu0 %v13191_v56  ;;  %v13521_v32 = vrot.slane %v13456_v59, 4  ;;  %v13522_v56 = vrot.slane %v13457_v35, 4  ;;  %v13525_v27 = vrot.slane %v13459_v23, 4  ;;  %v13537_v59 = vrot.slane %v13467_v34, 4  ;;  %v13468_v23 = vld [vmem:[#allocation2 + $0x2f0] sm:$0xf0] }
 0x7ab   : > { %21087 = vmatprep.subr.bf16.mxu1 %v22070_v22  ;;  %v13470_v15 = vld [vmem:[#allocation2 + $0x308] sm:$0xf0]  ;;  %v13485_v34 = vld [vmem:[#allocation2 + $0x3b8] sm:$0xf] }
 0x7ac   : > { %v13526_v5 = vsel %vm10835_vm6, %v13524_v1, %v13525_v27  ;;  %v13538_v61 = vsel %vm10835_vm6, %v13536_v10, %v13537_v59  ;;  %v13540_v1 = vrot.slane %v13469_v55, 4  ;;  %v13542_v27 = vrot.slane %v13470_v15, 4 }
 0x7ad   : > { %21095 = vmatpush3.bf16.msra.mxu1 %v22070_v22  ;;  %v13523_v22 = vsel %vm10835_vm6, %v13521_v32, %v13522_v56  ;;  %v13471_v32 = vld [vmem:[#allocation2 + $0x310] sm:$0xf]  ;;  %v11861_v56 = vrot.slane %v11782_v9, 4 }
 0x7ae   : > { %21088 = vmatprep.subr.bf16.mxu1 %v22071_v51 }
 0x7b0   : > { %19571 = vmatmul.mubr.bf16.gmra.mrb[4].mxu1 %v11827_v50  ;;  %v11848_v50 = vsel %vm10835_vm6, %v11846_v12, %v11847_v54  ;;  %v13539_v54 = vrot.slane %v13468_v23, 4 }
 0x7b1   : > { %19779 = vmatmul.mubr.bf16.gmra.mrb[20].mxu0 %v13192_v0  ;;  %19574 = vmatprep.mubr.bf16.mxu1 %v11830_v31  ;;  %v11774_v0 = vld [vmem:[#allocation2 + $0x288] sm:$0xf0]  ;;  %v11775_v31 = vld [vmem:[#allocation2 + $0x290] sm:$0xf] }
 0x7b2   : > { %19782 = vmatprep.mubr.bf16.mxu0 %v13193_v38  ;;  %21096 = vmatpush3.bf16.msra.mxu1 %v22071_v51  ;;  %v13461_v51 = vld [vmem:[#allocation2 + $0x298] sm:$0xf]  ;;  %v11776_v38 = vld [vmem:[#allocation2 + $0x2a0] sm:$0xf0]  ;;  %v11849_v41 = vrot.slane %v11774_v0, 4  ;;  %v11850_v52 = vrot.slane %v11775_v31, 4 }
 0x7b3   : > { %21089 = vmatprep.subr.bf16.mxu1 %v22072_v3  ;;  %v13472_v0 = vld [vmem:[#allocation2 + $0x320] sm:$0xf0]  ;;  %v13473_v31 = vld [vmem:[#allocation2 + $0x328] sm:$0xf] }
 0x7b4   : > { %v11851_v29 = vsel %vm10835_vm6, %v11849_v41, %v11850_v52  ;;  %v13476_v52 = vld [vmem:[#allocation2 + $0x350] sm:$0xf0] }
 0x7b6   : > { %21097 = vmatpush3.bf16.msra.mxu1 %v22072_v3  ;;  %v13528_v3 = vrot.slane %v13461_v51, 4  ;;  %v13545_v51 = vrot.slane %v13472_v0, 4 }
 0x7b7   : > { %21090 = vmatprep.subr.bf16.mxu1 %v22073_v40 }
 0x7b8   : > { %19575 = vmatmul.mubr.bf16.gmra.mrb[8].mxu1 %v11833_v14  ;;  %v11852_v14 = vrot.slane %v11776_v38, 4  ;;  %v13546_v38 = vrot.slane %v13473_v31, 4 }
 0x7b9   : > { %19783 = vmatmul.mubr.bf16.gmra.mrb[24].mxu0 %v13194_v48  ;;  %19578 = vmatprep.mubr.bf16.mxu1 %v11836_v17  ;;  %v11853_v48 = vrot.slane %v11777_v30, 4  ;;  %v13530_v17 = vrot.slane %v13462_v44, 4  ;;  %v13548_v30 = vrot.slane %v13474_v47, 4  ;;  %v13872_v47 = vld [vmem:[%s22606_s21 + $0x8] sm:$0xff] }
 0x7ba   : > { %19786 = vmatprep.mubr.bf16.mxu0 %v13195_v63  ;;  %21098 = vmatpush3.bf16.msra.mxu1 %v22073_v40  ;;  %v13529_v63 = vsel %vm10835_vm6, %v13527_v62, %v13528_v3  ;;  %v11779_v40 = vld [vmem:[#allocation2 + $0x2c0] sm:$0xf]  ;;  %v13547_v57 = vsel %vm10835_vm6, %v13545_v51, %v13546_v38  ;;  %v13477_v62 = vld [vmem:[#allocation2 + $0x358] sm:$0xf]  ;;  %v13478_v3 = vld [vmem:[#allocation2 + $0x368] sm:$0xf0] }
 0x7bb   : > { %21091 = vmatprep.subr.bf16.mxu1 %v22074_v20  ;;  %v11854_v19 = vsel %vm10835_vm6, %v11852_v14, %v11853_v48  ;;  %v13532_v6 = vsel %vm10835_vm6, %v13530_v17, %v13531_v8  ;;  %v13479_v14 = vld [vmem:[#allocation2 + $0x370] sm:$0xf]  ;;  %v13552_v48 = vrot.slane %v13477_v62, 4  ;;  %v13554_v17 = vrot.slane %v13478_v3, 4 }
 0x7bc   : > { %v13555_v8 = vrot.slane %v13479_v14, 4  ;;  %v13877_v3 = vld [vmem:[%s22606_s21 + $0x30] sm:$0xff] }
 0x7be   : > { %21099 = vmatpush3.bf16.msra.mxu1 %v22074_v20  ;;  %v11856_v20 = vrot.slane %v11779_v40, 4  ;;  %v13482_v40 = vld [vmem:[#allocation2 + $0x398] sm:$0xf0] }
 0x7bf   : > { %21092 = vmatprep.subr.bf16.mxu1 %v22075_v25 }
 0x7c0   : > { %19579 = vmatmul.mubr.bf16.gmra.mrb[12].mxu1 %v11839_v36  ;;  %v13533_v36 = vrot.slane %v13464_v24, 4  ;;  %v13558_v24 = vrot.slane %v13481_v26, 4 }
 0x7c1   : > { %19787 = vmatmul.mubr.bf16.gmra.mrb[28].mxu0 %v13196_v4  ;;  %19582 = vmatprep.mubr.bf16.mxu1 %v11842_v37  ;;  %v13534_v4 = vrot.slane %v13465_v18, 4  ;;  %v11858_v37 = vrot.slane %v11780_v49, 4 }
 0x7c2   : > { %19806 = vmatprep.mubr.bf16.mxu0 %v13520_v2  ;;  %21100 = vmatpush3.bf16.msra.mxu1 %v22075_v25  ;;  %v11857_v2 = vsel %vm10835_vm6, %v11855_v28, %v11856_v20  ;;  %v11783_v25 = vld [vmem:[#allocation2 + $0x2f0] sm:$0xf]  ;;  %v13564_v28 = vrot.slane %v13485_v34, 4 }
 0x7c3   : > { %21093 = vmatprep.subr.bf16.mxu1 %v22076_v11  ;;  %v13535_v35 = vsel %vm10835_vm6, %v13533_v36, %v13534_v4  ;;  %v11860_v46 = vsel %vm10835_vm6, %v11858_v37, %v11859_v39  ;;  %v11862_v12 = vrot.slane %v11783_v25, 4 }
 0x7c6   : > { %21101 = vmatpush3.bf16.msra.mxu1 %v22076_v11  ;;  %v13543_v11 = vrot.slane %v13471_v32, 4  ;;  %v13873_v32 = vld [vmem:[%s22606_s21 + $0x10] sm:$0xff] }
 0x7c8   : > { %19583 = vmatmul.mubr.bf16.gmra.mrb[16].mxu1 %v11845_v7  ;;  %v11863_v7 = vsel %vm10835_vm6, %v11861_v56, %v11862_v12 }
 0x7c9   : > { %19807 = vmatmul.mubr.bf16.vlgmr.msra.gmra.mrb[0].mxu0 %v13523_v22  ;;  %19586 = vmatprep.mubr.bf16.mxu1 %v11848_v50  ;;  %v13541_v22 = vsel %vm10835_vm6, %v13539_v54, %v13540_v1  ;;  %v13544_v50 = vsel %vm10835_vm6, %v13542_v27, %v13543_v11  ;;  %v13871_v1 = vld [vmem:[%s22606_s21] sm:$0xff] }
 0x7ca   : > { %19810 = vmatprep.mubr.bf16.mxu0 %v13526_v5  ;;  %v13475_v5 = vld [vmem:[#allocation2 + $0x340] sm:$0xf] }
 0x7cb   : > { %v13549_v44 = vrot.slane %v13475_v5, 4 }
 0x7cd   : > { %v13550_v41 = vsel %vm10835_vm6, %v13548_v30, %v13549_v44 }
 0x7d0   : > { %19587 = vmatmul.mubr.bf16.gmra.mrb[20].mxu1 %v11851_v29 }
 0x7d1   : > { %19811 = vmatmul.mubr.bf16.gmra.mrb[4].mxu0 %v13529_v63  ;;  %19590 = vmatprep.mubr.bf16.mxu1 %v11854_v19  ;;  %v13556_v63 = vsel %vm10835_vm6, %v13554_v17, %v13555_v8  ;;  %v13480_v19 = vld [vmem:[#allocation2 + $0x380] sm:$0xf0] }
 0x7d2   : > { %19814 = vmatprep.mubr.bf16.mxu0 %v13532_v6  ;;  %v13560_v6 = vrot.slane %v13482_v40, 4  ;;  %v13875_v17 = vld [vmem:[%s22606_s21 + $0x20] sm:$0xff] }
 0x7d8   : > { %19591 = vmatmul.mubr.bf16.gmra.mrb[24].mxu1 %v11857_v2 }
 0x7d9   : > { %19815 = vmatmul.mubr.bf16.gmra.mrb[8].mxu0 %v13535_v35  ;;  %19594 = vmatprep.mubr.bf16.mxu1 %v11860_v46 }
 0x7da   : > { %19818 = vmatprep.mubr.bf16.mxu0 %v13538_v61 }
 0x7e0   : > { %19595 = vmatmul.mubr.bf16.gmra.mrb[28].mxu1 %v11863_v7 }
 0x7e1   : > { %19819 = vmatmul.mubr.bf16.gmra.mrb[12].mxu0 %v13541_v22  ;;  %19630 = vmatprep.mubr.bf16.mxu1 %v24421_v33  ;;  %v13551_v33 = vrot.slane %v13476_v52, 4  ;;  %v13874_v22 = vld [vmem:[%s22606_s21 + $0x18] sm:$0xff] }
 0x7e2   : > { %19822 = vmatprep.mubr.bf16.mxu0 %v13544_v50 }
 0x7e3   : > { %v13553_v29 = vsel %vm10835_vm6, %v13551_v33, %v13552_v48 }
 0x7e8   : > { %19631 = vmatmul.mubr.bf16.vlgmr.msra.gmra.mrb[16].mxu1 %v24426_v45  ;;  %v13483_v45 = vld [vmem:[#allocation2 + $0x3a0] sm:$0xf] }
 0x7e9   : > { %19823 = vmatmul.mubr.bf16.gmra.mrb[16].mxu0 %v13547_v57  ;;  %19634 = vmatprep.mubr.bf16.mxu1 %v24429_v43  ;;  %v13557_v43 = vrot.slane %v13480_v19, 4  ;;  %v13561_v18 = vrot.slane %v13483_v45, 4  ;;  %v13878_v19 = vld [vmem:[%s22606_s21 + $0x38] sm:$0xff] }
 0x7ea   : > { %19826 = vmatprep.mubr.bf16.mxu0 %v13550_v41 }
 0x7eb   : > { %v13559_v49 = vsel %vm10835_vm6, %v13557_v43, %v13558_v24  ;;  %v13562_v13 = vsel %vm10835_vm6, %v13560_v6, %v13561_v18  ;;  %v13876_v43 = vld [vmem:[%s22606_s21 + $0x28] sm:$0xff] }
 0x7f0   : > { %19635 = vmatmul.mubr.bf16.gmra.mrb[20].mxu1 %v24441_v53  ;;  %v13563_v53 = vrot.slane %v13484_v60, 4 }
 0x7f1   : > { %19827 = vmatmul.mubr.bf16.gmra.mrb[20].mxu0 %v13553_v29  ;;  %19638 = vmatprep.mubr.bf16.mxu1 %v24444_v42 }
 0x7f2   : > { %19830 = vmatprep.mubr.bf16.mxu0 %v13556_v63  ;;  %v13565_v42 = vsel %vm10835_vm6, %v13563_v53, %v13564_v28 }
 0x7f8   : > { %19639 = vmatmul.mubr.bf16.gmra.mrb[24].mxu1 %v24451_v21 }
 0x7f9   : > { %19831 = vmatmul.mubr.bf16.gmra.mrb[24].mxu0 %v13559_v49  ;;  %19642 = vmatprep.mubr.bf16.mxu1 %v24454_v16 }
 0x7fa   : > { %19834 = vmatprep.mubr.bf16.mxu0 %v13562_v13 }
 0x800   : > { %19643 = vmatmul.mubr.bf16.gmra.mrb[28].mxu1 %v24461_v58 }
 0x801   : > { %19835 = vmatmul.mubr.bf16.gmra.mrb[28].mxu0 %v13565_v42  ;;  %v13881_v42 = vld [vmem:[%s22606_s21 + $0x50] sm:$0xff] }
 0x87b   : > { %v19568_v20 = vpop.f32.mrb[0].mxu1 }
 0x87c   : > { %v11978_v36 = vpop.f32.mrb[1].mxu1 }
 0x87d   : > { %v19569_v4 = vpop.f32.mrb[2].mxu1 }
 0x87e   : > { %v11981_v37 = vpop.f32.mrb[3].mxu1 }
 0x883   : > { %v19572_v39 = vpop.f32.mrb[4].mxu1 }
 0x884   : > { %v11994_v10 = vpop.f32.mrb[5].mxu1 }
 0x885   : > { %v19573_v59 = vpop.f32.mrb[6].mxu1 }
 0x886   : > { %v11997_v21 = vpop.f32.mrb[7].mxu1 }
 0x88b   : > { %v24513_v2 = vpop.f32.mrb[8].mxu1 }
 0x88c   : > { %v24515_v16 = vpop.f32.mrb[9].mxu1 }
 0x88d   : > { %v24517_v35 = vpop.f32.mrb[10].mxu1 }
 0x88e   : > { %v24519_v46 = vpop.f32.mrb[11].mxu1 }
 0x893   : > { %v24521_v58 = vpop.f32.mrb[12].mxu1 }
 0x894   : > { %v24523_v9 = vpop.f32.mrb[13].mxu1 }
 0x895   : > { %v24525_v25 = vpop.f32.mrb[14].mxu1 }
 0x896   : > { %v24527_v61 = vpop.f32.mrb[15].mxu1 }
 0x89c   : > { %v19808_v23 = vpop.f32.mrb[0].mxu0 }
 0x89d   : > { %v21102_v55 = vadd.f32 %v19808_v23, %v19568_v20  ;;  %v13680_v15 = vpop.f32.mrb[1].mxu0 }
 0x89e   : > { %v21103_v56 = vadd.f32 %v13680_v15, %v11978_v36  ;;  %v19809_v12 = vpop.f32.mrb[2].mxu0  ;;  %v13880_v15 = vld [vmem:[%s22606_s21 + $0x48] sm:$0xff] }
 0x89f   : > { %v13841_v54 = vmax.f32 %v21102_v55, 0.0  ;;  %v21104_v27 = vadd.f32 %v19809_v12, %v19569_v4  ;;  %v13683_v11 = vpop.f32.mrb[3].mxu0 }
 0x8a0   : > { %v13839_v7 = vmax.f32 %v21103_v56, 0.0  ;;  %v21105_v50 = vadd.f32 %v13683_v11, %v11981_v37  ;;  %v13879_v37 = vld [vmem:[%s22606_s21 + $0x40] sm:$0xff]  ;;  %v13885_v11 = vld [vmem:[%s22606_s21 + $0x70] sm:$0xff] }
 0x8a1   : > { %v13905_v0 = vadd.f32 %v13873_v32, %v13841_v54  ;;  %v13842_v31 = vmax.f32 %v21104_v27, 0.0 }
 0x8a2   : > { %v13903_v5 = vadd.f32 %v13871_v1, %v13839_v7  ;;  %v13840_v51 = vmax.f32 %v21105_v50, 0.0 }
 0x8a3   : > { %13937 = vst [vmem:[%s22606_s21 + $0x10] sm:$0xff] %v13905_v0  ;;  %v13906_v38 = vadd.f32 %v13874_v22, %v13842_v31  ;;  %v13968_v30 = vpack.c.bf16 %v13842_v31, %v13841_v54  ;;  %v13883_v0 = vld [vmem:[%s22606_s21 + $0x60] sm:$0xff] }
 0x8a4   : > { %13935 = vst [vmem:[%s22606_s21] sm:$0xff] %v13903_v5  ;;  %v13904_v44 = vadd.f32 %v13872_v47, %v13840_v51  ;;  %v13967_v57 = vpack.c.bf16 %v13840_v51, %v13839_v7  ;;  %v19812_v41 = vpop.f32.mrb[4].mxu0  ;;  %v13886_v51 = vld [vmem:[%s22606_s21 + $0x78] sm:$0xff] }
 0x8a5   : > { %13938 = vst [vmem:[%s22606_s21 + $0x18] sm:$0xff] %v13906_v38  ;;  %13984 = vst [vmem:[#allocation2 + $0x1a0] sm:$0xff] %v13968_v30  ;;  %v21106_v52 = vadd.f32 %v19812_v41, %v19572_v39  ;;  %v13696_v62 = vpop.f32.mrb[5].mxu0 }
 0x8a6   : > { %13936 = vst [vmem:[%s22606_s21 + $0x8] sm:$0xff] %v13904_v44  ;;  %13983 = vst [vmem:[#allocation2 + $0x188] sm:$0xff] %v13967_v57  ;;  %v21107_v14 = vadd.f32 %v13696_v62, %v11994_v10  ;;  %v19813_v33 = vpop.f32.mrb[6].mxu0  ;;  %v13884_v44 = vld [vmem:[%s22606_s21 + $0x68] sm:$0xff] }
 0x8a7   : > { %v13845_v48 = vmax.f32 %v21106_v52, 0.0  ;;  %v21108_v8 = vadd.f32 %v19813_v33, %v19573_v59  ;;  %v13699_v29 = vpop.f32.mrb[7].mxu0 }
 0x8a8   : > { %v13843_v63 = vmax.f32 %v21107_v14, 0.0  ;;  %v21109_v26 = vadd.f32 %v13699_v29, %v11997_v21  ;;  %v13882_v21 = vld [vmem:[%s22606_s21 + $0x58] sm:$0xff] }
 0x8a9   : > { %v13909_v40 = vadd.f32 %v13877_v3, %v13845_v48  ;;  %v13846_v45 = vmax.f32 %v21108_v8, 0.0  ;;  %v13889_v8 = vld [vmem:[%s22606_s21 + $0x90] sm:$0xff] }
 0x8aa   : > { %v13907_v24 = vadd.f32 %v13875_v17, %v13843_v63  ;;  %v13844_v6 = vmax.f32 %v21109_v26, 0.0 }
 0x8ab   : > { %13941 = vst [vmem:[%s22606_s21 + $0x30] sm:$0xff] %v13909_v40  ;;  %v13910_v18 = vadd.f32 %v13878_v19, %v13846_v45  ;;  %v13970_v49 = vpack.c.bf16 %v13846_v45, %v13845_v48  ;;  %v13887_v40 = vld [vmem:[%s22606_s21 + $0x80] sm:$0xff] }
 0x8ac   : > { %13939 = vst [vmem:[%s22606_s21 + $0x20] sm:$0xff] %v13907_v24  ;;  %v13908_v13 = vadd.f32 %v13876_v43, %v13844_v6  ;;  %v13969_v60 = vpack.c.bf16 %v13844_v6, %v13843_v63  ;;  %v19816_v34 = vpop.f32.mrb[8].mxu0  ;;  %v13890_v6 = vld [vmem:[%s22606_s21 + $0x98] sm:$0xff] }
 0x8ad   : > { %13942 = vst [vmem:[%s22606_s21 + $0x38] sm:$0xff] %v13910_v18  ;;  %13986 = vst [vmem:[#allocation2 + $0x1d0] sm:$0xff] %v13970_v49  ;;  %v21110_v53 = vadd.f32 %v19816_v34, %v24513_v2  ;;  %v13712_v28 = vpop.f32.mrb[9].mxu0 }
 0x8ae   : > { %13940 = vst [vmem:[%s22606_s21 + $0x28] sm:$0xff] %v13908_v13  ;;  %13985 = vst [vmem:[#allocation2 + $0x1b8] sm:$0xff] %v13969_v60  ;;  %v21111_v20 = vadd.f32 %v13712_v28, %v24515_v16  ;;  %v19817_v36 = vpop.f32.mrb[10].mxu0  ;;  %v13888_v60 = vld [vmem:[%s22606_s21 + $0x88] sm:$0xff] }
 0x8af   : > { %v13849_v4 = vmax.f32 %v21110_v53, 0.0  ;;  %v21112_v39 = vadd.f32 %v19817_v36, %v24517_v35  ;;  %v13715_v10 = vpop.f32.mrb[11].mxu0 }
 0x8b0   : > { %v13847_v59 = vmax.f32 %v21111_v20, 0.0  ;;  %v21113_v2 = vadd.f32 %v13715_v10, %v24519_v46 }
 0x8b1   : > { %v13913_v23 = vadd.f32 %v13881_v42, %v13849_v4  ;;  %v13850_v55 = vmax.f32 %v21112_v39, 0.0 }
 0x8b2   : > { %v13911_v32 = vadd.f32 %v13879_v37, %v13847_v59  ;;  %v13848_v56 = vmax.f32 %v21113_v2, 0.0  ;;  %v13893_v2 = vld [vmem:[%s22606_s21 + $0xb0] sm:$0xff] }
 0x8b3   : > { %13945 = vst [vmem:[%s22606_s21 + $0x50] sm:$0xff] %v13913_v23  ;;  %v13914_v16 = vadd.f32 %v13882_v21, %v13850_v55  ;;  %v13972_v12 = vpack.c.bf16 %v13850_v55, %v13849_v4 }
 0x8b4   : > { %13943 = vst [vmem:[%s22606_s21 + $0x40] sm:$0xff] %v13911_v32  ;;  %v13912_v54 = vadd.f32 %v13880_v15, %v13848_v56  ;;  %v13971_v35 = vpack.c.bf16 %v13848_v56, %v13847_v59  ;;  %v19820_v1 = vpop.f32.mrb[12].mxu0  ;;  %v13891_v56 = vld [vmem:[%s22606_s21 + $0xa0] sm:$0xff] }
 0x8b5   : > { %13946 = vst [vmem:[%s22606_s21 + $0x58] sm:$0xff] %v13914_v16  ;;  %13988 = vst [vmem:[#allocation2 + $0x200] sm:$0xff] %v13972_v12  ;;  %v21114_v46 = vadd.f32 %v19820_v1, %v24521_v58  ;;  %v13728_v27 = vpop.f32.mrb[13].mxu0 }
 0x8b6   : > { %13944 = vst [vmem:[%s22606_s21 + $0x48] sm:$0xff] %v13912_v54  ;;  %13987 = vst [vmem:[#allocation2 + $0x1e8] sm:$0xff] %v13971_v35  ;;  %v21115_v7 = vadd.f32 %v13728_v27, %v24523_v9  ;;  %v19821_v22 = vpop.f32.mrb[14].mxu0  ;;  %v13894_v35 = vld [vmem:[%s22606_s21 + $0xb8] sm:$0xff] }
 0x8b7   : > { %v13853_v50 = vmax.f32 %v21114_v46, 0.0  ;;  %v21116_v31 = vadd.f32 %v19821_v22, %v24525_v25  ;;  %v13731_v47 = vpop.f32.mrb[15].mxu0 }
 0x8b8   : > { %v13851_v5 = vmax.f32 %v21115_v7, 0.0  ;;  %v21117_v58 = vadd.f32 %v13731_v47, %v24527_v61 }
 0x8b9   : > { %v13917_v38 = vadd.f32 %v13885_v11, %v13853_v50  ;;  %v13854_v30 = vmax.f32 %v21116_v31, 0.0  ;;  %v13892_v11 = vld [vmem:[%s22606_s21 + $0xa8] sm:$0xff] }
 0x8ba   : > { %v13915_v57 = vadd.f32 %v13883_v0, %v13851_v5  ;;  %v13852_v41 = vmax.f32 %v21117_v58, 0.0 }
 0x8bb   : > { %13949 = vst [vmem:[%s22606_s21 + $0x70] sm:$0xff] %v13917_v38  ;;  %v13918_v9 = vadd.f32 %v13886_v51, %v13854_v30  ;;  %v13974_v52 = vpack.c.bf16 %v13854_v30, %v13853_v50  ;;  %v19632_v62 = vpop.f32.mrb[16].mxu1 }
 0x8bc   : > { %13947 = vst [vmem:[%s22606_s21 + $0x60] sm:$0xff] %v13915_v57  ;;  %v13916_v3 = vadd.f32 %v13884_v44, %v13852_v41  ;;  %v13973_v25 = vpack.c.bf16 %v13852_v41, %v13851_v5  ;;  %v19824_v14 = vpop.f32.mrb[16].mxu0  ;;  %v12315_v33 = vpop.f32.mrb[17].mxu1  ;;  %v13897_v57 = vld [vmem:[%s22606_s21 + $0xd0] sm:$0xff] }
 0x8bd   : > { %13950 = vst [vmem:[%s22606_s21 + $0x78] sm:$0xff] %v13918_v9  ;;  %13990 = vst [vmem:[#allocation2 + $0x230] sm:$0xff] %v13974_v52  ;;  %v21118_v61 = vadd.f32 %v19824_v14, %v19632_v62  ;;  %v13744_v48 = vpop.f32.mrb[17].mxu0  ;;  %v19633_v17 = vpop.f32.mrb[18].mxu1 }
 0x8be   : > { %13948 = vst [vmem:[%s22606_s21 + $0x68] sm:$0xff] %v13916_v3  ;;  %13989 = vst [vmem:[#allocation2 + $0x218] sm:$0xff] %v13973_v25  ;;  %v21119_v29 = vadd.f32 %v13744_v48, %v12315_v33  ;;  %v19825_v63 = vpop.f32.mrb[18].mxu0  ;;  %v12318_v19 = vpop.f32.mrb[19].mxu1  ;;  %v13895_v3 = vld [vmem:[%s22606_s21 + $0xc0] sm:$0xff] }
 0x8bf   : > { %v13857_v26 = vmax.f32 %v21118_v61, 0.0  ;;  %v21120_v45 = vadd.f32 %v19825_v63, %v19633_v17  ;;  %v13747_v43 = vpop.f32.mrb[19].mxu0  ;;  %v13898_v61 = vld [vmem:[%s22606_s21 + $0xd8] sm:$0xff] }
 0x8c0   : > { %v13855_v24 = vmax.f32 %v21119_v29, 0.0  ;;  %v21121_v18 = vadd.f32 %v13747_v43, %v12318_v19  ;;  %v13896_v29 = vld [vmem:[%s22606_s21 + $0xc8] sm:$0xff] }
 0x8c1   : > { %v13921_v49 = vadd.f32 %v13889_v8, %v13857_v26  ;;  %v13858_v13 = vmax.f32 %v21120_v45, 0.0 }
 0x8c2   : > { %v13919_v34 = vadd.f32 %v13887_v40, %v13855_v24  ;;  %v13856_v53 = vmax.f32 %v21121_v18, 0.0 }
 0x8c3   : > { %13953 = vst [vmem:[%s22606_s21 + $0x90] sm:$0xff] %v13921_v49  ;;  %v13922_v28 = vadd.f32 %v13890_v6, %v13858_v13  ;;  %v13976_v42 = vpack.c.bf16 %v13858_v13, %v13857_v26  ;;  %v19636_v20 = vpop.f32.mrb[20].mxu1 }
 0x8c4   : > { %13951 = vst [vmem:[%s22606_s21 + $0x80] sm:$0xff] %v13919_v34  ;;  %v13920_v36 = vadd.f32 %v13888_v60, %v13856_v53  ;;  %v13975_v4 = vpack.c.bf16 %v13856_v53, %v13855_v24  ;;  %v19828_v37 = vpop.f32.mrb[20].mxu0  ;;  %v12331_v39 = vpop.f32.mrb[21].mxu1  ;;  %v13901_v34 = vld [vmem:[%s22606_s21 + $0xf0] sm:$0xff] }
 0x8c5   : > { %13954 = vst [vmem:[%s22606_s21 + $0x98] sm:$0xff] %v13922_v28  ;;  %13992 = vst [vmem:[#allocation2 + $0x260] sm:$0xff] %v13976_v42  ;;  %v21122_v10 = vadd.f32 %v19828_v37, %v19636_v20  ;;  %v13760_v59 = vpop.f32.mrb[21].mxu0  ;;  %v19637_v21 = vpop.f32.mrb[22].mxu1 }
 0x8c6   : > { %13952 = vst [vmem:[%s22606_s21 + $0x88] sm:$0xff] %v13920_v36  ;;  %13991 = vst [vmem:[#allocation2 + $0x248] sm:$0xff] %v13975_v4  ;;  %v21123_v23 = vadd.f32 %v13760_v59, %v12331_v39  ;;  %v19829_v55 = vpop.f32.mrb[22].mxu0  ;;  %v12334_v15 = vpop.f32.mrb[23].mxu1  ;;  %v13899_v36 = vld [vmem:[%s22606_s21 + $0xe0] sm:$0xff] }
 0x8c7   : > { %v13861_v32 = vmax.f32 %v21122_v10, 0.0  ;;  %v21124_v16 = vadd.f32 %v19829_v55, %v19637_v21  ;;  %v13763_v12 = vpop.f32.mrb[23].mxu0  ;;  %v13902_v10 = vld [vmem:[%s22606_s21 + $0xf8] sm:$0xff] }
 0x8c8   : > { %v13859_v54 = vmax.f32 %v21123_v23, 0.0  ;;  %v21125_v1 = vadd.f32 %v13763_v12, %v12334_v15  ;;  %v13900_v23 = vld [vmem:[%s22606_s21 + $0xe8] sm:$0xff] }
 0x8c9   : > { %v13925_v46 = vadd.f32 %v13893_v2, %v13861_v32  ;;  %v13862_v27 = vmax.f32 %v21124_v16, 0.0 }
 0x8ca   : > { %v13923_v7 = vadd.f32 %v13891_v56, %v13859_v54  ;;  %v13860_v22 = vmax.f32 %v21125_v1, 0.0 }
 0x8cb   : > { %13957 = vst [vmem:[%s22606_s21 + $0xb0] sm:$0xff] %v13925_v46  ;;  %v13926_v50 = vadd.f32 %v13894_v35, %v13862_v27  ;;  %v13978_v0 = vpack.c.bf16 %v13862_v27, %v13861_v32  ;;  %v19640_v31 = vpop.f32.mrb[24].mxu1 }
 0x8cc   : > { %13955 = vst [vmem:[%s22606_s21 + $0xa0] sm:$0xff] %v13923_v7  ;;  %v13924_v47 = vadd.f32 %v13892_v11, %v13860_v22  ;;  %v13977_v5 = vpack.c.bf16 %v13860_v22, %v13859_v54  ;;  %v19832_v51 = vpop.f32.mrb[24].mxu0  ;;  %v12347_v58 = vpop.f32.mrb[25].mxu1 }
 0x8cd   : > { %13958 = vst [vmem:[%s22606_s21 + $0xb8] sm:$0xff] %v13926_v50  ;;  %13994 = vst [vmem:[#allocation2 + $0x290] sm:$0xff] %v13978_v0  ;;  %v21126_v38 = vadd.f32 %v19832_v51, %v19640_v31  ;;  %v13776_v30 = vpop.f32.mrb[25].mxu0  ;;  %v19641_v44 = vpop.f32.mrb[26].mxu1 }
 0x8ce   : > { %13956 = vst [vmem:[%s22606_s21 + $0xa8] sm:$0xff] %v13924_v47  ;;  %13993 = vst [vmem:[#allocation2 + $0x278] sm:$0xff] %v13977_v5  ;;  %v21127_v41 = vadd.f32 %v13776_v30, %v12347_v58  ;;  %v19833_v9 = vpop.f32.mrb[26].mxu0  ;;  %v12350_v52 = vpop.f32.mrb[27].mxu1 }
 0x8cf   : > { %v13865_v62 = vmax.f32 %v21126_v38, 0.0  ;;  %v21128_v25 = vadd.f32 %v19833_v9, %v19641_v44  ;;  %v13779_v14 = vpop.f32.mrb[27].mxu0 }
 0x8d0   : > { %v13863_v33 = vmax.f32 %v21127_v41, 0.0  ;;  %v21129_v48 = vadd.f32 %v13779_v14, %v12350_v52 }
 0x8d1   : > { %v13929_v17 = vadd.f32 %v13897_v57, %v13865_v62  ;;  %v13866_v8 = vmax.f32 %v21128_v25, 0.0 }
 0x8d2   : > { %v13927_v63 = vadd.f32 %v13895_v3, %v13863_v33  ;;  %v13864_v19 = vmax.f32 %v21129_v48, 0.0 }
 0x8d3   : > { %13961 = vst [vmem:[%s22606_s21 + $0xd0] sm:$0xff] %v13929_v17  ;;  %v13930_v26 = vadd.f32 %v13898_v61, %v13866_v8  ;;  %v13980_v40 = vpack.c.bf16 %v13866_v8, %v13865_v62  ;;  %v19644_v45 = vpop.f32.mrb[28].mxu1 }
 0x8d4   : > { %13959 = vst [vmem:[%s22606_s21 + $0xc0] sm:$0xff] %v13927_v63  ;;  %v13928_v43 = vadd.f32 %v13896_v29, %v13864_v19  ;;  %v13979_v24 = vpack.c.bf16 %v13864_v19, %v13863_v33  ;;  %v19836_v6 = vpop.f32.mrb[28].mxu0  ;;  %v12363_v18 = vpop.f32.mrb[29].mxu1 }
 0x8d5   : > { %13962 = vst [vmem:[%s22606_s21 + $0xd8] sm:$0xff] %v13930_v26  ;;  %13996 = vst [vmem:[#allocation2 + $0x2c0] sm:$0xff] %v13980_v40  ;;  %v21130_v49 = vadd.f32 %v19836_v6, %v19644_v45  ;;  %v13792_v13 = vpop.f32.mrb[29].mxu0  ;;  %v19645_v60 = vpop.f32.mrb[30].mxu1 }
 0x8d6   : > { %13960 = vst [vmem:[%s22606_s21 + $0xc8] sm:$0xff] %v13928_v43  ;;  %13995 = vst [vmem:[#allocation2 + $0x2a8] sm:$0xff] %v13979_v24  ;;  %v21131_v53 = vadd.f32 %v13792_v13, %v12363_v18  ;;  %v19837_v28 = vpop.f32.mrb[30].mxu0  ;;  %v12366_v42 = vpop.f32.mrb[31].mxu1 }
 0x8d7   : > { %v13869_v20 = vmax.f32 %v21130_v49, 0.0  ;;  %v21132_v4 = vadd.f32 %v19837_v28, %v19645_v60  ;;  %v13795_v37 = vpop.f32.mrb[31].mxu0 }
 0x8d8   : > { %v13867_v39 = vmax.f32 %v21131_v53, 0.0  ;;  %v21133_v59 = vadd.f32 %v13795_v37, %v12366_v42 }
 0x8d9   : > { %v13933_v21 = vadd.f32 %v13901_v34, %v13869_v20  ;;  %v13870_v2 = vmax.f32 %v21132_v4, 0.0 }
 0x8da   : > { %v13931_v55 = vadd.f32 %v13899_v36, %v13867_v39  ;;  %v13868_v15 = vmax.f32 %v21133_v59, 0.0 }
 0x8db   : > { %13965 = vst [vmem:[%s22606_s21 + $0xf0] sm:$0xff] %v13933_v21  ;;  %v13934_v32 = vadd.f32 %v13902_v10, %v13870_v2  ;;  %v13982_v56 = vpack.c.bf16 %v13870_v2, %v13869_v20 }
 0x8dc   : > { %13963 = vst [vmem:[%s22606_s21 + $0xe0] sm:$0xff] %v13931_v55  ;;  %v13932_v16 = vadd.f32 %v13900_v23, %v13868_v15  ;;  %v13981_v12 = vpack.c.bf16 %v13868_v15, %v13867_v39 }
 0x8dd   : > { %13966 = vst [vmem:[%s22606_s21 + $0xf8] sm:$0xff] %v13934_v32  ;;  %13998 = vst [vmem:[#allocation2 + $0x2f0] sm:$0xff] %v13982_v56 }
 0x8de   : > { %13964 = vst [vmem:[%s22606_s21 + $0xe8] sm:$0xff] %v13932_v16  ;;  %13997 = vst [vmem:[#allocation2 + $0x2d8] sm:$0xff] %v13981_v12 }
 0x8df PF: > { %p16950_p0 = scmp.ne.s32.totalorder %s22327_s15, 4 }
 0x8e0   : > { %v22077_v54 = vld [vmem:[%s22600_s30 + $0x40] sm:$0xff] (!%p16950_p0)   ;;  %v22079_v1 = vld [vmem:[%s22600_s30 + $0x48] sm:$0xff] (!%p16950_p0)   ;;  %v22081_v27 = vld [vmem:[%s22600_s30 + $0x50] sm:$0xff] (!%p16950_p0)  }
 0x8e1   : > { %14002 = sbr.rel (%p16950_p0) target bundleno = 2808 (0xaf8), region = 56  ;;  %v24604_v35 = vld [vmem:[%s22600_s30 + $0x100] sm:$0xff] (!%p16950_p0)   ;;  %19838 = vmatprep.subr.bf16.mxu1 (!%p16950_p0), %v22077_v54  ;;  %v22080_v46 = vld [vmem:[%s22600_s30 + $0x108] sm:$0xff] (!%p16950_p0)   ;;  %v22082_v11 = vld [vmem:[%s22600_s30 + $0x110] sm:$0xff] (!%p16950_p0)  }
 0x8e2   : > { %20030 = vmatprep.subr.bf16.mxu0 (!%p16950_p0), %v24604_v35  ;;  %19839 = vmatpush3.bf16.msra.mxu1 (!%p16950_p0), %v22077_v54  ;;  %v22083_v7 = vld [vmem:[%s22600_s30 + $0x58] sm:$0xff] (!%p16950_p0)   ;;  %v22085_v50 = vld [vmem:[%s22600_s30 + $0x60] sm:$0xff] (!%p16950_p0)   ;;  %v22087_v31 = vld [vmem:[%s22600_s30 + $0x68] sm:$0xff] (!%p16950_p0)  }
 0x8e3   : > { %20031 = vmatpush3.bf16.msra.mxu0 (!%p16950_p0), %v24604_v35  ;;  %19840 = vmatprep.subr.bf16.mxu1 (!%p16950_p0), %v22079_v1  ;;  %v22084_v22 = vld [vmem:[%s22600_s30 + $0x118] sm:$0xff] (!%p16950_p0)   ;;  %v22086_v0 = vld [vmem:[%s22600_s30 + $0x120] sm:$0xff] (!%p16950_p0)   ;;  %v14035_v47 = vld [vmem:[#allocation2 + $0x8] sm:$0xff] (!%p16950_p0) }
 0x8e4   : > { %20032 = vmatprep.subr.bf16.mxu0 (!%p16950_p0), %v22080_v46  ;;  %v15032_v5 = vld [vmem:[#allocation2 + $0x188] sm:$0xff] (!%p16950_p0)  ;;  %19854 = vmatprep.mubr.bf16.mxu1 (!%p16950_p0), %v14035_v47  ;;  %v22089_v58 = vld [vmem:[%s22600_s30 + $0x70] sm:$0xff] (!%p16950_p0)   ;;  %v22091_v30 = vld [vmem:[%s22600_s30 + $0x78] sm:$0xff] (!%p16950_p0)  }
 0x8e5   : > { %v22088_v51 = vld [vmem:[%s22600_s30 + $0x128] sm:$0xff] (!%p16950_p0)   ;;  %20046 = vmatprep.mubr.bf16.mxu0 (!%p16950_p0), %v15032_v5  ;;  %v22090_v38 = vld [vmem:[%s22600_s30 + $0x130] sm:$0xff] (!%p16950_p0)   ;;  %v22092_v44 = vld [vmem:[%s22600_s30 + $0x138] sm:$0xff] (!%p16950_p0)  }
 0x8e6   : > { %19841 = vmatpush3.bf16.msra.mxu1 (!%p16950_p0), %v22079_v1  ;;  %v22093_v57 = vld [vmem:[%s22600_s30] sm:$0xff] (!%p16950_p0)   ;;  %v22095_v62 = vld [vmem:[%s22600_s30 + $0x148] sm:$0xff] (!%p16950_p0)   ;;  %v14037_v3 = vld [vmem:[#allocation2 + $0x38] sm:$0xff] (!%p16950_p0) }
 0x8e7   : > { %20033 = vmatpush3.bf16.msra.mxu0 (!%p16950_p0), %v22080_v46  ;;  %19842 = vmatprep.subr.bf16.mxu1 (!%p16950_p0), %v22081_v27  ;;  %v22094_v41 = vld [vmem:[%s22600_s30 + $0x140] sm:$0xff] (!%p16950_p0)   ;;  %v15034_v25 = vld [vmem:[#allocation2 + $0x1b8] sm:$0xff] (!%p16950_p0)  ;;  %v22096_v14 = vld [vmem:[%s22600_s30 + $0x8] sm:$0xff] (!%p16950_p0)  }
 0x8e8   : > { %20034 = vmatprep.subr.bf16.mxu0 %v22082_v11  ;;  %v14036_v9 = vld [vmem:[#allocation2 + $0x20] sm:$0xff]  ;;  %v22099_v33 = vld [vmem:[%s22600_s30 + $0x10] sm:$0xff]   ;;  %v22098_v8 = vld [vmem:[%s22600_s30 + $0x158] sm:$0xff]  }
 0x8e9   : > { %v15033_v52 = vld [vmem:[#allocation2 + $0x1a0] sm:$0xff]  ;;  %v22097_v61 = vld [vmem:[%s22600_s30 + $0x150] sm:$0xff]   ;;  %v14039_v29 = vld [vmem:[#allocation2 + $0x68] sm:$0xff] }
 0x8ea   : > { %19843 = vmatpush3.bf16.msra.mxu1 %v22081_v27  ;;  %v14038_v48 = vld [vmem:[#allocation2 + $0x50] sm:$0xff]  ;;  %v15036_v63 = vld [vmem:[#allocation2 + $0x1e8] sm:$0xff]  ;;  %v22102_v19 = vld [vmem:[%s22600_s30 + $0x18] sm:$0xff]  }
 0x8eb   : > { %20035 = vmatpush3.bf16.msra.mxu0 %v22082_v11  ;;  %19844 = vmatprep.subr.bf16.mxu1 %v22083_v7  ;;  %v15035_v17 = vld [vmem:[#allocation2 + $0x1d0] sm:$0xff]  ;;  %v22100_v26 = vld [vmem:[%s22600_s30 + $0x160] sm:$0xff]   ;;  %v22101_v24 = vld [vmem:[%s22600_s30 + $0x168] sm:$0xff]  }
 0x8ec   : > { %20036 = vmatprep.subr.bf16.mxu0 %v22084_v22  ;;  %v22105_v40 = vld [vmem:[%s22600_s30 + $0x20] sm:$0xff]   ;;  %v14041_v6 = vld [vmem:[#allocation2 + $0x98] sm:$0xff]  ;;  %v22107_v49 = vld [vmem:[%s22600_s30 + $0x28] sm:$0xff]  }
 0x8ed   : > { %v14040_v45 = vld [vmem:[#allocation2 + $0x80] sm:$0xff]  ;;  %v15038_v18 = vld [vmem:[#allocation2 + $0x218] sm:$0xff]  ;;  %v22103_v13 = vld [vmem:[%s22600_s30 + $0x170] sm:$0xff]  }
 0x8ee   : > { %19845 = vmatpush3.bf16.msra.mxu1 %v22083_v7  ;;  %v15037_v43 = vld [vmem:[#allocation2 + $0x200] sm:$0xff]  ;;  %v22109_v60 = vld [vmem:[%s22600_s30 + $0x30] sm:$0xff]   ;;  %v14043_v28 = vld [vmem:[#allocation2 + $0xc8] sm:$0xff] }
 0x8ef   : > { %20037 = vmatpush3.bf16.msra.mxu0 %v22084_v22  ;;  %19846 = vmatprep.subr.bf16.mxu1 %v22085_v50  ;;  %v14042_v34 = vld [vmem:[#allocation2 + $0xb0] sm:$0xff]  ;;  %v22104_v42 = vld [vmem:[%s22600_s30 + $0x178] sm:$0xff]   ;;  %v22106_v4 = vld [vmem:[%s22600_s30 + $0x180] sm:$0xff]  }
 0x8f0   : > { %20038 = vmatprep.subr.bf16.mxu0 %v22086_v0  ;;  %v15039_v53 = vld [vmem:[#allocation2 + $0x230] sm:$0xff]  ;;  %v22111_v36 = vld [vmem:[%s22600_s30 + $0x38] sm:$0xff]   ;;  %v24640_v37 = vld [vmem:[%s22600_s30 + $0x80] sm:$0xff]  }
 0x8f1   : > { %v15305_v20 = vld [vmem:[#allocation2 + $0x190] sm:$0xff]  ;;  %v14044_v39 = vld [vmem:[#allocation2 + $0xe0] sm:$0xff]  ;;  %v15306_v10 = vld [vmem:[#allocation2 + $0x1a8] sm:$0xff] }
 0x8f2   : > { %19847 = vmatpush3.bf16.msra.mxu1 %v22085_v50  ;;  %v14045_v59 = vld [vmem:[#allocation2 + $0xf8] sm:$0xff]  ;;  %v15307_v21 = vld [vmem:[#allocation2 + $0x1c0] sm:$0xff]  ;;  %v22108_v2 = vld [vmem:[%s22600_s30 + $0x188] sm:$0xff]  }
 0x8f3   : > { %20039 = vmatpush3.bf16.msra.mxu0 %v22086_v0  ;;  %19848 = vmatprep.subr.bf16.mxu1 %v22087_v31  ;;  %v22110_v23 = vld [vmem:[%s22600_s30 + $0x190] sm:$0xff]   ;;  %v15308_v15 = vld [vmem:[#allocation2 + $0x1d8] sm:$0xff]  ;;  %v14047_v32 = vld [vmem:[#allocation2 + $0x128] sm:$0xff] }
 0x8f4   : > { %20040 = vmatprep.subr.bf16.mxu0 %v22088_v51  ;;  %v14046_v55 = vld [vmem:[#allocation2 + $0x110] sm:$0xff]  ;;  %v22112_v16 = vld [vmem:[%s22600_s30 + $0x198] sm:$0xff]   ;;  %v22114_v12 = vld [vmem:[%s22600_s30 + $0x1a0] sm:$0xff]  }
 0x8f5   : > { %v15309_v56 = vld [vmem:[#allocation2 + $0x1f0] sm:$0xff]  ;;  %v14048_v54 = vld [vmem:[#allocation2 + $0x140] sm:$0xff]  ;;  %v15310_v1 = vld [vmem:[#allocation2 + $0x208] sm:$0xff] }
 0x8f6   : > { %19849 = vmatpush3.bf16.msra.mxu1 %v22087_v31  ;;  %v14049_v46 = vld [vmem:[#allocation2 + $0x158] sm:$0xff]  ;;  %v15311_v27 = vld [vmem:[#allocation2 + $0x220] sm:$0xff]  ;;  %v22116_v11 = vld [vmem:[%s22600_s30 + $0x1a8] sm:$0xff]  }
 0x8f7   : > { %20041 = vmatpush3.bf16.msra.mxu0 %v22088_v51  ;;  %19850 = vmatprep.subr.bf16.mxu1 %v22089_v58  ;;  %v22118_v7 = vld [vmem:[%s22600_s30 + $0x1b0] sm:$0xff]   ;;  %v15312_v50 = vld [vmem:[#allocation2 + $0x238] sm:$0xff]  ;;  %v14003_v0 = vld [vmem:[#allocation2] sm:$0xff] }
 0x8f8   : > { %20042 = vmatprep.subr.bf16.mxu0 %v22090_v38  ;;  %v14050_v22 = vld [vmem:[#allocation2 + $0x170] sm:$0xff]  ;;  %v22120_v47 = vld [vmem:[%s22600_s30 + $0x1b8] sm:$0xff]   ;;  %v24651_v5 = vld [vmem:[%s22600_s30 + $0x1c0] sm:$0xff]  }
 0x8f9   : > { %v15313_v31 = vld [vmem:[#allocation2 + $0x250] sm:$0xff]  ;;  %v14004_v51 = vld [vmem:[#allocation2 + $0x18] sm:$0xff] }
 0x8fa   : > { %19851 = vmatpush3.bf16.msra.mxu1 %v22089_v58  ;;  %v15314_v58 = vld [vmem:[#allocation2 + $0x268] sm:$0xff] }
 0x8fb   : > { %20043 = vmatpush3.bf16.msra.mxu0 %v22090_v38  ;;  %19852 = vmatprep.subr.bf16.mxu1 %v22091_v30  ;;  %v14005_v38 = vld [vmem:[#allocation2 + $0x30] sm:$0xff] }
 0x8fc   : > { %20044 = vmatprep.subr.bf16.mxu0 %v22092_v44 }
 0x8fe   : > { %19853 = vmatpush3.bf16.msra.mxu1 %v22091_v30  ;;  %v15315_v30 = vld [vmem:[#allocation2 + $0x280] sm:$0xff] }
 0x8ff   : > { %20045 = vmatpush3.bf16.msra.mxu0 %v22092_v44  ;;  %19886 = vmatprep.subr.bf16.mxu1 %v22093_v57  ;;  %v22115_v44 = vld [vmem:[%s22600_s30 + $0x88] sm:$0xff]  }
 0x900   : > { %20078 = vmatprep.subr.bf16.mxu0 %v22094_v41 }
 0x901   : > { %19855 = vmatmul.mubr.bf16.vlgmr.msra.gmra.mrb[0].mxu1 %v14036_v9  ;;  %v15316_v9 = vld [vmem:[#allocation2 + $0x298] sm:$0xff] }
 0x902   : > { %20047 = vmatmul.mubr.bf16.vlgmr.msra.gmra.mrb[0].mxu0 %v15033_v52  ;;  %19887 = vmatpush3.bf16.msra.mxu1 %v22093_v57  ;;  %v22117_v57 = vld [vmem:[%s22600_s30 + $0x90] sm:$0xff]   ;;  %v14007_v52 = vld [vmem:[#allocation2 + $0x60] sm:$0xff] }
 0x903   : > { %20079 = vmatpush3.bf16.msra.mxu0 %v22094_v41  ;;  %19858 = vmatprep.mubr.bf16.mxu1 %v14037_v3  ;;  %v14006_v41 = vld [vmem:[#allocation2 + $0x48] sm:$0xff]  ;;  %v22119_v3 = vld [vmem:[%s22600_s30 + $0x98] sm:$0xff]  }
 0x904   : > { %20080 = vmatprep.subr.bf16.mxu0 %v22095_v62  ;;  %20050 = vmatprep.mubr.bf16.mxu0 %v15034_v25  ;;  %v22121_v25 = vld [vmem:[%s22600_s30 + $0xa0] sm:$0xff]  }
 0x905   : > { %19888 = vmatprep.subr.bf16.mxu1 %v22096_v14 }
 0x906   : > { %19889 = vmatpush3.bf16.msra.mxu1 %v22096_v14  ;;  %v14008_v14 = vld [vmem:[#allocation2 + $0x78] sm:$0xff] }
 0x907   : > { %20081 = vmatpush3.bf16.msra.mxu0 %v22095_v62  ;;  %19890 = vmatprep.subr.bf16.mxu1 %v22099_v33  ;;  %v15317_v62 = vld [vmem:[#allocation2 + $0x2b0] sm:$0xff] }
 0x908   : > { %20082 = vmatprep.subr.bf16.mxu0 %v22097_v61 }
 0x909   : > { %19859 = vmatmul.mubr.bf16.gmra.mrb[4].mxu1 %v14038_v48  ;;  %v15319_v48 = vld [vmem:[#allocation2 + $0x2e0] sm:$0xff] }
 0x90a   : > { %20051 = vmatmul.mubr.bf16.gmra.mrb[4].mxu0 %v15035_v17  ;;  %19862 = vmatprep.mubr.bf16.mxu1 %v14039_v29  ;;  %v22123_v17 = vld [vmem:[%s22600_s30 + $0xa8] sm:$0xff]  }
 0x90b   : > { %20083 = vmatpush3.bf16.msra.mxu0 %v22097_v61  ;;  %20054 = vmatprep.mubr.bf16.mxu0 %v15036_v63  ;;  %v14009_v61 = vld [vmem:[#allocation2 + $0x90] sm:$0xff]  ;;  %v14010_v29 = vld [vmem:[#allocation2 + $0xa8] sm:$0xff]  ;;  %v15320_v63 = vld [vmem:[#allocation2 + $0x2f8] sm:$0xff] }
 0x90c   : > { %20084 = vmatprep.subr.bf16.mxu0 %v22098_v8  ;;  %19891 = vmatpush3.bf16.msra.mxu1 %v22099_v33  ;;  %v15318_v33 = vld [vmem:[#allocation2 + $0x2c8] sm:$0xff] }
 0x90d   : > { %19892 = vmatprep.subr.bf16.mxu1 %v22102_v19 }
 0x90f   : > { %20085 = vmatpush3.bf16.msra.mxu0 %v22098_v8  ;;  %v22125_v8 = vld [vmem:[%s22600_s30 + $0xb0] sm:$0xff]  }
 0x910   : > { %20086 = vmatprep.subr.bf16.mxu0 %v22100_v26  ;;  %19893 = vmatpush3.bf16.msra.mxu1 %v22102_v19  ;;  %v14011_v19 = vld [vmem:[#allocation2 + $0xc0] sm:$0xff] }
 0x911   : > { %19863 = vmatmul.mubr.bf16.gmra.mrb[8].mxu1 %v14040_v45  ;;  %19894 = vmatprep.subr.bf16.mxu1 %v22105_v40  ;;  %v24663_v45 = vld [vmem:[%s22600_s30 + $0xc0] sm:$0xff]  }
 0x912   : > { %20055 = vmatmul.mubr.bf16.gmra.mrb[8].mxu0 %v15037_v43  ;;  %19866 = vmatprep.mubr.bf16.mxu1 %v14041_v6  ;;  %v14012_v43 = vld [vmem:[#allocation2 + $0xd8] sm:$0xff]  ;;  %v14013_v6 = vld [vmem:[#allocation2 + $0xf0] sm:$0xff] }
 0x913   : > { %20087 = vmatpush3.bf16.msra.mxu0 %v22100_v26  ;;  %20058 = vmatprep.mubr.bf16.mxu0 %v15038_v18  ;;  %v15579_v26 = vld [vmem:[#allocation2 + $0x300] sm:$0xff]  ;;  %v15581_v18 = vld [vmem:[#allocation2 + $0x330] sm:$0xff] }
 0x914   : > { %20088 = vmatprep.subr.bf16.mxu0 %v22101_v24  ;;  %19895 = vmatpush3.bf16.msra.mxu1 %v22105_v40  ;;  %v22127_v40 = vld [vmem:[%s22600_s30 + $0xb8] sm:$0xff]  }
 0x915   : > { %19896 = vmatprep.subr.bf16.mxu1 %v22107_v49 }
 0x917   : > { %20089 = vmatpush3.bf16.msra.mxu0 %v22101_v24  ;;  %v15580_v24 = vld [vmem:[#allocation2 + $0x318] sm:$0xff] }
 0x918   : > { %20090 = vmatprep.subr.bf16.mxu0 %v22103_v13  ;;  %19897 = vmatpush3.bf16.msra.mxu1 %v22107_v49  ;;  %v22124_v49 = vld [vmem:[%s22600_s30 + $0x1c8] sm:$0xff]  }
 0x919   : > { %19867 = vmatmul.mubr.bf16.gmra.mrb[12].mxu1 %v14042_v34  ;;  %19898 = vmatprep.subr.bf16.mxu1 %v22109_v60  ;;  %v15582_v34 = vld [vmem:[#allocation2 + $0x348] sm:$0xff] }
 0x91a   : > { %20059 = vmatmul.mubr.bf16.gmra.mrb[12].mxu0 %v15039_v53  ;;  %19870 = vmatprep.mubr.bf16.mxu1 %v14043_v28  ;;  %v14015_v53 = vld [vmem:[#allocation2 + $0x120] sm:$0xff] }
 0x91b   : > { %20091 = vmatpush3.bf16.msra.mxu0 %v22103_v13  ;;  %20094 = vmatprep.mubr.bf16.mxu0 %v15305_v20  ;;  %v22126_v13 = vld [vmem:[%s22600_s30 + $0x1d0] sm:$0xff]   ;;  %v15583_v28 = vld [vmem:[#allocation2 + $0x360] sm:$0xff] }
 0x91c   : > { %20092 = vmatprep.subr.bf16.mxu0 %v22104_v42  ;;  %19899 = vmatpush3.bf16.msra.mxu1 %v22109_v60  ;;  %v14014_v60 = vld [vmem:[#allocation2 + $0x108] sm:$0xff]  ;;  %v22130_v20 = vld [vmem:[%s22600_s30 + $0x1e0] sm:$0xff]  }
 0x91d   : > { %19900 = vmatprep.subr.bf16.mxu1 %v22111_v36 }
 0x91f   : > { %20093 = vmatpush3.bf16.msra.mxu0 %v22104_v42  ;;  %v22128_v42 = vld [vmem:[%s22600_s30 + $0x1d8] sm:$0xff]  }
 0x920   : > { %20126 = vmatprep.subr.bf16.mxu0 %v22106_v4  ;;  %19901 = vmatpush3.bf16.msra.mxu1 %v22111_v36  ;;  %v14016_v36 = vld [vmem:[#allocation2 + $0x138] sm:$0xff] }
 0x921   : > { %19871 = vmatmul.mubr.bf16.gmra.mrb[16].mxu1 %v14044_v39  ;;  %19934 = vmatprep.subr.bf16.mxu1 %v24640_v37  ;;  %v15585_v39 = vld [vmem:[#allocation2 + $0x390] sm:$0xff] }
 0x922   : > { %20095 = vmatmul.mubr.bf16.vlgmr.msra.gmra.mrb[0].mxu0 %v15306_v10  ;;  %19874 = vmatprep.mubr.bf16.mxu1 %v14045_v59  ;;  %v22132_v10 = vld [vmem:[%s22600_s30 + $0x1e8] sm:$0xff]   ;;  %v22134_v59 = vld [vmem:[%s22600_s30 + $0x1f0] sm:$0xff]  }
 0x923   : > { %20127 = vmatpush3.bf16.msra.mxu0 %v22106_v4  ;;  %20098 = vmatprep.mubr.bf16.mxu0 %v15307_v21  ;;  %v15584_v4 = vld [vmem:[#allocation2 + $0x378] sm:$0xff]  ;;  %v14018_v21 = vld [vmem:[#allocation2 + $0x168] sm:$0xff] }
 0x924   : > { %20128 = vmatprep.subr.bf16.mxu0 %v22108_v2 }
 0x927   : > { %20129 = vmatpush3.bf16.msra.mxu0 %v22108_v2  ;;  %v15586_v2 = vld [vmem:[#allocation2 + $0x3a8] sm:$0xff] }
 0x928   : > { %20130 = vmatprep.subr.bf16.mxu0 %v22110_v23 }
 0x929   : > { %19875 = vmatmul.mubr.bf16.gmra.mrb[20].mxu1 %v14046_v55  ;;  %v15587_v55 = vld [vmem:[#allocation2 + $0x3c0] sm:$0xff] }
 0x92a   : > { %20099 = vmatmul.mubr.bf16.gmra.mrb[4].mxu0 %v15308_v15  ;;  %19878 = vmatprep.mubr.bf16.mxu1 %v14047_v32  ;;  %v22136_v15 = vld [vmem:[%s22600_s30 + $0x1f8] sm:$0xff]   ;;  %v24675_v32 = vld [vmem:[%s22600_s30 + $0x200] sm:$0xff]  }
 0x92b   : > { %20102 = vmatprep.mubr.bf16.mxu0 %v15309_v56  ;;  %20131 = vmatpush3.bf16.msra.mxu0 %v22110_v23  ;;  %v14485_v23 = vld [vmem:[#allocation2 + $0x10] sm:$0xff]  ;;  %v14486_v56 = vld [vmem:[#allocation2 + $0x28] sm:$0xff] }
 0x92c   : > { %20132 = vmatprep.subr.bf16.mxu0 %v22112_v16 }
 0x92f   : > { %20133 = vmatpush3.bf16.msra.mxu0 %v22112_v16  ;;  %v15588_v16 = vld [vmem:[#allocation2 + $0x3d8] sm:$0xff] }
 0x930   : > { %20134 = vmatprep.subr.bf16.mxu0 %v22114_v12 }
 0x931   : > { %19879 = vmatmul.mubr.bf16.gmra.mrb[24].mxu1 %v14048_v54  ;;  %v15589_v54 = vld [vmem:[#allocation2 + $0x3f0] sm:$0xff] }
 0x932   : > { %20103 = vmatmul.mubr.bf16.gmra.mrb[8].mxu0 %v15310_v1  ;;  %19882 = vmatprep.mubr.bf16.mxu1 %v14049_v46  ;;  %v22131_v1 = vld [vmem:[%s22600_s30 + $0xc8] sm:$0xff]   ;;  %v22133_v46 = vld [vmem:[%s22600_s30 + $0xd0] sm:$0xff]  }
 0x933   : > { %20106 = vmatprep.mubr.bf16.mxu0 %v15311_v27  ;;  %20135 = vmatpush3.bf16.msra.mxu0 %v22114_v12  ;;  %v14487_v12 = vld [vmem:[#allocation2 + $0x40] sm:$0xff]  ;;  %v14488_v27 = vld [vmem:[#allocation2 + $0x58] sm:$0xff] }
 0x934   : > { %20136 = vmatprep.subr.bf16.mxu0 %v22116_v11 }
 0x937   : > { %20137 = vmatpush3.bf16.msra.mxu0 %v22116_v11  ;;  %v15590_v11 = vld [vmem:[#allocation2 + $0x408] sm:$0xff] }
 0x938   : > { %20138 = vmatprep.subr.bf16.mxu0 %v22118_v7 }
 0x939   : > { %19883 = vmatmul.mubr.bf16.gmra.mrb[28].mxu1 %v14050_v22  ;;  %v15591_v22 = vld [vmem:[#allocation2 + $0x420] sm:$0xff] }
 0x93a   : > { %20107 = vmatmul.mubr.bf16.gmra.mrb[12].mxu0 %v15312_v50  ;;  %19902 = vmatprep.mubr.bf16.mxu1 %v14003_v0  ;;  %v22135_v50 = vld [vmem:[%s22600_s30 + $0xd8] sm:$0xff]   ;;  %v22137_v0 = vld [vmem:[%s22600_s30 + $0xe0] sm:$0xff]  }
 0x93b   : > { %20110 = vmatprep.mubr.bf16.mxu0 %v15313_v31  ;;  %20139 = vmatpush3.bf16.msra.mxu0 %v22118_v7  ;;  %v14489_v7 = vld [vmem:[#allocation2 + $0x70] sm:$0xff]  ;;  %v14490_v31 = vld [vmem:[#allocation2 + $0x88] sm:$0xff] }
 0x93c   : > { %20140 = vmatprep.subr.bf16.mxu0 %v22120_v47 }
 0x93f   : > { %20141 = vmatpush3.bf16.msra.mxu0 %v22120_v47  ;;  %v15592_v47 = vld [vmem:[#allocation2 + $0x438] sm:$0xff] }
 0x940   : > { %20174 = vmatprep.subr.bf16.mxu0 %v24651_v5 }
 0x941   : > { %19903 = vmatmul.mubr.bf16.vlgmr.msra.gmra.mrb[0].mxu1 %v14004_v51  ;;  %v15593_v51 = vld [vmem:[#allocation2 + $0x450] sm:$0xff] }
 0x942   : > { %20111 = vmatmul.mubr.bf16.gmra.mrb[16].mxu0 %v15314_v58  ;;  %19935 = vmatpush3.bf16.msra.mxu1 %v24640_v37  ;;  %v14017_v37 = vld [vmem:[#allocation2 + $0x150] sm:$0xff]  ;;  %v22139_v58 = vld [vmem:[%s22600_s30 + $0xe8] sm:$0xff]  }
 0x943   : > { %19906 = vmatprep.mubr.bf16.mxu1 %v14005_v38  ;;  %20114 = vmatprep.mubr.bf16.mxu0 %v15315_v30  ;;  %v22141_v38 = vld [vmem:[%s22600_s30 + $0xf0] sm:$0xff]   ;;  %v14492_v30 = vld [vmem:[#allocation2 + $0xb8] sm:$0xff] }
 0x944   : > { %19936 = vmatprep.subr.bf16.mxu1 %v22115_v44 }
 0x946   : > { %19937 = vmatpush3.bf16.msra.mxu1 %v22115_v44  ;;  %v15594_v44 = vld [vmem:[#allocation2 + $0x468] sm:$0xff] }
 0x947   : > { %19938 = vmatprep.subr.bf16.mxu1 %v22117_v57 }
 0x949   : > { %19907 = vmatmul.mubr.bf16.gmra.mrb[4].mxu1 %v14006_v41  ;;  %v15852_v41 = vld [vmem:[#allocation2 + $0x308] sm:$0xff] }
 0x94a   : > { %20115 = vmatmul.mubr.bf16.gmra.mrb[20].mxu0 %v15316_v9  ;;  %19910 = vmatprep.mubr.bf16.mxu1 %v14007_v52  ;;  %v22143_v9 = vld [vmem:[%s22600_s30 + $0xf8] sm:$0xff]   ;;  %v14494_v52 = vld [vmem:[#allocation2 + $0xe8] sm:$0xff] }
 0x94b   : > { %20118 = vmatprep.mubr.bf16.mxu0 %v15317_v62  ;;  %19939 = vmatpush3.bf16.msra.mxu1 %v22117_v57  ;;  %v14493_v57 = vld [vmem:[#allocation2 + $0xd0] sm:$0xff]  ;;  %v15853_v62 = vld [vmem:[#allocation2 + $0x320] sm:$0xff] }
 0x94c   : > { %19940 = vmatprep.subr.bf16.mxu1 %v22119_v3 }
 0x94f   : > { %19941 = vmatpush3.bf16.msra.mxu1 %v22119_v3  ;;  %v14495_v3 = vld [vmem:[#allocation2 + $0x100] sm:$0xff] }
 0x950   : > { %19942 = vmatprep.subr.bf16.mxu1 %v22121_v25 }
 0x951   : > { %19911 = vmatmul.mubr.bf16.gmra.mrb[8].mxu1 %v14008_v14  ;;  %v22140_v14 = vld [vmem:[%s22600_s30 + $0x208] sm:$0xff]  }
 0x952   : > { %20119 = vmatmul.mubr.bf16.gmra.mrb[24].mxu0 %v15318_v33  ;;  %19914 = vmatprep.mubr.bf16.mxu1 %v14009_v61  ;;  %v22142_v33 = vld [vmem:[%s22600_s30 + $0x210] sm:$0xff]   ;;  %v14496_v61 = vld [vmem:[#allocation2 + $0x118] sm:$0xff] }
 0x953   : > { %20122 = vmatprep.mubr.bf16.mxu0 %v15319_v48  ;;  %19943 = vmatpush3.bf16.msra.mxu1 %v22121_v25  ;;  %v15854_v25 = vld [vmem:[#allocation2 + $0x338] sm:$0xff]  ;;  %v15855_v48 = vld [vmem:[#allocation2 + $0x350] sm:$0xff] }
 0x954   : > { %19944 = vmatprep.subr.bf16.mxu1 %v22123_v17 }
 0x957   : > { %19945 = vmatpush3.bf16.msra.mxu1 %v22123_v17  ;;  %v14497_v17 = vld [vmem:[#allocation2 + $0x130] sm:$0xff] }
 0x958   : > { %19946 = vmatprep.subr.bf16.mxu1 %v22125_v8 }
 0x959   : > { %19915 = vmatmul.mubr.bf16.gmra.mrb[12].mxu1 %v14010_v29  ;;  %v22144_v29 = vld [vmem:[%s22600_s30 + $0x218] sm:$0xff]  }
 0x95a   : > { %20123 = vmatmul.mubr.bf16.gmra.mrb[28].mxu0 %v15320_v63  ;;  %19918 = vmatprep.mubr.bf16.mxu1 %v14011_v19  ;;  %v14498_v63 = vld [vmem:[#allocation2 + $0x148] sm:$0xff]  ;;  %v15857_v19 = vld [vmem:[#allocation2 + $0x380] sm:$0xff] }
 0x95b   : > { %20142 = vmatprep.mubr.bf16.mxu0 %v15579_v26  ;;  %19947 = vmatpush3.bf16.msra.mxu1 %v22125_v8  ;;  %v15856_v8 = vld [vmem:[#allocation2 + $0x368] sm:$0xff]  ;;  %v14499_v26 = vld [vmem:[#allocation2 + $0x160] sm:$0xff] }
 0x95c   : > { %19948 = vmatprep.subr.bf16.mxu1 %v22127_v40 }
 0x95f   : > { %19949 = vmatpush3.bf16.msra.mxu1 %v22127_v40  ;;  %v15858_v40 = vld [vmem:[#allocation2 + $0x398] sm:$0xff] }
 0x960   : > { %19982 = vmatprep.subr.bf16.mxu1 %v24663_v45 }
 0x961   : > { %19919 = vmatmul.mubr.bf16.gmra.mrb[16].mxu1 %v14012_v43  ;;  %v22147_v43 = vld [vmem:[%s22600_s30 + $0x230] sm:$0xff]  }
 0x962   : > { %20143 = vmatmul.mubr.bf16.vlgmr.msra.gmra.mrb[0].mxu0 %v15580_v24  ;;  %19922 = vmatprep.mubr.bf16.mxu1 %v14013_v6  ;;  %v14500_v24 = vld [vmem:[#allocation2 + $0x178] sm:$0xff]  ;;  %v15859_v6 = vld [vmem:[#allocation2 + $0x3b0] sm:$0xff] }
 0x963   : > { %20175 = vmatpush3.bf16.msra.mxu0 %v24651_v5  ;;  %20146 = vmatprep.mubr.bf16.mxu0 %v15581_v18  ;;  %v14491_v5 = vld [vmem:[#allocation2 + $0xa0] sm:$0xff] }
 0x964   : > { %20176 = vmatprep.subr.bf16.mxu0 %v22124_v49  ;;  %v14759_v18 = vld [vmem:[#allocation2 + $0x180] sm:$0xff] }
 0x967   : > { %20177 = vmatpush3.bf16.msra.mxu0 %v22124_v49  ;;  %v15860_v49 = vld [vmem:[#allocation2 + $0x3c8] sm:$0xff] }
 0x968   : > { %20178 = vmatprep.subr.bf16.mxu0 %v22126_v13 }
 0x969   : > { %19923 = vmatmul.mubr.bf16.gmra.mrb[20].mxu1 %v14014_v60  ;;  %v14760_v60 = vld [vmem:[#allocation2 + $0x198] sm:$0xff] }
 0x96a   : > { %20147 = vmatmul.mubr.bf16.gmra.mrb[4].mxu0 %v15582_v34  ;;  %19926 = vmatprep.mubr.bf16.mxu1 %v14015_v53  ;;  %v15861_v34 = vld [vmem:[#allocation2 + $0x3e0] sm:$0xff]  ;;  %v14761_v53 = vld [vmem:[#allocation2 + $0x1b0] sm:$0xff] }
 0x96b   : > { %20150 = vmatprep.mubr.bf16.mxu0 %v15583_v28  ;;  %20179 = vmatpush3.bf16.msra.mxu0 %v22126_v13  ;;  %v22148_v13 = vld [vmem:[%s22600_s30 + $0x238] sm:$0xff]  }
 0x96c   : > { %20180 = vmatprep.subr.bf16.mxu0 %v22128_v42  ;;  %v15862_v28 = vld [vmem:[#allocation2 + $0x3f8] sm:$0xff] }
 0x96f   : > { %20181 = vmatpush3.bf16.msra.mxu0 %v22128_v42  ;;  %v22149_v42 = vld [vmem:[%s22600_s30 + $0x100] sm:$0xff]  }
 0x970   : > { %20182 = vmatprep.subr.bf16.mxu0 %v22130_v20 }
 0x971   : > { %19927 = vmatmul.mubr.bf16.gmra.mrb[24].mxu1 %v14016_v36  ;;  %v14762_v36 = vld [vmem:[#allocation2 + $0x1c8] sm:$0xff] }
 0x972   : > { %20151 = vmatmul.mubr.bf16.gmra.mrb[8].mxu0 %v15584_v4  ;;  %19930 = vmatprep.mubr.bf16.mxu1 %v14017_v37  ;;  %v15863_v4 = vld [vmem:[#allocation2 + $0x410] sm:$0xff]  ;;  %v14763_v37 = vld [vmem:[#allocation2 + $0x1e0] sm:$0xff] }
 0x973   : > { %20154 = vmatprep.mubr.bf16.mxu0 %v15585_v39  ;;  %20183 = vmatpush3.bf16.msra.mxu0 %v22130_v20  ;;  %v22150_v20 = vld [vmem:[%s22600_s30 + $0x108] sm:$0xff]   ;;  %v22151_v39 = vld [vmem:[%s22600_s30 + $0x110] sm:$0xff]  }
 0x974   : > { %20184 = vmatprep.subr.bf16.mxu0 %v22132_v10 }
 0x977   : > { %20185 = vmatpush3.bf16.msra.mxu0 %v22132_v10  ;;  %v15864_v10 = vld [vmem:[#allocation2 + $0x428] sm:$0xff] }
 0x978   : > { %20186 = vmatprep.subr.bf16.mxu0 %v22134_v59 }
 0x979   : > { %19931 = vmatmul.mubr.bf16.gmra.mrb[28].mxu1 %v14018_v21  ;;  %v14764_v21 = vld [vmem:[#allocation2 + $0x1f8] sm:$0xff] }
 0x97a   : > { %20155 = vmatmul.mubr.bf16.gmra.mrb[12].mxu0 %v15586_v2  ;;  %19950 = vmatprep.mubr.bf16.mxu1 %v14485_v23  ;;  %v15865_v2 = vld [vmem:[#allocation2 + $0x440] sm:$0xff]  ;;  %v14765_v23 = vld [vmem:[#allocation2 + $0x210] sm:$0xff] }
 0x97b   : > { %20158 = vmatprep.mubr.bf16.mxu0 %v15587_v55  ;;  %20187 = vmatpush3.bf16.msra.mxu0 %v22134_v59  ;;  %v22152_v59 = vld [vmem:[%s22600_s30 + $0x118] sm:$0xff]  }
 0x97c   : > { %20188 = vmatprep.subr.bf16.mxu0 %v22136_v15  ;;  %v15866_v55 = vld [vmem:[#allocation2 + $0x458] sm:$0xff] }
 0x97f   : > { %20189 = vmatpush3.bf16.msra.mxu0 %v22136_v15  ;;  %v22153_v15 = vld [vmem:[%s22600_s30 + $0x120] sm:$0xff]  }
 0x980   : > { %20222 = vmatprep.subr.bf16.mxu0 %v24675_v32 }
 0x981   : > { %19951 = vmatmul.mubr.bf16.vlgmr.msra.gmra.mrb[0].mxu1 %v14486_v56  ;;  %v14766_v56 = vld [vmem:[#allocation2 + $0x228] sm:$0xff] }
 0x982   : > { %20159 = vmatmul.mubr.bf16.gmra.mrb[16].mxu0 %v15588_v16  ;;  %19983 = vmatpush3.bf16.msra.mxu1 %v24663_v45  ;;  %v22146_v45 = vld [vmem:[%s22600_s30 + $0x228] sm:$0xff]   ;;  %v15867_v16 = vld [vmem:[#allocation2 + $0x470] sm:$0xff] }
 0x983   : > { %19954 = vmatprep.mubr.bf16.mxu1 %v14487_v12  ;;  %20162 = vmatprep.mubr.bf16.mxu0 %v15589_v54  ;;  %v14767_v12 = vld [vmem:[#allocation2 + $0x240] sm:$0xff]  ;;  %v16125_v54 = vld [vmem:[#allocation2 + $0x310] sm:$0xff] }
 0x984   : > { %19984 = vmatprep.subr.bf16.mxu1 %v22131_v1 }
 0x986   : > { %19985 = vmatpush3.bf16.msra.mxu1 %v22131_v1  ;;  %v22155_v1 = vld [vmem:[%s22600_s30 + $0x130] sm:$0xff]  }
 0x987   : > { %19986 = vmatprep.subr.bf16.mxu1 %v22133_v46 }
 0x989   : > { %19955 = vmatmul.mubr.bf16.gmra.mrb[4].mxu1 %v14488_v27  ;;  %v14768_v27 = vld [vmem:[#allocation2 + $0x258] sm:$0xff] }
 0x98a   : > { %20163 = vmatmul.mubr.bf16.gmra.mrb[20].mxu0 %v15590_v11  ;;  %19958 = vmatprep.mubr.bf16.mxu1 %v14489_v7  ;;  %v16126_v11 = vld [vmem:[#allocation2 + $0x328] sm:$0xff]  ;;  %v14769_v7 = vld [vmem:[#allocation2 + $0x270] sm:$0xff] }
 0x98b   : > { %20166 = vmatprep.mubr.bf16.mxu0 %v15591_v22  ;;  %19987 = vmatpush3.bf16.msra.mxu1 %v22133_v46  ;;  %v22156_v46 = vld [vmem:[%s22600_s30 + $0x138] sm:$0xff]   ;;  %v16127_v22 = vld [vmem:[#allocation2 + $0x340] sm:$0xff] }
 0x98c   : > { %19988 = vmatprep.subr.bf16.mxu1 %v22135_v50 }
 0x98f   : > { %19989 = vmatpush3.bf16.msra.mxu1 %v22135_v50  ;;  %v14770_v50 = vld [vmem:[#allocation2 + $0x288] sm:$0xff] }
 0x990   : > { %19990 = vmatprep.subr.bf16.mxu1 %v22137_v0 }
 0x991   : > { %19959 = vmatmul.mubr.bf16.gmra.mrb[8].mxu1 %v14490_v31  ;;  %v14771_v31 = vld [vmem:[#allocation2 + $0x2a0] sm:$0xff] }
 0x992   : > { %20167 = vmatmul.mubr.bf16.gmra.mrb[24].mxu0 %v15592_v47  ;;  %19962 = vmatprep.mubr.bf16.mxu1 %v14491_v5  ;;  %v16129_v47 = vld [vmem:[#allocation2 + $0x370] sm:$0xff]  ;;  %v14772_v5 = vld [vmem:[#allocation2 + $0x2b8] sm:$0xff] }
 0x993   : > { %20170 = vmatprep.mubr.bf16.mxu0 %v15593_v51  ;;  %19991 = vmatpush3.bf16.msra.mxu1 %v22137_v0  ;;  %v16128_v0 = vld [vmem:[#allocation2 + $0x358] sm:$0xff]  ;;  %v16130_v51 = vld [vmem:[#allocation2 + $0x388] sm:$0xff] }
 0x994   : > { %19992 = vmatprep.subr.bf16.mxu1 %v22139_v58 }
 0x997   : > { %19993 = vmatpush3.bf16.msra.mxu1 %v22139_v58  ;;  %v14773_v58 = vld [vmem:[#allocation2 + $0x2d0] sm:$0xff] }
 0x998   : > { %19994 = vmatprep.subr.bf16.mxu1 %v22141_v38 }
 0x999   : > { %19963 = vmatmul.mubr.bf16.gmra.mrb[12].mxu1 %v14492_v30  ;;  %v14774_v30 = vld [vmem:[#allocation2 + $0x2e8] sm:$0xff] }
 0x99a   : > { %20171 = vmatmul.mubr.bf16.gmra.mrb[28].mxu0 %v15594_v44  ;;  %19966 = vmatprep.mubr.bf16.mxu1 %v14493_v57  ;;  %v16132_v44 = vld [vmem:[#allocation2 + $0x3b8] sm:$0xff]  ;;  %v15040_v57 = vld [vmem:[#allocation2 + $0x248] sm:$0xff] }
 0x99b   : > { %20190 = vmatprep.mubr.bf16.mxu0 %v15852_v41  ;;  %19995 = vmatpush3.bf16.msra.mxu1 %v22141_v38  ;;  %v16131_v38 = vld [vmem:[#allocation2 + $0x3a0] sm:$0xff]  ;;  %v16133_v41 = vld [vmem:[#allocation2 + $0x3d0] sm:$0xff] }
 0x99c   : > { %19996 = vmatprep.subr.bf16.mxu1 %v22143_v9 }
 0x99f   : > { %19997 = vmatpush3.bf16.msra.mxu1 %v22143_v9  ;;  %v15041_v9 = vld [vmem:[#allocation2 + $0x260] sm:$0xff] }
 0x9a0   : > { %21358 = vmatprep.subr.bf16.mxu1 %v24604_v35  ;;  %v22145_v35 = vld [vmem:[%s22600_s30 + $0x220] sm:$0xff]  }
 0x9a1   : > { %19967 = vmatmul.mubr.bf16.gmra.mrb[16].mxu1 %v14494_v52  ;;  %v16134_v52 = vld [vmem:[#allocation2 + $0x3e8] sm:$0xff] }
 0x9a2   : > { %20191 = vmatmul.mubr.bf16.vlgmr.msra.gmra.mrb[0].mxu0 %v15853_v62  ;;  %19970 = vmatprep.mubr.bf16.mxu1 %v14495_v3  ;;  %v15042_v62 = vld [vmem:[#allocation2 + $0x278] sm:$0xff]  ;;  %v16135_v3 = vld [vmem:[#allocation2 + $0x400] sm:$0xff] }
 0x9a3   : > { %20223 = vmatpush3.bf16.msra.mxu0 %v24675_v32  ;;  %20194 = vmatprep.mubr.bf16.mxu0 %v15854_v25  ;;  %v22154_v32 = vld [vmem:[%s22600_s30 + $0x128] sm:$0xff]   ;;  %v15043_v25 = vld [vmem:[#allocation2 + $0x290] sm:$0xff] }
 0x9a4   : > { %20224 = vmatprep.subr.bf16.mxu0 %v22140_v14 }
 0x9a7   : > { %20225 = vmatpush3.bf16.msra.mxu0 %v22140_v14  ;;  %v16136_v14 = vld [vmem:[#allocation2 + $0x418] sm:$0xff] }
 0x9a8   : > { %20226 = vmatprep.subr.bf16.mxu0 %v22142_v33 }
 0x9a9   : > { %19971 = vmatmul.mubr.bf16.gmra.mrb[20].mxu1 %v14496_v61  ;;  %v16137_v61 = vld [vmem:[#allocation2 + $0x430] sm:$0xff] }
 0x9aa   : > { %20195 = vmatmul.mubr.bf16.gmra.mrb[4].mxu0 %v15855_v48  ;;  %19974 = vmatprep.mubr.bf16.mxu1 %v14497_v17  ;;  %v15045_v48 = vld [vmem:[#allocation2 + $0x2c0] sm:$0xff]  ;;  %v16138_v17 = vld [vmem:[#allocation2 + $0x448] sm:$0xff] }
 0x9ab   : > { %20198 = vmatprep.mubr.bf16.mxu0 %v15856_v8  ;;  %20227 = vmatpush3.bf16.msra.mxu0 %v22142_v33  ;;  %v15044_v33 = vld [vmem:[#allocation2 + $0x2a8] sm:$0xff]  ;;  %v15046_v8 = vld [vmem:[#allocation2 + $0x2d8] sm:$0xff] }
 0x9ac   : > { %20228 = vmatprep.subr.bf16.mxu0 %v22144_v29 }
 0x9af   : > { %20229 = vmatpush3.bf16.msra.mxu0 %v22144_v29  ;;  %v16139_v29 = vld [vmem:[#allocation2 + $0x460] sm:$0xff] }
 0x9b0   : > { %20230 = vmatprep.subr.bf16.mxu0 %v22145_v35 }
 0x9b1   : > { %19975 = vmatmul.mubr.bf16.gmra.mrb[24].mxu1 %v14498_v63  ;;  %v16140_v63 = vld [vmem:[#allocation2 + $0x478] sm:$0xff] }
 0x9b2   : > { %20199 = vmatmul.mubr.bf16.gmra.mrb[8].mxu0 %v15857_v19  ;;  %19978 = vmatprep.mubr.bf16.mxu1 %v14499_v26 }
 0x9b3   : > { %20202 = vmatprep.mubr.bf16.mxu0 %v15858_v40  ;;  %20231 = vmatpush3.bf16.msra.mxu0 %v22145_v35  ;;  %v15047_v35 = vld [vmem:[#allocation2 + $0x2f0] sm:$0xff] }
 0x9b4   : > { %20232 = vmatprep.subr.bf16.mxu0 %v22146_v45 }
 0x9b7   : > { %20233 = vmatpush3.bf16.msra.mxu0 %v22146_v45 }
 0x9b8   : > { %20234 = vmatprep.subr.bf16.mxu0 %v22147_v43 }
 0x9b9   : > { %19979 = vmatmul.mubr.bf16.gmra.mrb[28].mxu1 %v14500_v24 }
 0x9ba   : > { %20203 = vmatmul.mubr.bf16.gmra.mrb[12].mxu0 %v15859_v6  ;;  %19998 = vmatprep.mubr.bf16.mxu1 %v14759_v18 }
 0x9bb   : > { %20206 = vmatprep.mubr.bf16.mxu0 %v15860_v49  ;;  %20235 = vmatpush3.bf16.msra.mxu0 %v22147_v43 }
 0x9bc   : > { %20236 = vmatprep.subr.bf16.mxu0 %v22148_v13 }
 0x9bf   : > { %20237 = vmatpush3.bf16.msra.mxu0 %v22148_v13 }
 0x9c1   : > { %19999 = vmatmul.mubr.bf16.vlgmr.msra.gmra.mrb[0].mxu1 %v14760_v60 }
 0x9c2   : > { %20207 = vmatmul.mubr.bf16.gmra.mrb[16].mxu0 %v15861_v34  ;;  %21366 = vmatpush3.bf16.msra.mxu1 %v22149_v42 }
 0x9c3   : > { %20002 = vmatprep.mubr.bf16.mxu1 %v14761_v53  ;;  %20210 = vmatprep.mubr.bf16.mxu0 %v15862_v28 }
 0x9c4   : > { %21359 = vmatprep.subr.bf16.mxu1 %v22150_v20 }
 0x9c6   : > { %21367 = vmatpush3.bf16.msra.mxu1 %v22150_v20 }
 0x9c7   : > { %21360 = vmatprep.subr.bf16.mxu1 %v22151_v39 }
 0x9c9   : > { %20003 = vmatmul.mubr.bf16.gmra.mrb[4].mxu1 %v14762_v36 }
 0x9ca   : > { %20211 = vmatmul.mubr.bf16.gmra.mrb[20].mxu0 %v15863_v4  ;;  %20006 = vmatprep.mubr.bf16.mxu1 %v14763_v37 }
 0x9cb   : > { %20214 = vmatprep.mubr.bf16.mxu0 %v15864_v10  ;;  %21368 = vmatpush3.bf16.msra.mxu1 %v22151_v39  ;;  %v16432_v39 = vld [vmem:[%s22606_s21 + $0x10] sm:$0xff] }
 0x9cc   : > { %21361 = vmatprep.subr.bf16.mxu1 %v22152_v59 }
 0x9cf   : > { %21369 = vmatpush3.bf16.msra.mxu1 %v22152_v59 }
 0x9d0   : > { %21362 = vmatprep.subr.bf16.mxu1 %v22153_v15 }
 0x9d1   : > { %20007 = vmatmul.mubr.bf16.gmra.mrb[8].mxu1 %v14764_v21 }
 0x9d2   : > { %20215 = vmatmul.mubr.bf16.gmra.mrb[24].mxu0 %v15865_v2  ;;  %20010 = vmatprep.mubr.bf16.mxu1 %v14765_v23  ;;  %v16430_v2 = vld [vmem:[%s22606_s21] sm:$0xff] }
 0x9d3   : > { %20218 = vmatprep.mubr.bf16.mxu0 %v15866_v55  ;;  %21370 = vmatpush3.bf16.msra.mxu1 %v22153_v15 }
 0x9d4   : > { %21363 = vmatprep.subr.bf16.mxu1 %v22154_v32 }
 0x9d7   : > { %21371 = vmatpush3.bf16.msra.mxu1 %v22154_v32  ;;  %v16433_v32 = vld [vmem:[%s22606_s21 + $0x18] sm:$0xff] }
 0x9d8   : > { %21364 = vmatprep.subr.bf16.mxu1 %v22155_v1 }
 0x9d9   : > { %20011 = vmatmul.mubr.bf16.gmra.mrb[12].mxu1 %v14766_v56 }
 0x9da   : > { %20219 = vmatmul.mubr.bf16.gmra.mrb[28].mxu0 %v15867_v16  ;;  %20014 = vmatprep.mubr.bf16.mxu1 %v14767_v12 }
 0x9db   : > { %20238 = vmatprep.mubr.bf16.mxu0 %v16125_v54  ;;  %21372 = vmatpush3.bf16.msra.mxu1 %v22155_v1  ;;  %v16431_v54 = vld [vmem:[%s22606_s21 + $0x8] sm:$0xff] }
 0x9dc   : > { %21365 = vmatprep.subr.bf16.mxu1 %v22156_v46 }
 0x9df   : > { %21373 = vmatpush3.bf16.msra.mxu1 %v22156_v46 }
 0x9e1   : > { %20015 = vmatmul.mubr.bf16.gmra.mrb[16].mxu1 %v14768_v27 }
 0x9e2   : > { %20239 = vmatmul.mubr.bf16.vlgmr.msra.gmra.mrb[0].mxu0 %v16126_v11  ;;  %20018 = vmatprep.mubr.bf16.mxu1 %v14769_v7 }
 0x9e3   : > { %20242 = vmatprep.mubr.bf16.mxu0 %v16127_v22 }
 0x9e9   : > { %20019 = vmatmul.mubr.bf16.gmra.mrb[20].mxu1 %v14770_v50 }
 0x9ea   : > { %20243 = vmatmul.mubr.bf16.gmra.mrb[4].mxu0 %v16128_v0  ;;  %20022 = vmatprep.mubr.bf16.mxu1 %v14771_v31  ;;  %v16436_v0 = vld [vmem:[%s22606_s21 + $0x30] sm:$0xff] }
 0x9eb   : > { %20246 = vmatprep.mubr.bf16.mxu0 %v16129_v47 }
 0x9f1   : > { %20023 = vmatmul.mubr.bf16.gmra.mrb[24].mxu1 %v14772_v5 }
 0x9f2   : > { %20247 = vmatmul.mubr.bf16.gmra.mrb[8].mxu0 %v16130_v51  ;;  %20026 = vmatprep.mubr.bf16.mxu1 %v14773_v58  ;;  %v16434_v51 = vld [vmem:[%s22606_s21 + $0x20] sm:$0xff] }
 0x9f3   : > { %20250 = vmatprep.mubr.bf16.mxu0 %v16131_v38 }
 0x9f9   : > { %20027 = vmatmul.mubr.bf16.gmra.mrb[28].mxu1 %v14774_v30 }
 0x9fa   : > { %20251 = vmatmul.mubr.bf16.gmra.mrb[12].mxu0 %v16132_v44  ;;  %20062 = vmatprep.mubr.bf16.mxu1 %v15040_v57  ;;  %v16437_v44 = vld [vmem:[%s22606_s21 + $0x38] sm:$0xff] }
 0x9fb   : > { %20254 = vmatprep.mubr.bf16.mxu0 %v16133_v41 }
 0xa01   : > { %20063 = vmatmul.mubr.bf16.vlgmr.msra.gmra.mrb[16].mxu1 %v15041_v9 }
 0xa02   : > { %20255 = vmatmul.mubr.bf16.gmra.mrb[16].mxu0 %v16134_v52  ;;  %20066 = vmatprep.mubr.bf16.mxu1 %v15042_v62  ;;  %v16435_v52 = vld [vmem:[%s22606_s21 + $0x28] sm:$0xff] }
 0xa03   : > { %20258 = vmatprep.mubr.bf16.mxu0 %v16135_v3 }
 0xa09   : > { %20067 = vmatmul.mubr.bf16.gmra.mrb[20].mxu1 %v15043_v25 }
 0xa0a   : > { %20259 = vmatmul.mubr.bf16.gmra.mrb[20].mxu0 %v16136_v14  ;;  %20070 = vmatprep.mubr.bf16.mxu1 %v15044_v33 }
 0xa0b   : > { %20262 = vmatprep.mubr.bf16.mxu0 %v16137_v61 }
 0xa11   : > { %20071 = vmatmul.mubr.bf16.gmra.mrb[24].mxu1 %v15045_v48 }
 0xa12   : > { %20263 = vmatmul.mubr.bf16.gmra.mrb[24].mxu0 %v16138_v17  ;;  %20074 = vmatprep.mubr.bf16.mxu1 %v15046_v8  ;;  %v16440_v17 = vld [vmem:[%s22606_s21 + $0x50] sm:$0xff] }
 0xa13   : > { %20266 = vmatprep.mubr.bf16.mxu0 %v16139_v29 }
 0xa19   : > { %20075 = vmatmul.mubr.bf16.gmra.mrb[28].mxu1 %v15047_v35 }
 0xa1a   : > { %20267 = vmatmul.mubr.bf16.gmra.mrb[28].mxu0 %v16140_v63  ;;  %v16438_v63 = vld [vmem:[%s22606_s21 + $0x40] sm:$0xff] }
 0xa94   : > { %v20000_v19 = vpop.f32.mrb[0].mxu1 }
 0xa95   : > { %v14873_v26 = vpop.f32.mrb[1].mxu1 }
 0xa96   : > { %v20001_v40 = vpop.f32.mrb[2].mxu1 }
 0xa97   : > { %v14876_v45 = vpop.f32.mrb[3].mxu1 }
 0xa9c   : > { %v20004_v43 = vpop.f32.mrb[4].mxu1 }
 0xa9d   : > { %v14889_v24 = vpop.f32.mrb[5].mxu1 }
 0xa9e   : > { %v20005_v6 = vpop.f32.mrb[6].mxu1 }
 0xa9f   : > { %v14892_v18 = vpop.f32.mrb[7].mxu1 }
 0xaa4   : > { %v20008_v49 = vpop.f32.mrb[8].mxu1 }
 0xaa5   : > { %v14905_v13 = vpop.f32.mrb[9].mxu1 }
 0xaa6   : > { %v20009_v60 = vpop.f32.mrb[10].mxu1 }
 0xaa7   : > { %v24703_v34 = vpop.f32.mrb[11].mxu1 }
 0xaac   : > { %v24705_v53 = vpop.f32.mrb[12].mxu1 }
 0xaad   : > { %v24707_v28 = vpop.f32.mrb[13].mxu1 }
 0xaae   : > { %v24709_v42 = vpop.f32.mrb[14].mxu1 }
 0xaaf   : > { %v24711_v20 = vpop.f32.mrb[15].mxu1 }
 0xab5   : > { %v20240_v36 = vpop.f32.mrb[0].mxu0 }
 0xab6   : > { %v21374_v4 = vadd.f32 %v20240_v36, %v20000_v19  ;;  %v16239_v37 = vpop.f32.mrb[1].mxu0 }
 0xab7   : > { %v21375_v10 = vadd.f32 %v16239_v37, %v14873_v26  ;;  %v20241_v59 = vpop.f32.mrb[2].mxu0 }
 0xab8   : > { %v16400_v21 = vmax.f32 %v21374_v4, 0.0  ;;  %v21376_v23 = vadd.f32 %v20241_v59, %v20001_v40  ;;  %v16242_v55 = vpop.f32.mrb[3].mxu0 }
 0xab9   : > { %v16398_v15 = vmax.f32 %v21375_v10, 0.0  ;;  %v21377_v56 = vadd.f32 %v16242_v55, %v14876_v45  ;;  %v16441_v45 = vld [vmem:[%s22606_s21 + $0x58] sm:$0xff] }
 0xaba   : > { %v16464_v16 = vadd.f32 %v16432_v39, %v16400_v21  ;;  %v16401_v12 = vmax.f32 %v21376_v23, 0.0 }
 0xabb   : > { %v16462_v1 = vadd.f32 %v16430_v2, %v16398_v15  ;;  %v16399_v46 = vmax.f32 %v21377_v56, 0.0  ;;  %v16442_v2 = vld [vmem:[%s22606_s21 + $0x60] sm:$0xff] }
 0xabc   : > { %16496 = vst [vmem:[%s22606_s21 + $0x10] sm:$0xff] %v16464_v16  ;;  %v16465_v27 = vadd.f32 %v16433_v32, %v16401_v12  ;;  %v16445_v32 = vld [vmem:[%s22606_s21 + $0x78] sm:$0xff]  ;;  %v16443_v12 = vld [vmem:[%s22606_s21 + $0x68] sm:$0xff] }
 0xabd   : > { %16494 = vst [vmem:[%s22606_s21] sm:$0xff] %v16462_v1  ;;  %v16463_v11 = vadd.f32 %v16431_v54, %v16399_v46  ;;  %v20244_v7 = vpop.f32.mrb[4].mxu0 }
 0xabe   : > { %16497 = vst [vmem:[%s22606_s21 + $0x18] sm:$0xff] %v16465_v27  ;;  %v21378_v22 = vadd.f32 %v20244_v7, %v20004_v43  ;;  %v16255_v50 = vpop.f32.mrb[5].mxu0 }
 0xabf   : > { %16495 = vst [vmem:[%s22606_s21 + $0x8] sm:$0xff] %v16463_v11  ;;  %v21379_v31 = vadd.f32 %v16255_v50, %v14889_v24  ;;  %v20245_v47 = vpop.f32.mrb[6].mxu0  ;;  %v16448_v50 = vld [vmem:[%s22606_s21 + $0x90] sm:$0xff] }
 0xac0   : > { %v16404_v5 = vmax.f32 %v21378_v22, 0.0  ;;  %v21380_v58 = vadd.f32 %v20245_v47, %v20005_v6  ;;  %v16258_v38 = vpop.f32.mrb[7].mxu0 }
 0xac1   : > { %v16402_v30 = vmax.f32 %v21379_v31, 0.0  ;;  %v21381_v57 = vadd.f32 %v16258_v38, %v14892_v18  ;;  %v16439_v18 = vld [vmem:[%s22606_s21 + $0x48] sm:$0xff] }
 0xac2   : > { %v16468_v41 = vadd.f32 %v16436_v0, %v16404_v5  ;;  %v16405_v9 = vmax.f32 %v21380_v58, 0.0 }
 0xac3   : > { %v16466_v62 = vadd.f32 %v16434_v51, %v16402_v30  ;;  %v16403_v3 = vmax.f32 %v21381_v57, 0.0  ;;  %v16446_v51 = vld [vmem:[%s22606_s21 + $0x80] sm:$0xff] }
 0xac4   : > { %16500 = vst [vmem:[%s22606_s21 + $0x30] sm:$0xff] %v16468_v41  ;;  %v16469_v25 = vadd.f32 %v16437_v44, %v16405_v9  ;;  %v16449_v44 = vld [vmem:[%s22606_s21 + $0x98] sm:$0xff] }
 0xac5   : > { %16498 = vst [vmem:[%s22606_s21 + $0x20] sm:$0xff] %v16466_v62  ;;  %v16467_v14 = vadd.f32 %v16435_v52, %v16403_v3  ;;  %v20248_v33 = vpop.f32.mrb[8].mxu0  ;;  %v16447_v52 = vld [vmem:[%s22606_s21 + $0x88] sm:$0xff] }
 0xac6   : > { %16501 = vst [vmem:[%s22606_s21 + $0x38] sm:$0xff] %v16469_v25  ;;  %v21382_v61 = vadd.f32 %v20248_v33, %v20008_v49  ;;  %v16271_v48 = vpop.f32.mrb[9].mxu0 }
 0xac7   : > { %16499 = vst [vmem:[%s22606_s21 + $0x28] sm:$0xff] %v16467_v14  ;;  %v21383_v8 = vadd.f32 %v16271_v48, %v14905_v13  ;;  %v20249_v29 = vpop.f32.mrb[10].mxu0 }
 0xac8   : > { %v16408_v35 = vmax.f32 %v21382_v61, 0.0  ;;  %v21384_v19 = vadd.f32 %v20249_v29, %v20009_v60  ;;  %v16274_v26 = vpop.f32.mrb[11].mxu0 }
 0xac9   : > { %v16406_v40 = vmax.f32 %v21383_v8, 0.0  ;;  %v21385_v43 = vadd.f32 %v16274_v26, %v24703_v34  ;;  %v16444_v34 = vld [vmem:[%s22606_s21 + $0x70] sm:$0xff] }
 0xaca   : > { %v16472_v24 = vadd.f32 %v16440_v17, %v16408_v35  ;;  %v16409_v6 = vmax.f32 %v21384_v19, 0.0  ;;  %v16452_v35 = vld [vmem:[%s22606_s21 + $0xb0] sm:$0xff] }
 0xacb   : > { %v16470_v49 = vadd.f32 %v16438_v63, %v16406_v40  ;;  %v16407_v36 = vmax.f32 %v21385_v43, 0.0 }
 0xacc   : > { %16504 = vst [vmem:[%s22606_s21 + $0x50] sm:$0xff] %v16472_v24  ;;  %v16473_v13 = vadd.f32 %v16441_v45, %v16409_v6  ;;  %v16450_v45 = vld [vmem:[%s22606_s21 + $0xa0] sm:$0xff] }
 0xacd   : > { %16502 = vst [vmem:[%s22606_s21 + $0x40] sm:$0xff] %v16470_v49  ;;  %v16471_v4 = vadd.f32 %v16439_v18, %v16407_v36  ;;  %v20252_v37 = vpop.f32.mrb[12].mxu0  ;;  %v16453_v18 = vld [vmem:[%s22606_s21 + $0xb8] sm:$0xff] }
 0xace   : > { %16505 = vst [vmem:[%s22606_s21 + $0x58] sm:$0xff] %v16473_v13  ;;  %v21386_v60 = vadd.f32 %v20252_v37, %v24705_v53  ;;  %v16287_v39 = vpop.f32.mrb[13].mxu0 }
 0xacf   : > { %16503 = vst [vmem:[%s22606_s21 + $0x48] sm:$0xff] %v16471_v4  ;;  %v21387_v10 = vadd.f32 %v16287_v39, %v24707_v28  ;;  %v20253_v59 = vpop.f32.mrb[14].mxu0  ;;  %v16451_v4 = vld [vmem:[%s22606_s21 + $0xa8] sm:$0xff] }
 0xad0   : > { %v16412_v21 = vmax.f32 %v21386_v60, 0.0  ;;  %v21388_v23 = vadd.f32 %v20253_v59, %v24709_v42  ;;  %v16290_v55 = vpop.f32.mrb[15].mxu0 }
 0xad1   : > { %v16410_v15 = vmax.f32 %v21387_v10, 0.0  ;;  %v21389_v56 = vadd.f32 %v16290_v55, %v24711_v20 }
 0xad2   : > { %v16476_v16 = vadd.f32 %v16444_v34, %v16412_v21  ;;  %v16413_v53 = vmax.f32 %v21388_v23, 0.0 }
 0xad3   : > { %v16474_v54 = vadd.f32 %v16442_v2, %v16410_v15  ;;  %v16411_v1 = vmax.f32 %v21389_v56, 0.0  ;;  %v16456_v15 = vld [vmem:[%s22606_s21 + $0xd0] sm:$0xff] }
 0xad4   : > { %16508 = vst [vmem:[%s22606_s21 + $0x70] sm:$0xff] %v16476_v16  ;;  %v16477_v28 = vadd.f32 %v16445_v32, %v16413_v53  ;;  %v20064_v46 = vpop.f32.mrb[16].mxu1 }
 0xad5   : > { %16506 = vst [vmem:[%s22606_s21 + $0x60] sm:$0xff] %v16474_v54  ;;  %v16475_v27 = vadd.f32 %v16443_v12, %v16411_v1  ;;  %v20256_v42 = vpop.f32.mrb[16].mxu0  ;;  %v15210_v11 = vpop.f32.mrb[17].mxu1  ;;  %v16454_v12 = vld [vmem:[%s22606_s21 + $0xc0] sm:$0xff] }
 0xad6   : > { %16509 = vst [vmem:[%s22606_s21 + $0x78] sm:$0xff] %v16477_v28  ;;  %v21390_v7 = vadd.f32 %v20256_v42, %v20064_v46  ;;  %v16303_v22 = vpop.f32.mrb[17].mxu0  ;;  %v20065_v20 = vpop.f32.mrb[18].mxu1  ;;  %v16457_v46 = vld [vmem:[%s22606_s21 + $0xd8] sm:$0xff] }
 0xad7   : > { %16507 = vst [vmem:[%s22606_s21 + $0x68] sm:$0xff] %v16475_v27  ;;  %v21391_v0 = vadd.f32 %v16303_v22, %v15210_v11  ;;  %v20257_v31 = vpop.f32.mrb[18].mxu0  ;;  %v15213_v47 = vpop.f32.mrb[19].mxu1 }
 0xad8   : > { %v16416_v5 = vmax.f32 %v21390_v7, 0.0  ;;  %v21392_v58 = vadd.f32 %v20257_v31, %v20065_v20  ;;  %v16306_v38 = vpop.f32.mrb[19].mxu0  ;;  %v16455_v7 = vld [vmem:[%s22606_s21 + $0xc8] sm:$0xff] }
 0xad9   : > { %v16414_v30 = vmax.f32 %v21391_v0, 0.0  ;;  %v21393_v57 = vadd.f32 %v16306_v38, %v15213_v47 }
 0xada   : > { %v16480_v41 = vadd.f32 %v16448_v50, %v16416_v5  ;;  %v16417_v9 = vmax.f32 %v21392_v58, 0.0 }
 0xadb   : > { %v16478_v62 = vadd.f32 %v16446_v51, %v16414_v30  ;;  %v16415_v3 = vmax.f32 %v21393_v57, 0.0  ;;  %v16460_v30 = vld [vmem:[%s22606_s21 + $0xf0] sm:$0xff] }
 0xadc   : > { %16512 = vst [vmem:[%s22606_s21 + $0x90] sm:$0xff] %v16480_v41  ;;  %v16481_v25 = vadd.f32 %v16449_v44, %v16417_v9  ;;  %v20068_v14 = vpop.f32.mrb[20].mxu1 }
 0xadd   : > { %16510 = vst [vmem:[%s22606_s21 + $0x80] sm:$0xff] %v16478_v62  ;;  %v16479_v33 = vadd.f32 %v16447_v52, %v16415_v3  ;;  %v20260_v61 = vpop.f32.mrb[20].mxu0  ;;  %v15226_v48 = vpop.f32.mrb[21].mxu1  ;;  %v16458_v52 = vld [vmem:[%s22606_s21 + $0xe0] sm:$0xff] }
 0xade   : > { %16513 = vst [vmem:[%s22606_s21 + $0x98] sm:$0xff] %v16481_v25  ;;  %v21394_v17 = vadd.f32 %v20260_v61, %v20068_v14  ;;  %v16319_v8 = vpop.f32.mrb[21].mxu0  ;;  %v20069_v29 = vpop.f32.mrb[22].mxu1  ;;  %v16461_v14 = vld [vmem:[%s22606_s21 + $0xf8] sm:$0xff] }
 0xadf   : > { %16511 = vst [vmem:[%s22606_s21 + $0x88] sm:$0xff] %v16479_v33  ;;  %v21395_v63 = vadd.f32 %v16319_v8, %v15226_v48  ;;  %v20261_v19 = vpop.f32.mrb[22].mxu0  ;;  %v15229_v26 = vpop.f32.mrb[23].mxu1 }
 0xae0   : > { %v16420_v40 = vmax.f32 %v21394_v17, 0.0  ;;  %v21396_v43 = vadd.f32 %v20261_v19, %v20069_v29  ;;  %v16322_v24 = vpop.f32.mrb[23].mxu0  ;;  %v16459_v17 = vld [vmem:[%s22606_s21 + $0xe8] sm:$0xff] }
 0xae1   : > { %v16418_v6 = vmax.f32 %v21395_v63, 0.0  ;;  %v21397_v49 = vadd.f32 %v16322_v24, %v15229_v26 }
 0xae2   : > { %v16484_v36 = vadd.f32 %v16452_v35, %v16420_v40  ;;  %v16421_v13 = vmax.f32 %v21396_v43, 0.0 }
 0xae3   : > { %v16482_v37 = vadd.f32 %v16450_v45, %v16418_v6  ;;  %v16419_v60 = vmax.f32 %v21397_v49, 0.0 }
 0xae4   : > { %16516 = vst [vmem:[%s22606_s21 + $0xb0] sm:$0xff] %v16484_v36  ;;  %v16485_v39 = vadd.f32 %v16453_v18, %v16421_v13  ;;  %v20072_v34 = vpop.f32.mrb[24].mxu1 }
 0xae5   : > { %16514 = vst [vmem:[%s22606_s21 + $0xa0] sm:$0xff] %v16482_v37  ;;  %v16483_v10 = vadd.f32 %v16451_v4, %v16419_v60  ;;  %v20264_v59 = vpop.f32.mrb[24].mxu0  ;;  %v15242_v21 = vpop.f32.mrb[25].mxu1 }
 0xae6   : > { %16517 = vst [vmem:[%s22606_s21 + $0xb8] sm:$0xff] %v16485_v39  ;;  %v21398_v2 = vadd.f32 %v20264_v59, %v20072_v34  ;;  %v16335_v23 = vpop.f32.mrb[25].mxu0  ;;  %v20073_v55 = vpop.f32.mrb[26].mxu1 }
 0xae7   : > { %16515 = vst [vmem:[%s22606_s21 + $0xa8] sm:$0xff] %v16483_v10  ;;  %v21399_v32 = vadd.f32 %v16335_v23, %v15242_v21  ;;  %v20265_v56 = vpop.f32.mrb[26].mxu0  ;;  %v15245_v16 = vpop.f32.mrb[27].mxu1 }
 0xae8   : > { %v16424_v53 = vmax.f32 %v21398_v2, 0.0  ;;  %v21400_v54 = vadd.f32 %v20265_v56, %v20073_v55  ;;  %v16338_v1 = vpop.f32.mrb[27].mxu0 }
 0xae9   : > { %v16422_v28 = vmax.f32 %v21399_v32, 0.0  ;;  %v21401_v27 = vadd.f32 %v16338_v1, %v15245_v16 }
 0xaea   : > { %v16488_v42 = vadd.f32 %v16456_v15, %v16424_v53  ;;  %v16425_v11 = vmax.f32 %v21400_v54, 0.0 }
 0xaeb   : > { %v16486_v22 = vadd.f32 %v16454_v12, %v16422_v28  ;;  %v16423_v20 = vmax.f32 %v21401_v27, 0.0 }
 0xaec   : > { %16520 = vst [vmem:[%s22606_s21 + $0xd0] sm:$0xff] %v16488_v42  ;;  %v16489_v50 = vadd.f32 %v16457_v46, %v16425_v11  ;;  %v20076_v0 = vpop.f32.mrb[28].mxu1 }
 0xaed   : > { %16518 = vst [vmem:[%s22606_s21 + $0xc0] sm:$0xff] %v16486_v22  ;;  %v16487_v31 = vadd.f32 %v16455_v7, %v16423_v20  ;;  %v20268_v47 = vpop.f32.mrb[28].mxu0  ;;  %v15258_v5 = vpop.f32.mrb[29].mxu1 }
 0xaee   : > { %16521 = vst [vmem:[%s22606_s21 + $0xd8] sm:$0xff] %v16489_v50  ;;  %v21402_v51 = vadd.f32 %v20268_v47, %v20076_v0  ;;  %v16351_v58 = vpop.f32.mrb[29].mxu0  ;;  %v20077_v38 = vpop.f32.mrb[30].mxu1 }
 0xaef   : > { %16519 = vst [vmem:[%s22606_s21 + $0xc8] sm:$0xff] %v16487_v31  ;;  %v21403_v44 = vadd.f32 %v16351_v58, %v15258_v5  ;;  %v20269_v57 = vpop.f32.mrb[30].mxu0  ;;  %v15261_v41 = vpop.f32.mrb[31].mxu1 }
 0xaf0   : > { %v16428_v9 = vmax.f32 %v21402_v51, 0.0  ;;  %v21404_v62 = vadd.f32 %v20269_v57, %v20077_v38  ;;  %v16354_v3 = vpop.f32.mrb[31].mxu0 }
 0xaf1   : > { %v16426_v25 = vmax.f32 %v21403_v44, 0.0  ;;  %v21405_v33 = vadd.f32 %v16354_v3, %v15261_v41 }
 0xaf2   : > { %v16492_v61 = vadd.f32 %v16460_v30, %v16428_v9  ;;  %v16429_v48 = vmax.f32 %v21404_v62, 0.0 }
 0xaf3   : > { %v16490_v8 = vadd.f32 %v16458_v52, %v16426_v25  ;;  %v16427_v29 = vmax.f32 %v21405_v33, 0.0 }
 0xaf4   : > { %16524 = vst [vmem:[%s22606_s21 + $0xf0] sm:$0xff] %v16492_v61  ;;  %v16493_v35 = vadd.f32 %v16461_v14, %v16429_v48 }
 0xaf5   : > { %16522 = vst [vmem:[%s22606_s21 + $0xe0] sm:$0xff] %v16490_v8  ;;  %v16491_v63 = vadd.f32 %v16459_v17, %v16427_v29 }
 0xaf6   : > { %16525 = vst [vmem:[%s22606_s21 + $0xf8] sm:$0xff] %v16493_v35 }
 0xaf7   : > { %16523 = vst [vmem:[%s22606_s21 + $0xe8] sm:$0xff] %v16491_v63 }
 0xaf8 PF: > { %s17029_s15 = sshll.u32 %s22331_s16, 12  ;;  %s16540_s25 = sshll.u32 %s22606_s21, 4  ;;  %s24789_s25 = int_to_ptr.vmem [resolvable:$true] %s16540_s25 }
 0xaf9   : > { %s24786_s3 = scalar_lea.hbm %s24854_s2, %s17029_s15  ;;  %s16527_s18 = scalar_lea.sflag [#allocation5], %s22589_s5 }
 0xafa   : > { %s22217_s29 = scalar_lea.vmem %s24789_s25, 4096  ;;  %p24889_p10 = scmp.ne.s32.totalorder %s24872_s27, 0 }
 0xafb   : > { %p22218_p5 = scmp.ne.s32.totalorder %s24789_s25, %s22217_s29  ;;  %s22352_s23 = smov [#allocation8]  }
 0xafc   : > { %s22221_s4 = sshll.u32 %s22352_s23, 4  ;;  %s22222_s4 = int_to_ptr.vmem [resolvable:$false] %s22221_s4 }
 0xafd   : > { %p22219_p3 = pnand %p22218_p5, %p24889_p10  ;;  %s22223_s16 = scalar_lea.vmem %s22222_s4, 8192 }
 0xafe   : > { %p22224_p2 = scmp.lt.s32.totalorder %s24789_s25, %s22222_s4  ;;  %p22225_p11 = scmp.lt.s32.totalorder %s22223_s16, %s22217_s29 }
 0xaff   : > { %p22220_p9 = pneg %p22219_p3 }
 0xb00   : > { %p22226_p7 = por %p22225_p11, %p22224_p2 }
 0xb02   : > { %p22227_p4 = pnand %p22226_p7, %p22220_p9 }
 0xb04   : > { %22230 = shalt.err (!%p22227_p4)
}
 0xb05   : > { %s22231_s6 = scalar_lea.hbm %s24786_s3, 4096  ;;  %s22235_s22 = scalar_lea.hbm %s24854_s2, 8192 }
 0xb06   : > { %p22232_p8 = scmp.ne.s32.totalorder %s24786_s3, %s22231_s6  ;;  %p22236_p13 = scmp.lt.u32.totalorder %s24786_s3, %s24854_s2 }
 0xb07   : > { %p22237_p12 = scmp.lt.u32.totalorder %s22235_s22, %s22231_s6  ;;  %p22239_p5 = scmp.lt.u32.totalorder %s22231_s6, %s24786_s3 }
 0xb08   : > { %p22233_p1 = pnand %p22232_p8, %p24889_p10 }
 0xb09   : > { %p22238_p0 = por %p22237_p12, %p22236_p13 }
 0xb0a   : > { %p22234_p6 = pneg %p22233_p1 }
 0xb0b   : > { %p22240_p3 = por %p22239_p5, %p22238_p0 }
 0xb0d   : > { %p22241_p9 = pnand %p22240_p3, %p22234_p6 }
 0xb0f   : > { %22244 = shalt.err (!%p22241_p9)
}
 0xb10   : > { %s22353_s21 = smov 128   ;;  %s22354_s15 = smov 8  }
 0xb11   : > { %21637 = dma.vmem_to_hbm [thread:$0]  (%p24889_p10), %s24789_s25, 4096, %s24786_s3, %s16527_s18, %s22353_s21, %s22353_s21, %s22354_s15  }
 0xb12 PF: > { %p21651_p2 = scmp.ge.s32.totalorder %s22343_s19, 2  ;;  %s16555_s26 = sand.u32 1, %s22315_s12  }
 0xb13   : > { %p24890_p11 = scmp.ne.s32.totalorder %s24873_s28, 0  ;;  %s16556_s8 = scalar_lea.sflag [#allocation5], %s16555_s26 }
 0xb15   : > { %p21647_p7 = pnand %p21651_p2, %p24890_p11 }
 0xb17   : > { %22298 = dma.done.wait (!%p21647_p7), %s16556_s8, 4096  }
 0xb18   : > { %22300 = vsyncadd (!%p21647_p7), %s16556_s8, 4294963200  ;;  %s21_s19 = sadd.s32 1, %s22343_s19   ;;  %s24891_s29 = smov %s22535_s9 }
 0xb19   : > { %p18_p4 = scmp.ge.s32.totalorder %s21_s19, 12   ;;  %s24892_s16 = sld [smem:[#allocation12_spill]] }
 0xb1a   : > { %s24893_s27 = sld [smem:[#allocation13_spill]]  ;;  %s24894_s18 = sld [smem:[#allocation14_spill]] }
 0xb1b   : > { %s24895_s9 = smov %s22307_s10  ;;  %s24896_s10 = smov %s22311_s11 }
 0xb1c   : > { %s24897_s11 = smov %s24891_s29  ;;  %s24898_s12 = smov %s22319_s13 }
 0xb1d   : > { %s24899_s13 = smov %s22323_s14  ;;  %s24900_s14 = smov %s22549_s24 }
 0xb1e   : > { %s24901_s15 = smov %s22335_s17  ;;  %20 = sbr.rel (!%p18_p4) target bundleno = 13 (0xd), region = 121 }
 0xb20   : > { %s24902_s17 = smov %s24893_s27 }
 0xb25   :  { %16561 = vsyncpa [#allocation4], 1 }
 0xb26   :  { %16563 = vsyncpa [#allocation4 + $0x1], 1 }
 0xb27   :  { %16564 = vsyncpa [#allocation7], 1 }
 0xb28   :  { %16566 = vsyncpa [#allocation7 + $0x1], 1 }
 0xb29   :  { %16567 = vsyncpa [#allocation5], 1 }
 0xb2a   :  { %16569 = vsyncpa [#allocation5 + $0x1], 1 }

</bundles_post_ra>
